<compile_context>
chip_gen: v7x
topology: tpu7x:2x2x1
jax: 0.10.0
libtpu: 0.0.40
codegen_flags: <defaults>
</compile_context>

<pallas_src>
import math

import jax
import jax.numpy as jnp
from jax import lax
from jax.experimental import pallas as pl
from jax.experimental.pallas import tpu as pltpu


# ---------------------------- Pallas kernels ----------------------------

def _matmul_kernel(a_ref, w_ref, o_ref):
    # plain conv matmul (stem conv)
    o_ref[...] = jnp.dot(a_ref[...], w_ref[...],
                         preferred_element_type=jnp.float32)


def _matmul_bnrelu_kernel(a_ref, w_ref, s_ref, b_ref, o_ref):
    # conv matmul with fused inference-BatchNorm + ReLU epilogue (f32 math)
    acc = jnp.dot(a_ref[...], w_ref[...], preferred_element_type=jnp.float32)
    o_ref[...] = jnp.maximum(acc * s_ref[...] + b_ref[...], 0.0)


def _matmul_shortcut_kernel(a_ref, w_ref, h_ref, wsc_ref, o_ref):
    # conv2 matmul + fused 1x1 shortcut conv (residual) in the same kernel
    acc = jnp.dot(a_ref[...], w_ref[...], preferred_element_type=jnp.float32)
    acc = acc + jnp.dot(h_ref[...], wsc_ref[...],
                        preferred_element_type=jnp.float32)
    o_ref[...] = acc


def _matmul_add_kernel(a_ref, w_ref, r_ref, o_ref):
    # conv2 matmul + fused identity-residual add (equal-dim blocks)
    o_ref[...] = jnp.dot(a_ref[...], w_ref[...],
                         preferred_element_type=jnp.float32) + r_ref[...]


def _bn_relu_kernel(x_ref, s_ref, b_ref, o_ref):
    # standalone inference BN + ReLU, lane-dense layout
    o_ref[...] = jnp.maximum(x_ref[...] * s_ref[...] + b_ref[...], 0.0)


def _tail_kernel(x_ref, s_ref, b_ref, w_ref, fb_ref, o_ref):
    # fused: final BN+ReLU -> global average pool over HW -> FC (+bias)
    h = jnp.maximum(x_ref[...] * s_ref[...] + b_ref[...], 0.0)   # (N, HW, C)
    pooled = jnp.mean(h, axis=1)                                 # (N, C)
    o_ref[...] = jnp.dot(pooled, w_ref[...],
                         preferred_element_type=jnp.float32) + fb_ref[...]


# ---------------------------- helpers ----------------------------

def _pick_tm(m, cap=512):
    """Pick a row tile: as large as possible (less per-step overhead) while
    keeping the grid length >= 2 (both v7x TensorCores busy).  Falls back to
    the full extent if nothing divides."""
    t = cap
    while t >= 16:
        if m % t == 0 and (m // t) >= 2:
            return t
        t //= 2
    return m


def _mm_specs(K, Nc, TM):
    a_spec = pl.BlockSpec((TM, K), lambda i: (i, 0))
    w_spec = pl.BlockSpec((K, Nc), lambda i: (0, 0))
    o_spec = pl.BlockSpec((TM, Nc), lambda i: (i, 0))
    return a_spec, w_spec, o_spec


_PARALLEL = pltpu.CompilerParams(dimension_semantics=("parallel",))


def _im2col3x3(x, stride):
    """x: NHWC f32 -> (M, 9*Cin) bf16 patches, ordering (kh, kw, cin)."""
    N, H, W, Cin = x.shape
    Ho = (H + 2 - 3) // stride + 1
    Wo = (W + 2 - 3) // stride + 1
    xp = jnp.pad(x, ((0, 0), (1, 1), (1, 1), (0, 0)))
    patches = []
    for dh in range(3):
        for dw in range(3):
            patches.append(
                xp[:, dh:dh + stride * (Ho - 1) + 1:stride,
                      dw:dw + stride * (Wo - 1) + 1:stride, :])
    a = jnp.stack(patches, axis=3).reshape(N * Ho * Wo, 9 * Cin)
    return a.astype(jnp.bfloat16), (N, Ho, Wo)


def _w3x3_matrix(w):
    # torch (Cout, Cin, 3, 3) -> (9*Cin, Cout), bf16 for the MXU
    return jnp.transpose(w, (2, 3, 1, 0)).reshape(-1, w.shape[0]).astype(
        jnp.bfloat16)


# ---------------------------- Pallas wrappers ----------------------------

def conv3x3_pallas(x, w, stride):
    """Plain 3x3 conv (padding=1, no bias).  bf16 operands, f32 accumulate."""
    a, (N, Ho, Wo) = _im2col3x3(x, stride)
    wm = _w3x3_matrix(w)
    M, K = a.shape
    Cout = wm.shape[1]
    TM = _pick_tm(M)
    a_spec, w_spec, o_spec = _mm_specs(K, Cout, TM)
    out = pl.pallas_call(
        _matmul_kernel, grid=(M // TM,),
        in_specs=[a_spec, w_spec], out_specs=o_spec,
        out_shape=jax.ShapeDtypeStruct((M, Cout), jnp.float32),
        compiler_params=_PARALLEL,
    )(a, wm)
    return out.reshape(N, Ho, Wo, Cout)


def conv3x3_bnrelu_pallas(x, w, stride, scale, bias):
    """3x3 conv with fused BN+ReLU epilogue (inference BN folded to s,b)."""
    a, (N, Ho, Wo) = _im2col3x3(x, stride)
    wm = _w3x3_matrix(w)
    M, K = a.shape
    Cout = wm.shape[1]
    TM = _pick_tm(M)
    a_spec, w_spec, o_spec = _mm_specs(K, Cout, TM)
    sb_spec = pl.BlockSpec((1, Cout), lambda i: (0, 0))
    out = pl.pallas_call(
        _matmul_bnrelu_kernel, grid=(M // TM,),
        in_specs=[a_spec, w_spec, sb_spec, sb_spec], out_specs=o_spec,
        out_shape=jax.ShapeDtypeStruct((M, Cout), jnp.float32),
        compiler_params=_PARALLEL,
    )(a, wm, scale, bias)
    return out.reshape(N, Ho, Wo, Cout)


def conv3x3_shortcut_pallas(x, w, h, wsc, stride_sc):
    """out = conv3x3(x, w, stride=1) + conv1x1(h, wsc, stride=stride_sc),
    both dots fused in one kernel (the 1x1 K is tiny -> near-free MXU filler)."""
    a, (N, Ho, Wo) = _im2col3x3(x, 1)
    wm = _w3x3_matrix(w)
    M, K = a.shape
    Cout = wm.shape[1]
    Cin_sc = wsc.shape[1]
    hs = h[:, ::stride_sc, ::stride_sc, :].reshape(M, Cin_sc).astype(
        jnp.bfloat16)
    wscm = wsc.reshape(wsc.shape[0], Cin_sc).T.astype(jnp.bfloat16)
    TM = _pick_tm(M)
    a_spec, w_spec, o_spec = _mm_specs(K, Cout, TM)
    h_spec = pl.BlockSpec((TM, Cin_sc), lambda i: (i, 0))
    wsc_spec = pl.BlockSpec((Cin_sc, Cout), lambda i: (0, 0))
    out = pl.pallas_call(
        _matmul_shortcut_kernel, grid=(M // TM,),
        in_specs=[a_spec, w_spec, h_spec, wsc_spec], out_specs=o_spec,
        out_shape=jax.ShapeDtypeStruct((M, Cout), jnp.float32),
        compiler_params=_PARALLEL,
    )(a, wm, hs, wscm)
    return out.reshape(N, Ho, Wo, Cout)


def conv3x3_add_pallas(x, w, residual):
    """3x3 conv (stride 1) + fused identity-residual add (equal-dim blocks)."""
    a, (N, Ho, Wo) = _im2col3x3(x, 1)
    wm = _w3x3_matrix(w)
    M, K = a.shape
    Cout = wm.shape[1]
    TM = _pick_tm(M)
    a_spec, w_spec, o_spec = _mm_specs(K, Cout, TM)
    r_spec = pl.BlockSpec((TM, Cout), lambda i: (i, 0))
    out = pl.pallas_call(
        _matmul_add_kernel, grid=(M // TM,),
        in_specs=[a_spec, w_spec, r_spec], out_specs=o_spec,
        out_shape=jax.ShapeDtypeStruct((M, Cout), jnp.float32),
        compiler_params=_PARALLEL,
    )(a, wm, residual)
    return out.reshape(N, Ho, Wo, Cout)


def bn_relu_pallas(x, scale, bias):
    """relu(x*scale + bias), lane-dense: 128 % C == 0 for C in {16,32,64,128},
    so reshape to (N*H*W*C/128, 128) and tile scale/bias across 128 lanes."""
    N, H, W, C = x.shape
    M = N * H * W
    rep = 128 // C if (C <= 128 and 128 % C == 0 and M % (128 // C) == 0) else 1
    lanes = C * rep
    rows = (M * C) // lanes
    xf = x.reshape(rows, lanes)
    s = jnp.tile(scale, (1, rep))
    b = jnp.tile(bias, (1, rep))
    TM = _pick_tm(rows)
    out = pl.pallas_call(
        _bn_relu_kernel, grid=(rows // TM,),
        in_specs=[pl.BlockSpec((TM, lanes), lambda i: (i, 0)),
                  pl.BlockSpec((1, lanes), lambda i: (0, 0)),
                  pl.BlockSpec((1, lanes), lambda i: (0, 0))],
        out_specs=pl.BlockSpec((TM, lanes), lambda i: (i, 0)),
        out_shape=jax.ShapeDtypeStruct((rows, lanes), jnp.float32),
        compiler_params=_PARALLEL,
    )(xf, s, b)
    return out.reshape(N, H, W, C)


def tail_pallas(x, scale, bias, fc_w, fc_b):
    """Fused: final BN+ReLU -> avg_pool2d(H) -> view -> Linear."""
    N, H, W, C = x.shape
    xf = x.reshape(N, H * W, C)
    s = scale.reshape(1, 1, C)
    b = bias.reshape(1, 1, C)
    wm = fc_w.T                      # (C, num_classes)
    nc = wm.shape[1]
    fb = fc_b.reshape(1, nc)
    return pl.pallas_call(
        _tail_kernel, grid=(1,),
        in_specs=[pl.BlockSpec((N, H * W, C), lambda i: (0, 0, 0)),
                  pl.BlockSpec((1, 1, C), lambda i: (0, 0, 0)),
                  pl.BlockSpec((1, 1, C), lambda i: (0, 0, 0)),
                  pl.BlockSpec((C, nc), lambda i: (0, 0)),
                  pl.BlockSpec((1, nc), lambda i: (0, 0))],
        out_specs=pl.BlockSpec((N, nc), lambda i: (0, 0)),
        out_shape=jax.ShapeDtypeStruct((N, nc), jnp.float32),
    )(xf, s, b, wm, fb)


# ---------------------------- Model (glue) ----------------------------

def init_params(key, num_classes=10, k=2):
    """Mirrors WRN.__init__ weight init (conv: N(0, sqrt(2/(ks*ks*Cout))),
    BN gamma=1/beta=0 with running stats at defaults, fc bias=0)."""
    dims = [16, 16 * k, 32 * k, 64 * k]
    keys = iter(jax.random.split(key, 32))

    def conv_w(cout, cin, ks):
        std = math.sqrt(2.0 / (ks * ks * cout))
        return std * jax.random.normal(next(keys), (cout, cin, ks, ks),
                                       jnp.float32)

    def bn(c):
        gamma = jnp.ones((c,), jnp.float32)
        beta = jnp.zeros((c,), jnp.float32)
        rm = jnp.zeros((c,), jnp.float32)
        rv = jnp.ones((c,), jnp.float32)
        scale = gamma / jnp.sqrt(rv + 1e-5)
        bias = beta - rm * scale
        return scale.reshape(1, c), bias.reshape(1, c)

    def block(indim, outdim):
        s1, b1 = bn(indim)
        s2, b2 = bn(outdim)
        d = {'bn1_scale': s1, 'bn1_bias': b1,
             'conv1_w': conv_w(outdim, indim, 3),
             'bn2_scale': s2, 'bn2_bias': b2,
             'conv2_w': conv_w(outdim, outdim, 3)}
        if indim != outdim:
            d['shortcut_w'] = conv_w(outdim, indim, 1)
        return d

    p = {'conv_w': conv_w(dims[0], 3, 3),
         'r1': [block(dims[0], dims[1])],    # depth=10 -> n=1 BasicBlock/stage
         'r2': [block(dims[1], dims[2])],
         'r3': [block(dims[2], dims[3])]}
    s, b = bn(dims[3])
    p['bn1_scale'], p['bn1_bias'] = s, b
    lim = 1.0 / math.sqrt(dims[3])
    p['fc_w'] = jax.random.uniform(next(keys), (num_classes, dims[3]),
                                   jnp.float32, -lim, lim)
    p['fc_b'] = jnp.zeros((num_classes,), jnp.float32)
    return p, dims


def basic_block_forward(x, bp, stride):
    equaldim = 'shortcut_w' not in bp
    h = bn_relu_pallas(x, bp['bn1_scale'], bp['bn1_bias'])
    out = conv3x3_bnrelu_pallas(h, bp['conv1_w'], stride,
                                bp['bn2_scale'], bp['bn2_bias'])
    # dropout: p=0.0 / eval mode -> identity
    if equaldim:
        N, Ho, Wo, C = x.shape
        return conv3x3_add_pallas(out, bp['conv2_w'],
                                  x.reshape(N * Ho * Wo, C))
    return conv3x3_shortcut_pallas(out, bp['conv2_w'], h,
                                   bp['shortcut_w'], stride)


def _wrn_forward_impl(x_nchw, p):
    x = jnp.transpose(x_nchw, (0, 2, 3, 1))           # NCHW -> NHWC
    out = conv3x3_pallas(x, p['conv_w'], 1)
    for bp in p['r1']:
        out = basic_block_forward(out, bp, 1)
    for i, bp in enumerate(p['r2']):
        out = basic_block_forward(out, bp, 2 if i == 0 else 1)
    for i, bp in enumerate(p['r3']):
        out = basic_block_forward(out, bp, 2 if i == 0 else 1)
    # final bn + relu + avg_pool2d(8) + view + fc, fused in one kernel
    return tail_pallas(out, p['bn1_scale'], p['bn1_bias'],
                       p['fc_w'], p['fc_b'])


wrn_forward = jax.jit(_wrn_forward_impl)


# ---------------------------- Pure-JAX reference ----------------------------

def _wrn_reference_impl(x_nchw, p):
    # Same math; convs also use bf16 operands with f32 accumulation so the
    # only difference vs. the Pallas path is accumulation order.
    x = jnp.transpose(x_nchw, (0, 2, 3, 1))

    def conv(x, w, stride, pad):
        return lax.conv_general_dilated(
            x.astype(jnp.bfloat16),
            jnp.transpose(w, (2, 3, 1, 0)).astype(jnp.bfloat16),
            (stride, stride), [(pad, pad), (pad, pad)],
            dimension_numbers=('NHWC', 'HWIO', 'NHWC'),
            preferred_element_type=jnp.float32)

    def bnrelu(x, s, b):
        return jnp.maximum(x * s.reshape(1, 1, 1, -1) + b.reshape(1, 1, 1, -1),
                           0.0)

    def blk(x, bp, stride):
        h = bnrelu(x, bp['bn1_scale'], bp['bn1_bias'])
        o = bnrelu(conv(h, bp['conv1_w'], stride, 1),
                   bp['bn2_scale'], bp['bn2_bias'])
        o = conv(o, bp['conv2_w'], 1, 1)
        if 'shortcut_w' in bp:
            return conv(h, bp['shortcut_w'], stride, 0) + o
        return x + o

    out = conv(x, p['conv_w'], 1, 1)
    for bp in p['r1']:
        out = blk(out, bp, 1)
    for i, bp in enumerate(p['r2']):
        out = blk(out, bp, 2 if i == 0 else 1)
    for i, bp in enumerate(p['r3']):
        out = blk(out, bp, 2 if i == 0 else 1)
    out = bnrelu(out, p['bn1_scale'], p['bn1_bias'])
    pooled = jnp.mean(out, axis=(1, 2))
    return pooled @ p['fc_w'].T + p['fc_b']


wrn_reference = jax.jit(_wrn_reference_impl)


# ---------------------------- main ----------------------------

if __name__ == "__main__":
    key = jax.random.PRNGKey(0)
    pkey, xkey = jax.random.split(key)
    # WRN(depth=10, num_classes=10, k=2): dims=[16,32,64,128], n=1 block/stage
    params, dims = init_params(pkey, num_classes=10, k=2)
    x = jax.random.normal(xkey, (2, 3, 32, 32), jnp.float32)   # NCHW like torch

    logits = wrn_forward(x, params)
    logits = jax.block_until_ready(logits)

    ref = jax.block_until_ready(wrn_reference(x, params))
    assert logits.shape == (2, 10), logits.shape
    assert bool(jnp.allclose(logits, ref, rtol=2e-2, atol=2e-2)), (logits, ref)

    print("KERNEL_OK")
</pallas_src>

<mosaic_0001>
module attributes {stable_mosaic.version = 11 : i64} {
  func.func @_matmul_kernel(%arg0: i32, %arg1: memref<512x27xbf16, #tpu.memory_space<vmem>>, %arg2: memref<27x16xbf16, #tpu.memory_space<vmem>>, %arg3: memref<512x16xf32, #tpu.memory_space<vmem>>) attributes {dimension_semantics = [#tpu.dimension_semantics<parallel>], iteration_bounds = array<i64: 4>, scalar_prefetch = 0 : i64, scratch_operands = 0 : i64, tpu.core_type = #tpu.core_type<tc>, window_params = [{transform_indices = @transform_0, window_bounds = array<i64: 512, 27>}, {pipeline_mode = #tpu.pipeline_mode<synchronous>, transform_indices = @transform_1, window_bounds = array<i64: 27, 16>}, {transform_indices = @transform_2, window_bounds = array<i64: 512, 16>}]} {
    %c0 = arith.constant 0 : index
    %c0_0 = arith.constant 0 : index
    %0 = vector.load %arg1[%c0, %c0_0] : memref<512x27xbf16, #tpu.memory_space<vmem>>, vector<512x27xbf16>
    %c0_1 = arith.constant 0 : index
    %c0_2 = arith.constant 0 : index
    %1 = vector.load %arg2[%c0_1, %c0_2] : memref<27x16xbf16, #tpu.memory_space<vmem>>, vector<27x16xbf16>
    %cst = arith.constant dense<0.000000e+00> : vector<512x16xf32>
    %2 = tpu.matmul %0, %1, %cst {dimension_numbers = #tpu.dot_dimension_numbers<[1], [0], [0], [1], [0, 0, 1, 1], [], []>} : vector<512x27xbf16>, vector<27x16xbf16>, vector<512x16xf32> -> vector<512x16xf32>
    %c0_3 = arith.constant 0 : index
    %c0_4 = arith.constant 0 : index
    %3 = vector.load %arg3[%c0_3, %c0_4] : memref<512x16xf32, #tpu.memory_space<vmem>>, vector<512x16xf32>
    tpu.vector_store %arg3[%c0_3, %c0_4], %2 {strides = array<i32>} : memref<512x16xf32, #tpu.memory_space<vmem>>, vector<512x16xf32>,
    return
  }
  func.func @transform_0(%arg0: i32) -> (i32, i32) {
    %c0_i32 = arith.constant 0 : i32
    %c0_i32_0 = arith.constant 0 : i32
    return %arg0, %c0_i32 : i32, i32
  }
  func.func @transform_1(%arg0: i32) -> (i32, i32) {
    %c0_i32 = arith.constant 0 : i32
    %c0_i32_0 = arith.constant 0 : i32
    %c0_i32_1 = arith.constant 0 : i32
    return %c0_i32, %c0_i32_0 : i32, i32
  }
  func.func @transform_2(%arg0: i32) -> (i32, i32) {
    %c0_i32 = arith.constant 0 : i32
    %c0_i32_0 = arith.constant 0 : i32
    return %arg0, %c0_i32 : i32, i32
  }
}

module attributes {stable_mosaic.version = 11 : i64} {
  func.func @_bn_relu_kernel(%arg0: i32, %arg1: memref<128x128xf32, #tpu.memory_space<vmem>>, %arg2: memref<1x128xf32, #tpu.memory_space<vmem>>, %arg3: memref<1x128xf32, #tpu.memory_space<vmem>>, %arg4: memref<128x128xf32, #tpu.memory_space<vmem>>) attributes {dimension_semantics = [#tpu.dimension_semantics<parallel>], iteration_bounds = array<i64: 2>, scalar_prefetch = 0 : i64, scratch_operands = 0 : i64, tpu.core_type = #tpu.core_type<tc>, window_params = [{transform_indices = @transform_0, window_bounds = array<i64: 128, 128>}, {pipeline_mode = #tpu.pipeline_mode<synchronous>, transform_indices = @transform_1, window_bounds = array<i64: 1, 128>}, {pipeline_mode = #tpu.pipeline_mode<synchronous>, transform_indices = @transform_2, window_bounds = array<i64: 1, 128>}, {transform_indices = @transform_3, window_bounds = array<i64: 128, 128>}]} {
    %c0 = arith.constant 0 : index
    %c0_0 = arith.constant 0 : index
    %0 = vector.load %arg1[%c0, %c0_0] : memref<128x128xf32, #tpu.memory_space<vmem>>, vector<128x128xf32>
    %c0_1 = arith.constant 0 : index
    %c0_2 = arith.constant 0 : index
    %1 = vector.load %arg2[%c0_1, %c0_2] : memref<1x128xf32, #tpu.memory_space<vmem>>, vector<1x128xf32>
    %2 = vector.broadcast %1 : vector<1x128xf32> to vector<128x128xf32>
    %3 = arith.mulf %0, %2 : vector<128x128xf32>
    %c0_3 = arith.constant 0 : index
    %c0_4 = arith.constant 0 : index
    %4 = vector.load %arg3[%c0_3, %c0_4] : memref<1x128xf32, #tpu.memory_space<vmem>>, vector<1x128xf32>
    %5 = vector.broadcast %4 : vector<1x128xf32> to vector<128x128xf32>
    %6 = arith.addf %3, %5 : vector<128x128xf32>
    %cst = arith.constant 0.000000e+00 : f32
    %7 = vector.broadcast %cst : f32 to vector<128x128xf32>
    %8 = arith.maximumf %6, %7 : vector<128x128xf32>
    %c0_5 = arith.constant 0 : index
    %c0_6 = arith.constant 0 : index
    %9 = vector.load %arg4[%c0_5, %c0_6] : memref<128x128xf32, #tpu.memory_space<vmem>>, vector<128x128xf32>
    tpu.vector_store %arg4[%c0_5, %c0_6], %8 {strides = array<i32>} : memref<128x128xf32, #tpu.memory_space<vmem>>, vector<128x128xf32>,
    return
  }
  func.func @transform_0(%arg0: i32) -> (i32, i32) {
    %c0_i32 = arith.constant 0 : i32
    %c0_i32_0 = arith.constant 0 : i32
    return %arg0, %c0_i32 : i32, i32
  }
  func.func @transform_1(%arg0: i32) -> (i32, i32) {
    %c0_i32 = arith.constant 0 : i32
    %c0_i32_0 = arith.constant 0 : i32
    %c0_i32_1 = arith.constant 0 : i32
    return %c0_i32, %c0_i32_0 : i32, i32
  }
  func.func @transform_2(%arg0: i32) -> (i32, i32) {
    %c0_i32 = arith.constant 0 : i32
    %c0_i32_0 = arith.constant 0 : i32
    %c0_i32_1 = arith.constant 0 : i32
    return %c0_i32, %c0_i32_0 : i32, i32
  }
  func.func @transform_3(%arg0: i32) -> (i32, i32) {
    %c0_i32 = arith.constant 0 : i32
    %c0_i32_0 = arith.constant 0 : i32
    return %arg0, %c0_i32 : i32, i32
  }
}

module attributes {stable_mosaic.version = 11 : i64} {
  func.func @_matmul_bnrelu_kernel(%arg0: i32, %arg1: memref<512x144xbf16, #tpu.memory_space<vmem>>, %arg2: memref<144x32xbf16, #tpu.memory_space<vmem>>, %arg3: memref<1x32xf32, #tpu.memory_space<vmem>>, %arg4: memref<1x32xf32, #tpu.memory_space<vmem>>, %arg5: memref<512x32xf32, #tpu.memory_space<vmem>>) attributes {dimension_semantics = [#tpu.dimension_semantics<parallel>], iteration_bounds = array<i64: 4>, scalar_prefetch = 0 : i64, scratch_operands = 0 : i64, tpu.core_type = #tpu.core_type<tc>, window_params = [{transform_indices = @transform_0, window_bounds = array<i64: 512, 144>}, {pipeline_mode = #tpu.pipeline_mode<synchronous>, transform_indices = @transform_1, window_bounds = array<i64: 144, 32>}, {pipeline_mode = #tpu.pipeline_mode<synchronous>, transform_indices = @transform_2, window_bounds = array<i64: 1, 32>}, {pipeline_mode = #tpu.pipeline_mode<synchronous>, transform_indices = @transform_3, window_bounds = array<i64: 1, 32>}, {transform_indices = @transform_4, window_bounds = array<i64: 512, 32>}]} {
    %c0 = arith.constant 0 : index
    %c0_0 = arith.constant 0 : index
    %0 = vector.load %arg1[%c0, %c0_0] : memref<512x144xbf16, #tpu.memory_space<vmem>>, vector<512x144xbf16>
    %c0_1 = arith.constant 0 : index
    %c0_2 = arith.constant 0 : index
    %1 = vector.load %arg2[%c0_1, %c0_2] : memref<144x32xbf16, #tpu.memory_space<vmem>>, vector<144x32xbf16>
    %cst = arith.constant dense<0.000000e+00> : vector<512x32xf32>
    %2 = tpu.matmul %0, %1, %cst {dimension_numbers = #tpu.dot_dimension_numbers<[1], [0], [0], [1], [0, 0, 1, 1], [], []>} : vector<512x144xbf16>, vector<144x32xbf16>, vector<512x32xf32> -> vector<512x32xf32>
    %c0_3 = arith.constant 0 : index
    %c0_4 = arith.constant 0 : index
    %3 = vector.load %arg3[%c0_3, %c0_4] : memref<1x32xf32, #tpu.memory_space<vmem>>, vector<1x32xf32>
    %4 = vector.broadcast %3 : vector<1x32xf32> to vector<512x32xf32>
    %5 = arith.mulf %2, %4 : vector<512x32xf32>
    %c0_5 = arith.constant 0 : index
    %c0_6 = arith.constant 0 : index
    %6 = vector.load %arg4[%c0_5, %c0_6] : memref<1x32xf32, #tpu.memory_space<vmem>>, vector<1x32xf32>
    %7 = vector.broadcast %6 : vector<1x32xf32> to vector<512x32xf32>
    %8 = arith.addf %5, %7 : vector<512x32xf32>
    %cst_7 = arith.constant 0.000000e+00 : f32
    %9 = vector.broadcast %cst_7 : f32 to vector<512x32xf32>
    %10 = arith.maximumf %8, %9 : vector<512x32xf32>
    %c0_8 = arith.constant 0 : index
    %c0_9 = arith.constant 0 : index
    %11 = vector.load %arg5[%c0_8, %c0_9] : memref<512x32xf32, #tpu.memory_space<vmem>>, vector<512x32xf32>
    tpu.vector_store %arg5[%c0_8, %c0_9], %10 {strides = array<i32>} : memref<512x32xf32, #tpu.memory_space<vmem>>, vector<512x32xf32>,
    return
  }
  func.func @transform_0(%arg0: i32) -> (i32, i32) {
    %c0_i32 = arith.constant 0 : i32
    %c0_i32_0 = arith.constant 0 : i32
    return %arg0, %c0_i32 : i32, i32
  }
  func.func @transform_1(%arg0: i32) -> (i32, i32) {
    %c0_i32 = arith.constant 0 : i32
    %c0_i32_0 = arith.constant 0 : i32
    %c0_i32_1 = arith.constant 0 : i32
    return %c0_i32, %c0_i32_0 : i32, i32
  }
  func.func @transform_2(%arg0: i32) -> (i32, i32) {
    %c0_i32 = arith.constant 0 : i32
    %c0_i32_0 = arith.constant 0 : i32
    %c0_i32_1 = arith.constant 0 : i32
    return %c0_i32, %c0_i32_0 : i32, i32
  }
  func.func @transform_3(%arg0: i32) -> (i32, i32) {
    %c0_i32 = arith.constant 0 : i32
    %c0_i32_0 = arith.constant 0 : i32
    %c0_i32_1 = arith.constant 0 : i32
    return %c0_i32, %c0_i32_0 : i32, i32
  }
  func.func @transform_4(%arg0: i32) -> (i32, i32) {
    %c0_i32 = arith.constant 0 : i32
    %c0_i32_0 = arith.constant 0 : i32
    return %arg0, %c0_i32 : i32, i32
  }
}

module attributes {stable_mosaic.version = 11 : i64} {
  func.func @_matmul_shortcut_kernel(%arg0: i32, %arg1: memref<512x288xbf16, #tpu.memory_space<vmem>>, %arg2: memref<288x32xbf16, #tpu.memory_space<vmem>>, %arg3: memref<512x16xbf16, #tpu.memory_space<vmem>>, %arg4: memref<16x32xbf16, #tpu.memory_space<vmem>>, %arg5: memref<512x32xf32, #tpu.memory_space<vmem>>) attributes {dimension_semantics = [#tpu.dimension_semantics<parallel>], iteration_bounds = array<i64: 4>, scalar_prefetch = 0 : i64, scratch_operands = 0 : i64, tpu.core_type = #tpu.core_type<tc>, window_params = [{transform_indices = @transform_0, window_bounds = array<i64: 512, 288>}, {pipeline_mode = #tpu.pipeline_mode<synchronous>, transform_indices = @transform_1, window_bounds = array<i64: 288, 32>}, {transform_indices = @transform_2, window_bounds = array<i64: 512, 16>}, {pipeline_mode = #tpu.pipeline_mode<synchronous>, transform_indices = @transform_3, window_bounds = array<i64: 16, 32>}, {transform_indices = @transform_4, window_bounds = array<i64: 512, 32>}]} {
    %c0 = arith.constant 0 : index
    %c0_0 = arith.constant 0 : index
    %0 = vector.load %arg1[%c0, %c0_0] : memref<512x288xbf16, #tpu.memory_space<vmem>>, vector<512x288xbf16>
    %c0_1 = arith.constant 0 : index
    %c0_2 = arith.constant 0 : index
    %1 = vector.load %arg2[%c0_1, %c0_2] : memref<288x32xbf16, #tpu.memory_space<vmem>>, vector<288x32xbf16>
    %cst = arith.constant dense<0.000000e+00> : vector<512x32xf32>
    %2 = tpu.matmul %0, %1, %cst {dimension_numbers = #tpu.dot_dimension_numbers<[1], [0], [0], [1], [0, 0, 1, 1], [], []>} : vector<512x288xbf16>, vector<288x32xbf16>, vector<512x32xf32> -> vector<512x32xf32>
    %c0_3 = arith.constant 0 : index
    %c0_4 = arith.constant 0 : index
    %3 = vector.load %arg3[%c0_3, %c0_4] : memref<512x16xbf16, #tpu.memory_space<vmem>>, vector<512x16xbf16>
    %c0_5 = arith.constant 0 : index
    %c0_6 = arith.constant 0 : index
    %4 = vector.load %arg4[%c0_5, %c0_6] : memref<16x32xbf16, #tpu.memory_space<vmem>>, vector<16x32xbf16>
    %cst_7 = arith.constant dense<0.000000e+00> : vector<512x32xf32>
    %5 = tpu.matmul %3, %4, %cst_7 {dimension_numbers = #tpu.dot_dimension_numbers<[1], [0], [0], [1], [0, 0, 1, 1], [], []>} : vector<512x16xbf16>, vector<16x32xbf16>, vector<512x32xf32> -> vector<512x32xf32>
    %6 = arith.addf %2, %5 : vector<512x32xf32>
    %c0_8 = arith.constant 0 : index
    %c0_9 = arith.constant 0 : index
    %7 = vector.load %arg5[%c0_8, %c0_9] : memref<512x32xf32, #tpu.memory_space<vmem>>, vector<512x32xf32>
    tpu.vector_store %arg5[%c0_8, %c0_9], %6 {strides = array<i32>} : memref<512x32xf32, #tpu.memory_space<vmem>>, vector<512x32xf32>,
    return
  }
  func.func @transform_0(%arg0: i32) -> (i32, i32) {
    %c0_i32 = arith.constant 0 : i32
    %c0_i32_0 = arith.constant 0 : i32
    return %arg0, %c0_i32 : i32, i32
  }
  func.func @transform_1(%arg0: i32) -> (i32, i32) {
    %c0_i32 = arith.constant 0 : i32
    %c0_i32_0 = arith.constant 0 : i32
    %c0_i32_1 = arith.constant 0 : i32
    return %c0_i32, %c0_i32_0 : i32, i32
  }
  func.func @transform_2(%arg0: i32) -> (i32, i32) {
    %c0_i32 = arith.constant 0 : i32
    %c0_i32_0 = arith.constant 0 : i32
    return %arg0, %c0_i32 : i32, i32
  }
  func.func @transform_3(%arg0: i32) -> (i32, i32) {
    %c0_i32 = arith.constant 0 : i32
    %c0_i32_0 = arith.constant 0 : i32
    %c0_i32_1 = arith.constant 0 : i32
    return %c0_i32, %c0_i32_0 : i32, i32
  }
  func.func @transform_4(%arg0: i32) -> (i32, i32) {
    %c0_i32 = arith.constant 0 : i32
    %c0_i32_0 = arith.constant 0 : i32
    return %arg0, %c0_i32 : i32, i32
  }
}

module attributes {stable_mosaic.version = 11 : i64} {
  func.func @_bn_relu_kernel(%arg0: i32, %arg1: memref<256x128xf32, #tpu.memory_space<vmem>>, %arg2: memref<1x128xf32, #tpu.memory_space<vmem>>, %arg3: memref<1x128xf32, #tpu.memory_space<vmem>>, %arg4: memref<256x128xf32, #tpu.memory_space<vmem>>) attributes {dimension_semantics = [#tpu.dimension_semantics<parallel>], iteration_bounds = array<i64: 2>, scalar_prefetch = 0 : i64, scratch_operands = 0 : i64, tpu.core_type = #tpu.core_type<tc>, window_params = [{transform_indices = @transform_0, window_bounds = array<i64: 256, 128>}, {pipeline_mode = #tpu.pipeline_mode<synchronous>, transform_indices = @transform_1, window_bounds = array<i64: 1, 128>}, {pipeline_mode = #tpu.pipeline_mode<synchronous>, transform_indices = @transform_2, window_bounds = array<i64: 1, 128>}, {transform_indices = @transform_3, window_bounds = array<i64: 256, 128>}]} {
    %c0 = arith.constant 0 : index
    %c0_0 = arith.constant 0 : index
    %0 = vector.load %arg1[%c0, %c0_0] : memref<256x128xf32, #tpu.memory_space<vmem>>, vector<256x128xf32>
    %c0_1 = arith.constant 0 : index
    %c0_2 = arith.constant 0 : index
    %1 = vector.load %arg2[%c0_1, %c0_2] : memref<1x128xf32, #tpu.memory_space<vmem>>, vector<1x128xf32>
    %2 = vector.broadcast %1 : vector<1x128xf32> to vector<256x128xf32>
    %3 = arith.mulf %0, %2 : vector<256x128xf32>
    %c0_3 = arith.constant 0 : index
    %c0_4 = arith.constant 0 : index
    %4 = vector.load %arg3[%c0_3, %c0_4] : memref<1x128xf32, #tpu.memory_space<vmem>>, vector<1x128xf32>
    %5 = vector.broadcast %4 : vector<1x128xf32> to vector<256x128xf32>
    %6 = arith.addf %3, %5 : vector<256x128xf32>
    %cst = arith.constant 0.000000e+00 : f32
    %7 = vector.broadcast %cst : f32 to vector<256x128xf32>
    %8 = arith.maximumf %6, %7 : vector<256x128xf32>
    %c0_5 = arith.constant 0 : index
    %c0_6 = arith.constant 0 : index
    %9 = vector.load %arg4[%c0_5, %c0_6] : memref<256x128xf32, #tpu.memory_space<vmem>>, vector<256x128xf32>
    tpu.vector_store %arg4[%c0_5, %c0_6], %8 {strides = array<i32>} : memref<256x128xf32, #tpu.memory_space<vmem>>, vector<256x128xf32>,
    return
  }
  func.func @transform_0(%arg0: i32) -> (i32, i32) {
    %c0_i32 = arith.constant 0 : i32
    %c0_i32_0 = arith.constant 0 : i32
    return %arg0, %c0_i32 : i32, i32
  }
  func.func @transform_1(%arg0: i32) -> (i32, i32) {
    %c0_i32 = arith.constant 0 : i32
    %c0_i32_0 = arith.constant 0 : i32
    %c0_i32_1 = arith.constant 0 : i32
    return %c0_i32, %c0_i32_0 : i32, i32
  }
  func.func @transform_2(%arg0: i32) -> (i32, i32) {
    %c0_i32 = arith.constant 0 : i32
    %c0_i32_0 = arith.constant 0 : i32
    %c0_i32_1 = arith.constant 0 : i32
    return %c0_i32, %c0_i32_0 : i32, i32
  }
  func.func @transform_3(%arg0: i32) -> (i32, i32) {
    %c0_i32 = arith.constant 0 : i32
    %c0_i32_0 = arith.constant 0 : i32
    return %arg0, %c0_i32 : i32, i32
  }
}

module attributes {stable_mosaic.version = 11 : i64} {
  func.func @_matmul_bnrelu_kernel(%arg0: i32, %arg1: memref<256x288xbf16, #tpu.memory_space<vmem>>, %arg2: memref<288x64xbf16, #tpu.memory_space<vmem>>, %arg3: memref<1x64xf32, #tpu.memory_space<vmem>>, %arg4: memref<1x64xf32, #tpu.memory_space<vmem>>, %arg5: memref<256x64xf32, #tpu.memory_space<vmem>>) attributes {dimension_semantics = [#tpu.dimension_semantics<parallel>], iteration_bounds = array<i64: 2>, scalar_prefetch = 0 : i64, scratch_operands = 0 : i64, tpu.core_type = #tpu.core_type<tc>, window_params = [{transform_indices = @transform_0, window_bounds = array<i64: 256, 288>}, {pipeline_mode = #tpu.pipeline_mode<synchronous>, transform_indices = @transform_1, window_bounds = array<i64: 288, 64>}, {pipeline_mode = #tpu.pipeline_mode<synchronous>, transform_indices = @transform_2, window_bounds = array<i64: 1, 64>}, {pipeline_mode = #tpu.pipeline_mode<synchronous>, transform_indices = @transform_3, window_bounds = array<i64: 1, 64>}, {transform_indices = @transform_4, window_bounds = array<i64: 256, 64>}]} {
    %c0 = arith.constant 0 : index
    %c0_0 = arith.constant 0 : index
    %0 = vector.load %arg1[%c0, %c0_0] : memref<256x288xbf16, #tpu.memory_space<vmem>>, vector<256x288xbf16>
    %c0_1 = arith.constant 0 : index
    %c0_2 = arith.constant 0 : index
    %1 = vector.load %arg2[%c0_1, %c0_2] : memref<288x64xbf16, #tpu.memory_space<vmem>>, vector<288x64xbf16>
    %cst = arith.constant dense<0.000000e+00> : vector<256x64xf32>
    %2 = tpu.matmul %0, %1, %cst {dimension_numbers = #tpu.dot_dimension_numbers<[1], [0], [0], [1], [0, 0, 1, 1], [], []>} : vector<256x288xbf16>, vector<288x64xbf16>, vector<256x64xf32> -> vector<256x64xf32>
    %c0_3 = arith.constant 0 : index
    %c0_4 = arith.constant 0 : index
    %3 = vector.load %arg3[%c0_3, %c0_4] : memref<1x64xf32, #tpu.memory_space<vmem>>, vector<1x64xf32>
    %4 = vector.broadcast %3 : vector<1x64xf32> to vector<256x64xf32>
    %5 = arith.mulf %2, %4 : vector<256x64xf32>
    %c0_5 = arith.constant 0 : index
    %c0_6 = arith.constant 0 : index
    %6 = vector.load %arg4[%c0_5, %c0_6] : memref<1x64xf32, #tpu.memory_space<vmem>>, vector<1x64xf32>
    %7 = vector.broadcast %6 : vector<1x64xf32> to vector<256x64xf32>
    %8 = arith.addf %5, %7 : vector<256x64xf32>
    %cst_7 = arith.constant 0.000000e+00 : f32
    %9 = vector.broadcast %cst_7 : f32 to vector<256x64xf32>
    %10 = arith.maximumf %8, %9 : vector<256x64xf32>
    %c0_8 = arith.constant 0 : index
    %c0_9 = arith.constant 0 : index
    %11 = vector.load %arg5[%c0_8, %c0_9] : memref<256x64xf32, #tpu.memory_space<vmem>>, vector<256x64xf32>
    tpu.vector_store %arg5[%c0_8, %c0_9], %10 {strides = array<i32>} : memref<256x64xf32, #tpu.memory_space<vmem>>, vector<256x64xf32>,
    return
  }
  func.func @transform_0(%arg0: i32) -> (i32, i32) {
    %c0_i32 = arith.constant 0 : i32
    %c0_i32_0 = arith.constant 0 : i32
    return %arg0, %c0_i32 : i32, i32
  }
  func.func @transform_1(%arg0: i32) -> (i32, i32) {
    %c0_i32 = arith.constant 0 : i32
    %c0_i32_0 = arith.constant 0 : i32
    %c0_i32_1 = arith.constant 0 : i32
    return %c0_i32, %c0_i32_0 : i32, i32
  }
  func.func @transform_2(%arg0: i32) -> (i32, i32) {
    %c0_i32 = arith.constant 0 : i32
    %c0_i32_0 = arith.constant 0 : i32
    %c0_i32_1 = arith.constant 0 : i32
    return %c0_i32, %c0_i32_0 : i32, i32
  }
  func.func @transform_3(%arg0: i32) -> (i32, i32) {
    %c0_i32 = arith.constant 0 : i32
    %c0_i32_0 = arith.constant 0 : i32
    %c0_i32_1 = arith.constant 0 : i32
    return %c0_i32, %c0_i32_0 : i32, i32
  }
  func.func @transform_4(%arg0: i32) -> (i32, i32) {
    %c0_i32 = arith.constant 0 : i32
    %c0_i32_0 = arith.constant 0 : i32
    return %arg0, %c0_i32 : i32, i32
  }
}

module attributes {stable_mosaic.version = 11 : i64} {
  func.func @_matmul_shortcut_kernel(%arg0: i32, %arg1: memref<256x576xbf16, #tpu.memory_space<vmem>>, %arg2: memref<576x64xbf16, #tpu.memory_space<vmem>>, %arg3: memref<256x32xbf16, #tpu.memory_space<vmem>>, %arg4: memref<32x64xbf16, #tpu.memory_space<vmem>>, %arg5: memref<256x64xf32, #tpu.memory_space<vmem>>) attributes {dimension_semantics = [#tpu.dimension_semantics<parallel>], iteration_bounds = array<i64: 2>, scalar_prefetch = 0 : i64, scratch_operands = 0 : i64, tpu.core_type = #tpu.core_type<tc>, window_params = [{transform_indices = @transform_0, window_bounds = array<i64: 256, 576>}, {pipeline_mode = #tpu.pipeline_mode<synchronous>, transform_indices = @transform_1, window_bounds = array<i64: 576, 64>}, {transform_indices = @transform_2, window_bounds = array<i64: 256, 32>}, {pipeline_mode = #tpu.pipeline_mode<synchronous>, transform_indices = @transform_3, window_bounds = array<i64: 32, 64>}, {transform_indices = @transform_4, window_bounds = array<i64: 256, 64>}]} {
    %c0 = arith.constant 0 : index
    %c0_0 = arith.constant 0 : index
    %0 = vector.load %arg1[%c0, %c0_0] : memref<256x576xbf16, #tpu.memory_space<vmem>>, vector<256x576xbf16>
    %c0_1 = arith.constant 0 : index
    %c0_2 = arith.constant 0 : index
    %1 = vector.load %arg2[%c0_1, %c0_2] : memref<576x64xbf16, #tpu.memory_space<vmem>>, vector<576x64xbf16>
    %cst = arith.constant dense<0.000000e+00> : vector<256x64xf32>
    %2 = tpu.matmul %0, %1, %cst {dimension_numbers = #tpu.dot_dimension_numbers<[1], [0], [0], [1], [0, 0, 1, 1], [], []>} : vector<256x576xbf16>, vector<576x64xbf16>, vector<256x64xf32> -> vector<256x64xf32>
    %c0_3 = arith.constant 0 : index
    %c0_4 = arith.constant 0 : index
    %3 = vector.load %arg3[%c0_3, %c0_4] : memref<256x32xbf16, #tpu.memory_space<vmem>>, vector<256x32xbf16>
    %c0_5 = arith.constant 0 : index
    %c0_6 = arith.constant 0 : index
    %4 = vector.load %arg4[%c0_5, %c0_6] : memref<32x64xbf16, #tpu.memory_space<vmem>>, vector<32x64xbf16>
    %cst_7 = arith.constant dense<0.000000e+00> : vector<256x64xf32>
    %5 = tpu.matmul %3, %4, %cst_7 {dimension_numbers = #tpu.dot_dimension_numbers<[1], [0], [0], [1], [0, 0, 1, 1], [], []>} : vector<256x32xbf16>, vector<32x64xbf16>, vector<256x64xf32> -> vector<256x64xf32>
    %6 = arith.addf %2, %5 : vector<256x64xf32>
    %c0_8 = arith.constant 0 : index
    %c0_9 = arith.constant 0 : index
    %7 = vector.load %arg5[%c0_8, %c0_9] : memref<256x64xf32, #tpu.memory_space<vmem>>, vector<256x64xf32>
    tpu.vector_store %arg5[%c0_8, %c0_9], %6 {strides = array<i32>} : memref<256x64xf32, #tpu.memory_space<vmem>>, vector<256x64xf32>,
    return
  }
  func.func @transform_0(%arg0: i32) -> (i32, i32) {
    %c0_i32 = arith.constant 0 : i32
    %c0_i32_0 = arith.constant 0 : i32
    return %arg0, %c0_i32 : i32, i32
  }
  func.func @transform_1(%arg0: i32) -> (i32, i32) {
    %c0_i32 = arith.constant 0 : i32
    %c0_i32_0 = arith.constant 0 : i32
    %c0_i32_1 = arith.constant 0 : i32
    return %c0_i32, %c0_i32_0 : i32, i32
  }
  func.func @transform_2(%arg0: i32) -> (i32, i32) {
    %c0_i32 = arith.constant 0 : i32
    %c0_i32_0 = arith.constant 0 : i32
    return %arg0, %c0_i32 : i32, i32
  }
  func.func @transform_3(%arg0: i32) -> (i32, i32) {
    %c0_i32 = arith.constant 0 : i32
    %c0_i32_0 = arith.constant 0 : i32
    %c0_i32_1 = arith.constant 0 : i32
    return %c0_i32, %c0_i32_0 : i32, i32
  }
  func.func @transform_4(%arg0: i32) -> (i32, i32) {
    %c0_i32 = arith.constant 0 : i32
    %c0_i32_0 = arith.constant 0 : i32
    return %arg0, %c0_i32 : i32, i32
  }
}

module attributes {stable_mosaic.version = 11 : i64} {
  func.func @_matmul_bnrelu_kernel(%arg0: i32, %arg1: memref<64x576xbf16, #tpu.memory_space<vmem>>, %arg2: memref<576x128xbf16, #tpu.memory_space<vmem>>, %arg3: memref<1x128xf32, #tpu.memory_space<vmem>>, %arg4: memref<1x128xf32, #tpu.memory_space<vmem>>, %arg5: memref<64x128xf32, #tpu.memory_space<vmem>>) attributes {dimension_semantics = [#tpu.dimension_semantics<parallel>], iteration_bounds = array<i64: 2>, scalar_prefetch = 0 : i64, scratch_operands = 0 : i64, tpu.core_type = #tpu.core_type<tc>, window_params = [{transform_indices = @transform_0, window_bounds = array<i64: 64, 576>}, {pipeline_mode = #tpu.pipeline_mode<synchronous>, transform_indices = @transform_1, window_bounds = array<i64: 576, 128>}, {pipeline_mode = #tpu.pipeline_mode<synchronous>, transform_indices = @transform_2, window_bounds = array<i64: 1, 128>}, {pipeline_mode = #tpu.pipeline_mode<synchronous>, transform_indices = @transform_3, window_bounds = array<i64: 1, 128>}, {transform_indices = @transform_4, window_bounds = array<i64: 64, 128>}]} {
    %c0 = arith.constant 0 : index
    %c0_0 = arith.constant 0 : index
    %0 = vector.load %arg1[%c0, %c0_0] : memref<64x576xbf16, #tpu.memory_space<vmem>>, vector<64x576xbf16>
    %c0_1 = arith.constant 0 : index
    %c0_2 = arith.constant 0 : index
    %1 = vector.load %arg2[%c0_1, %c0_2] : memref<576x128xbf16, #tpu.memory_space<vmem>>, vector<576x128xbf16>
    %cst = arith.constant dense<0.000000e+00> : vector<64x128xf32>
    %2 = tpu.matmul %0, %1, %cst {dimension_numbers = #tpu.dot_dimension_numbers<[1], [0], [0], [1], [0, 0, 1, 1], [], []>} : vector<64x576xbf16>, vector<576x128xbf16>, vector<64x128xf32> -> vector<64x128xf32>
    %c0_3 = arith.constant 0 : index
    %c0_4 = arith.constant 0 : index
    %3 = vector.load %arg3[%c0_3, %c0_4] : memref<1x128xf32, #tpu.memory_space<vmem>>, vector<1x128xf32>
    %4 = vector.broadcast %3 : vector<1x128xf32> to vector<64x128xf32>
    %5 = arith.mulf %2, %4 : vector<64x128xf32>
    %c0_5 = arith.constant 0 : index
    %c0_6 = arith.constant 0 : index
    %6 = vector.load %arg4[%c0_5, %c0_6] : memref<1x128xf32, #tpu.memory_space<vmem>>, vector<1x128xf32>
    %7 = vector.broadcast %6 : vector<1x128xf32> to vector<64x128xf32>
    %8 = arith.addf %5, %7 : vector<64x128xf32>
    %cst_7 = arith.constant 0.000000e+00 : f32
    %9 = vector.broadcast %cst_7 : f32 to vector<64x128xf32>
    %10 = arith.maximumf %8, %9 : vector<64x128xf32>
    %c0_8 = arith.constant 0 : index
    %c0_9 = arith.constant 0 : index
    %11 = vector.load %arg5[%c0_8, %c0_9] : memref<64x128xf32, #tpu.memory_space<vmem>>, vector<64x128xf32>
    tpu.vector_store %arg5[%c0_8, %c0_9], %10 {strides = array<i32>} : memref<64x128xf32, #tpu.memory_space<vmem>>, vector<64x128xf32>,
    return
  }
  func.func @transform_0(%arg0: i32) -> (i32, i32) {
    %c0_i32 = arith.constant 0 : i32
    %c0_i32_0 = arith.constant 0 : i32
    return %arg0, %c0_i32 : i32, i32
  }
  func.func @transform_1(%arg0: i32) -> (i32, i32) {
    %c0_i32 = arith.constant 0 : i32
    %c0_i32_0 = arith.constant 0 : i32
    %c0_i32_1 = arith.constant 0 : i32
    return %c0_i32, %c0_i32_0 : i32, i32
  }
  func.func @transform_2(%arg0: i32) -> (i32, i32) {
    %c0_i32 = arith.constant 0 : i32
    %c0_i32_0 = arith.constant 0 : i32
    %c0_i32_1 = arith.constant 0 : i32
    return %c0_i32, %c0_i32_0 : i32, i32
  }
  func.func @transform_3(%arg0: i32) -> (i32, i32) {
    %c0_i32 = arith.constant 0 : i32
    %c0_i32_0 = arith.constant 0 : i32
    %c0_i32_1 = arith.constant 0 : i32
    return %c0_i32, %c0_i32_0 : i32, i32
  }
  func.func @transform_4(%arg0: i32) -> (i32, i32) {
    %c0_i32 = arith.constant 0 : i32
    %c0_i32_0 = arith.constant 0 : i32
    return %arg0, %c0_i32 : i32, i32
  }
}

module attributes {stable_mosaic.version = 11 : i64} {
  func.func @_tail_kernel(%arg0: i32, %arg1: memref<2x64x128xf32, #tpu.memory_space<vmem>>, %arg2: memref<1x1x128xf32, #tpu.memory_space<vmem>>, %arg3: memref<1x1x128xf32, #tpu.memory_space<vmem>>, %arg4: memref<128x10xf32, #tpu.memory_space<vmem>>, %arg5: memref<1x10xf32, #tpu.memory_space<vmem>>, %arg6: memref<2x10xf32, #tpu.memory_space<vmem>>) attributes {dimension_semantics = [#tpu.dimension_semantics<arbitrary>], iteration_bounds = array<i64: 1>, scalar_prefetch = 0 : i64, scratch_operands = 0 : i64, tpu.core_type = #tpu.core_type<tc>, window_params = [{pipeline_mode = #tpu.pipeline_mode<synchronous>, transform_indices = @transform_0, window_bounds = array<i64: 2, 64, 128>}, {pipeline_mode = #tpu.pipeline_mode<synchronous>, transform_indices = @transform_1, window_bounds = array<i64: 1, 1, 128>}, {pipeline_mode = #tpu.pipeline_mode<synchronous>, transform_indices = @transform_2, window_bounds = array<i64: 1, 1, 128>}, {pipeline_mode = #tpu.pipeline_mode<synchronous>, transform_indices = @transform_3, window_bounds = array<i64: 128, 10>}, {pipeline_mode = #tpu.pipeline_mode<synchronous>, transform_indices = @transform_4, window_bounds = array<i64: 1, 10>}, {pipeline_mode = #tpu.pipeline_mode<synchronous>, transform_indices = @transform_5, window_bounds = array<i64: 2, 10>}]} {
    %c0 = arith.constant 0 : index
    %c0_0 = arith.constant 0 : index
    %c0_1 = arith.constant 0 : index
    %0 = vector.load %arg1[%c0, %c0_0, %c0_1] : memref<2x64x128xf32, #tpu.memory_space<vmem>>, vector<2x64x128xf32>
    %c0_2 = arith.constant 0 : index
    %c0_3 = arith.constant 0 : index
    %c0_4 = arith.constant 0 : index
    %1 = vector.load %arg2[%c0_2, %c0_3, %c0_4] : memref<1x1x128xf32, #tpu.memory_space<vmem>>, vector<1x1x128xf32>
    %2 = vector.broadcast %1 : vector<1x1x128xf32> to vector<2x64x128xf32>
    %3 = arith.mulf %0, %2 : vector<2x64x128xf32>
    %c0_5 = arith.constant 0 : index
    %c0_6 = arith.constant 0 : index
    %c0_7 = arith.constant 0 : index
    %4 = vector.load %arg3[%c0_5, %c0_6, %c0_7] : memref<1x1x128xf32, #tpu.memory_space<vmem>>, vector<1x1x128xf32>
    %5 = vector.broadcast %4 : vector<1x1x128xf32> to vector<2x64x128xf32>
    %6 = arith.addf %3, %5 : vector<2x64x128xf32>
    %cst = arith.constant 0.000000e+00 : f32
    %7 = vector.broadcast %cst : f32 to vector<2x64x128xf32>
    %8 = arith.maximumf %6, %7 : vector<2x64x128xf32>
    %cst_8 = arith.constant dense<0.000000e+00> : vector<2x128xf32>
    %9 = vector.multi_reduction <add>, %8, %cst_8 [1] : vector<2x64x128xf32> to vector<2x128xf32>
    %cst_9 = arith.constant 6.400000e+01 : f32
    %10 = vector.broadcast %cst_9 : f32 to vector<2x128xf32>
    %11 = arith.divf %9, %10 : vector<2x128xf32>
    %c0_10 = arith.constant 0 : index
    %c0_11 = arith.constant 0 : index
    %12 = vector.load %arg4[%c0_10, %c0_11] : memref<128x10xf32, #tpu.memory_space<vmem>>, vector<128x10xf32>
    %cst_12 = arith.constant dense<0.000000e+00> : vector<2x10xf32>
    %13 = tpu.matmul %11, %12, %cst_12 {dimension_numbers = #tpu.dot_dimension_numbers<[1], [0], [0], [1], [0, 0, 1, 1], [], []>} : vector<2x128xf32>, vector<128x10xf32>, vector<2x10xf32> -> vector<2x10xf32>
    %c0_13 = arith.constant 0 : index
    %c0_14 = arith.constant 0 : index
    %14 = vector.load %arg5[%c0_13, %c0_14] : memref<1x10xf32, #tpu.memory_space<vmem>>, vector<1x10xf32>
    %15 = vector.broadcast %14 : vector<1x10xf32> to vector<2x10xf32>
    %16 = arith.addf %13, %15 : vector<2x10xf32>
    %c0_15 = arith.constant 0 : index
    %c0_16 = arith.constant 0 : index
    %17 = vector.load %arg6[%c0_15, %c0_16] : memref<2x10xf32, #tpu.memory_space<vmem>>, vector<2x10xf32>
    tpu.vector_store %arg6[%c0_15, %c0_16], %16 {strides = array<i32>} : memref<2x10xf32, #tpu.memory_space<vmem>>, vector<2x10xf32>,
    return
  }
  func.func @transform_0(%arg0: i32) -> (i32, i32, i32) {
    %c0_i32 = arith.constant 0 : i32
    %c0_i32_0 = arith.constant 0 : i32
    %c0_i32_1 = arith.constant 0 : i32
    %c0_i32_2 = arith.constant 0 : i32
    return %c0_i32, %c0_i32_0, %c0_i32_1 : i32, i32, i32
  }
  func.func @transform_1(%arg0: i32) -> (i32, i32, i32) {
    %c0_i32 = arith.constant 0 : i32
    %c0_i32_0 = arith.constant 0 : i32
    %c0_i32_1 = arith.constant 0 : i32
    %c0_i32_2 = arith.constant 0 : i32
    return %c0_i32, %c0_i32_0, %c0_i32_1 : i32, i32, i32
  }
  func.func @transform_2(%arg0: i32) -> (i32, i32, i32) {
    %c0_i32 = arith.constant 0 : i32
    %c0_i32_0 = arith.constant 0 : i32
    %c0_i32_1 = arith.constant 0 : i32
    %c0_i32_2 = arith.constant 0 : i32
    return %c0_i32, %c0_i32_0, %c0_i32_1 : i32, i32, i32
  }
  func.func @transform_3(%arg0: i32) -> (i32, i32) {
    %c0_i32 = arith.constant 0 : i32
    %c0_i32_0 = arith.constant 0 : i32
    %c0_i32_1 = arith.constant 0 : i32
    return %c0_i32, %c0_i32_0 : i32, i32
  }
  func.func @transform_4(%arg0: i32) -> (i32, i32) {
    %c0_i32 = arith.constant 0 : i32
    %c0_i32_0 = arith.constant 0 : i32
    %c0_i32_1 = arith.constant 0 : i32
    return %c0_i32, %c0_i32_0 : i32, i32
  }
  func.func @transform_5(%arg0: i32) -> (i32, i32) {
    %c0_i32 = arith.constant 0 : i32
    %c0_i32_0 = arith.constant 0 : i32
    %c0_i32_1 = arith.constant 0 : i32
    return %c0_i32, %c0_i32_0 : i32, i32
  }
}

module attributes {stable_mosaic.version = 11 : i64} {
  func.func @_matmul_shortcut_kernel(%arg0: i32, %arg1: memref<64x1152xbf16, #tpu.memory_space<vmem>>, %arg2: memref<1152x128xbf16, #tpu.memory_space<vmem>>, %arg3: memref<64x64xbf16, #tpu.memory_space<vmem>>, %arg4: memref<64x128xbf16, #tpu.memory_space<vmem>>, %arg5: memref<64x128xf32, #tpu.memory_space<vmem>>) attributes {dimension_semantics = [#tpu.dimension_semantics<parallel>], iteration_bounds = array<i64: 2>, scalar_prefetch = 0 : i64, scratch_operands = 0 : i64, tpu.core_type = #tpu.core_type<tc>, window_params = [{transform_indices = @transform_0, window_bounds = array<i64: 64, 1152>}, {pipeline_mode = #tpu.pipeline_mode<synchronous>, transform_indices = @transform_1, window_bounds = array<i64: 1152, 128>}, {transform_indices = @transform_2, window_bounds = array<i64: 64, 64>}, {pipeline_mode = #tpu.pipeline_mode<synchronous>, transform_indices = @transform_3, window_bounds = array<i64: 64, 128>}, {transform_indices = @transform_4, window_bounds = array<i64: 64, 128>}]} {
    %c0 = arith.constant 0 : index
    %c0_0 = arith.constant 0 : index
    %0 = vector.load %arg1[%c0, %c0_0] : memref<64x1152xbf16, #tpu.memory_space<vmem>>, vector<64x1152xbf16>
    %c0_1 = arith.constant 0 : index
    %c0_2 = arith.constant 0 : index
    %1 = vector.load %arg2[%c0_1, %c0_2] : memref<1152x128xbf16, #tpu.memory_space<vmem>>, vector<1152x128xbf16>
    %cst = arith.constant dense<0.000000e+00> : vector<64x128xf32>
    %2 = tpu.matmul %0, %1, %cst {dimension_numbers = #tpu.dot_dimension_numbers<[1], [0], [0], [1], [0, 0, 1, 1], [], []>} : vector<64x1152xbf16>, vector<1152x128xbf16>, vector<64x128xf32> -> vector<64x128xf32>
    %c0_3 = arith.constant 0 : index
    %c0_4 = arith.constant 0 : index
    %3 = vector.load %arg3[%c0_3, %c0_4] : memref<64x64xbf16, #tpu.memory_space<vmem>>, vector<64x64xbf16>
    %c0_5 = arith.constant 0 : index
    %c0_6 = arith.constant 0 : index
    %4 = vector.load %arg4[%c0_5, %c0_6] : memref<64x128xbf16, #tpu.memory_space<vmem>>, vector<64x128xbf16>
    %cst_7 = arith.constant dense<0.000000e+00> : vector<64x128xf32>
    %5 = tpu.matmul %3, %4, %cst_7 {dimension_numbers = #tpu.dot_dimension_numbers<[1], [0], [0], [1], [0, 0, 1, 1], [], []>} : vector<64x64xbf16>, vector<64x128xbf16>, vector<64x128xf32> -> vector<64x128xf32>
    %6 = arith.addf %2, %5 : vector<64x128xf32>
    %c0_8 = arith.constant 0 : index
    %c0_9 = arith.constant 0 : index
    %7 = vector.load %arg5[%c0_8, %c0_9] : memref<64x128xf32, #tpu.memory_space<vmem>>, vector<64x128xf32>
    tpu.vector_store %arg5[%c0_8, %c0_9], %6 {strides = array<i32>} : memref<64x128xf32, #tpu.memory_space<vmem>>, vector<64x128xf32>,
    return
  }
  func.func @transform_0(%arg0: i32) -> (i32, i32) {
    %c0_i32 = arith.constant 0 : i32
    %c0_i32_0 = arith.constant 0 : i32
    return %arg0, %c0_i32 : i32, i32
  }
  func.func @transform_1(%arg0: i32) -> (i32, i32) {
    %c0_i32 = arith.constant 0 : i32
    %c0_i32_0 = arith.constant 0 : i32
    %c0_i32_1 = arith.constant 0 : i32
    return %c0_i32, %c0_i32_0 : i32, i32
  }
  func.func @transform_2(%arg0: i32) -> (i32, i32) {
    %c0_i32 = arith.constant 0 : i32
    %c0_i32_0 = arith.constant 0 : i32
    return %arg0, %c0_i32 : i32, i32
  }
  func.func @transform_3(%arg0: i32) -> (i32, i32) {
    %c0_i32 = arith.constant 0 : i32
    %c0_i32_0 = arith.constant 0 : i32
    %c0_i32_1 = arith.constant 0 : i32
    return %c0_i32, %c0_i32_0 : i32, i32
  }
  func.func @transform_4(%arg0: i32) -> (i32, i32) {
    %c0_i32 = arith.constant 0 : i32
    %c0_i32_0 = arith.constant 0 : i32
    return %arg0, %c0_i32 : i32, i32
  }
}

</mosaic_0001>

<bundles_post_ra>
// kernel: _wrn_forward_impl.11
= control target key start
LH: loop header
LB: loop body
LE: loop exit
PB: predicated region body
PF: predicated region fallthrough
CT: control target
= control target key end

     0   :  { %s1151_s9 = smov 0   ;;  %s1374_s0 = inlined_call_operand.vmem [shape: bf16[2048,27], index: 0, kind: input, shape index: {}]   ;;  %s1375_s1 = inlined_call_operand.vmem [shape: bf16[27,16], index: 1, kind: input, shape index: {}]   ;;  %s1376_s2 = inlined_call_operand.vmem [shape: f32[2048,16], index: 2, kind: output, shape index: {}]  }
   0x1 LB: > { %s901_s10 = sadd.s32 4294967295, %s1133_s9   ;;  %p905_p0 = scmp.ge.s32.totalorder %s1133_s9, 1  ;;  %s1133_s9 = sphi %s1151_s9, %s12_s9  }
   0x2   : > { %p113_p1 = scmp.lt.s32.totalorder %s1133_s9, 5 }
   0x4   : > { %p114_p2 = pnand %p905_p0, %p113_p1 }
   0x5   : > { %v1093_v0 = vld [vmem:[%s1375_s1] sm:$0xff] (!%p114_p2)   ;;  %vm484_vm0 = vcmask (!%p114_p2), 1044480   ;;  %v1094_v1 = vld [vmem:[%s1375_s1 + $0x8] sm:$0x3f] (!%p114_p2)   ;;  %vm485_vm1 = vcmask (!%p114_p2), 1045504   ;;  %s906_s15 = sshll.u32 (!%p114_p2), %s901_s10, 6 }
   0x6   : > { %117 = sbr.rel (%p114_p2) target bundleno = 291 (0x123), region = 28  ;;  %1012 = vmatprep.subr.bf16.mxu0 (!%p114_p2), %v1093_v0  ;;  %1080 = vmatprep.subr.bf16.mxu1 (!%p114_p2), %v1093_v0  ;;  %v1135_v2 = vmov (!%p114_p2), 65535   ;;  %p136_p3 = scmp.lt.s32.totalorder (!%p114_p2), %s906_s15, 255  ;;  %vm387_vm2 = vcmask (!%p114_p2), 220160   ;;  %vm780_vm3 = vcmask (!%p114_p2), 130048  }
   0x7   : > { %1013 = vmatpush3.bf16.msra.mxu0 (!%p114_p2), %v1093_v0  ;;  %1082 = vmatpush3.bf16.msra.mxu1 (!%p114_p2), %v1093_v0  ;;  %v486_v3 = vsel (!%p114_p2), %vm484_vm0, 4294967295, %v1135_v2 }
   0x8   : > { %v487_v4 = vsel (!%p114_p2), %vm485_vm1, %v486_v3, 0 }
   0x9   : > { %v489_v5 = vand.u32 (!%p114_p2), %v1094_v1, %v487_v4 }
   0xb   : > { %1014 = vmatprep.subr.bf16.mxu0 (!%p114_p2), %v489_v5  ;;  %1081 = vmatprep.subr.bf16.mxu1 (!%p114_p2), %v489_v5 }
   0xc   : > { %1015 = vmatpush3.bf16.msra.mxu0 (!%p114_p2), %v489_v5  ;;  %1083 = vmatpush3.bf16.msra.mxu1 (!%p114_p2), %v489_v5 }
   0xd   : > { %s1378_s15 = smov (!%p136_p3, %s906_s15), 255 }
   0xe   : > { %s907_s16 = sshll.u32 %s1378_s15, 2  ;;  %s909_s20 = sshll.u32 %s1378_s15, 3 }
   0xf   : > { %s1171_s19 = scalar_lea.vmem %s1374_s0, %s907_s16  ;;  %s1241_s23 = scalar_lea.vmem %s1376_s2, %s909_s20 }
  0x10   : > { %v1095_v6 = vld [vmem:[%s1171_s19] sm:$0xff]   ;;  %v1097_v8 = vld [vmem:[%s1171_s19 + $0x8] sm:$0xff]   ;;  %v1099_v10 = vld [vmem:[%s1171_s19 + $0x10] sm:$0xff]  }
  0x11   : > { %v1096_v7 = vld [vmem:[%s1171_s19 + $0x80] sm:$0xff]   ;;  %1016 = vmatprep.mubr.msk.bf16.mxu0 %vm387_vm2, %v1095_v6  ;;  %v1098_v9 = vld [vmem:[%s1171_s19 + $0x88] sm:$0xff]   ;;  %v1100_v11 = vld [vmem:[%s1171_s19 + $0x90] sm:$0xff]  }
  0x12   : > { %1048 = vmatprep.mubr.msk.bf16.mxu1 %vm387_vm2, %v1096_v7  ;;  %1017 = vmatmul.mubr.msk.bf16.vlgmr.msra.gmra.mrb[0].mxu0 %vm387_vm2, %v1097_v8  ;;  %v1101_v12 = vld [vmem:[%s1171_s19 + $0x18] sm:$0xff]   ;;  %v1103_v14 = vld [vmem:[%s1171_s19 + $0x20] sm:$0xff]   ;;  %v1105_v16 = vld [vmem:[%s1171_s19 + $0x28] sm:$0xff]  }
  0x13   : > { %1049 = vmatmul.mubr.msk.bf16.vlgmr.msra.gmra.mrb[0].mxu1 %vm387_vm2, %v1098_v9  ;;  %1020 = vmatprep.mubr.msk.bf16.mxu0 %vm387_vm2, %v1099_v10  ;;  %v1102_v13 = vld [vmem:[%s1171_s19 + $0x98] sm:$0xff]   ;;  %v1104_v15 = vld [vmem:[%s1171_s19 + $0xa0] sm:$0xff]   ;;  %v1106_v17 = vld [vmem:[%s1171_s19 + $0xa8] sm:$0xff]  }
  0x14   : > { %1052 = vmatprep.mubr.msk.bf16.mxu1 %vm387_vm2, %v1100_v11  ;;  %v1107_v18 = vld [vmem:[%s1171_s19 + $0x30] sm:$0xff]   ;;  %v1109_v20 = vld [vmem:[%s1171_s19 + $0x38] sm:$0xff]   ;;  %v1111_v22 = vld [vmem:[%s1171_s19 + $0x40] sm:$0xff]  }
  0x15   : > { %v1108_v19 = vld [vmem:[%s1171_s19 + $0xb0] sm:$0xff]   ;;  %v1110_v21 = vld [vmem:[%s1171_s19 + $0xb8] sm:$0xff]   ;;  %v1112_v23 = vld [vmem:[%s1171_s19 + $0xc0] sm:$0xff]  }
  0x16   : > { %v1113_v24 = vld [vmem:[%s1171_s19 + $0x48] sm:$0xff]   ;;  %v1115_v26 = vld [vmem:[%s1171_s19 + $0x50] sm:$0xff]   ;;  %v1117_v28 = vld [vmem:[%s1171_s19 + $0x58] sm:$0xff]  }
  0x17   : > { %v1114_v25 = vld [vmem:[%s1171_s19 + $0xc8] sm:$0xff]   ;;  %v1116_v27 = vld [vmem:[%s1171_s19 + $0xd0] sm:$0xff]   ;;  %v1118_v29 = vld [vmem:[%s1171_s19 + $0xd8] sm:$0xff]  }
  0x18   : > { %v1119_v30 = vld [vmem:[%s1171_s19 + $0x60] sm:$0xff]   ;;  %v1121_v32 = vld [vmem:[%s1171_s19 + $0x68] sm:$0xff]   ;;  %v1123_v34 = vld [vmem:[%s1171_s19 + $0x70] sm:$0xff]  }
  0x19   : > { %v1120_v31 = vld [vmem:[%s1171_s19 + $0xe0] sm:$0xff]   ;;  %v1122_v33 = vld [vmem:[%s1171_s19 + $0xe8] sm:$0xff]   ;;  %v1124_v35 = vld [vmem:[%s1171_s19 + $0xf0] sm:$0xff]  }
  0x1a   : > { %1021 = vmatmul.mubr.msk.bf16.gmra.mrb[4].mxu0 %vm387_vm2, %v1101_v12  ;;  %v1125_v36 = vld [vmem:[%s1171_s19 + $0x78] sm:$0xff]  }
  0x1b   : > { %1053 = vmatmul.mubr.msk.bf16.gmra.mrb[4].mxu1 %vm387_vm2, %v1102_v13  ;;  %1024 = vmatprep.mubr.msk.bf16.mxu0 %vm387_vm2, %v1103_v14  ;;  %v1126_v37 = vld [vmem:[%s1171_s19 + $0xf8] sm:$0xff]  }
  0x1c   : > { %1056 = vmatprep.mubr.msk.bf16.mxu1 %vm387_vm2, %v1104_v15 }
  0x22   : > { %1025 = vmatmul.mubr.msk.bf16.gmra.mrb[8].mxu0 %vm387_vm2, %v1105_v16 }
  0x23   : > { %1057 = vmatmul.mubr.msk.bf16.gmra.mrb[8].mxu1 %vm387_vm2, %v1106_v17  ;;  %1028 = vmatprep.mubr.msk.bf16.mxu0 %vm387_vm2, %v1107_v18 }
  0x24   : > { %1060 = vmatprep.mubr.msk.bf16.mxu1 %vm387_vm2, %v1108_v19 }
  0x2a   : > { %1029 = vmatmul.mubr.msk.bf16.gmra.mrb[12].mxu0 %vm387_vm2, %v1109_v20 }
  0x2b   : > { %1061 = vmatmul.mubr.msk.bf16.gmra.mrb[12].mxu1 %vm387_vm2, %v1110_v21  ;;  %1032 = vmatprep.mubr.msk.bf16.mxu0 %vm387_vm2, %v1111_v22 }
  0x2c   : > { %1064 = vmatprep.mubr.msk.bf16.mxu1 %vm387_vm2, %v1112_v23 }
  0x32   : > { %1033 = vmatmul.mubr.msk.bf16.gmra.mrb[16].mxu0 %vm387_vm2, %v1113_v24 }
  0x33   : > { %1065 = vmatmul.mubr.msk.bf16.gmra.mrb[16].mxu1 %vm387_vm2, %v1114_v25  ;;  %1036 = vmatprep.mubr.msk.bf16.mxu0 %vm387_vm2, %v1115_v26 }
  0x34   : > { %1068 = vmatprep.mubr.msk.bf16.mxu1 %vm387_vm2, %v1116_v27 }
  0x3a   : > { %1037 = vmatmul.mubr.msk.bf16.gmra.mrb[20].mxu0 %vm387_vm2, %v1117_v28 }
  0x3b   : > { %1069 = vmatmul.mubr.msk.bf16.gmra.mrb[20].mxu1 %vm387_vm2, %v1118_v29  ;;  %1040 = vmatprep.mubr.msk.bf16.mxu0 %vm387_vm2, %v1119_v30 }
  0x3c   : > { %1072 = vmatprep.mubr.msk.bf16.mxu1 %vm387_vm2, %v1120_v31 }
  0x42   : > { %1041 = vmatmul.mubr.msk.bf16.gmra.mrb[24].mxu0 %vm387_vm2, %v1121_v32 }
  0x43   : > { %1073 = vmatmul.mubr.msk.bf16.gmra.mrb[24].mxu1 %vm387_vm2, %v1122_v33  ;;  %1044 = vmatprep.mubr.msk.bf16.mxu0 %vm387_vm2, %v1123_v34 }
  0x44   : > { %1076 = vmatprep.mubr.msk.bf16.mxu1 %vm387_vm2, %v1124_v35 }
  0x4a   : > { %1045 = vmatmul.mubr.msk.bf16.gmra.mrb[28].mxu0 %vm387_vm2, %v1125_v36 }
  0x4b   : > { %1077 = vmatmul.mubr.msk.bf16.gmra.mrb[28].mxu1 %vm387_vm2, %v1126_v37 }
  0xe5   : > { %v1018_v38 = vpop.f32.mrb[0].mxu0 }
  0xe6   : > { %783 = vst.msk [vmem:[%s1241_s23 + $0x10] sm:$0xff] %vm780_vm3, %v1018_v38  ;;  %v1050_v39 = vpop.f32.mrb[0].mxu1  ;;  %v525_v40 = vpop.f32.mrb[1].mxu0 }
  0xe7   : > { %815 = vst.msk [vmem:[%s1241_s23 + $0x110] sm:$0xff] %vm780_vm3, %v1050_v39  ;;  %781 = vst.msk [vmem:[%s1241_s23] sm:$0xff] %vm780_vm3, %v525_v40  ;;  %v653_v41 = vpop.f32.mrb[1].mxu1  ;;  %v1019_v42 = vpop.f32.mrb[2].mxu0 }
  0xe8   : > { %813 = vst.msk [vmem:[%s1241_s23 + $0x100] sm:$0xff] %vm780_vm3, %v653_v41  ;;  %784 = vst.msk [vmem:[%s1241_s23 + $0x18] sm:$0xff] %vm780_vm3, %v1019_v42  ;;  %v1051_v43 = vpop.f32.mrb[2].mxu1  ;;  %v528_v44 = vpop.f32.mrb[3].mxu0 }
  0xe9   : > { %816 = vst.msk [vmem:[%s1241_s23 + $0x118] sm:$0xff] %vm780_vm3, %v1051_v43  ;;  %782 = vst.msk [vmem:[%s1241_s23 + $0x8] sm:$0xff] %vm780_vm3, %v528_v44  ;;  %v656_v45 = vpop.f32.mrb[3].mxu1 }
  0xea   : > { %814 = vst.msk [vmem:[%s1241_s23 + $0x108] sm:$0xff] %vm780_vm3, %v656_v45 }
  0xed   : > { %v1022_v46 = vpop.f32.mrb[4].mxu0 }
  0xee   : > { %787 = vst.msk [vmem:[%s1241_s23 + $0x30] sm:$0xff] %vm780_vm3, %v1022_v46  ;;  %v1054_v47 = vpop.f32.mrb[4].mxu1  ;;  %v541_v48 = vpop.f32.mrb[5].mxu0 }
  0xef   : > { %819 = vst.msk [vmem:[%s1241_s23 + $0x130] sm:$0xff] %vm780_vm3, %v1054_v47  ;;  %785 = vst.msk [vmem:[%s1241_s23 + $0x20] sm:$0xff] %vm780_vm3, %v541_v48  ;;  %v669_v49 = vpop.f32.mrb[5].mxu1  ;;  %v1023_v50 = vpop.f32.mrb[6].mxu0 }
  0xf0   : > { %817 = vst.msk [vmem:[%s1241_s23 + $0x120] sm:$0xff] %vm780_vm3, %v669_v49  ;;  %788 = vst.msk [vmem:[%s1241_s23 + $0x38] sm:$0xff] %vm780_vm3, %v1023_v50  ;;  %v1055_v51 = vpop.f32.mrb[6].mxu1  ;;  %v544_v52 = vpop.f32.mrb[7].mxu0 }
  0xf1   : > { %820 = vst.msk [vmem:[%s1241_s23 + $0x138] sm:$0xff] %vm780_vm3, %v1055_v51  ;;  %786 = vst.msk [vmem:[%s1241_s23 + $0x28] sm:$0xff] %vm780_vm3, %v544_v52  ;;  %v672_v53 = vpop.f32.mrb[7].mxu1 }
  0xf2   : > { %818 = vst.msk [vmem:[%s1241_s23 + $0x128] sm:$0xff] %vm780_vm3, %v672_v53 }
  0xf5   : > { %v1026_v54 = vpop.f32.mrb[8].mxu0 }
  0xf6   : > { %791 = vst.msk [vmem:[%s1241_s23 + $0x50] sm:$0xff] %vm780_vm3, %v1026_v54  ;;  %v1058_v55 = vpop.f32.mrb[8].mxu1  ;;  %v557_v56 = vpop.f32.mrb[9].mxu0 }
  0xf7   : > { %823 = vst.msk [vmem:[%s1241_s23 + $0x150] sm:$0xff] %vm780_vm3, %v1058_v55  ;;  %789 = vst.msk [vmem:[%s1241_s23 + $0x40] sm:$0xff] %vm780_vm3, %v557_v56  ;;  %v685_v57 = vpop.f32.mrb[9].mxu1  ;;  %v1027_v58 = vpop.f32.mrb[10].mxu0 }
  0xf8   : > { %821 = vst.msk [vmem:[%s1241_s23 + $0x140] sm:$0xff] %vm780_vm3, %v685_v57  ;;  %792 = vst.msk [vmem:[%s1241_s23 + $0x58] sm:$0xff] %vm780_vm3, %v1027_v58  ;;  %v1059_v59 = vpop.f32.mrb[10].mxu1  ;;  %v560_v60 = vpop.f32.mrb[11].mxu0 }
  0xf9   : > { %824 = vst.msk [vmem:[%s1241_s23 + $0x158] sm:$0xff] %vm780_vm3, %v1059_v59  ;;  %790 = vst.msk [vmem:[%s1241_s23 + $0x48] sm:$0xff] %vm780_vm3, %v560_v60  ;;  %v688_v61 = vpop.f32.mrb[11].mxu1 }
  0xfa   : > { %822 = vst.msk [vmem:[%s1241_s23 + $0x148] sm:$0xff] %vm780_vm3, %v688_v61 }
  0xfd   : > { %v1030_v62 = vpop.f32.mrb[12].mxu0 }
  0xfe   : > { %795 = vst.msk [vmem:[%s1241_s23 + $0x70] sm:$0xff] %vm780_vm3, %v1030_v62  ;;  %v1062_v63 = vpop.f32.mrb[12].mxu1  ;;  %v573_v0 = vpop.f32.mrb[13].mxu0 }
  0xff   : > { %827 = vst.msk [vmem:[%s1241_s23 + $0x170] sm:$0xff] %vm780_vm3, %v1062_v63  ;;  %793 = vst.msk [vmem:[%s1241_s23 + $0x60] sm:$0xff] %vm780_vm3, %v573_v0  ;;  %v701_v1 = vpop.f32.mrb[13].mxu1  ;;  %v1031_v2 = vpop.f32.mrb[14].mxu0 }
 0x100   : > { %825 = vst.msk [vmem:[%s1241_s23 + $0x160] sm:$0xff] %vm780_vm3, %v701_v1  ;;  %796 = vst.msk [vmem:[%s1241_s23 + $0x78] sm:$0xff] %vm780_vm3, %v1031_v2  ;;  %v1063_v3 = vpop.f32.mrb[14].mxu1  ;;  %v576_v4 = vpop.f32.mrb[15].mxu0 }
 0x101   : > { %828 = vst.msk [vmem:[%s1241_s23 + $0x178] sm:$0xff] %vm780_vm3, %v1063_v3  ;;  %794 = vst.msk [vmem:[%s1241_s23 + $0x68] sm:$0xff] %vm780_vm3, %v576_v4  ;;  %v704_v5 = vpop.f32.mrb[15].mxu1 }
 0x102   : > { %826 = vst.msk [vmem:[%s1241_s23 + $0x168] sm:$0xff] %vm780_vm3, %v704_v5 }
 0x105   : > { %v1034_v6 = vpop.f32.mrb[16].mxu0 }
 0x106   : > { %799 = vst.msk [vmem:[%s1241_s23 + $0x90] sm:$0xff] %vm780_vm3, %v1034_v6  ;;  %v1066_v7 = vpop.f32.mrb[16].mxu1  ;;  %v589_v8 = vpop.f32.mrb[17].mxu0 }
 0x107   : > { %831 = vst.msk [vmem:[%s1241_s23 + $0x190] sm:$0xff] %vm780_vm3, %v1066_v7  ;;  %797 = vst.msk [vmem:[%s1241_s23 + $0x80] sm:$0xff] %vm780_vm3, %v589_v8  ;;  %v717_v9 = vpop.f32.mrb[17].mxu1  ;;  %v1035_v10 = vpop.f32.mrb[18].mxu0 }
 0x108   : > { %829 = vst.msk [vmem:[%s1241_s23 + $0x180] sm:$0xff] %vm780_vm3, %v717_v9  ;;  %800 = vst.msk [vmem:[%s1241_s23 + $0x98] sm:$0xff] %vm780_vm3, %v1035_v10  ;;  %v1067_v11 = vpop.f32.mrb[18].mxu1  ;;  %v592_v12 = vpop.f32.mrb[19].mxu0 }
 0x109   : > { %832 = vst.msk [vmem:[%s1241_s23 + $0x198] sm:$0xff] %vm780_vm3, %v1067_v11  ;;  %798 = vst.msk [vmem:[%s1241_s23 + $0x88] sm:$0xff] %vm780_vm3, %v592_v12  ;;  %v720_v13 = vpop.f32.mrb[19].mxu1 }
 0x10a   : > { %830 = vst.msk [vmem:[%s1241_s23 + $0x188] sm:$0xff] %vm780_vm3, %v720_v13 }
 0x10d   : > { %v1038_v14 = vpop.f32.mrb[20].mxu0 }
 0x10e   : > { %803 = vst.msk [vmem:[%s1241_s23 + $0xb0] sm:$0xff] %vm780_vm3, %v1038_v14  ;;  %v1070_v15 = vpop.f32.mrb[20].mxu1  ;;  %v605_v16 = vpop.f32.mrb[21].mxu0 }
 0x10f   : > { %835 = vst.msk [vmem:[%s1241_s23 + $0x1b0] sm:$0xff] %vm780_vm3, %v1070_v15  ;;  %801 = vst.msk [vmem:[%s1241_s23 + $0xa0] sm:$0xff] %vm780_vm3, %v605_v16  ;;  %v733_v17 = vpop.f32.mrb[21].mxu1  ;;  %v1039_v18 = vpop.f32.mrb[22].mxu0 }
 0x110   : > { %833 = vst.msk [vmem:[%s1241_s23 + $0x1a0] sm:$0xff] %vm780_vm3, %v733_v17  ;;  %804 = vst.msk [vmem:[%s1241_s23 + $0xb8] sm:$0xff] %vm780_vm3, %v1039_v18  ;;  %v1071_v19 = vpop.f32.mrb[22].mxu1  ;;  %v608_v20 = vpop.f32.mrb[23].mxu0 }
 0x111   : > { %836 = vst.msk [vmem:[%s1241_s23 + $0x1b8] sm:$0xff] %vm780_vm3, %v1071_v19  ;;  %802 = vst.msk [vmem:[%s1241_s23 + $0xa8] sm:$0xff] %vm780_vm3, %v608_v20  ;;  %v736_v21 = vpop.f32.mrb[23].mxu1 }
 0x112   : > { %834 = vst.msk [vmem:[%s1241_s23 + $0x1a8] sm:$0xff] %vm780_vm3, %v736_v21 }
 0x115   : > { %v1042_v22 = vpop.f32.mrb[24].mxu0 }
 0x116   : > { %807 = vst.msk [vmem:[%s1241_s23 + $0xd0] sm:$0xff] %vm780_vm3, %v1042_v22  ;;  %v1074_v23 = vpop.f32.mrb[24].mxu1  ;;  %v621_v24 = vpop.f32.mrb[25].mxu0 }
 0x117   : > { %839 = vst.msk [vmem:[%s1241_s23 + $0x1d0] sm:$0xff] %vm780_vm3, %v1074_v23  ;;  %805 = vst.msk [vmem:[%s1241_s23 + $0xc0] sm:$0xff] %vm780_vm3, %v621_v24  ;;  %v749_v25 = vpop.f32.mrb[25].mxu1  ;;  %v1043_v26 = vpop.f32.mrb[26].mxu0 }
 0x118   : > { %837 = vst.msk [vmem:[%s1241_s23 + $0x1c0] sm:$0xff] %vm780_vm3, %v749_v25  ;;  %808 = vst.msk [vmem:[%s1241_s23 + $0xd8] sm:$0xff] %vm780_vm3, %v1043_v26  ;;  %v1075_v27 = vpop.f32.mrb[26].mxu1  ;;  %v624_v28 = vpop.f32.mrb[27].mxu0 }
 0x119   : > { %840 = vst.msk [vmem:[%s1241_s23 + $0x1d8] sm:$0xff] %vm780_vm3, %v1075_v27  ;;  %806 = vst.msk [vmem:[%s1241_s23 + $0xc8] sm:$0xff] %vm780_vm3, %v624_v28  ;;  %v752_v29 = vpop.f32.mrb[27].mxu1 }
 0x11a   : > { %838 = vst.msk [vmem:[%s1241_s23 + $0x1c8] sm:$0xff] %vm780_vm3, %v752_v29 }
 0x11d   : > { %v1046_v30 = vpop.f32.mrb[28].mxu0 }
 0x11e   : > { %811 = vst.msk [vmem:[%s1241_s23 + $0xf0] sm:$0xff] %vm780_vm3, %v1046_v30  ;;  %v1078_v31 = vpop.f32.mrb[28].mxu1  ;;  %v637_v32 = vpop.f32.mrb[29].mxu0 }
 0x11f   : > { %843 = vst.msk [vmem:[%s1241_s23 + $0x1f0] sm:$0xff] %vm780_vm3, %v1078_v31  ;;  %809 = vst.msk [vmem:[%s1241_s23 + $0xe0] sm:$0xff] %vm780_vm3, %v637_v32  ;;  %v765_v33 = vpop.f32.mrb[29].mxu1  ;;  %v1047_v34 = vpop.f32.mrb[30].mxu0 }
 0x120   : > { %841 = vst.msk [vmem:[%s1241_s23 + $0x1e0] sm:$0xff] %vm780_vm3, %v765_v33  ;;  %812 = vst.msk [vmem:[%s1241_s23 + $0xf8] sm:$0xff] %vm780_vm3, %v1047_v34  ;;  %v1079_v35 = vpop.f32.mrb[30].mxu1  ;;  %v640_v36 = vpop.f32.mrb[31].mxu0 }
 0x121   : > { %844 = vst.msk [vmem:[%s1241_s23 + $0x1f8] sm:$0xff] %vm780_vm3, %v1079_v35  ;;  %810 = vst.msk [vmem:[%s1241_s23 + $0xe8] sm:$0xff] %vm780_vm3, %v640_v36  ;;  %v768_v37 = vpop.f32.mrb[31].mxu1 }
 0x122   : > { %842 = vst.msk [vmem:[%s1241_s23 + $0x1e8] sm:$0xff] %vm780_vm3, %v768_v37 }
 0x123 PF: > { %s12_s9 = sadd.s32 1, %s1133_s9  }
 0x124   : > { %p9_p4 = scmp.ge.s32.totalorder %s12_s9, 6  }
 0x126   :  { %11 = sbr.rel (!%p9_p4) target bundleno = 1 (0x1), region = 58 }

// kernel: _wrn_forward_impl.12
= control target key start
LH: loop header
LB: loop body
LE: loop exit
PB: predicated region body
PF: predicated region fallthrough
CT: control target
= control target key end

     0   :  { %s373_s12 = smov 0   ;;  %s468_s0 = inlined_call_operand.vmem [shape: f32[256,128], index: 0, kind: input, shape index: {}]   ;;  %s469_s1 = inlined_call_operand.vmem [shape: f32[1,128], index: 1, kind: input, shape index: {}]   ;;  %s470_s2 = inlined_call_operand.vmem [shape: f32[1,128], index: 2, kind: input, shape index: {}]   ;;  %s471_s3 = inlined_call_operand.vmem [shape: f32[256,128], index: 3, kind: output, shape index: {}]  }
   0x1 LB: > { %s324_s13 = sadd.s32 4294967295, %s351_s12   ;;  %p328_p0 = scmp.ge.s32.totalorder %s351_s12, 1  ;;  %s351_s12 = sphi %s373_s12, %s13_s12  }
   0x2   : > { %p138_p1 = scmp.lt.s32.totalorder %s351_s12, 3 }
   0x4   : > { %p139_p2 = pnand %p328_p0, %p138_p1 }
   0x5   : > { %s329_s14 = sshll.u32 (!%p139_p2), %s324_s13, 4  ;;  %v384_v0 = vld [vmem:[%s469_s1] ss:$0 sm:$0xff] (!%p139_p2) }
   0x6   : > { %142 = sbr.rel (%p139_p2) target bundleno = 34 (0x22), region = 32  ;;  %p163_p3 = scmp.lt.s32.totalorder (!%p139_p2), %s329_s14, 31  ;;  %v394_v1 = vld [vmem:[%s470_s2] ss:$0 sm:$0xff] (!%p139_p2) }
   0xd   : > { %s473_s14 = smov (!%p163_p3, %s329_s14), 31 }
   0xe   : > { %s330_s15 = sshll.u32 %s473_s14, 3 }
   0xf   : > { %s389_s20 = scalar_lea.vmem %s468_s0, %s330_s15  ;;  %s417_s25 = scalar_lea.vmem %s471_s3, %s330_s15 }
  0x10   : > { %v174_v2 = vld [vmem:[%s389_s20] sm:$0xff]  ;;  %v175_v3 = vld [vmem:[%s389_s20 + $0x8] sm:$0xff]  ;;  %v176_v4 = vld [vmem:[%s389_s20 + $0x10] sm:$0xff] }
  0x11   : > { %v197_v5 = vmul.f32 %v384_v0, %v174_v2  ;;  %v198_v6 = vmul.f32 %v384_v0, %v175_v3  ;;  %v199_v7 = vmul.f32 %v384_v0, %v176_v4  ;;  %v177_v8 = vld [vmem:[%s389_s20 + $0x18] sm:$0xff]  ;;  %v178_v9 = vld [vmem:[%s389_s20 + $0x20] sm:$0xff]  ;;  %v179_v10 = vld [vmem:[%s389_s20 + $0x28] sm:$0xff] }
  0x12   : > { %v200_v11 = vmul.f32 %v384_v0, %v177_v8  ;;  %v201_v12 = vmul.f32 %v384_v0, %v178_v9  ;;  %v202_v13 = vmul.f32 %v384_v0, %v179_v10  ;;  %v180_v14 = vld [vmem:[%s389_s20 + $0x30] sm:$0xff]  ;;  %v181_v15 = vld [vmem:[%s389_s20 + $0x38] sm:$0xff]  ;;  %v182_v24 = vld [vmem:[%s389_s20 + $0x40] sm:$0xff] }
  0x13   : > { %v220_v16 = vadd.f32 %v394_v1, %v197_v5  ;;  %v221_v17 = vadd.f32 %v394_v1, %v198_v6  ;;  %v222_v18 = vadd.f32 %v394_v1, %v199_v7  ;;  %v203_v19 = vmul.f32 %v384_v0, %v180_v14  ;;  %v183_v25 = vld [vmem:[%s389_s20 + $0x48] sm:$0xff]  ;;  %v184_v26 = vld [vmem:[%s389_s20 + $0x50] sm:$0xff]  ;;  %v185_v31 = vld [vmem:[%s389_s20 + $0x58] sm:$0xff] }
  0x14   : > { %v223_v20 = vadd.f32 %v394_v1, %v200_v11  ;;  %v224_v21 = vadd.f32 %v394_v1, %v201_v12  ;;  %v225_v22 = vadd.f32 %v394_v1, %v202_v13  ;;  %v204_v23 = vmul.f32 %v384_v0, %v181_v15  ;;  %v186_v32 = vld [vmem:[%s389_s20 + $0x60] sm:$0xff]  ;;  %v187_v33 = vld [vmem:[%s389_s20 + $0x68] sm:$0xff]  ;;  %v188_v38 = vld [vmem:[%s389_s20 + $0x70] sm:$0xff] }
  0x15   : > { %v236_v27 = vmax.f32 %v220_v16, 0.0  ;;  %v237_v28 = vmax.f32 %v221_v17, 0.0  ;;  %v238_v29 = vmax.f32 %v222_v18, 0.0  ;;  %v226_v30 = vadd.f32 %v394_v1, %v203_v19  ;;  %v189_v43 = vld [vmem:[%s389_s20 + $0x78] sm:$0xff] }
  0x16   : > { %v239_v34 = vmax.f32 %v223_v20, 0.0  ;;  %v240_v35 = vmax.f32 %v224_v21, 0.0  ;;  %v241_v36 = vmax.f32 %v225_v22, 0.0  ;;  %v227_v37 = vadd.f32 %v394_v1, %v204_v23 }
  0x17   : > { %252 = vst [vmem:[%s417_s25] sm:$0xff] %v236_v27  ;;  %253 = vst [vmem:[%s417_s25 + $0x8] sm:$0xff] %v237_v28  ;;  %v242_v39 = vmax.f32 %v226_v30, 0.0  ;;  %v205_v40 = vmul.f32 %v384_v0, %v182_v24  ;;  %v206_v41 = vmul.f32 %v384_v0, %v183_v25  ;;  %v207_v42 = vmul.f32 %v384_v0, %v184_v26 }
  0x18   : > { %254 = vst [vmem:[%s417_s25 + $0x10] sm:$0xff] %v238_v29  ;;  %255 = vst [vmem:[%s417_s25 + $0x18] sm:$0xff] %v239_v34  ;;  %v243_v44 = vmax.f32 %v227_v37, 0.0  ;;  %v208_v45 = vmul.f32 %v384_v0, %v185_v31  ;;  %v209_v46 = vmul.f32 %v384_v0, %v186_v32  ;;  %v210_v47 = vmul.f32 %v384_v0, %v187_v33 }
  0x19   : > { %256 = vst [vmem:[%s417_s25 + $0x20] sm:$0xff] %v240_v35  ;;  %257 = vst [vmem:[%s417_s25 + $0x28] sm:$0xff] %v241_v36  ;;  %v228_v48 = vadd.f32 %v394_v1, %v205_v40  ;;  %v229_v49 = vadd.f32 %v394_v1, %v206_v41  ;;  %v230_v50 = vadd.f32 %v394_v1, %v207_v42 }
  0x1a   : > { %258 = vst [vmem:[%s417_s25 + $0x30] sm:$0xff] %v242_v39  ;;  %v211_v51 = vmul.f32 %v384_v0, %v188_v38  ;;  %259 = vst [vmem:[%s417_s25 + $0x38] sm:$0xff] %v243_v44  ;;  %v231_v52 = vadd.f32 %v394_v1, %v208_v45  ;;  %v232_v53 = vadd.f32 %v394_v1, %v209_v46 }
  0x1b   : > { %v233_v54 = vadd.f32 %v394_v1, %v210_v47  ;;  %v212_v55 = vmul.f32 %v384_v0, %v189_v43  ;;  %v244_v56 = vmax.f32 %v228_v48, 0.0  ;;  %v245_v57 = vmax.f32 %v229_v49, 0.0 }
  0x1c   : > { %v246_v58 = vmax.f32 %v230_v50, 0.0  ;;  %v234_v59 = vadd.f32 %v394_v1, %v211_v51  ;;  %v247_v60 = vmax.f32 %v231_v52, 0.0  ;;  %v248_v61 = vmax.f32 %v232_v53, 0.0 }
  0x1d   : > { %v249_v62 = vmax.f32 %v233_v54, 0.0  ;;  %v235_v63 = vadd.f32 %v394_v1, %v212_v55  ;;  %260 = vst [vmem:[%s417_s25 + $0x40] sm:$0xff] %v244_v56  ;;  %261 = vst [vmem:[%s417_s25 + $0x48] sm:$0xff] %v245_v57 }
  0x1e   : > { %262 = vst [vmem:[%s417_s25 + $0x50] sm:$0xff] %v246_v58  ;;  %v250_v2 = vmax.f32 %v234_v59, 0.0  ;;  %263 = vst [vmem:[%s417_s25 + $0x58] sm:$0xff] %v247_v60 }
  0x1f   : > { %264 = vst [vmem:[%s417_s25 + $0x60] sm:$0xff] %v248_v61  ;;  %265 = vst [vmem:[%s417_s25 + $0x68] sm:$0xff] %v249_v62  ;;  %v251_v0 = vmax.f32 %v235_v63, 0.0 }
  0x20   : > { %266 = vst [vmem:[%s417_s25 + $0x70] sm:$0xff] %v250_v2 }
  0x21   : > { %267 = vst [vmem:[%s417_s25 + $0x78] sm:$0xff] %v251_v0 }
  0x22 PF: > { %s13_s12 = sadd.s32 1, %s351_s12  }
  0x23   : > { %p10_p4 = scmp.ge.s32.totalorder %s13_s12, 4  }
  0x25   :  { %12 = sbr.rel (!%p10_p4) target bundleno = 1 (0x1), region = 62 }

// kernel: _wrn_forward_impl.13
= control target key start
LH: loop header
LB: loop body
LE: loop exit
PB: predicated region body
PF: predicated region fallthrough
CT: control target
= control target key end

     0   :  { %s1628_s15 = smov 0   ;;  %s2045_s0 = inlined_call_operand.vmem [shape: bf16[2048,144], index: 0, kind: input, shape index: {}]   ;;  %s2046_s1 = inlined_call_operand.vmem [shape: bf16[144,32], index: 1, kind: input, shape index: {}]   ;;  %s2047_s2 = inlined_call_operand.vmem [shape: f32[1,32], index: 2, kind: input, shape index: {}]   ;;  %s2048_s3 = inlined_call_operand.vmem [shape: f32[1,32], index: 3, kind: input, shape index: {}]   ;;  %s2049_s4 = inlined_call_operand.vmem [shape: f32[2048,32], index: 4, kind: output, shape index: {}]  }
   0x1 LB: > { %s1342_s16 = sadd.s32 4294967295, %s1600_s15   ;;  %p1346_p0 = scmp.ge.s32.totalorder %s1600_s15, 1  ;;  %s1600_s15 = sphi %s1628_s15, %s14_s15  }
   0x2   : > { %p164_p1 = scmp.lt.s32.totalorder %s1600_s15, 5 }
   0x4   : > { %p165_p2 = pnand %p1346_p0, %p164_p1 }
   0x5   : > { %v1489_v0 = vld [vmem:[%s2046_s1] sm:$0xff] (!%p165_p2)   ;;  %v1602_v1 = vmov (!%p165_p2), 0   ;;  %s1347_s19 = sshll.u32 (!%p165_p2), %s1342_s16, 6  ;;  %v1490_v2 = vld [vmem:[%s2046_s1 + $0x8] sm:$0xff] (!%p165_p2)   ;;  %v1491_v3 = vld [vmem:[%s2046_s1 + $0x10] sm:$0xff] (!%p165_p2)   ;;  %vm629_vm0 = vcmask (!%p165_p2), 130048  }
   0x6   : > { %168 = sbr.rel (%p165_p2) target bundleno = 383 (0x17f), region = 36  ;;  %726 = vmatprep.subr.bf16.mxu0 (!%p165_p2), %v1602_v1  ;;  %1462 = vmatprep.subr.bf16.mxu1 (!%p165_p2), %v1602_v1  ;;  %p192_p3 = scmp.lt.s32.totalorder (!%p165_p2), %s1347_s19, 255  ;;  %v1492_v4 = vld [vmem:[%s2046_s1 + $0x18] sm:$0xff] (!%p165_p2)   ;;  %v1493_v7 = vld [vmem:[%s2046_s1 + $0x20] sm:$0xff] (!%p165_p2)   ;;  %v1494_v8 = vld [vmem:[%s2046_s1 + $0x28] sm:$0xff] (!%p165_p2)   ;;  %vm1221_vm1 = vcmask (!%p165_p2), 261120  }
   0x7   : > { %727 = vmatpush1.bf16.msra.mxu0 (!%p165_p2), %v1489_v0  ;;  %1471 = vmatpush1.bf16.msra.mxu1 (!%p165_p2), %v1489_v0  ;;  %v1495_v9 = vld [vmem:[%s2046_s1 + $0x30] sm:$0xff] (!%p165_p2)   ;;  %v1496_v10 = vld [vmem:[%s2046_s1 + $0x38] sm:$0xff] (!%p165_p2)   ;;  %v1497_v11 = vld [vmem:[%s2046_s1 + $0x40] sm:$0xff] (!%p165_p2)  }
   0x8   : > { %728 = vmatprep.subr.bf16.mxu0 (!%p165_p2), %v1602_v1  ;;  %1463 = vmatprep.subr.bf16.mxu1 (!%p165_p2), %v1602_v1 }
   0xb   : > { %729 = vmatpush1.bf16.msra.mxu0 (!%p165_p2), %v1490_v2  ;;  %1472 = vmatpush1.bf16.msra.mxu1 (!%p165_p2), %v1490_v2 }
   0xc   : > { %730 = vmatprep.subr.bf16.mxu0 (!%p165_p2), %v1602_v1  ;;  %1464 = vmatprep.subr.bf16.mxu1 (!%p165_p2), %v1602_v1 }
   0xd   : > { %s2051_s19 = smov (!%p192_p3, %s1347_s19), 255 }
   0xe   : > { %s1461_s24 = sshll.u32 %s2051_s19, 3 }
   0xf   : > { %s1653_s27 = scalar_lea.vmem %s2045_s0, %s1461_s24  ;;  %731 = vmatpush1.bf16.msra.mxu0 %v1491_v3  ;;  %1473 = vmatpush1.bf16.msra.mxu1 %v1491_v3  ;;  %s1790_s22 = scalar_lea.vmem %s2049_s4, %s1461_s24 }
  0x10   : > { %v1500_v5 = vld [vmem:[%s1653_s27 + $0x4] ss:$8 sps:$4 sm:$0xff]   ;;  %732 = vmatprep.subr.bf16.mxu0 %v1602_v1  ;;  %1465 = vmatprep.subr.bf16.mxu1 %v1602_v1  ;;  %v1498_v12 = vld [vmem:[%s1653_s27] ss:$8 sps:$4 sm:$0xff]   ;;  %v1504_v14 = vld [vmem:[%s1653_s27 + $0x14] ss:$8 sps:$4 sm:$0xff]  }
  0x11   : > { %v1503_v6 = vld [vmem:[%s1653_s27 + $0x104] ss:$8 sps:$4 sm:$0xff]   ;;  %1425 = vmatprep.mubr.msk.bf16.mxu0 %vm629_vm0, %v1500_v5  ;;  %v1501_v13 = vld [vmem:[%s1653_s27 + $0x100] ss:$8 sps:$4 sm:$0xff]   ;;  %v1506_v15 = vld [vmem:[%s1653_s27 + $0x114] ss:$8 sps:$4 sm:$0xff]  }
  0x12   : > { %1441 = vmatprep.mubr.msk.bf16.mxu1 %vm629_vm0, %v1503_v6  ;;  %v1508_v16 = vld [vmem:[%s1653_s27 + $0x10] ss:$8 sps:$4 sm:$0xff]   ;;  %v1510_v18 = vld [vmem:[%s1653_s27 + $0x24] ss:$8 sps:$4 sm:$0xff]   ;;  %v1514_v20 = vld [vmem:[%s1653_s27 + $0x20] ss:$8 sps:$4 sm:$0xff]  }
  0x13   : > { %733 = vmatpush1.bf16.msra.mxu0 %v1492_v4  ;;  %1474 = vmatpush1.bf16.msra.mxu1 %v1492_v4  ;;  %v1509_v17 = vld [vmem:[%s1653_s27 + $0x110] ss:$8 sps:$4 sm:$0xff]   ;;  %v1512_v19 = vld [vmem:[%s1653_s27 + $0x124] ss:$8 sps:$4 sm:$0xff]   ;;  %v1515_v21 = vld [vmem:[%s1653_s27 + $0x120] ss:$8 sps:$4 sm:$0xff]  }
  0x14   : > { %734 = vmatprep.subr.bf16.mxu0 %v1602_v1  ;;  %1466 = vmatprep.subr.bf16.mxu1 %v1602_v1  ;;  %v1516_v22 = vld [vmem:[%s1653_s27 + $0x34] ss:$8 sps:$4 sm:$0xff]   ;;  %v1520_v24 = vld [vmem:[%s1653_s27 + $0x30] ss:$8 sps:$4 sm:$0xff]   ;;  %v1522_v26 = vld [vmem:[%s1653_s27 + $0x44] ss:$8 sps:$4 sm:$0xff]  }
  0x15   : > { %v1518_v23 = vld [vmem:[%s1653_s27 + $0x134] ss:$8 sps:$4 sm:$0xff]   ;;  %v1521_v25 = vld [vmem:[%s1653_s27 + $0x130] ss:$8 sps:$4 sm:$0xff]   ;;  %v1524_v27 = vld [vmem:[%s1653_s27 + $0x144] ss:$8 sps:$4 sm:$0xff]  }
  0x16   : > { %v1526_v28 = vld [vmem:[%s1653_s27 + $0x40] ss:$8 sps:$4 sm:$0xff]   ;;  %v1528_v30 = vld [vmem:[%s1653_s27 + $0x54] ss:$8 sps:$4 sm:$0xff]   ;;  %v1532_v32 = vld [vmem:[%s1653_s27 + $0x50] ss:$8 sps:$4 sm:$0xff]  }
  0x17   : > { %735 = vmatpush1.bf16.msra.mxu0 %v1493_v7  ;;  %1475 = vmatpush1.bf16.msra.mxu1 %v1493_v7  ;;  %v1527_v29 = vld [vmem:[%s1653_s27 + $0x140] ss:$8 sps:$4 sm:$0xff]   ;;  %v1530_v31 = vld [vmem:[%s1653_s27 + $0x154] ss:$8 sps:$4 sm:$0xff]   ;;  %v1533_v33 = vld [vmem:[%s1653_s27 + $0x150] ss:$8 sps:$4 sm:$0xff]  }
  0x18   : > { %736 = vmatprep.subr.bf16.mxu0 %v1602_v1  ;;  %1467 = vmatprep.subr.bf16.mxu1 %v1602_v1  ;;  %v1534_v34 = vld [vmem:[%s1653_s27 + $0x64] ss:$8 sps:$4 sm:$0xff]   ;;  %v1538_v36 = vld [vmem:[%s1653_s27 + $0x60] ss:$8 sps:$4 sm:$0xff]   ;;  %v1540_v38 = vld [vmem:[%s1653_s27 + $0x74] ss:$8 sps:$4 sm:$0xff]  }
  0x19   : > { %v1536_v35 = vld [vmem:[%s1653_s27 + $0x164] ss:$8 sps:$4 sm:$0xff]   ;;  %v1539_v37 = vld [vmem:[%s1653_s27 + $0x160] ss:$8 sps:$4 sm:$0xff]   ;;  %v1542_v39 = vld [vmem:[%s1653_s27 + $0x174] ss:$8 sps:$4 sm:$0xff]  }
  0x1a   : > { %v1544_v40 = vld [vmem:[%s1653_s27 + $0x70] ss:$8 sps:$4 sm:$0xff]   ;;  %v1546_v42 = vld [vmem:[%s1653_s27 + $0x84] ss:$8 sps:$4 sm:$0xff]   ;;  %v1550_v44 = vld [vmem:[%s1653_s27 + $0x80] ss:$8 sps:$4 sm:$0xff]  }
  0x1b   : > { %737 = vmatpush1.bf16.msra.mxu0 %v1494_v8  ;;  %1476 = vmatpush1.bf16.msra.mxu1 %v1494_v8  ;;  %v1545_v41 = vld [vmem:[%s1653_s27 + $0x170] ss:$8 sps:$4 sm:$0xff]   ;;  %v1548_v43 = vld [vmem:[%s1653_s27 + $0x184] ss:$8 sps:$4 sm:$0xff]   ;;  %v1551_v45 = vld [vmem:[%s1653_s27 + $0x180] ss:$8 sps:$4 sm:$0xff]  }
  0x1c   : > { %738 = vmatprep.subr.bf16.mxu0 %v1602_v1  ;;  %1468 = vmatprep.subr.bf16.mxu1 %v1602_v1  ;;  %v1552_v46 = vld [vmem:[%s1653_s27 + $0x94] ss:$8 sps:$4 sm:$0xff]   ;;  %v1556_v48 = vld [vmem:[%s1653_s27 + $0x90] ss:$8 sps:$4 sm:$0xff]   ;;  %v1558_v50 = vld [vmem:[%s1653_s27 + $0xa4] ss:$8 sps:$4 sm:$0xff]  }
  0x1d   : > { %v1554_v47 = vld [vmem:[%s1653_s27 + $0x194] ss:$8 sps:$4 sm:$0xff]   ;;  %v1557_v49 = vld [vmem:[%s1653_s27 + $0x190] ss:$8 sps:$4 sm:$0xff]   ;;  %v1560_v51 = vld [vmem:[%s1653_s27 + $0x1a4] ss:$8 sps:$4 sm:$0xff]  }
  0x1e   : > { %v1562_v52 = vld [vmem:[%s1653_s27 + $0xa0] ss:$8 sps:$4 sm:$0xff]   ;;  %v1564_v54 = vld [vmem:[%s1653_s27 + $0xb4] ss:$8 sps:$4 sm:$0xff]   ;;  %v1568_v56 = vld [vmem:[%s1653_s27 + $0xb0] ss:$8 sps:$4 sm:$0xff]  }
  0x1f   : > { %739 = vmatpush1.bf16.msra.mxu0 %v1495_v9  ;;  %1477 = vmatpush1.bf16.msra.mxu1 %v1495_v9  ;;  %v1563_v53 = vld [vmem:[%s1653_s27 + $0x1a0] ss:$8 sps:$4 sm:$0xff]   ;;  %v1566_v55 = vld [vmem:[%s1653_s27 + $0x1b4] ss:$8 sps:$4 sm:$0xff]   ;;  %v1569_v57 = vld [vmem:[%s1653_s27 + $0x1b0] ss:$8 sps:$4 sm:$0xff]  }
  0x20   : > { %740 = vmatprep.subr.bf16.mxu0 %v1602_v1  ;;  %1469 = vmatprep.subr.bf16.mxu1 %v1602_v1  ;;  %v1570_v58 = vld [vmem:[%s1653_s27 + $0xc4] ss:$8 sps:$4 sm:$0xff]   ;;  %v1574_v60 = vld [vmem:[%s1653_s27 + $0xc0] ss:$8 sps:$4 sm:$0xff]   ;;  %v1576_v62 = vld [vmem:[%s1653_s27 + $0xd4] ss:$8 sps:$4 sm:$0xff]  }
  0x21   : > { %v1572_v59 = vld [vmem:[%s1653_s27 + $0x1c4] ss:$8 sps:$4 sm:$0xff]   ;;  %v1575_v61 = vld [vmem:[%s1653_s27 + $0x1c0] ss:$8 sps:$4 sm:$0xff]   ;;  %v1578_v63 = vld [vmem:[%s1653_s27 + $0x1d4] ss:$8 sps:$4 sm:$0xff]  }
  0x22   : > { %v1580_v0 = vld [vmem:[%s1653_s27 + $0xd0] ss:$8 sps:$4 sm:$0xff]   ;;  %v1582_v2 = vld [vmem:[%s1653_s27 + $0xe4] ss:$8 sps:$4 sm:$0xff]   ;;  %v1586_v4 = vld [vmem:[%s1653_s27 + $0xe0] ss:$8 sps:$4 sm:$0xff]  }
  0x23   : > { %741 = vmatpush1.bf16.msra.mxu0 %v1496_v10  ;;  %1478 = vmatpush1.bf16.msra.mxu1 %v1496_v10  ;;  %v1584_v3 = vld [vmem:[%s1653_s27 + $0x1e4] ss:$8 sps:$4 sm:$0xff]   ;;  %v1587_v5 = vld [vmem:[%s1653_s27 + $0x1e0] ss:$8 sps:$4 sm:$0xff]   ;;  %v1588_v6 = vld [vmem:[%s1653_s27 + $0xf4] ss:$8 sps:$4 sm:$0xff]  }
  0x24   : > { %742 = vmatprep.subr.bf16.mxu0 %v1602_v1  ;;  %1470 = vmatprep.subr.bf16.mxu1 %v1602_v1  ;;  %v1581_v1 = vld [vmem:[%s1653_s27 + $0x1d0] ss:$8 sps:$4 sm:$0xff]   ;;  %v1590_v7 = vld [vmem:[%s1653_s27 + $0x1f4] ss:$8 sps:$4 sm:$0xff]   ;;  %v1772_v10 = vld [vmem:[%s2047_s2] ss:$0 sm:$0xff] }
  0x25   : > { %v1592_v8 = vld [vmem:[%s1653_s27 + $0xf0] ss:$8 sps:$4 sm:$0xff]  }
  0x26   : > { %v1593_v9 = vld [vmem:[%s1653_s27 + $0x1f0] ss:$8 sps:$4 sm:$0xff]  }
  0x27   : > { %743 = vmatpush1.bf16.msra.mxu0 %v1497_v11  ;;  %1479 = vmatpush1.bf16.msra.mxu1 %v1497_v11 }
  0x2a   : > { %759 = vmatmul.mubr.bf16.vlgmr.msra.gmra.mrb[0].mxu0 %v1498_v12  ;;  %887 = vmatmul.mubr.bf16.vlgmr.msra.gmra.mrb[0].mxu1 %v1501_v13  ;;  %v1777_v12 = vld [vmem:[%s2048_s3] ss:$0 sm:$0xff] }
  0x2b   : > { %1426 = vmatprep.mubr.msk.bf16.mxu0 %vm629_vm0, %v1504_v14  ;;  %1442 = vmatprep.mubr.msk.bf16.mxu1 %vm629_vm0, %v1506_v15 }
  0x32   : > { %767 = vmatmul.mubr.bf16.gmra.mrb[4].mxu0 %v1508_v16  ;;  %895 = vmatmul.mubr.bf16.gmra.mrb[4].mxu1 %v1509_v17 }
  0x33   : > { %1427 = vmatprep.mubr.msk.bf16.mxu0 %vm629_vm0, %v1510_v18  ;;  %1443 = vmatprep.mubr.msk.bf16.mxu1 %vm629_vm0, %v1512_v19 }
  0x3a   : > { %775 = vmatmul.mubr.bf16.gmra.mrb[8].mxu0 %v1514_v20  ;;  %903 = vmatmul.mubr.bf16.gmra.mrb[8].mxu1 %v1515_v21 }
  0x3b   : > { %1428 = vmatprep.mubr.msk.bf16.mxu0 %vm629_vm0, %v1516_v22  ;;  %1444 = vmatprep.mubr.msk.bf16.mxu1 %vm629_vm0, %v1518_v23 }
  0x42   : > { %783 = vmatmul.mubr.bf16.gmra.mrb[12].mxu0 %v1520_v24  ;;  %911 = vmatmul.mubr.bf16.gmra.mrb[12].mxu1 %v1521_v25 }
  0x43   : > { %1429 = vmatprep.mubr.msk.bf16.mxu0 %vm629_vm0, %v1522_v26  ;;  %1445 = vmatprep.mubr.msk.bf16.mxu1 %vm629_vm0, %v1524_v27 }
  0x4a   : > { %791 = vmatmul.mubr.bf16.gmra.mrb[16].mxu0 %v1526_v28  ;;  %919 = vmatmul.mubr.bf16.gmra.mrb[16].mxu1 %v1527_v29 }
  0x4b   : > { %1430 = vmatprep.mubr.msk.bf16.mxu0 %vm629_vm0, %v1528_v30  ;;  %1446 = vmatprep.mubr.msk.bf16.mxu1 %vm629_vm0, %v1530_v31 }
  0x52   : > { %799 = vmatmul.mubr.bf16.gmra.mrb[20].mxu0 %v1532_v32  ;;  %927 = vmatmul.mubr.bf16.gmra.mrb[20].mxu1 %v1533_v33 }
  0x53   : > { %1431 = vmatprep.mubr.msk.bf16.mxu0 %vm629_vm0, %v1534_v34  ;;  %1447 = vmatprep.mubr.msk.bf16.mxu1 %vm629_vm0, %v1536_v35 }
  0x5a   : > { %807 = vmatmul.mubr.bf16.gmra.mrb[24].mxu0 %v1538_v36  ;;  %935 = vmatmul.mubr.bf16.gmra.mrb[24].mxu1 %v1539_v37 }
  0x5b   : > { %1432 = vmatprep.mubr.msk.bf16.mxu0 %vm629_vm0, %v1540_v38  ;;  %1448 = vmatprep.mubr.msk.bf16.mxu1 %vm629_vm0, %v1542_v39 }
  0x62   : > { %815 = vmatmul.mubr.bf16.gmra.mrb[28].mxu0 %v1544_v40  ;;  %943 = vmatmul.mubr.bf16.gmra.mrb[28].mxu1 %v1545_v41 }
  0x63   : > { %1433 = vmatprep.mubr.msk.bf16.mxu0 %vm629_vm0, %v1546_v42  ;;  %1449 = vmatprep.mubr.msk.bf16.mxu1 %vm629_vm0, %v1548_v43 }
  0x6a   : > { %823 = vmatmul.mubr.bf16.gmra.mrb[32].mxu0 %v1550_v44  ;;  %951 = vmatmul.mubr.bf16.gmra.mrb[32].mxu1 %v1551_v45 }
  0x6b   : > { %1434 = vmatprep.mubr.msk.bf16.mxu0 %vm629_vm0, %v1552_v46  ;;  %1450 = vmatprep.mubr.msk.bf16.mxu1 %vm629_vm0, %v1554_v47 }
  0x72   : > { %831 = vmatmul.mubr.bf16.gmra.mrb[36].mxu0 %v1556_v48  ;;  %959 = vmatmul.mubr.bf16.gmra.mrb[36].mxu1 %v1557_v49 }
  0x73   : > { %1435 = vmatprep.mubr.msk.bf16.mxu0 %vm629_vm0, %v1558_v50  ;;  %1451 = vmatprep.mubr.msk.bf16.mxu1 %vm629_vm0, %v1560_v51 }
  0x7a   : > { %839 = vmatmul.mubr.bf16.gmra.mrb[40].mxu0 %v1562_v52  ;;  %967 = vmatmul.mubr.bf16.gmra.mrb[40].mxu1 %v1563_v53 }
  0x7b   : > { %1436 = vmatprep.mubr.msk.bf16.mxu0 %vm629_vm0, %v1564_v54  ;;  %1452 = vmatprep.mubr.msk.bf16.mxu1 %vm629_vm0, %v1566_v55 }
  0x82   : > { %847 = vmatmul.mubr.bf16.gmra.mrb[44].mxu0 %v1568_v56  ;;  %975 = vmatmul.mubr.bf16.gmra.mrb[44].mxu1 %v1569_v57 }
  0x83   : > { %1437 = vmatprep.mubr.msk.bf16.mxu0 %vm629_vm0, %v1570_v58  ;;  %1453 = vmatprep.mubr.msk.bf16.mxu1 %vm629_vm0, %v1572_v59 }
  0x8a   : > { %855 = vmatmul.mubr.bf16.gmra.mrb[48].mxu0 %v1574_v60  ;;  %983 = vmatmul.mubr.bf16.gmra.mrb[48].mxu1 %v1575_v61 }
  0x8b   : > { %1438 = vmatprep.mubr.msk.bf16.mxu0 %vm629_vm0, %v1576_v62  ;;  %1454 = vmatprep.mubr.msk.bf16.mxu1 %vm629_vm0, %v1578_v63 }
  0x92   : > { %863 = vmatmul.mubr.bf16.gmra.mrb[52].mxu0 %v1580_v0  ;;  %991 = vmatmul.mubr.bf16.gmra.mrb[52].mxu1 %v1581_v1 }
  0x93   : > { %1439 = vmatprep.mubr.msk.bf16.mxu0 %vm629_vm0, %v1582_v2  ;;  %1455 = vmatprep.mubr.msk.bf16.mxu1 %vm629_vm0, %v1584_v3 }
  0x9a   : > { %871 = vmatmul.mubr.bf16.gmra.mrb[56].mxu0 %v1586_v4  ;;  %999 = vmatmul.mubr.bf16.gmra.mrb[56].mxu1 %v1587_v5 }
  0x9b   : > { %1440 = vmatprep.mubr.msk.bf16.mxu0 %vm629_vm0, %v1588_v6  ;;  %1456 = vmatprep.mubr.msk.bf16.mxu1 %vm629_vm0, %v1590_v7 }
  0xa2   : > { %879 = vmatmul.mubr.bf16.gmra.mrb[60].mxu0 %v1592_v8  ;;  %1007 = vmatmul.mubr.bf16.gmra.mrb[60].mxu1 %v1593_v9 }
  0xfd   : > { %v760_v11 = vpop.f32.mrb[0].mxu0  ;;  %v888_v13 = vpop.f32.mrb[0].mxu1 }
  0xfe   : > { %v1022_v14 = vmul.f32 %v1772_v10, %v760_v11  ;;  %v1054_v15 = vmul.f32 %v1772_v10, %v888_v13  ;;  %v762_v16 = vpop.f32.mrb[1].mxu0  ;;  %v890_v17 = vpop.f32.mrb[1].mxu1 }
  0xff   : > { %v763_v18 = vpop.f32.mrb[2].mxu0  ;;  %v891_v19 = vpop.f32.mrb[2].mxu1 }
 0x100   : > { %v1093_v20 = vadd.f32 %v1777_v12, %v1022_v14  ;;  %v1125_v21 = vadd.f32 %v1777_v12, %v1054_v15  ;;  %v1023_v22 = vmul.f32 %v1772_v10, %v763_v18  ;;  %v1055_v23 = vmul.f32 %v1772_v10, %v891_v19  ;;  %v765_v24 = vpop.f32.mrb[3].mxu0  ;;  %v893_v25 = vpop.f32.mrb[3].mxu1 }
 0x102   : > { %v1157_v26 = vmax.f32 %v1093_v20, 0.0  ;;  %v1189_v27 = vmax.f32 %v1125_v21, 0.0  ;;  %v1094_v28 = vadd.f32 %v1777_v12, %v1023_v22  ;;  %v1126_v29 = vadd.f32 %v1777_v12, %v1055_v23 }
 0x104   : > { %1222 = vst.msk [vmem:[%s1790_s22] sm:$0xff] %vm1221_vm1, %v1157_v26  ;;  %1254 = vst.msk [vmem:[%s1790_s22 + $0x100] sm:$0xff] %vm1221_vm1, %v1189_v27  ;;  %v1158_v30 = vmax.f32 %v1094_v28, 0.0  ;;  %v1190_v31 = vmax.f32 %v1126_v29, 0.0 }
 0x105   : > { %v768_v32 = vpop.f32.mrb[4].mxu0  ;;  %v896_v33 = vpop.f32.mrb[4].mxu1 }
 0x106   : > { %1223 = vst.msk [vmem:[%s1790_s22 + $0x8] sm:$0xff] %vm1221_vm1, %v1158_v30  ;;  %1255 = vst.msk [vmem:[%s1790_s22 + $0x108] sm:$0xff] %vm1221_vm1, %v1190_v31  ;;  %v1024_v34 = vmul.f32 %v1772_v10, %v768_v32  ;;  %v1056_v35 = vmul.f32 %v1772_v10, %v896_v33  ;;  %v770_v36 = vpop.f32.mrb[5].mxu0  ;;  %v898_v37 = vpop.f32.mrb[5].mxu1 }
 0x107   : > { %v771_v38 = vpop.f32.mrb[6].mxu0  ;;  %v899_v39 = vpop.f32.mrb[6].mxu1 }
 0x108   : > { %v1095_v40 = vadd.f32 %v1777_v12, %v1024_v34  ;;  %v1127_v41 = vadd.f32 %v1777_v12, %v1056_v35  ;;  %v1025_v42 = vmul.f32 %v1772_v10, %v771_v38  ;;  %v1057_v43 = vmul.f32 %v1772_v10, %v899_v39  ;;  %v773_v44 = vpop.f32.mrb[7].mxu0  ;;  %v901_v45 = vpop.f32.mrb[7].mxu1 }
 0x10a   : > { %v1159_v46 = vmax.f32 %v1095_v40, 0.0  ;;  %v1191_v47 = vmax.f32 %v1127_v41, 0.0  ;;  %v1096_v48 = vadd.f32 %v1777_v12, %v1025_v42  ;;  %v1128_v49 = vadd.f32 %v1777_v12, %v1057_v43 }
 0x10c   : > { %1224 = vst.msk [vmem:[%s1790_s22 + $0x10] sm:$0xff] %vm1221_vm1, %v1159_v46  ;;  %1256 = vst.msk [vmem:[%s1790_s22 + $0x110] sm:$0xff] %vm1221_vm1, %v1191_v47  ;;  %v1160_v50 = vmax.f32 %v1096_v48, 0.0  ;;  %v1192_v51 = vmax.f32 %v1128_v49, 0.0 }
 0x10d   : > { %v776_v52 = vpop.f32.mrb[8].mxu0  ;;  %v904_v53 = vpop.f32.mrb[8].mxu1 }
 0x10e   : > { %1225 = vst.msk [vmem:[%s1790_s22 + $0x18] sm:$0xff] %vm1221_vm1, %v1160_v50  ;;  %1257 = vst.msk [vmem:[%s1790_s22 + $0x118] sm:$0xff] %vm1221_vm1, %v1192_v51  ;;  %v1026_v54 = vmul.f32 %v1772_v10, %v776_v52  ;;  %v1058_v55 = vmul.f32 %v1772_v10, %v904_v53  ;;  %v778_v56 = vpop.f32.mrb[9].mxu0  ;;  %v906_v57 = vpop.f32.mrb[9].mxu1 }
 0x10f   : > { %v779_v58 = vpop.f32.mrb[10].mxu0  ;;  %v907_v59 = vpop.f32.mrb[10].mxu1 }
 0x110   : > { %v1097_v60 = vadd.f32 %v1777_v12, %v1026_v54  ;;  %v1129_v61 = vadd.f32 %v1777_v12, %v1058_v55  ;;  %v1027_v62 = vmul.f32 %v1772_v10, %v779_v58  ;;  %v1059_v63 = vmul.f32 %v1772_v10, %v907_v59  ;;  %v781_v0 = vpop.f32.mrb[11].mxu0  ;;  %v909_v1 = vpop.f32.mrb[11].mxu1 }
 0x112   : > { %v1161_v2 = vmax.f32 %v1097_v60, 0.0  ;;  %v1193_v3 = vmax.f32 %v1129_v61, 0.0  ;;  %v1098_v4 = vadd.f32 %v1777_v12, %v1027_v62  ;;  %v1130_v5 = vadd.f32 %v1777_v12, %v1059_v63 }
 0x114   : > { %1226 = vst.msk [vmem:[%s1790_s22 + $0x20] sm:$0xff] %vm1221_vm1, %v1161_v2  ;;  %1258 = vst.msk [vmem:[%s1790_s22 + $0x120] sm:$0xff] %vm1221_vm1, %v1193_v3  ;;  %v1162_v6 = vmax.f32 %v1098_v4, 0.0  ;;  %v1194_v7 = vmax.f32 %v1130_v5, 0.0 }
 0x115   : > { %v784_v8 = vpop.f32.mrb[12].mxu0  ;;  %v912_v9 = vpop.f32.mrb[12].mxu1 }
 0x116   : > { %1227 = vst.msk [vmem:[%s1790_s22 + $0x28] sm:$0xff] %vm1221_vm1, %v1162_v6  ;;  %1259 = vst.msk [vmem:[%s1790_s22 + $0x128] sm:$0xff] %vm1221_vm1, %v1194_v7  ;;  %v1028_v11 = vmul.f32 %v1772_v10, %v784_v8  ;;  %v1060_v13 = vmul.f32 %v1772_v10, %v912_v9  ;;  %v786_v14 = vpop.f32.mrb[13].mxu0  ;;  %v914_v15 = vpop.f32.mrb[13].mxu1 }
 0x117   : > { %v787_v16 = vpop.f32.mrb[14].mxu0  ;;  %v915_v17 = vpop.f32.mrb[14].mxu1 }
 0x118   : > { %v1099_v18 = vadd.f32 %v1777_v12, %v1028_v11  ;;  %v1131_v19 = vadd.f32 %v1777_v12, %v1060_v13  ;;  %v1029_v20 = vmul.f32 %v1772_v10, %v787_v16  ;;  %v1061_v21 = vmul.f32 %v1772_v10, %v915_v17  ;;  %v789_v22 = vpop.f32.mrb[15].mxu0  ;;  %v917_v23 = vpop.f32.mrb[15].mxu1 }
 0x11a   : > { %v1163_v24 = vmax.f32 %v1099_v18, 0.0  ;;  %v1195_v25 = vmax.f32 %v1131_v19, 0.0  ;;  %v1100_v26 = vadd.f32 %v1777_v12, %v1029_v20  ;;  %v1132_v27 = vadd.f32 %v1777_v12, %v1061_v21 }
 0x11c   : > { %1228 = vst.msk [vmem:[%s1790_s22 + $0x30] sm:$0xff] %vm1221_vm1, %v1163_v24  ;;  %1260 = vst.msk [vmem:[%s1790_s22 + $0x130] sm:$0xff] %vm1221_vm1, %v1195_v25  ;;  %v1164_v28 = vmax.f32 %v1100_v26, 0.0  ;;  %v1196_v29 = vmax.f32 %v1132_v27, 0.0 }
 0x11d   : > { %v792_v30 = vpop.f32.mrb[16].mxu0  ;;  %v920_v31 = vpop.f32.mrb[16].mxu1 }
 0x11e   : > { %1229 = vst.msk [vmem:[%s1790_s22 + $0x38] sm:$0xff] %vm1221_vm1, %v1164_v28  ;;  %1261 = vst.msk [vmem:[%s1790_s22 + $0x138] sm:$0xff] %vm1221_vm1, %v1196_v29  ;;  %v1030_v32 = vmul.f32 %v1772_v10, %v792_v30  ;;  %v1062_v33 = vmul.f32 %v1772_v10, %v920_v31  ;;  %v794_v34 = vpop.f32.mrb[17].mxu0  ;;  %v922_v35 = vpop.f32.mrb[17].mxu1 }
 0x11f   : > { %v795_v36 = vpop.f32.mrb[18].mxu0  ;;  %v923_v37 = vpop.f32.mrb[18].mxu1 }
 0x120   : > { %v1101_v38 = vadd.f32 %v1777_v12, %v1030_v32  ;;  %v1133_v39 = vadd.f32 %v1777_v12, %v1062_v33  ;;  %v1031_v40 = vmul.f32 %v1772_v10, %v795_v36  ;;  %v1063_v41 = vmul.f32 %v1772_v10, %v923_v37  ;;  %v797_v42 = vpop.f32.mrb[19].mxu0  ;;  %v925_v43 = vpop.f32.mrb[19].mxu1 }
 0x122   : > { %v1165_v44 = vmax.f32 %v1101_v38, 0.0  ;;  %v1197_v45 = vmax.f32 %v1133_v39, 0.0  ;;  %v1102_v46 = vadd.f32 %v1777_v12, %v1031_v40  ;;  %v1134_v47 = vadd.f32 %v1777_v12, %v1063_v41 }
 0x124   : > { %1230 = vst.msk [vmem:[%s1790_s22 + $0x40] sm:$0xff] %vm1221_vm1, %v1165_v44  ;;  %1262 = vst.msk [vmem:[%s1790_s22 + $0x140] sm:$0xff] %vm1221_vm1, %v1197_v45  ;;  %v1166_v48 = vmax.f32 %v1102_v46, 0.0  ;;  %v1198_v49 = vmax.f32 %v1134_v47, 0.0 }
 0x125   : > { %v800_v50 = vpop.f32.mrb[20].mxu0  ;;  %v928_v51 = vpop.f32.mrb[20].mxu1 }
 0x126   : > { %1231 = vst.msk [vmem:[%s1790_s22 + $0x48] sm:$0xff] %vm1221_vm1, %v1166_v48  ;;  %1263 = vst.msk [vmem:[%s1790_s22 + $0x148] sm:$0xff] %vm1221_vm1, %v1198_v49  ;;  %v1032_v52 = vmul.f32 %v1772_v10, %v800_v50  ;;  %v1064_v53 = vmul.f32 %v1772_v10, %v928_v51  ;;  %v802_v54 = vpop.f32.mrb[21].mxu0  ;;  %v930_v55 = vpop.f32.mrb[21].mxu1 }
 0x127   : > { %v803_v56 = vpop.f32.mrb[22].mxu0  ;;  %v931_v57 = vpop.f32.mrb[22].mxu1 }
 0x128   : > { %v1103_v58 = vadd.f32 %v1777_v12, %v1032_v52  ;;  %v1135_v59 = vadd.f32 %v1777_v12, %v1064_v53  ;;  %v1033_v60 = vmul.f32 %v1772_v10, %v803_v56  ;;  %v1065_v61 = vmul.f32 %v1772_v10, %v931_v57  ;;  %v805_v62 = vpop.f32.mrb[23].mxu0  ;;  %v933_v63 = vpop.f32.mrb[23].mxu1 }
 0x12a   : > { %v1167_v0 = vmax.f32 %v1103_v58, 0.0  ;;  %v1199_v1 = vmax.f32 %v1135_v59, 0.0  ;;  %v1104_v2 = vadd.f32 %v1777_v12, %v1033_v60  ;;  %v1136_v3 = vadd.f32 %v1777_v12, %v1065_v61 }
 0x12c   : > { %1232 = vst.msk [vmem:[%s1790_s22 + $0x50] sm:$0xff] %vm1221_vm1, %v1167_v0  ;;  %1264 = vst.msk [vmem:[%s1790_s22 + $0x150] sm:$0xff] %vm1221_vm1, %v1199_v1  ;;  %v1168_v4 = vmax.f32 %v1104_v2, 0.0  ;;  %v1200_v5 = vmax.f32 %v1136_v3, 0.0 }
 0x12d   : > { %v808_v6 = vpop.f32.mrb[24].mxu0  ;;  %v936_v7 = vpop.f32.mrb[24].mxu1 }
 0x12e   : > { %1233 = vst.msk [vmem:[%s1790_s22 + $0x58] sm:$0xff] %vm1221_vm1, %v1168_v4  ;;  %1265 = vst.msk [vmem:[%s1790_s22 + $0x158] sm:$0xff] %vm1221_vm1, %v1200_v5  ;;  %v1034_v8 = vmul.f32 %v1772_v10, %v808_v6  ;;  %v1066_v9 = vmul.f32 %v1772_v10, %v936_v7  ;;  %v810_v11 = vpop.f32.mrb[25].mxu0  ;;  %v938_v13 = vpop.f32.mrb[25].mxu1 }
 0x12f   : > { %v811_v14 = vpop.f32.mrb[26].mxu0  ;;  %v939_v15 = vpop.f32.mrb[26].mxu1 }
 0x130   : > { %v1105_v16 = vadd.f32 %v1777_v12, %v1034_v8  ;;  %v1137_v17 = vadd.f32 %v1777_v12, %v1066_v9  ;;  %v1035_v18 = vmul.f32 %v1772_v10, %v811_v14  ;;  %v1067_v19 = vmul.f32 %v1772_v10, %v939_v15  ;;  %v813_v20 = vpop.f32.mrb[27].mxu0  ;;  %v941_v21 = vpop.f32.mrb[27].mxu1 }
 0x132   : > { %v1169_v22 = vmax.f32 %v1105_v16, 0.0  ;;  %v1201_v23 = vmax.f32 %v1137_v17, 0.0  ;;  %v1106_v24 = vadd.f32 %v1777_v12, %v1035_v18  ;;  %v1138_v25 = vadd.f32 %v1777_v12, %v1067_v19 }
 0x134   : > { %1234 = vst.msk [vmem:[%s1790_s22 + $0x60] sm:$0xff] %vm1221_vm1, %v1169_v22  ;;  %1266 = vst.msk [vmem:[%s1790_s22 + $0x160] sm:$0xff] %vm1221_vm1, %v1201_v23  ;;  %v1170_v26 = vmax.f32 %v1106_v24, 0.0  ;;  %v1202_v27 = vmax.f32 %v1138_v25, 0.0 }
 0x135   : > { %v816_v28 = vpop.f32.mrb[28].mxu0  ;;  %v944_v29 = vpop.f32.mrb[28].mxu1 }
 0x136   : > { %1235 = vst.msk [vmem:[%s1790_s22 + $0x68] sm:$0xff] %vm1221_vm1, %v1170_v26  ;;  %1267 = vst.msk [vmem:[%s1790_s22 + $0x168] sm:$0xff] %vm1221_vm1, %v1202_v27  ;;  %v1036_v30 = vmul.f32 %v1772_v10, %v816_v28  ;;  %v1068_v31 = vmul.f32 %v1772_v10, %v944_v29  ;;  %v818_v32 = vpop.f32.mrb[29].mxu0  ;;  %v946_v33 = vpop.f32.mrb[29].mxu1 }
 0x137   : > { %v819_v34 = vpop.f32.mrb[30].mxu0  ;;  %v947_v35 = vpop.f32.mrb[30].mxu1 }
 0x138   : > { %v1107_v36 = vadd.f32 %v1777_v12, %v1036_v30  ;;  %v1139_v37 = vadd.f32 %v1777_v12, %v1068_v31  ;;  %v1037_v38 = vmul.f32 %v1772_v10, %v819_v34  ;;  %v1069_v39 = vmul.f32 %v1772_v10, %v947_v35  ;;  %v821_v40 = vpop.f32.mrb[31].mxu0  ;;  %v949_v41 = vpop.f32.mrb[31].mxu1 }
 0x13a   : > { %v1171_v42 = vmax.f32 %v1107_v36, 0.0  ;;  %v1203_v43 = vmax.f32 %v1139_v37, 0.0  ;;  %v1108_v44 = vadd.f32 %v1777_v12, %v1037_v38  ;;  %v1140_v45 = vadd.f32 %v1777_v12, %v1069_v39 }
 0x13c   : > { %1236 = vst.msk [vmem:[%s1790_s22 + $0x70] sm:$0xff] %vm1221_vm1, %v1171_v42  ;;  %1268 = vst.msk [vmem:[%s1790_s22 + $0x170] sm:$0xff] %vm1221_vm1, %v1203_v43  ;;  %v1172_v46 = vmax.f32 %v1108_v44, 0.0  ;;  %v1204_v47 = vmax.f32 %v1140_v45, 0.0 }
 0x13d   : > { %v824_v48 = vpop.f32.mrb[32].mxu0  ;;  %v952_v49 = vpop.f32.mrb[32].mxu1 }
 0x13e   : > { %1237 = vst.msk [vmem:[%s1790_s22 + $0x78] sm:$0xff] %vm1221_vm1, %v1172_v46  ;;  %1269 = vst.msk [vmem:[%s1790_s22 + $0x178] sm:$0xff] %vm1221_vm1, %v1204_v47  ;;  %v1038_v50 = vmul.f32 %v1772_v10, %v824_v48  ;;  %v1070_v51 = vmul.f32 %v1772_v10, %v952_v49  ;;  %v826_v52 = vpop.f32.mrb[33].mxu0  ;;  %v954_v53 = vpop.f32.mrb[33].mxu1 }
 0x13f   : > { %v827_v54 = vpop.f32.mrb[34].mxu0  ;;  %v955_v55 = vpop.f32.mrb[34].mxu1 }
 0x140   : > { %v1109_v56 = vadd.f32 %v1777_v12, %v1038_v50  ;;  %v1141_v57 = vadd.f32 %v1777_v12, %v1070_v51  ;;  %v1039_v58 = vmul.f32 %v1772_v10, %v827_v54  ;;  %v1071_v59 = vmul.f32 %v1772_v10, %v955_v55  ;;  %v829_v60 = vpop.f32.mrb[35].mxu0  ;;  %v957_v61 = vpop.f32.mrb[35].mxu1 }
 0x142   : > { %v1173_v62 = vmax.f32 %v1109_v56, 0.0  ;;  %v1205_v63 = vmax.f32 %v1141_v57, 0.0  ;;  %v1110_v0 = vadd.f32 %v1777_v12, %v1039_v58  ;;  %v1142_v1 = vadd.f32 %v1777_v12, %v1071_v59 }
 0x144   : > { %1238 = vst.msk [vmem:[%s1790_s22 + $0x80] sm:$0xff] %vm1221_vm1, %v1173_v62  ;;  %1270 = vst.msk [vmem:[%s1790_s22 + $0x180] sm:$0xff] %vm1221_vm1, %v1205_v63  ;;  %v1174_v2 = vmax.f32 %v1110_v0, 0.0  ;;  %v1206_v3 = vmax.f32 %v1142_v1, 0.0 }
 0x145   : > { %v832_v4 = vpop.f32.mrb[36].mxu0  ;;  %v960_v5 = vpop.f32.mrb[36].mxu1 }
 0x146   : > { %1239 = vst.msk [vmem:[%s1790_s22 + $0x88] sm:$0xff] %vm1221_vm1, %v1174_v2  ;;  %1271 = vst.msk [vmem:[%s1790_s22 + $0x188] sm:$0xff] %vm1221_vm1, %v1206_v3  ;;  %v1040_v6 = vmul.f32 %v1772_v10, %v832_v4  ;;  %v1072_v7 = vmul.f32 %v1772_v10, %v960_v5  ;;  %v834_v8 = vpop.f32.mrb[37].mxu0  ;;  %v962_v9 = vpop.f32.mrb[37].mxu1 }
 0x147   : > { %v835_v11 = vpop.f32.mrb[38].mxu0  ;;  %v963_v13 = vpop.f32.mrb[38].mxu1 }
 0x148   : > { %v1111_v14 = vadd.f32 %v1777_v12, %v1040_v6  ;;  %v1143_v15 = vadd.f32 %v1777_v12, %v1072_v7  ;;  %v1041_v16 = vmul.f32 %v1772_v10, %v835_v11  ;;  %v1073_v17 = vmul.f32 %v1772_v10, %v963_v13  ;;  %v837_v18 = vpop.f32.mrb[39].mxu0  ;;  %v965_v19 = vpop.f32.mrb[39].mxu1 }
 0x14a   : > { %v1175_v20 = vmax.f32 %v1111_v14, 0.0  ;;  %v1207_v21 = vmax.f32 %v1143_v15, 0.0  ;;  %v1112_v22 = vadd.f32 %v1777_v12, %v1041_v16  ;;  %v1144_v23 = vadd.f32 %v1777_v12, %v1073_v17 }
 0x14c   : > { %1240 = vst.msk [vmem:[%s1790_s22 + $0x90] sm:$0xff] %vm1221_vm1, %v1175_v20  ;;  %1272 = vst.msk [vmem:[%s1790_s22 + $0x190] sm:$0xff] %vm1221_vm1, %v1207_v21  ;;  %v1176_v24 = vmax.f32 %v1112_v22, 0.0  ;;  %v1208_v25 = vmax.f32 %v1144_v23, 0.0 }
 0x14d   : > { %v840_v26 = vpop.f32.mrb[40].mxu0  ;;  %v968_v27 = vpop.f32.mrb[40].mxu1 }
 0x14e   : > { %1241 = vst.msk [vmem:[%s1790_s22 + $0x98] sm:$0xff] %vm1221_vm1, %v1176_v24  ;;  %1273 = vst.msk [vmem:[%s1790_s22 + $0x198] sm:$0xff] %vm1221_vm1, %v1208_v25  ;;  %v1042_v28 = vmul.f32 %v1772_v10, %v840_v26  ;;  %v1074_v29 = vmul.f32 %v1772_v10, %v968_v27  ;;  %v842_v30 = vpop.f32.mrb[41].mxu0  ;;  %v970_v31 = vpop.f32.mrb[41].mxu1 }
 0x14f   : > { %v843_v32 = vpop.f32.mrb[42].mxu0  ;;  %v971_v33 = vpop.f32.mrb[42].mxu1 }
 0x150   : > { %v1113_v34 = vadd.f32 %v1777_v12, %v1042_v28  ;;  %v1145_v35 = vadd.f32 %v1777_v12, %v1074_v29  ;;  %v1043_v36 = vmul.f32 %v1772_v10, %v843_v32  ;;  %v1075_v37 = vmul.f32 %v1772_v10, %v971_v33  ;;  %v845_v38 = vpop.f32.mrb[43].mxu0  ;;  %v973_v39 = vpop.f32.mrb[43].mxu1 }
 0x152   : > { %v1177_v40 = vmax.f32 %v1113_v34, 0.0  ;;  %v1209_v41 = vmax.f32 %v1145_v35, 0.0  ;;  %v1114_v42 = vadd.f32 %v1777_v12, %v1043_v36  ;;  %v1146_v43 = vadd.f32 %v1777_v12, %v1075_v37 }
 0x154   : > { %1242 = vst.msk [vmem:[%s1790_s22 + $0xa0] sm:$0xff] %vm1221_vm1, %v1177_v40  ;;  %1274 = vst.msk [vmem:[%s1790_s22 + $0x1a0] sm:$0xff] %vm1221_vm1, %v1209_v41  ;;  %v1178_v44 = vmax.f32 %v1114_v42, 0.0  ;;  %v1210_v45 = vmax.f32 %v1146_v43, 0.0 }
 0x155   : > { %v848_v46 = vpop.f32.mrb[44].mxu0  ;;  %v976_v47 = vpop.f32.mrb[44].mxu1 }
 0x156   : > { %1243 = vst.msk [vmem:[%s1790_s22 + $0xa8] sm:$0xff] %vm1221_vm1, %v1178_v44  ;;  %1275 = vst.msk [vmem:[%s1790_s22 + $0x1a8] sm:$0xff] %vm1221_vm1, %v1210_v45  ;;  %v1044_v48 = vmul.f32 %v1772_v10, %v848_v46  ;;  %v1076_v49 = vmul.f32 %v1772_v10, %v976_v47  ;;  %v850_v50 = vpop.f32.mrb[45].mxu0  ;;  %v978_v51 = vpop.f32.mrb[45].mxu1 }
 0x157   : > { %v851_v52 = vpop.f32.mrb[46].mxu0  ;;  %v979_v53 = vpop.f32.mrb[46].mxu1 }
 0x158   : > { %v1115_v54 = vadd.f32 %v1777_v12, %v1044_v48  ;;  %v1147_v55 = vadd.f32 %v1777_v12, %v1076_v49  ;;  %v1045_v56 = vmul.f32 %v1772_v10, %v851_v52  ;;  %v1077_v57 = vmul.f32 %v1772_v10, %v979_v53  ;;  %v853_v58 = vpop.f32.mrb[47].mxu0  ;;  %v981_v59 = vpop.f32.mrb[47].mxu1 }
 0x15a   : > { %v1179_v60 = vmax.f32 %v1115_v54, 0.0  ;;  %v1211_v61 = vmax.f32 %v1147_v55, 0.0  ;;  %v1116_v62 = vadd.f32 %v1777_v12, %v1045_v56  ;;  %v1148_v63 = vadd.f32 %v1777_v12, %v1077_v57 }
 0x15c   : > { %1244 = vst.msk [vmem:[%s1790_s22 + $0xb0] sm:$0xff] %vm1221_vm1, %v1179_v60  ;;  %1276 = vst.msk [vmem:[%s1790_s22 + $0x1b0] sm:$0xff] %vm1221_vm1, %v1211_v61  ;;  %v1180_v0 = vmax.f32 %v1116_v62, 0.0  ;;  %v1212_v1 = vmax.f32 %v1148_v63, 0.0 }
 0x15d   : > { %v856_v2 = vpop.f32.mrb[48].mxu0  ;;  %v984_v3 = vpop.f32.mrb[48].mxu1 }
 0x15e   : > { %1245 = vst.msk [vmem:[%s1790_s22 + $0xb8] sm:$0xff] %vm1221_vm1, %v1180_v0  ;;  %1277 = vst.msk [vmem:[%s1790_s22 + $0x1b8] sm:$0xff] %vm1221_vm1, %v1212_v1  ;;  %v1046_v4 = vmul.f32 %v1772_v10, %v856_v2  ;;  %v1078_v5 = vmul.f32 %v1772_v10, %v984_v3  ;;  %v858_v6 = vpop.f32.mrb[49].mxu0  ;;  %v986_v7 = vpop.f32.mrb[49].mxu1 }
 0x15f   : > { %v859_v8 = vpop.f32.mrb[50].mxu0  ;;  %v987_v9 = vpop.f32.mrb[50].mxu1 }
 0x160   : > { %v1117_v11 = vadd.f32 %v1777_v12, %v1046_v4  ;;  %v1149_v13 = vadd.f32 %v1777_v12, %v1078_v5  ;;  %v1047_v14 = vmul.f32 %v1772_v10, %v859_v8  ;;  %v1079_v15 = vmul.f32 %v1772_v10, %v987_v9  ;;  %v861_v16 = vpop.f32.mrb[51].mxu0  ;;  %v989_v17 = vpop.f32.mrb[51].mxu1 }
 0x162   : > { %v1181_v18 = vmax.f32 %v1117_v11, 0.0  ;;  %v1213_v19 = vmax.f32 %v1149_v13, 0.0  ;;  %v1118_v20 = vadd.f32 %v1777_v12, %v1047_v14  ;;  %v1150_v21 = vadd.f32 %v1777_v12, %v1079_v15 }
 0x164   : > { %1246 = vst.msk [vmem:[%s1790_s22 + $0xc0] sm:$0xff] %vm1221_vm1, %v1181_v18  ;;  %1278 = vst.msk [vmem:[%s1790_s22 + $0x1c0] sm:$0xff] %vm1221_vm1, %v1213_v19  ;;  %v1182_v22 = vmax.f32 %v1118_v20, 0.0  ;;  %v1214_v23 = vmax.f32 %v1150_v21, 0.0 }
 0x165   : > { %v864_v24 = vpop.f32.mrb[52].mxu0  ;;  %v992_v25 = vpop.f32.mrb[52].mxu1 }
 0x166   : > { %1247 = vst.msk [vmem:[%s1790_s22 + $0xc8] sm:$0xff] %vm1221_vm1, %v1182_v22  ;;  %1279 = vst.msk [vmem:[%s1790_s22 + $0x1c8] sm:$0xff] %vm1221_vm1, %v1214_v23  ;;  %v1048_v26 = vmul.f32 %v1772_v10, %v864_v24  ;;  %v1080_v27 = vmul.f32 %v1772_v10, %v992_v25  ;;  %v866_v28 = vpop.f32.mrb[53].mxu0  ;;  %v994_v29 = vpop.f32.mrb[53].mxu1 }
 0x167   : > { %v867_v30 = vpop.f32.mrb[54].mxu0  ;;  %v995_v31 = vpop.f32.mrb[54].mxu1 }
 0x168   : > { %v1119_v32 = vadd.f32 %v1777_v12, %v1048_v26  ;;  %v1151_v33 = vadd.f32 %v1777_v12, %v1080_v27  ;;  %v1049_v34 = vmul.f32 %v1772_v10, %v867_v30  ;;  %v1081_v35 = vmul.f32 %v1772_v10, %v995_v31  ;;  %v869_v36 = vpop.f32.mrb[55].mxu0  ;;  %v997_v37 = vpop.f32.mrb[55].mxu1 }
 0x16a   : > { %v1183_v38 = vmax.f32 %v1119_v32, 0.0  ;;  %v1215_v39 = vmax.f32 %v1151_v33, 0.0  ;;  %v1120_v40 = vadd.f32 %v1777_v12, %v1049_v34  ;;  %v1152_v41 = vadd.f32 %v1777_v12, %v1081_v35 }
 0x16c   : > { %1248 = vst.msk [vmem:[%s1790_s22 + $0xd0] sm:$0xff] %vm1221_vm1, %v1183_v38  ;;  %1280 = vst.msk [vmem:[%s1790_s22 + $0x1d0] sm:$0xff] %vm1221_vm1, %v1215_v39  ;;  %v1184_v42 = vmax.f32 %v1120_v40, 0.0  ;;  %v1216_v43 = vmax.f32 %v1152_v41, 0.0 }
 0x16d   : > { %v872_v44 = vpop.f32.mrb[56].mxu0  ;;  %v1000_v45 = vpop.f32.mrb[56].mxu1 }
 0x16e   : > { %1249 = vst.msk [vmem:[%s1790_s22 + $0xd8] sm:$0xff] %vm1221_vm1, %v1184_v42  ;;  %1281 = vst.msk [vmem:[%s1790_s22 + $0x1d8] sm:$0xff] %vm1221_vm1, %v1216_v43  ;;  %v1050_v46 = vmul.f32 %v1772_v10, %v872_v44  ;;  %v1082_v47 = vmul.f32 %v1772_v10, %v1000_v45  ;;  %v874_v48 = vpop.f32.mrb[57].mxu0  ;;  %v1002_v49 = vpop.f32.mrb[57].mxu1 }
 0x16f   : > { %v875_v50 = vpop.f32.mrb[58].mxu0  ;;  %v1003_v51 = vpop.f32.mrb[58].mxu1 }
 0x170   : > { %v1121_v52 = vadd.f32 %v1777_v12, %v1050_v46  ;;  %v1153_v53 = vadd.f32 %v1777_v12, %v1082_v47  ;;  %v1051_v54 = vmul.f32 %v1772_v10, %v875_v50  ;;  %v1083_v55 = vmul.f32 %v1772_v10, %v1003_v51  ;;  %v877_v56 = vpop.f32.mrb[59].mxu0  ;;  %v1005_v57 = vpop.f32.mrb[59].mxu1 }
 0x172   : > { %v1185_v58 = vmax.f32 %v1121_v52, 0.0  ;;  %v1217_v59 = vmax.f32 %v1153_v53, 0.0  ;;  %v1122_v60 = vadd.f32 %v1777_v12, %v1051_v54  ;;  %v1154_v61 = vadd.f32 %v1777_v12, %v1083_v55 }
 0x174   : > { %1250 = vst.msk [vmem:[%s1790_s22 + $0xe0] sm:$0xff] %vm1221_vm1, %v1185_v58  ;;  %1282 = vst.msk [vmem:[%s1790_s22 + $0x1e0] sm:$0xff] %vm1221_vm1, %v1217_v59  ;;  %v1186_v62 = vmax.f32 %v1122_v60, 0.0  ;;  %v1218_v63 = vmax.f32 %v1154_v61, 0.0 }
 0x175   : > { %v880_v0 = vpop.f32.mrb[60].mxu0  ;;  %v1008_v1 = vpop.f32.mrb[60].mxu1 }
 0x176   : > { %1251 = vst.msk [vmem:[%s1790_s22 + $0xe8] sm:$0xff] %vm1221_vm1, %v1186_v62  ;;  %1283 = vst.msk [vmem:[%s1790_s22 + $0x1e8] sm:$0xff] %vm1221_vm1, %v1218_v63  ;;  %v1052_v2 = vmul.f32 %v1772_v10, %v880_v0  ;;  %v1084_v3 = vmul.f32 %v1772_v10, %v1008_v1  ;;  %v882_v4 = vpop.f32.mrb[61].mxu0  ;;  %v1010_v5 = vpop.f32.mrb[61].mxu1 }
 0x177   : > { %v883_v6 = vpop.f32.mrb[62].mxu0  ;;  %v1011_v7 = vpop.f32.mrb[62].mxu1 }
 0x178   : > { %v1123_v8 = vadd.f32 %v1777_v12, %v1052_v2  ;;  %v1155_v9 = vadd.f32 %v1777_v12, %v1084_v3  ;;  %v1053_v11 = vmul.f32 %v1772_v10, %v883_v6  ;;  %v1085_v13 = vmul.f32 %v1772_v10, %v1011_v7  ;;  %v885_v14 = vpop.f32.mrb[63].mxu0  ;;  %v1013_v15 = vpop.f32.mrb[63].mxu1 }
 0x17a   : > { %v1187_v16 = vmax.f32 %v1123_v8, 0.0  ;;  %v1219_v17 = vmax.f32 %v1155_v9, 0.0  ;;  %v1124_v18 = vadd.f32 %v1777_v12, %v1053_v11  ;;  %v1156_v19 = vadd.f32 %v1777_v12, %v1085_v13 }
 0x17c   : > { %1252 = vst.msk [vmem:[%s1790_s22 + $0xf0] sm:$0xff] %vm1221_vm1, %v1187_v16  ;;  %1284 = vst.msk [vmem:[%s1790_s22 + $0x1f0] sm:$0xff] %vm1221_vm1, %v1219_v17  ;;  %v1188_v20 = vmax.f32 %v1124_v18, 0.0  ;;  %v1220_v21 = vmax.f32 %v1156_v19, 0.0 }
 0x17e   : > { %1253 = vst.msk [vmem:[%s1790_s22 + $0xf8] sm:$0xff] %vm1221_vm1, %v1188_v20  ;;  %1285 = vst.msk [vmem:[%s1790_s22 + $0x1f8] sm:$0xff] %vm1221_vm1, %v1220_v21 }
 0x17f PF: > { %s14_s15 = sadd.s32 1, %s1600_s15  }
 0x180   : > { %p11_p4 = scmp.ge.s32.totalorder %s14_s15, 6  }
 0x182   :  { %13 = sbr.rel (!%p11_p4) target bundleno = 1 (0x1), region = 66 }

// kernel: _wrn_forward_impl.14
= control target key start
LH: loop header
LB: loop body
LE: loop exit
PB: predicated region body
PF: predicated region fallthrough
CT: control target
= control target key end

     0   :  { %s3084_s15 = smov 0   ;;  %s3843_s0 = inlined_call_operand.vmem [shape: bf16[2048,288], index: 0, kind: input, shape index: {}]   ;;  %s3844_s1 = inlined_call_operand.vmem [shape: bf16[288,32], index: 1, kind: input, shape index: {}]   ;;  %s3845_s2 = inlined_call_operand.vmem [shape: bf16[2048,16], index: 2, kind: input, shape index: {}]   ;;  %s3846_s3 = inlined_call_operand.vmem [shape: bf16[16,32], index: 3, kind: input, shape index: {}]   ;;  %s3847_s4 = inlined_call_operand.vmem [shape: f32[2048,32], index: 4, kind: output, shape index: {}]  }
   0x1 LB: > { %s2404_s16 = sadd.s32 4294967295, %s3056_s15   ;;  %p2408_p0 = scmp.ge.s32.totalorder %s3056_s15, 1  ;;  %s3056_s15 = sphi %s3084_s15, %s14_s15  }
   0x2   : > { %p175_p1 = scmp.lt.s32.totalorder %s3056_s15, 5 }
   0x4   : > { %p176_p2 = pnand %p2408_p0, %p175_p1 }
   0x6   : > { %179 = sbr.rel (%p176_p2) target bundleno = 521 (0x209), region = 36 }
   0xd   : > { %v2871_v0 = vld [vmem:[%s3844_s1] sm:$0xff]   ;;  %v3058_v1 = vmov 0   ;;  %s2409_s21 = sshll.u32 %s2404_s16, 6  ;;  %v2873_v3 = vld [vmem:[%s3844_s1 + $0x8] sm:$0xff]   ;;  %v2876_v4 = vld [vmem:[%s3844_s1 + $0x10] sm:$0xff]   ;;  %vm623_vm0 = vcmask 130048  }
   0xe   : > { %2829 = vmatprep.subr.bf16.mxu1 %v3058_v1  ;;  %v2872_v2 = vld [vmem:[%s3846_s3] sm:$0xff]   ;;  %p208_p3 = scmp.lt.s32.totalorder %s2409_s21, 255  ;;  %v2877_v6 = vld [vmem:[%s3844_s1 + $0x18] sm:$0xff]   ;;  %v2881_v12 = vld [vmem:[%s3844_s1 + $0x28] sm:$0xff]   ;;  %vm1597_vm1 = vcmask 261120  }
   0xf   : > { %2845 = vmatpush1.bf16.msra.mxu1 %v2871_v0  ;;  %2695 = vmatprep.subr.bf16.mxu0 %v2872_v2  ;;  %v2880_v9 = vld [vmem:[%s3844_s1 + $0x20] sm:$0xff]   ;;  %v2884_v13 = vld [vmem:[%s3844_s1 + $0x30] sm:$0xff]   ;;  %v2885_v16 = vld [vmem:[%s3844_s1 + $0x38] sm:$0xff]  }
  0x10   : > { %2830 = vmatprep.subr.bf16.mxu1 %v3058_v1  ;;  %2696 = vmatpush3.bf16.msra.mxu0 %v2872_v2  ;;  %s3881_s21 = smov (!%p208_p3, %s2409_s21), 255  ;;  %v2888_v17 = vld [vmem:[%s3844_s1 + $0x40] sm:$0xff]   ;;  %v2889_v21 = vld [vmem:[%s3844_s1 + $0x48] sm:$0xff]   ;;  %v2892_v22 = vld [vmem:[%s3844_s1 + $0x50] sm:$0xff]  }
  0x11   : > { %1694 = vmatprep.subr.bf16.mxu0 %v3058_v1  ;;  %s2412_s24 = sshll.u32 %s3881_s21, 2  ;;  %s2861_s12 = smul.u32 12, %s3881_s21  ;;  %v2893_v25 = vld [vmem:[%s3844_s1 + $0x58] sm:$0xff]   ;;  %v2896_v26 = vld [vmem:[%s3844_s1 + $0x60] sm:$0xff]   ;;  %v2897_v29 = vld [vmem:[%s3844_s1 + $0x68] sm:$0xff]  }
  0x12   : > { %s3113_s29 = scalar_lea.vmem %s3845_s2, %s2412_s24  ;;  %v2900_v30 = vld [vmem:[%s3844_s1 + $0x70] sm:$0xff]   ;;  %v2901_v33 = vld [vmem:[%s3844_s1 + $0x78] sm:$0xff]   ;;  %v3230_v39 = vld [vmem:[%s3844_s1 + $0x80] sm:$0xff]  }
  0x13   : > { %2846 = vmatpush1.bf16.msra.mxu1 %v2873_v3  ;;  %v2874_v5 = vld [vmem:[%s3113_s29] sm:$0xff]   ;;  %v2875_v7 = vld [vmem:[%s3113_s29 + $0x8] sm:$0xff]   ;;  %v2878_v8 = vld [vmem:[%s3113_s29 + $0x10] sm:$0xff]   ;;  %s3158_s18 = scalar_lea.vmem %s3843_s0, %s2861_s12 }
  0x14   : > { %2831 = vmatprep.subr.bf16.mxu1 %v3058_v1  ;;  %2697 = vmatprep.mubr.msk.bf16.mxu0 %vm623_vm0, %v2874_v5  ;;  %v2879_v10 = vld [vmem:[%s3113_s29 + $0x18] sm:$0xff]   ;;  %v2882_v11 = vld [vmem:[%s3113_s29 + $0x20] sm:$0xff]   ;;  %v2883_v14 = vld [vmem:[%s3113_s29 + $0x28] sm:$0xff]  }
  0x15   : > { %2698 = vmatmul.mubr.msk.bf16.vlgmr.msra.gmra.mrb[0].mxu0 %vm623_vm0, %v2875_v7  ;;  %v2886_v15 = vld [vmem:[%s3113_s29 + $0x30] sm:$0xff]   ;;  %v2887_v18 = vld [vmem:[%s3113_s29 + $0x38] sm:$0xff]   ;;  %v2890_v19 = vld [vmem:[%s3113_s29 + $0x40] sm:$0xff]  }
  0x16   : > { %2701 = vmatprep.mubr.msk.bf16.mxu0 %vm623_vm0, %v2878_v8  ;;  %1695 = vmatpush1.bf16.msra.mxu0 %v2871_v0  ;;  %v2904_v20 = vld [vmem:[%s3158_s18 + $0x4c] ss:$12 sps:$4 sm:$0xff]   ;;  %v2894_v24 = vld [vmem:[%s3113_s29 + $0x50] sm:$0xff]   ;;  %v2898_v28 = vld [vmem:[%s3113_s29 + $0x60] sm:$0xff]  }
  0x17   : > { %2847 = vmatpush1.bf16.msra.mxu1 %v2876_v4  ;;  %1696 = vmatprep.subr.bf16.mxu0 %v3058_v1  ;;  %v2891_v23 = vld [vmem:[%s3113_s29 + $0x48] sm:$0xff]   ;;  %v2895_v27 = vld [vmem:[%s3113_s29 + $0x58] sm:$0xff]   ;;  %v2905_v32 = vld [vmem:[%s3113_s29 + $0x70] sm:$0xff]  }
  0x18   : > { %2832 = vmatprep.subr.bf16.mxu1 %v3058_v1  ;;  %1750 = vmatprep.mubr.bf16.mxu1 %v2904_v20  ;;  %v2899_v31 = vld [vmem:[%s3113_s29 + $0x68] sm:$0xff]   ;;  %v2907_v35 = vld [vmem:[%s3158_s18 + $0x64] ss:$12 sps:$4 sm:$0xff]   ;;  %v2906_v36 = vld [vmem:[%s3113_s29 + $0x78] sm:$0xff]  }
  0x19   : > { %v2902_v34 = vld [vmem:[%s3158_s18 + $0x48] ss:$12 sps:$4 sm:$0xff]   ;;  %v2909_v37 = vld [vmem:[%s3113_s29 + $0x80] sm:$0xff]   ;;  %v2916_v45 = vld [vmem:[%s3113_s29 + $0x98] sm:$0xff]  }
  0x1a   : > { %1697 = vmatpush1.bf16.msra.mxu0 %v2873_v3  ;;  %v2910_v38 = vld [vmem:[%s3158_s18 + $0x60] ss:$12 sps:$4 sm:$0xff]   ;;  %v2912_v40 = vld [vmem:[%s3158_s18 + $0x7c] ss:$12 sps:$4 sm:$0xff]   ;;  %v2914_v42 = vld [vmem:[%s3113_s29 + $0x90] sm:$0xff]  }
  0x1b   : > { %2848 = vmatpush1.bf16.msra.mxu1 %v2877_v6  ;;  %1698 = vmatprep.subr.bf16.mxu0 %v3058_v1  ;;  %v2911_v41 = vld [vmem:[%s3113_s29 + $0x88] sm:$0xff]   ;;  %v2915_v43 = vld [vmem:[%s3158_s18 + $0x78] ss:$12 sps:$4 sm:$0xff]   ;;  %v2917_v44 = vld [vmem:[%s3158_s18 + $0x94] ss:$12 sps:$4 sm:$0xff]  }
  0x1c   : > { %2833 = vmatprep.subr.bf16.mxu1 %v3058_v1  ;;  %v2919_v46 = vld [vmem:[%s3113_s29 + $0xa0] sm:$0xff]   ;;  %v2920_v47 = vld [vmem:[%s3158_s18 + $0x90] ss:$12 sps:$4 sm:$0xff]   ;;  %v2922_v48 = vld [vmem:[%s3158_s18 + $0xac] ss:$12 sps:$4 sm:$0xff]  }
  0x1d   : > { %2702 = vmatmul.mubr.msk.bf16.gmra.mrb[4].mxu0 %vm623_vm0, %v2879_v10  ;;  %v2921_v49 = vld [vmem:[%s3113_s29 + $0xa8] sm:$0xff]   ;;  %v2924_v50 = vld [vmem:[%s3113_s29 + $0xb0] sm:$0xff]   ;;  %v2926_v53 = vld [vmem:[%s3113_s29 + $0xb8] sm:$0xff]  }
  0x1e   : > { %2705 = vmatprep.mubr.msk.bf16.mxu0 %vm623_vm0, %v2882_v11  ;;  %1699 = vmatpush1.bf16.msra.mxu0 %v2876_v4  ;;  %v2925_v51 = vld [vmem:[%s3158_s18 + $0xa8] ss:$12 sps:$4 sm:$0xff]   ;;  %v2927_v52 = vld [vmem:[%s3158_s18 + $0xc4] ss:$12 sps:$4 sm:$0xff]   ;;  %v2930_v55 = vld [vmem:[%s3158_s18 + $0xc0] ss:$12 sps:$4 sm:$0xff]  }
  0x1f   : > { %2849 = vmatpush1.bf16.msra.mxu1 %v2880_v9  ;;  %1700 = vmatprep.subr.bf16.mxu0 %v3058_v1  ;;  %v2929_v54 = vld [vmem:[%s3113_s29 + $0xc0] sm:$0xff]   ;;  %v2931_v56 = vld [vmem:[%s3113_s29 + $0xc8] sm:$0xff]   ;;  %v2934_v58 = vld [vmem:[%s3113_s29 + $0xd0] sm:$0xff]  }
  0x20   : > { %2834 = vmatprep.subr.bf16.mxu1 %v3058_v1  ;;  %v2932_v57 = vld [vmem:[%s3158_s18 + $0xdc] ss:$12 sps:$4 sm:$0xff]   ;;  %v2935_v59 = vld [vmem:[%s3158_s18 + $0xd8] ss:$12 sps:$4 sm:$0xff]   ;;  %v2937_v60 = vld [vmem:[%s3158_s18 + $0xf4] ss:$12 sps:$4 sm:$0xff]  }
  0x21   : > { %v2936_v61 = vld [vmem:[%s3113_s29 + $0xd8] sm:$0xff]   ;;  %v2939_v62 = vld [vmem:[%s3113_s29 + $0xe0] sm:$0xff]   ;;  %v2944_v2 = vld [vmem:[%s3113_s29 + $0xf0] sm:$0xff]  }
  0x22   : > { %1701 = vmatpush1.bf16.msra.mxu0 %v2877_v6  ;;  %v2940_v63 = vld [vmem:[%s3158_s18 + $0xf0] ss:$12 sps:$4 sm:$0xff]   ;;  %v2942_v0 = vld [vmem:[%s3158_s18 + $0x10c] ss:$12 sps:$4 sm:$0xff]   ;;  %v2945_v3 = vld [vmem:[%s3158_s18 + $0x108] ss:$12 sps:$4 sm:$0xff]  }
  0x23   : > { %2850 = vmatpush1.bf16.msra.mxu1 %v2881_v12  ;;  %1702 = vmatprep.subr.bf16.mxu0 %v3058_v1  ;;  %v2947_v4 = vld [vmem:[%s3158_s18 + $0x124] ss:$12 sps:$4 sm:$0xff]   ;;  %v2946_v5 = vld [vmem:[%s3113_s29 + $0xf8] sm:$0xff]   ;;  %v2952_v7 = vld [vmem:[%s3158_s18 + $0x120] ss:$12 sps:$4 sm:$0xff]  }
  0x24   : > { %2835 = vmatprep.subr.bf16.mxu1 %v3058_v1  ;;  %v2951_v6 = vld [vmem:[%s3158_s18 + $0x4] ss:$12 sps:$4 sm:$0xff]   ;;  %v2953_v8 = vld [vmem:[%s3158_s18 + $0x13c] ss:$12 sps:$4 sm:$0xff]  }
  0x25   : > { %2706 = vmatmul.mubr.msk.bf16.gmra.mrb[8].mxu0 %vm623_vm0, %v2883_v14  ;;  %v2955_v10 = vld [vmem:[%s3158_s18 + $0x1c] ss:$12 sps:$4 sm:$0xff]   ;;  %v2959_v14 = vld [vmem:[%s3158_s18 + $0x18] ss:$12 sps:$4 sm:$0xff]  }
  0x26   : > { %2709 = vmatprep.mubr.msk.bf16.mxu0 %vm623_vm0, %v2886_v15  ;;  %1703 = vmatpush1.bf16.msra.mxu0 %v2880_v9  ;;  %v2949_v9 = vld [vmem:[%s3158_s18] ss:$12 sps:$4 sm:$0xff]   ;;  %v2969_v20 = vld [vmem:[%s3158_s18 + $0x168] ss:$12 sps:$4 sm:$0xff]  }
  0x27   : > { %2851 = vmatpush1.bf16.msra.mxu1 %v2884_v13  ;;  %1704 = vmatprep.subr.bf16.mxu0 %v3058_v1  ;;  %v2966_v11 = vld [vmem:[%s3844_s1 + $0x88] sm:$0xff]   ;;  %v2962_v15 = vld [vmem:[%s3158_s18 + $0x34] ss:$12 sps:$4 sm:$0xff]  }
  0x28   : > { %2836 = vmatprep.subr.bf16.mxu1 %v3058_v1 }
  0x2a   : > { %1705 = vmatpush1.bf16.msra.mxu0 %v2881_v12  ;;  %v2957_v12 = vld [vmem:[%s3158_s18 + $0x138] ss:$12 sps:$4 sm:$0xff]  }
  0x2b   : > { %2852 = vmatpush1.bf16.msra.mxu1 %v2885_v16  ;;  %1706 = vmatprep.subr.bf16.mxu0 %v3058_v1 }
  0x2c   : > { %2837 = vmatprep.subr.bf16.mxu1 %v3058_v1 }
  0x2d   : > { %2710 = vmatmul.mubr.msk.bf16.gmra.mrb[12].mxu0 %vm623_vm0, %v2887_v18  ;;  %v2965_v18 = vld [vmem:[%s3158_s18 + $0x30] ss:$12 sps:$4 sm:$0xff]  }
  0x2e   : > { %2713 = vmatprep.mubr.msk.bf16.mxu0 %vm623_vm0, %v2890_v19  ;;  %1707 = vmatpush1.bf16.msra.mxu0 %v2884_v13  ;;  %v2960_v13 = vld [vmem:[%s3158_s18 + $0x154] ss:$12 sps:$4 sm:$0xff]  }
  0x2f   : > { %2853 = vmatpush1.bf16.msra.mxu1 %v2888_v17  ;;  %1708 = vmatprep.subr.bf16.mxu0 %v3058_v1  ;;  %v2970_v19 = vld [vmem:[%s3158_s18 + $0x8] ss:$12 sps:$4 sm:$0xff]  }
  0x30   : > { %2838 = vmatprep.subr.bf16.mxu1 %v3058_v1 }
  0x32   : > { %1709 = vmatpush1.bf16.msra.mxu0 %v2885_v16  ;;  %v2964_v16 = vld [vmem:[%s3158_s18 + $0x150] ss:$12 sps:$4 sm:$0xff]  }
  0x33   : > { %2854 = vmatpush1.bf16.msra.mxu1 %v2889_v21  ;;  %1710 = vmatprep.subr.bf16.mxu0 %v3058_v1 }
  0x34   : > { %2839 = vmatprep.subr.bf16.mxu1 %v3058_v1 }
  0x35   : > { %2714 = vmatmul.mubr.msk.bf16.gmra.mrb[16].mxu0 %vm623_vm0, %v2891_v23  ;;  %v2975_v23 = vld [vmem:[%s3158_s18 + $0x38] ss:$12 sps:$4 sm:$0xff]  }
  0x36   : > { %2717 = vmatprep.mubr.msk.bf16.mxu0 %vm623_vm0, %v2894_v24  ;;  %1711 = vmatpush1.bf16.msra.mxu0 %v2888_v17  ;;  %v2967_v17 = vld [vmem:[%s3158_s18 + $0x16c] ss:$12 sps:$4 sm:$0xff]  }
  0x37   : > { %2855 = vmatpush1.bf16.msra.mxu1 %v2892_v22  ;;  %1712 = vmatprep.subr.bf16.mxu0 %v3058_v1  ;;  %v2974_v24 = vld [vmem:[%s3158_s18 + $0x180] ss:$12 sps:$4 sm:$0xff]  }
  0x38   : > { %2840 = vmatprep.subr.bf16.mxu1 %v3058_v1 }
  0x3a   : > { %1713 = vmatpush1.bf16.msra.mxu0 %v2889_v21  ;;  %v2972_v21 = vld [vmem:[%s3158_s18 + $0x184] ss:$12 sps:$4 sm:$0xff]  }
  0x3b   : > { %2856 = vmatpush1.bf16.msra.mxu1 %v2893_v25  ;;  %1714 = vmatprep.subr.bf16.mxu0 %v3058_v1 }
  0x3c   : > { %2841 = vmatprep.subr.bf16.mxu1 %v3058_v1 }
  0x3d   : > { %2718 = vmatmul.mubr.msk.bf16.gmra.mrb[20].mxu0 %vm623_vm0, %v2895_v27  ;;  %v2980_v27 = vld [vmem:[%s3158_s18 + $0x68] ss:$12 sps:$4 sm:$0xff]  }
  0x3e   : > { %2721 = vmatprep.mubr.msk.bf16.mxu0 %vm623_vm0, %v2898_v28  ;;  %1715 = vmatpush1.bf16.msra.mxu0 %v2892_v22  ;;  %v2971_v22 = vld [vmem:[%s3158_s18 + $0x20] ss:$12 sps:$4 sm:$0xff]   ;;  %v2979_v28 = vld [vmem:[%s3158_s18 + $0x198] ss:$12 sps:$4 sm:$0xff]  }
  0x3f   : > { %2857 = vmatpush1.bf16.msra.mxu1 %v2896_v26  ;;  %1716 = vmatprep.subr.bf16.mxu0 %v3058_v1 }
  0x40   : > { %2842 = vmatprep.subr.bf16.mxu1 %v3058_v1 }
  0x42   : > { %1717 = vmatpush1.bf16.msra.mxu0 %v2893_v25  ;;  %v2977_v25 = vld [vmem:[%s3158_s18 + $0x19c] ss:$12 sps:$4 sm:$0xff]  }
  0x43   : > { %2858 = vmatpush1.bf16.msra.mxu1 %v2897_v29  ;;  %1718 = vmatprep.subr.bf16.mxu0 %v3058_v1 }
  0x44   : > { %2843 = vmatprep.subr.bf16.mxu1 %v3058_v1 }
  0x45   : > { %2722 = vmatmul.mubr.msk.bf16.gmra.mrb[24].mxu0 %vm623_vm0, %v2899_v31  ;;  %v2985_v31 = vld [vmem:[%s3158_s18 + $0x98] ss:$12 sps:$4 sm:$0xff]  }
  0x46   : > { %2725 = vmatprep.mubr.msk.bf16.mxu0 %vm623_vm0, %v2905_v32  ;;  %1719 = vmatpush1.bf16.msra.mxu0 %v2896_v26  ;;  %v2976_v26 = vld [vmem:[%s3158_s18 + $0x50] ss:$12 sps:$4 sm:$0xff]  }
  0x47   : > { %2859 = vmatpush1.bf16.msra.mxu1 %v2900_v30  ;;  %1720 = vmatprep.subr.bf16.mxu0 %v3058_v1  ;;  %v2984_v32 = vld [vmem:[%s3158_s18 + $0x1b0] ss:$12 sps:$4 sm:$0xff]  }
  0x48   : > { %2844 = vmatprep.subr.bf16.mxu1 %v3058_v1 }
  0x4a   : > { %1721 = vmatpush1.bf16.msra.mxu0 %v2897_v29  ;;  %v2982_v29 = vld [vmem:[%s3158_s18 + $0x1b4] ss:$12 sps:$4 sm:$0xff]  }
  0x4b   : > { %2860 = vmatpush1.bf16.msra.mxu1 %v2901_v33  ;;  %1722 = vmatprep.subr.bf16.mxu0 %v3058_v1 }
  0x4d   : > { %2726 = vmatmul.mubr.msk.bf16.gmra.mrb[28].mxu0 %vm623_vm0, %v2906_v36  ;;  %v2989_v36 = vld [vmem:[%s3158_s18 + $0x1c8] ss:$12 sps:$4 sm:$0xff]  }
  0x4e   : > { %1751 = vmatmul.mubr.bf16.vlgmr.msra.gmra.mrb[0].mxu1 %v2902_v34  ;;  %2729 = vmatprep.mubr.msk.bf16.mxu0 %vm623_vm0, %v2909_v37  ;;  %v2986_v34 = vld [vmem:[%s3158_s18 + $0xb0] ss:$12 sps:$4 sm:$0xff]  }
  0x4f   : > { %1758 = vmatprep.mubr.bf16.mxu1 %v2907_v35  ;;  %1723 = vmatpush1.bf16.msra.mxu0 %v2900_v30  ;;  %v2981_v30 = vld [vmem:[%s3158_s18 + $0x80] ss:$12 sps:$4 sm:$0xff]   ;;  %v2990_v35 = vld [vmem:[%s3158_s18 + $0xc8] ss:$12 sps:$4 sm:$0xff]   ;;  %v2992_v37 = vld [vmem:[%s3158_s18 + $0x1e4] ss:$12 sps:$4 sm:$0xff]  }
  0x50   : > { %1724 = vmatprep.subr.bf16.mxu0 %v3058_v1  ;;  %v2941_v1 = vld [vmem:[%s3113_s29 + $0xe8] sm:$0xff]   ;;  %s2414_s29 = sshll.u32 %s3881_s21, 3 }
  0x53   : > { %1725 = vmatpush1.bf16.msra.mxu0 %v2901_v33  ;;  %v2987_v33 = vld [vmem:[%s3158_s18 + $0x1cc] ss:$12 sps:$4 sm:$0xff]  }
  0x54   : > { %2761 = vmatprep.subr.bf16.mxu0 %v3230_v39 }
  0x55   : > { %2730 = vmatmul.mubr.msk.bf16.gmra.mrb[32].mxu0 %vm623_vm0, %v2911_v41  ;;  %v2997_v41 = vld [vmem:[%s3158_s18 + $0x1fc] ss:$12 sps:$4 sm:$0xff]  }
  0x56   : > { %1759 = vmatmul.mubr.bf16.gmra.mrb[4].mxu1 %v2910_v38  ;;  %2733 = vmatprep.mubr.msk.bf16.mxu0 %vm623_vm0, %v2914_v42  ;;  %v2991_v38 = vld [vmem:[%s3158_s18 + $0xe0] ss:$12 sps:$4 sm:$0xff]   ;;  %v2996_v42 = vld [vmem:[%s3158_s18 + $0x110] ss:$12 sps:$4 sm:$0xff]  }
  0x57   : > { %1766 = vmatprep.mubr.bf16.mxu1 %v2912_v40  ;;  %v2994_v40 = vld [vmem:[%s3158_s18 + $0x1e0] ss:$12 sps:$4 sm:$0xff]  }
  0x5d   : > { %2734 = vmatmul.mubr.msk.bf16.gmra.mrb[36].mxu0 %vm623_vm0, %v2916_v45  ;;  %v3002_v45 = vld [vmem:[%s3158_s18 + $0x214] ss:$12 sps:$4 sm:$0xff]  }
  0x5e   : > { %1767 = vmatmul.mubr.bf16.gmra.mrb[8].mxu1 %v2915_v43  ;;  %2737 = vmatprep.mubr.msk.bf16.mxu0 %vm623_vm0, %v2919_v46  ;;  %v3000_v43 = vld [vmem:[%s3158_s18 + $0x128] ss:$12 sps:$4 sm:$0xff]   ;;  %v3001_v46 = vld [vmem:[%s3158_s18 + $0x140] ss:$12 sps:$4 sm:$0xff]  }
  0x5f   : > { %1774 = vmatprep.mubr.bf16.mxu1 %v2917_v44  ;;  %v2999_v44 = vld [vmem:[%s3158_s18 + $0x1f8] ss:$12 sps:$4 sm:$0xff]  }
  0x65   : > { %2738 = vmatmul.mubr.msk.bf16.gmra.mrb[40].mxu0 %vm623_vm0, %v2921_v49  ;;  %v3007_v49 = vld [vmem:[%s3158_s18 + $0x22c] ss:$12 sps:$4 sm:$0xff]  }
  0x66   : > { %1775 = vmatmul.mubr.bf16.gmra.mrb[12].mxu1 %v2920_v47  ;;  %2741 = vmatprep.mubr.msk.bf16.mxu0 %vm623_vm0, %v2924_v50  ;;  %v3005_v47 = vld [vmem:[%s3158_s18 + $0x158] ss:$12 sps:$4 sm:$0xff]   ;;  %v3006_v50 = vld [vmem:[%s3158_s18 + $0x170] ss:$12 sps:$4 sm:$0xff]  }
  0x67   : > { %1782 = vmatprep.mubr.bf16.mxu1 %v2922_v48  ;;  %v3004_v48 = vld [vmem:[%s3158_s18 + $0x210] ss:$12 sps:$4 sm:$0xff]  }
  0x6d   : > { %2742 = vmatmul.mubr.msk.bf16.gmra.mrb[44].mxu0 %vm623_vm0, %v2926_v53 }
  0x6e   : > { %1783 = vmatmul.mubr.bf16.gmra.mrb[16].mxu1 %v2925_v51  ;;  %2745 = vmatprep.mubr.msk.bf16.mxu0 %vm623_vm0, %v2929_v54  ;;  %v3010_v51 = vld [vmem:[%s3158_s18 + $0x188] ss:$12 sps:$4 sm:$0xff]   ;;  %v3012_v54 = vld [vmem:[%s3158_s18 + $0x244] ss:$12 sps:$4 sm:$0xff]  }
  0x6f   : > { %1790 = vmatprep.mubr.bf16.mxu1 %v2927_v52  ;;  %v3009_v52 = vld [vmem:[%s3158_s18 + $0x228] ss:$12 sps:$4 sm:$0xff]  }
  0x75   : > { %2746 = vmatmul.mubr.msk.bf16.gmra.mrb[48].mxu0 %vm623_vm0, %v2931_v56 }
  0x76   : > { %1791 = vmatmul.mubr.bf16.gmra.mrb[20].mxu1 %v2930_v55  ;;  %2749 = vmatprep.mubr.msk.bf16.mxu0 %vm623_vm0, %v2934_v58  ;;  %v3011_v55 = vld [vmem:[%s3158_s18 + $0x1a0] ss:$12 sps:$4 sm:$0xff]   ;;  %v3015_v58 = vld [vmem:[%s3158_s18 + $0x1b8] ss:$12 sps:$4 sm:$0xff]  }
  0x77   : > { %1798 = vmatprep.mubr.bf16.mxu1 %v2932_v57 }
  0x7d   : > { %2750 = vmatmul.mubr.msk.bf16.gmra.mrb[52].mxu0 %vm623_vm0, %v2936_v61 }
  0x7e   : > { %1799 = vmatmul.mubr.bf16.gmra.mrb[24].mxu1 %v2935_v59  ;;  %2753 = vmatprep.mubr.msk.bf16.mxu0 %vm623_vm0, %v2939_v62  ;;  %v3017_v62 = vld [vmem:[%s3158_s18 + $0x25c] ss:$12 sps:$4 sm:$0xff]  }
  0x7f   : > { %1806 = vmatprep.mubr.bf16.mxu1 %v2937_v60  ;;  %v3014_v60 = vld [vmem:[%s3158_s18 + $0x240] ss:$12 sps:$4 sm:$0xff]  }
  0x85   : > { %2754 = vmatmul.mubr.msk.bf16.gmra.mrb[56].mxu0 %vm623_vm0, %v2941_v1 }
  0x86   : > { %1807 = vmatmul.mubr.bf16.gmra.mrb[28].mxu1 %v2940_v63  ;;  %2757 = vmatprep.mubr.msk.bf16.mxu0 %vm623_vm0, %v2944_v2  ;;  %v3016_v63 = vld [vmem:[%s3158_s18 + $0x1d0] ss:$12 sps:$4 sm:$0xff]   ;;  %v3020_v2 = vld [vmem:[%s3158_s18 + $0x1e8] ss:$12 sps:$4 sm:$0xff]  }
  0x87   : > { %1814 = vmatprep.mubr.bf16.mxu1 %v2942_v0 }
  0x8d   : > { %2758 = vmatmul.mubr.msk.bf16.gmra.mrb[60].mxu0 %vm623_vm0, %v2946_v5 }
  0x8e   : > { %1815 = vmatmul.mubr.bf16.gmra.mrb[32].mxu1 %v2945_v3  ;;  %1726 = vmatprep.mubr.bf16.mxu0 %v2951_v6  ;;  %v3022_v6 = vld [vmem:[%s3158_s18 + $0x274] ss:$12 sps:$4 sm:$0xff]  }
  0x8f   : > { %1822 = vmatprep.mubr.bf16.mxu1 %v2947_v4  ;;  %v3019_v4 = vld [vmem:[%s3158_s18 + $0x258] ss:$12 sps:$4 sm:$0xff]  }
  0x95   : > { %1727 = vmatmul.mubr.bf16.vlgmr.msra.gmra.mrb[64].mxu0 %v2949_v9 }
  0x96   : > { %1823 = vmatmul.mubr.bf16.gmra.mrb[36].mxu1 %v2952_v7  ;;  %1734 = vmatprep.mubr.bf16.mxu0 %v2955_v10  ;;  %v3021_v7 = vld [vmem:[%s3158_s18 + $0x200] ss:$12 sps:$4 sm:$0xff]   ;;  %v3025_v10 = vld [vmem:[%s3158_s18 + $0x218] ss:$12 sps:$4 sm:$0xff]  }
  0x97   : > { %1830 = vmatprep.mubr.bf16.mxu1 %v2953_v8  ;;  %2762 = vmatpush3.bf16.msra.mxu0 %v3230_v39  ;;  %v2995_v39 = vld [vmem:[%s3158_s18 + $0xf8] ss:$12 sps:$4 sm:$0xff]  }
  0x98   : > { %2763 = vmatprep.subr.bf16.mxu0 %v2966_v11 }
  0x9b   : > { %2764 = vmatpush3.bf16.msra.mxu0 %v2966_v11 }
  0x9d   : > { %1735 = vmatmul.mubr.bf16.gmra.mrb[68].mxu0 %v2959_v14  ;;  %v3027_v14 = vld [vmem:[%s3158_s18 + $0x28c] ss:$12 sps:$4 sm:$0xff]  }
  0x9e   : > { %1831 = vmatmul.mubr.bf16.gmra.mrb[40].mxu1 %v2957_v12  ;;  %1742 = vmatprep.mubr.bf16.mxu0 %v2962_v15  ;;  %v3024_v12 = vld [vmem:[%s3158_s18 + $0x270] ss:$12 sps:$4 sm:$0xff]  }
  0x9f   : > { %1838 = vmatprep.mubr.bf16.mxu1 %v2960_v13  ;;  %v3026_v15 = vld [vmem:[%s3158_s18 + $0x230] ss:$12 sps:$4 sm:$0xff]  }
  0xa5   : > { %1743 = vmatmul.mubr.bf16.gmra.mrb[72].mxu0 %v2965_v18  ;;  %v3030_v18 = vld [vmem:[%s3158_s18 + $0x248] ss:$12 sps:$4 sm:$0xff]  }
  0xa6   : > { %1839 = vmatmul.mubr.bf16.gmra.mrb[44].mxu1 %v2964_v16  ;;  %2765 = vmatprep.mubr.msk.bf16.mxu0 %vm1597_vm1, %v2970_v19 }
  0xa7   : > { %1846 = vmatprep.mubr.bf16.mxu1 %v2967_v17 }
  0xad   : > { %2766 = vmatmul.mubr.msk.bf16.vlgmr.msra.gmra.mrb[76].mxu0 %vm1597_vm1, %v2971_v22  ;;  %v3032_v22 = vld [vmem:[%s3158_s18 + $0x2a4] ss:$12 sps:$4 sm:$0xff]  }
  0xae   : > { %1847 = vmatmul.mubr.bf16.gmra.mrb[48].mxu1 %v2969_v20  ;;  %2769 = vmatprep.mubr.msk.bf16.mxu0 %vm1597_vm1, %v2975_v23  ;;  %v3029_v20 = vld [vmem:[%s3158_s18 + $0x288] ss:$12 sps:$4 sm:$0xff]   ;;  %v3031_v23 = vld [vmem:[%s3158_s18 + $0x260] ss:$12 sps:$4 sm:$0xff]  }
  0xaf   : > { %1854 = vmatprep.mubr.bf16.mxu1 %v2972_v21 }
  0xb5   : > { %2770 = vmatmul.mubr.msk.bf16.gmra.mrb[80].mxu0 %vm1597_vm1, %v2976_v26  ;;  %v3035_v26 = vld [vmem:[%s3158_s18 + $0x278] ss:$12 sps:$4 sm:$0xff]  }
  0xb6   : > { %1855 = vmatmul.mubr.bf16.gmra.mrb[52].mxu1 %v2974_v24  ;;  %2773 = vmatprep.mubr.msk.bf16.mxu0 %vm1597_vm1, %v2980_v27 }
  0xb7   : > { %1862 = vmatprep.mubr.bf16.mxu1 %v2977_v25 }
  0xbd   : > { %2774 = vmatmul.mubr.msk.bf16.gmra.mrb[84].mxu0 %vm1597_vm1, %v2981_v30  ;;  %v3037_v30 = vld [vmem:[%s3158_s18 + $0x2bc] ss:$12 sps:$4 sm:$0xff]  }
  0xbe   : > { %1863 = vmatmul.mubr.bf16.gmra.mrb[56].mxu1 %v2979_v28  ;;  %2777 = vmatprep.mubr.msk.bf16.mxu0 %vm1597_vm1, %v2985_v31  ;;  %v3034_v28 = vld [vmem:[%s3158_s18 + $0x2a0] ss:$12 sps:$4 sm:$0xff]   ;;  %v3036_v31 = vld [vmem:[%s3158_s18 + $0x290] ss:$12 sps:$4 sm:$0xff]  }
  0xbf   : > { %1870 = vmatprep.mubr.bf16.mxu1 %v2982_v29 }
  0xc5   : > { %2778 = vmatmul.mubr.msk.bf16.gmra.mrb[88].mxu0 %vm1597_vm1, %v2986_v34  ;;  %v3040_v34 = vld [vmem:[%s3158_s18 + $0x2a8] ss:$12 sps:$4 sm:$0xff]  }
  0xc6   : > { %1871 = vmatmul.mubr.bf16.gmra.mrb[60].mxu1 %v2984_v32  ;;  %2781 = vmatprep.mubr.msk.bf16.mxu0 %vm1597_vm1, %v2990_v35 }
  0xc7   : > { %1878 = vmatprep.mubr.bf16.mxu1 %v2987_v33 }
  0xcd   : > { %2782 = vmatmul.mubr.msk.bf16.gmra.mrb[92].mxu0 %vm1597_vm1, %v2991_v38  ;;  %v3042_v38 = vld [vmem:[%s3158_s18 + $0x2d4] ss:$12 sps:$4 sm:$0xff]  }
  0xce   : > { %1879 = vmatmul.mubr.bf16.gmra.mrb[64].mxu1 %v2989_v36  ;;  %2785 = vmatprep.mubr.msk.bf16.mxu0 %vm1597_vm1, %v2995_v39  ;;  %v3039_v36 = vld [vmem:[%s3158_s18 + $0x2b8] ss:$12 sps:$4 sm:$0xff]   ;;  %v3041_v39 = vld [vmem:[%s3158_s18 + $0x2c0] ss:$12 sps:$4 sm:$0xff]  }
  0xcf   : > { %1886 = vmatprep.mubr.bf16.mxu1 %v2992_v37 }
  0xd5   : > { %2786 = vmatmul.mubr.msk.bf16.gmra.mrb[96].mxu0 %vm1597_vm1, %v2996_v42  ;;  %v3045_v42 = vld [vmem:[%s3158_s18 + $0x2d8] ss:$12 sps:$4 sm:$0xff]  }
  0xd6   : > { %1887 = vmatmul.mubr.bf16.gmra.mrb[68].mxu1 %v2994_v40  ;;  %2789 = vmatprep.mubr.msk.bf16.mxu0 %vm1597_vm1, %v3000_v43 }
  0xd7   : > { %1894 = vmatprep.mubr.bf16.mxu1 %v2997_v41 }
  0xdd   : > { %2790 = vmatmul.mubr.msk.bf16.gmra.mrb[100].mxu0 %vm1597_vm1, %v3001_v46 }
  0xde   : > { %1895 = vmatmul.mubr.bf16.gmra.mrb[72].mxu1 %v2999_v44  ;;  %2793 = vmatprep.mubr.msk.bf16.mxu0 %vm1597_vm1, %v3005_v47  ;;  %v3044_v47 = vld [vmem:[%s3158_s18 + $0x2d0] ss:$12 sps:$4 sm:$0xff]  }
  0xdf   : > { %1902 = vmatprep.mubr.bf16.mxu1 %v3002_v45 }
  0xe5   : > { %2794 = vmatmul.mubr.msk.bf16.gmra.mrb[104].mxu0 %vm1597_vm1, %v3006_v50  ;;  %v3047_v50 = vld [vmem:[%s3158_s18 + $0x2ec] ss:$12 sps:$4 sm:$0xff]  }
  0xe6   : > { %1903 = vmatmul.mubr.bf16.gmra.mrb[76].mxu1 %v3004_v48  ;;  %2797 = vmatprep.mubr.msk.bf16.mxu0 %vm1597_vm1, %v3010_v51 }
  0xe7   : > { %1910 = vmatprep.mubr.bf16.mxu1 %v3007_v49 }
  0xe8   : > { %v3345_v53 = vpop.f32.mrb[0].mxu0 }
  0xe9   : > { %v3349_v56 = vpop.f32.mrb[1].mxu0 }
  0xea   : > { %v3351_v57 = vpop.f32.mrb[2].mxu0 }
  0xeb   : > { %v3354_v59 = vpop.f32.mrb[3].mxu0 }
  0xed   : > { %2798 = vmatmul.mubr.msk.bf16.gmra.mrb[108].mxu0 %vm1597_vm1, %v3011_v55 }
  0xee   : > { %1911 = vmatmul.mubr.bf16.gmra.mrb[80].mxu1 %v3009_v52  ;;  %2801 = vmatprep.mubr.msk.bf16.mxu0 %vm1597_vm1, %v3015_v58 }
  0xef   : > { %1918 = vmatprep.mubr.bf16.mxu1 %v3012_v54  ;;  %v3046_v54 = vld [vmem:[%s3158_s18 + $0x2f0] ss:$12 sps:$4 sm:$0xff]  }
  0xf0   : > { %v3359_v61 = vpop.f32.mrb[4].mxu0 }
  0xf1   : > { %v3363_v0 = vpop.f32.mrb[5].mxu0 }
  0xf2   : > { %v3365_v1 = vpop.f32.mrb[6].mxu0 }
  0xf3   : > { %v3368_v3 = vpop.f32.mrb[7].mxu0 }
  0xf5   : > { %2802 = vmatmul.mubr.msk.bf16.gmra.mrb[112].mxu0 %vm1597_vm1, %v3016_v63 }
  0xf6   : > { %1919 = vmatmul.mubr.bf16.gmra.mrb[84].mxu1 %v3014_v60  ;;  %2805 = vmatprep.mubr.msk.bf16.mxu0 %vm1597_vm1, %v3020_v2  ;;  %v3049_v2 = vld [vmem:[%s3158_s18 + $0x2e8] ss:$12 sps:$4 sm:$0xff]   ;;  %s3604_s18 = scalar_lea.vmem %s3847_s4, %s2414_s29 }
  0xf7   : > { %1926 = vmatprep.mubr.bf16.mxu1 %v3017_v62 }
  0xf8   : > { %v3373_v5 = vpop.f32.mrb[8].mxu0 }
  0xf9   : > { %v3377_v8 = vpop.f32.mrb[9].mxu0 }
  0xfa   : > { %v3379_v9 = vpop.f32.mrb[10].mxu0 }
  0xfb   : > { %v3382_v11 = vpop.f32.mrb[11].mxu0 }
  0xfd   : > { %2806 = vmatmul.mubr.msk.bf16.gmra.mrb[116].mxu0 %vm1597_vm1, %v3021_v7 }
  0xfe   : > { %1927 = vmatmul.mubr.bf16.gmra.mrb[88].mxu1 %v3019_v4  ;;  %2809 = vmatprep.mubr.msk.bf16.mxu0 %vm1597_vm1, %v3025_v10 }
  0xff   : > { %1934 = vmatprep.mubr.bf16.mxu1 %v3022_v6 }
 0x100   : > { %v3387_v13 = vpop.f32.mrb[12].mxu0 }
 0x101   : > { %v3391_v16 = vpop.f32.mrb[13].mxu0 }
 0x102   : > { %v3393_v17 = vpop.f32.mrb[14].mxu0 }
 0x103   : > { %v3396_v19 = vpop.f32.mrb[15].mxu0 }
 0x105   : > { %2810 = vmatmul.mubr.msk.bf16.gmra.mrb[120].mxu0 %vm1597_vm1, %v3026_v15 }
 0x106   : > { %1935 = vmatmul.mubr.bf16.gmra.mrb[92].mxu1 %v3024_v12  ;;  %2813 = vmatprep.mubr.msk.bf16.mxu0 %vm1597_vm1, %v3030_v18 }
 0x107   : > { %1942 = vmatprep.mubr.bf16.mxu1 %v3027_v14 }
 0x108   : > { %v3401_v21 = vpop.f32.mrb[16].mxu0 }
 0x109   : > { %v3405_v24 = vpop.f32.mrb[17].mxu0 }
 0x10a   : > { %v3407_v25 = vpop.f32.mrb[18].mxu0 }
 0x10b   : > { %v3410_v27 = vpop.f32.mrb[19].mxu0 }
 0x10d   : > { %2814 = vmatmul.mubr.msk.bf16.gmra.mrb[124].mxu0 %vm1597_vm1, %v3031_v23 }
 0x10e   : > { %1943 = vmatmul.mubr.bf16.gmra.mrb[96].mxu1 %v3029_v20  ;;  %2817 = vmatprep.mubr.msk.bf16.mxu0 %vm1597_vm1, %v3035_v26 }
 0x10f   : > { %1950 = vmatprep.mubr.bf16.mxu1 %v3032_v22 }
 0x110   : > { %v3415_v29 = vpop.f32.mrb[20].mxu0 }
 0x111   : > { %v3419_v32 = vpop.f32.mrb[21].mxu0 }
 0x112   : > { %v3421_v33 = vpop.f32.mrb[22].mxu0 }
 0x113   : > { %v3424_v35 = vpop.f32.mrb[23].mxu0 }
 0x115   : > { %2818 = vmatmul.mubr.msk.bf16.gmra.mrb[128].mxu0 %vm1597_vm1, %v3036_v31 }
 0x116   : > { %1951 = vmatmul.mubr.bf16.gmra.mrb[100].mxu1 %v3034_v28  ;;  %2821 = vmatprep.mubr.msk.bf16.mxu0 %vm1597_vm1, %v3040_v34 }
 0x117   : > { %1958 = vmatprep.mubr.bf16.mxu1 %v3037_v30 }
 0x118   : > { %v3429_v37 = vpop.f32.mrb[24].mxu0 }
 0x119   : > { %v3433_v40 = vpop.f32.mrb[25].mxu0 }
 0x11a   : > { %v3435_v41 = vpop.f32.mrb[26].mxu0 }
 0x11b   : > { %v3438_v43 = vpop.f32.mrb[27].mxu0 }
 0x11d   : > { %2822 = vmatmul.mubr.msk.bf16.gmra.mrb[132].mxu0 %vm1597_vm1, %v3041_v39 }
 0x11e   : > { %1959 = vmatmul.mubr.bf16.gmra.mrb[104].mxu1 %v3039_v36  ;;  %2825 = vmatprep.mubr.msk.bf16.mxu0 %vm1597_vm1, %v3045_v42 }
 0x11f   : > { %1966 = vmatprep.mubr.bf16.mxu1 %v3042_v38 }
 0x120   : > { %v3446_v49 = vpop.f32.mrb[28].mxu0 }
 0x121   : > { %v1752_v44 = vpop.f32.mrb[0].mxu1  ;;  %v3453_v55 = vpop.f32.mrb[29].mxu0 }
 0x122   : > { %v3443_v45 = vadd.f32 %v3359_v61, %v1752_v44  ;;  %v1754_v46 = vpop.f32.mrb[1].mxu1  ;;  %v3455_v58 = vpop.f32.mrb[30].mxu0 }
 0x123   : > { %v1755_v48 = vpop.f32.mrb[2].mxu1  ;;  %v3457_v60 = vpop.f32.mrb[31].mxu0 }
 0x124   : > { %v3450_v51 = vadd.f32 %v3365_v1, %v1755_v48  ;;  %v1757_v52 = vpop.f32.mrb[3].mxu1 }
 0x125   : > { %2826 = vmatmul.mubr.msk.bf16.gmra.mrb[136].mxu0 %vm1597_vm1, %v3046_v54 }
 0x126   : > { %1967 = vmatmul.mubr.bf16.gmra.mrb[108].mxu1 %v3044_v47 }
 0x127   : > { %1974 = vmatprep.mubr.bf16.mxu1 %v3047_v50 }
 0x128   : > { %v3464_v4 = vpop.f32.mrb[32].mxu0 }
 0x129   : > { %v1760_v61 = vpop.f32.mrb[4].mxu1  ;;  %v3469_v10 = vpop.f32.mrb[33].mxu0 }
 0x12a   : > { %v3461_v62 = vadd.f32 %v1760_v61, %v3377_v8  ;;  %v1762_v63 = vpop.f32.mrb[5].mxu1  ;;  %v3471_v12 = vpop.f32.mrb[34].mxu0 }
 0x12b   : > { %v1763_v1 = vpop.f32.mrb[6].mxu1  ;;  %v3473_v14 = vpop.f32.mrb[35].mxu0 }
 0x12c   : > { %v3467_v6 = vadd.f32 %v1763_v1, %v3382_v11  ;;  %v1765_v7 = vpop.f32.mrb[7].mxu1 }
 0x12e   : > { %1975 = vmatmul.mubr.bf16.gmra.mrb[112].mxu1 %v3049_v2 }
 0x130   : > { %v3478_v22 = vpop.f32.mrb[36].mxu0 }
 0x131   : > { %v1768_v15 = vpop.f32.mrb[8].mxu1  ;;  %v3483_v26 = vpop.f32.mrb[37].mxu0 }
 0x132   : > { %v3476_v8 = vadd.f32 %v3373_v5, %v1768_v15  ;;  %v1770_v18 = vpop.f32.mrb[9].mxu1  ;;  %v3485_v28 = vpop.f32.mrb[38].mxu0 }
 0x133   : > { %v1771_v20 = vpop.f32.mrb[10].mxu1  ;;  %v3487_v30 = vpop.f32.mrb[39].mxu0 }
 0x134   : > { %v3481_v23 = vadd.f32 %v3379_v9, %v1771_v20  ;;  %v1773_v11 = vpop.f32.mrb[11].mxu1 }
 0x138   : > { %v3492_v38 = vpop.f32.mrb[40].mxu0 }
 0x139   : > { %v1776_v31 = vpop.f32.mrb[12].mxu1  ;;  %v3497_v42 = vpop.f32.mrb[41].mxu0 }
 0x13a   : > { %v3490_v34 = vadd.f32 %v1776_v31, %v3391_v16  ;;  %v1778_v5 = vpop.f32.mrb[13].mxu1  ;;  %v3499_v44 = vpop.f32.mrb[42].mxu0 }
 0x13b   : > { %v1779_v36 = vpop.f32.mrb[14].mxu1  ;;  %v3501_v46 = vpop.f32.mrb[43].mxu0 }
 0x13c   : > { %v3495_v39 = vadd.f32 %v1779_v36, %v3396_v19  ;;  %v1781_v9 = vpop.f32.mrb[15].mxu1 }
 0x140   : > { %v3506_v52 = vpop.f32.mrb[44].mxu0 }
 0x141   : > { %v1784_v47 = vpop.f32.mrb[16].mxu1  ;;  %v3511_v61 = vpop.f32.mrb[45].mxu0 }
 0x142   : > { %v3504_v48 = vadd.f32 %v3387_v13, %v1784_v47  ;;  %v1786_v16 = vpop.f32.mrb[17].mxu1  ;;  %v3513_v63 = vpop.f32.mrb[46].mxu0 }
 0x143   : > { %v1787_v50 = vpop.f32.mrb[18].mxu1  ;;  %v3515_v2 = vpop.f32.mrb[47].mxu0 }
 0x144   : > { %v3509_v54 = vadd.f32 %v3393_v17, %v1787_v50  ;;  %v1789_v19 = vpop.f32.mrb[19].mxu1 }
 0x148   : > { %v3520_v18 = vpop.f32.mrb[48].mxu0 }
 0x149   : > { %v1792_v1 = vpop.f32.mrb[20].mxu1  ;;  %3848 = vst [vmem:[#allocation2_spill] sm:$0xff] %v3520_v18  ;;  %v3525_v11 = vpop.f32.mrb[49].mxu0 }
 0x14a   : > { %v3518_v7 = vadd.f32 %v1792_v1, %v3405_v24  ;;  %v1794_v13 = vpop.f32.mrb[21].mxu1  ;;  %3849 = vst [vmem:[#allocation3_spill] sm:$0xff] %v3525_v11  ;;  %v3527_v31 = vpop.f32.mrb[50].mxu0 }
 0x14b   : > { %v1795_v15 = vpop.f32.mrb[22].mxu1  ;;  %3850 = vst [vmem:[#allocation4_spill] sm:$0xff] %v3527_v31  ;;  %v3529_v5 = vpop.f32.mrb[51].mxu0 }
 0x14c   : > { %v3523_v20 = vadd.f32 %v1795_v15, %v3410_v27  ;;  %v1797_v17 = vpop.f32.mrb[23].mxu1  ;;  %3851 = vst [vmem:[#allocation5_spill] sm:$0xff] %v3529_v5 }
 0x150   : > { %v3534_v16 = vpop.f32.mrb[52].mxu0 }
 0x151   : > { %v1800_v36 = vpop.f32.mrb[24].mxu1  ;;  %3852 = vst [vmem:[#allocation6_spill] sm:$0xff] %v3534_v16  ;;  %v3539_v19 = vpop.f32.mrb[53].mxu0 }
 0x152   : > { %v3532_v9 = vadd.f32 %v3401_v21, %v1800_v36  ;;  %v1802_v24 = vpop.f32.mrb[25].mxu1  ;;  %3853 = vst [vmem:[#allocation7_spill] sm:$0xff] %v3539_v19  ;;  %v3541_v1 = vpop.f32.mrb[54].mxu0 }
 0x153   : > { %v1803_v47 = vpop.f32.mrb[26].mxu1  ;;  %3854 = vst [vmem:[#allocation8_spill] sm:$0xff] %v3541_v1  ;;  %v3543_v13 = vpop.f32.mrb[55].mxu0 }
 0x154   : > { %v3537_v50 = vadd.f32 %v3407_v25, %v1803_v47  ;;  %v1805_v27 = vpop.f32.mrb[27].mxu1  ;;  %3855 = vst [vmem:[#allocation9_spill] sm:$0xff] %v3543_v13 }
 0x158   : > { %v3548_v24 = vpop.f32.mrb[56].mxu0 }
 0x159   : > { %v1808_v15 = vpop.f32.mrb[28].mxu1  ;;  %3856 = vst [vmem:[#allocation10_spill] sm:$0xff] %v3548_v24  ;;  %v3553_v47 = vpop.f32.mrb[57].mxu0 }
 0x15a   : > { %v3546_v17 = vadd.f32 %v1808_v15, %v3419_v32  ;;  %v1810_v21 = vpop.f32.mrb[29].mxu1  ;;  %3857 = vst [vmem:[#allocation11_spill] sm:$0xff] %v3553_v47  ;;  %v3555_v27 = vpop.f32.mrb[58].mxu0 }
 0x15b   : > { %v1811_v36 = vpop.f32.mrb[30].mxu1  ;;  %3858 = vst [vmem:[#allocation12_spill] sm:$0xff] %v3555_v27  ;;  %v3557_v19 = vpop.f32.mrb[59].mxu0 }
 0x15c   : > { %v3551_v16 = vadd.f32 %v1811_v36, %v3424_v35  ;;  %v1813_v25 = vpop.f32.mrb[31].mxu1  ;;  %3859 = vst [vmem:[#allocation13_spill] sm:$0xff] %v3557_v19 }
 0x160   : > { %v3562_v21 = vpop.f32.mrb[60].mxu0 }
 0x161   : > { %v1816_v1 = vpop.f32.mrb[32].mxu1  ;;  %3860 = vst [vmem:[#allocation14_spill] sm:$0xff] %v3562_v21  ;;  %v3567_v36 = vpop.f32.mrb[61].mxu0 }
 0x162   : > { %v3560_v13 = vadd.f32 %v3415_v29, %v1816_v1  ;;  %v1818_v32 = vpop.f32.mrb[33].mxu1  ;;  %3861 = vst [vmem:[#allocation15_spill] sm:$0xff] %v3567_v36  ;;  %v3569_v25 = vpop.f32.mrb[62].mxu0 }
 0x163   : > { %v1819_v15 = vpop.f32.mrb[34].mxu1  ;;  %3862 = vst [vmem:[#allocation16_spill] sm:$0xff] %v3569_v25  ;;  %v3571_v47 = vpop.f32.mrb[63].mxu0 }
 0x164   : > { %v3565_v24 = vadd.f32 %v3421_v33, %v1819_v15  ;;  %v1821_v35 = vpop.f32.mrb[35].mxu1  ;;  %3863 = vst [vmem:[#allocation17_spill] sm:$0xff] %v3571_v47 }
 0x168   : > { %v1728_v1 = vpop.f32.mrb[64].mxu0 }
 0x169   : > { %v1824_v27 = vpop.f32.mrb[36].mxu1  ;;  %v1729_v31 = vadd.f32 %v1728_v1, %v3349_v56  ;;  %v1730_v21 = vpop.f32.mrb[65].mxu0 }
 0x16a   : > { %v3574_v19 = vadd.f32 %v1824_v27, %v3433_v40  ;;  %v1826_v29 = vpop.f32.mrb[37].mxu1  ;;  %v1731_v35 = vpop.f32.mrb[66].mxu0 }
 0x16b   : > { %v1827_v32 = vpop.f32.mrb[38].mxu1  ;;  %v1732_v36 = vadd.f32 %v1731_v35, %v3354_v59  ;;  %v1733_v25 = vpop.f32.mrb[67].mxu0 }
 0x16c   : > { %v3578_v33 = vadd.f32 %v1827_v32, %v3438_v43  ;;  %v1829_v15 = vpop.f32.mrb[39].mxu1 }
 0x170   : > { %v1736_v27 = vpop.f32.mrb[68].mxu0 }
 0x171   : > { %v1832_v18 = vpop.f32.mrb[40].mxu1  ;;  %v1737_v5 = vadd.f32 %v3345_v53, %v1736_v27  ;;  %v1738_v11 = vpop.f32.mrb[69].mxu0 }
 0x172   : > { %v3582_v47 = vadd.f32 %v3429_v37, %v1832_v18  ;;  %v1834_v40 = vpop.f32.mrb[41].mxu1  ;;  %v1739_v21 = vpop.f32.mrb[70].mxu0 }
 0x173   : > { %v1835_v29 = vpop.f32.mrb[42].mxu1  ;;  %v1740_v1 = vadd.f32 %v3351_v57, %v1739_v21  ;;  %v1741_v59 = vpop.f32.mrb[71].mxu0 }
 0x174   : > { %v3586_v56 = vadd.f32 %v3435_v41, %v1835_v29  ;;  %v1837_v43 = vpop.f32.mrb[43].mxu1 }
 0x178   : > { %v1744_v18 = vpop.f32.mrb[72].mxu0 }
 0x179   : > { %v1840_v25 = vpop.f32.mrb[44].mxu1  ;;  %v1745_v35 = vadd.f32 %v1744_v18, %v3363_v0  ;;  %v1746_v53 = vpop.f32.mrb[73].mxu0 }
 0x17a   : > { %v3590_v32 = vadd.f32 %v1840_v25, %v3453_v55  ;;  %v1842_v37 = vpop.f32.mrb[45].mxu1  ;;  %v1747_v40 = vpop.f32.mrb[74].mxu0 }
 0x17b   : > { %v1843_v15 = vpop.f32.mrb[46].mxu1  ;;  %v1748_v27 = vadd.f32 %v1747_v40, %v3368_v3  ;;  %v1749_v29 = vpop.f32.mrb[75].mxu0 }
 0x17c   : > { %v3594_v11 = vadd.f32 %v1843_v15, %v3457_v60  ;;  %v1845_v41 = vpop.f32.mrb[47].mxu1 }
 0x180   : > { %v2767_v0 = vpop.f32.mrb[76].mxu0 }
 0x181   : > { %v1848_v57 = vpop.f32.mrb[48].mxu1  ;;  %v2026_v21 = vadd.f32 %v2767_v0, %v1737_v5  ;;  %v2017_v59 = vpop.f32.mrb[77].mxu0 }
 0x182   : > { %v3599_v43 = vadd.f32 %v3446_v49, %v1848_v57  ;;  %v1850_v55 = vpop.f32.mrb[49].mxu1  ;;  %v2018_v49 = vadd.f32 %v2017_v59, %v1729_v31  ;;  %v2768_v37 = vpop.f32.mrb[78].mxu0 }
 0x183   : > { %v1851_v60 = vpop.f32.mrb[50].mxu1  ;;  %2274 = vst.msk [vmem:[%s3604_s18 + $0x10] sm:$0xff] %vm1597_vm1, %v2026_v21  ;;  %v2029_v18 = vadd.f32 %v2768_v37, %v1740_v1  ;;  %v2020_v15 = vpop.f32.mrb[79].mxu0 }
 0x184   : > { %v3607_v3 = vadd.f32 %v3455_v58, %v1851_v60  ;;  %v1853_v25 = vpop.f32.mrb[51].mxu1  ;;  %2272 = vst.msk [vmem:[%s3604_s18] sm:$0xff] %vm1597_vm1, %v2018_v49  ;;  %v2021_v53 = vadd.f32 %v2020_v15, %v1732_v36 }
 0x185   : > { %2275 = vst.msk [vmem:[%s3604_s18 + $0x18] sm:$0xff] %vm1597_vm1, %v2029_v18 }
 0x186   : > { %2273 = vst.msk [vmem:[%s3604_s18 + $0x8] sm:$0xff] %vm1597_vm1, %v2021_v53 }
 0x188   : > { %v2771_v41 = vpop.f32.mrb[80].mxu0 }
 0x189   : > { %v1856_v5 = vpop.f32.mrb[52].mxu1  ;;  %v2042_v1 = vadd.f32 %v2771_v41, %v3443_v45  ;;  %v2033_v36 = vpop.f32.mrb[81].mxu0 }
 0x18a   : > { %v3618_v58 = vadd.f32 %v1856_v5, %v3469_v10  ;;  %v1858_v31 = vpop.f32.mrb[53].mxu1  ;;  %v2034_v55 = vadd.f32 %v2033_v36, %v1745_v35  ;;  %v2772_v0 = vpop.f32.mrb[82].mxu0 }
 0x18b   : > { %v1859_v40 = vpop.f32.mrb[54].mxu1  ;;  %2278 = vst.msk [vmem:[%s3604_s18 + $0x30] sm:$0xff] %vm1597_vm1, %v2042_v1  ;;  %v2045_v60 = vadd.f32 %v2772_v0, %v3450_v51  ;;  %v2036_v21 = vpop.f32.mrb[83].mxu0 }
 0x18c   : > { %v3622_v29 = vadd.f32 %v1859_v40, %v3473_v14  ;;  %v1861_v57 = vpop.f32.mrb[55].mxu1  ;;  %2276 = vst.msk [vmem:[%s3604_s18 + $0x20] sm:$0xff] %vm1597_vm1, %v2034_v55  ;;  %v2037_v10 = vadd.f32 %v2036_v21, %v1748_v27 }
 0x18d   : > { %2279 = vst.msk [vmem:[%s3604_s18 + $0x38] sm:$0xff] %vm1597_vm1, %v2045_v60 }
 0x18e   : > { %2277 = vst.msk [vmem:[%s3604_s18 + $0x28] sm:$0xff] %vm1597_vm1, %v2037_v10 }
 0x190   : > { %v2775_v59 = vpop.f32.mrb[84].mxu0 }
 0x191   : > { %v1864_v45 = vpop.f32.mrb[56].mxu1  ;;  %v2058_v51 = vadd.f32 %v2775_v59, %v3476_v8  ;;  %v2049_v27 = vpop.f32.mrb[85].mxu0 }
 0x192   : > { %v3634_v14 = vadd.f32 %v3464_v4, %v1864_v45  ;;  %v1866_v35 = vpop.f32.mrb[57].mxu1  ;;  %v2050_v18 = vadd.f32 %v2049_v27, %v3461_v62  ;;  %v2776_v15 = vpop.f32.mrb[86].mxu0 }
 0x193   : > { %v1867_v25 = vpop.f32.mrb[58].mxu1  ;;  %2282 = vst.msk [vmem:[%s3604_s18 + $0x50] sm:$0xff] %vm1597_vm1, %v2058_v51  ;;  %v2061_v53 = vadd.f32 %v2776_v15, %v3481_v23  ;;  %v2052_v4 = vpop.f32.mrb[87].mxu0 }
 0x194   : > { %v3638_v49 = vadd.f32 %v3471_v12, %v1867_v25  ;;  %v1869_v37 = vpop.f32.mrb[59].mxu1  ;;  %2280 = vst.msk [vmem:[%s3604_s18 + $0x40] sm:$0xff] %vm1597_vm1, %v2050_v18  ;;  %v2053_v5 = vadd.f32 %v2052_v4, %v3467_v6 }
 0x195   : > { %2283 = vst.msk [vmem:[%s3604_s18 + $0x58] sm:$0xff] %vm1597_vm1, %v2061_v53 }
 0x196   : > { %2281 = vst.msk [vmem:[%s3604_s18 + $0x48] sm:$0xff] %vm1597_vm1, %v2053_v5 }
 0x198   : > { %v2779_v31 = vpop.f32.mrb[88].mxu0 }
 0x199   : > { %v1872_v12 = vpop.f32.mrb[60].mxu1  ;;  %v2074_v41 = vadd.f32 %v2779_v31, %v3504_v48  ;;  %v2065_v6 = vpop.f32.mrb[89].mxu0 }
 0x19a   : > { %v3652_v62 = vadd.f32 %v1872_v12, %v3483_v26  ;;  %v1874_v8 = vpop.f32.mrb[61].mxu1  ;;  %v2066_v36 = vadd.f32 %v2065_v6, %v3490_v34  ;;  %v2780_v57 = vpop.f32.mrb[90].mxu0 }
 0x19b   : > { %v1875_v23 = vpop.f32.mrb[62].mxu1  ;;  %2286 = vst.msk [vmem:[%s3604_s18 + $0x70] sm:$0xff] %vm1597_vm1, %v2074_v41  ;;  %v2077_v55 = vadd.f32 %v2780_v57, %v3509_v54  ;;  %v2068_v26 = vpop.f32.mrb[91].mxu0 }
 0x19c   : > { %v3656_v40 = vadd.f32 %v1875_v23, %v3487_v30  ;;  %v1877_v1 = vpop.f32.mrb[63].mxu1  ;;  %2284 = vst.msk [vmem:[%s3604_s18 + $0x60] sm:$0xff] %vm1597_vm1, %v2066_v36  ;;  %v2069_v0 = vadd.f32 %v2068_v26, %v3495_v39 }
 0x19d   : > { %2287 = vst.msk [vmem:[%s3604_s18 + $0x78] sm:$0xff] %vm1597_vm1, %v2077_v55 }
 0x19e   : > { %2285 = vst.msk [vmem:[%s3604_s18 + $0x68] sm:$0xff] %vm1597_vm1, %v2069_v0 }
 0x1a0   : > { %v2783_v60 = vpop.f32.mrb[92].mxu0 }
 0x1a1   : > { %v1880_v30 = vpop.f32.mrb[64].mxu1  ;;  %v2090_v21 = vadd.f32 %v2783_v60, %v3532_v9  ;;  %v2081_v39 = vpop.f32.mrb[93].mxu0 }
 0x1a2   : > { %v3670_v34 = vadd.f32 %v3478_v22, %v1880_v30  ;;  %v1882_v48 = vpop.f32.mrb[65].mxu1  ;;  %v2082_v35 = vadd.f32 %v2081_v39, %v3518_v7  ;;  %v2784_v59 = vpop.f32.mrb[94].mxu0 }
 0x1a3   : > { %v1883_v54 = vpop.f32.mrb[66].mxu1  ;;  %2290 = vst.msk [vmem:[%s3604_s18 + $0x90] sm:$0xff] %vm1597_vm1, %v2090_v21  ;;  %v2093_v25 = vadd.f32 %v2784_v59, %v3537_v50  ;;  %v2084_v22 = vpop.f32.mrb[95].mxu0 }
 0x1a4   : > { %v3674_v10 = vadd.f32 %v3485_v28, %v1883_v54  ;;  %v1885_v45 = vpop.f32.mrb[67].mxu1  ;;  %2288 = vst.msk [vmem:[%s3604_s18 + $0x80] sm:$0xff] %vm1597_vm1, %v2082_v35  ;;  %v2085_v51 = vadd.f32 %v2084_v22, %v3523_v20 }
 0x1a5   : > { %2291 = vst.msk [vmem:[%s3604_s18 + $0x98] sm:$0xff] %vm1597_vm1, %v2093_v25 }
 0x1a6   : > { %2289 = vst.msk [vmem:[%s3604_s18 + $0x88] sm:$0xff] %vm1597_vm1, %v2085_v51 }
 0x1a8   : > { %v2787_v27 = vpop.f32.mrb[96].mxu0 }
 0x1a9   : > { %v1888_v28 = vpop.f32.mrb[68].mxu1  ;;  %v2106_v37 = vadd.f32 %v2787_v27, %v3560_v13  ;;  %v2097_v20 = vpop.f32.mrb[97].mxu0 }
 0x1aa   : > { %v3688_v7 = vadd.f32 %v1888_v28, %v3497_v42  ;;  %v1890_v9 = vpop.f32.mrb[69].mxu1  ;;  %v2098_v53 = vadd.f32 %v2097_v20, %v3546_v17  ;;  %v2788_v4 = vpop.f32.mrb[98].mxu0 }
 0x1ab   : > { %v1891_v50 = vpop.f32.mrb[70].mxu1  ;;  %2294 = vst.msk [vmem:[%s3604_s18 + $0xb0] sm:$0xff] %vm1597_vm1, %v2106_v37  ;;  %v2109_v5 = vadd.f32 %v2788_v4, %v3565_v24  ;;  %v2100_v42 = vpop.f32.mrb[99].mxu0  ;;  %v3865_v37 = vld [vmem:[#allocation5_spill] sm:$0xff] }
 0x1ac   : > { %v3692_v18 = vadd.f32 %v1891_v50, %v3501_v46  ;;  %v1893_v15 = vpop.f32.mrb[71].mxu1  ;;  %2292 = vst.msk [vmem:[%s3604_s18 + $0xa0] sm:$0xff] %vm1597_vm1, %v2098_v53  ;;  %v2101_v12 = vadd.f32 %v2100_v42, %v3551_v16 }
 0x1ad   : > { %2295 = vst.msk [vmem:[%s3604_s18 + $0xb8] sm:$0xff] %vm1597_vm1, %v2109_v5 }
 0x1ae   : > { %2293 = vst.msk [vmem:[%s3604_s18 + $0xa8] sm:$0xff] %vm1597_vm1, %v2101_v12 }
 0x1b0   : > { %v2791_v8 = vpop.f32.mrb[100].mxu0 }
 0x1b1   : > { %v1896_v46 = vpop.f32.mrb[72].mxu1  ;;  %v2122_v31 = vadd.f32 %v2791_v8, %v3582_v47  ;;  %v2113_v16 = vpop.f32.mrb[101].mxu0 }
 0x1b2   : > { %v3706_v13 = vadd.f32 %v3492_v38, %v1896_v46  ;;  %v1898_v17 = vpop.f32.mrb[73].mxu1  ;;  %v2114_v6 = vadd.f32 %v2113_v16, %v3574_v19  ;;  %v2792_v1 = vpop.f32.mrb[102].mxu0  ;;  %v3866_v46 = vld [vmem:[#allocation2_spill] sm:$0xff] }
 0x1b3   : > { %v1899_v24 = vpop.f32.mrb[74].mxu1  ;;  %2298 = vst.msk [vmem:[%s3604_s18 + $0xd0] sm:$0xff] %vm1597_vm1, %v2122_v31  ;;  %v2125_v36 = vadd.f32 %v2792_v1, %v3586_v56  ;;  %v2116_v38 = vpop.f32.mrb[103].mxu0  ;;  %v3867_v31 = vld [vmem:[#allocation4_spill] sm:$0xff] }
 0x1b4   : > { %v3710_v23 = vadd.f32 %v3499_v44, %v1899_v24  ;;  %v1901_v41 = vpop.f32.mrb[75].mxu1  ;;  %2296 = vst.msk [vmem:[%s3604_s18 + $0xc0] sm:$0xff] %vm1597_vm1, %v2114_v6  ;;  %v2117_v57 = vadd.f32 %v2116_v38, %v3578_v33 }
 0x1b5   : > { %2299 = vst.msk [vmem:[%s3604_s18 + $0xd8] sm:$0xff] %vm1597_vm1, %v2125_v36 }
 0x1b6   : > { %2297 = vst.msk [vmem:[%s3604_s18 + $0xc8] sm:$0xff] %vm1597_vm1, %v2117_v57 }
 0x1b8   : > { %v2795_v55 = vpop.f32.mrb[104].mxu0 }
 0x1b9   : > { %v1904_v44 = vpop.f32.mrb[76].mxu1  ;;  %v2138_v26 = vadd.f32 %v2795_v55, %v3599_v43  ;;  %v2129_v33 = vpop.f32.mrb[105].mxu0 }
 0x1ba   : > { %v3724_v19 = vadd.f32 %v1904_v44, %v3511_v61  ;;  %v1906_v47 = vpop.f32.mrb[77].mxu1  ;;  %v2130_v48 = vadd.f32 %v2129_v33, %v3590_v32  ;;  %v2796_v60 = vpop.f32.mrb[106].mxu0  ;;  %v3868_v44 = vld [vmem:[#allocation7_spill] sm:$0xff] }
 0x1bb   : > { %v1907_v56 = vpop.f32.mrb[78].mxu1  ;;  %2302 = vst.msk [vmem:[%s3604_s18 + $0xf0] sm:$0xff] %vm1597_vm1, %v2138_v26  ;;  %v2141_v54 = vadd.f32 %v2796_v60, %v3607_v3  ;;  %v2132_v61 = vpop.f32.mrb[107].mxu0  ;;  %v3869_v26 = vld [vmem:[#allocation9_spill] sm:$0xff] }
 0x1bc   : > { %v3728_v0 = vadd.f32 %v1907_v56, %v3515_v2  ;;  %v1909_v30 = vpop.f32.mrb[79].mxu1  ;;  %2300 = vst.msk [vmem:[%s3604_s18 + $0xe0] sm:$0xff] %vm1597_vm1, %v2130_v48  ;;  %v2133_v21 = vadd.f32 %v2132_v61, %v3594_v11 }
 0x1bd   : > { %2303 = vst.msk [vmem:[%s3604_s18 + $0xf8] sm:$0xff] %vm1597_vm1, %v2141_v54 }
 0x1be   : > { %2301 = vst.msk [vmem:[%s3604_s18 + $0xe8] sm:$0xff] %vm1597_vm1, %v2133_v21 }
 0x1c0   : > { %v2799_v39 = vpop.f32.mrb[108].mxu0 }
 0x1c1   : > { %v1912_v2 = vpop.f32.mrb[80].mxu1  ;;  %v2154_v3 = vadd.f32 %v2799_v39, %v3634_v14  ;;  %v2145_v59 = vpop.f32.mrb[109].mxu0  ;;  %v3864_v14 = vld [vmem:[#allocation3_spill] sm:$0xff] }
 0x1c2   : > { %v1913_v32 = vadd.f32 %v3506_v52, %v1912_v2  ;;  %v1914_v43 = vpop.f32.mrb[81].mxu1  ;;  %v2146_v11 = vadd.f32 %v2145_v59, %v3618_v58  ;;  %v2800_v22 = vpop.f32.mrb[110].mxu0 }
 0x1c3   : > { %v1915_v45 = vpop.f32.mrb[82].mxu1  ;;  %2306 = vst.msk [vmem:[%s3604_s18 + $0x110] sm:$0xff] %vm1597_vm1, %v2154_v3  ;;  %v2157_v51 = vadd.f32 %v2800_v22, %v3638_v49  ;;  %v2148_v28 = vpop.f32.mrb[111].mxu0 }
 0x1c4   : > { %v1916_v35 = vadd.f32 %v3513_v63, %v1915_v45  ;;  %v1917_v25 = vpop.f32.mrb[83].mxu1  ;;  %2304 = vst.msk [vmem:[%s3604_s18 + $0x100] sm:$0xff] %vm1597_vm1, %v2146_v11  ;;  %v2149_v52 = vadd.f32 %v2148_v28, %v3622_v29 }
 0x1c5   : > { %2307 = vst.msk [vmem:[%s3604_s18 + $0x118] sm:$0xff] %vm1597_vm1, %v2157_v51 }
 0x1c6   : > { %2305 = vst.msk [vmem:[%s3604_s18 + $0x108] sm:$0xff] %vm1597_vm1, %v2149_v52 }
 0x1c8   : > { %v2803_v27 = vpop.f32.mrb[112].mxu0 }
 0x1c9   : > { %v1920_v63 = vpop.f32.mrb[84].mxu1  ;;  %v2170_v49 = vadd.f32 %v2803_v27, %v3670_v34  ;;  %v2161_v15 = vpop.f32.mrb[113].mxu0 }
 0x1ca   : > { %v1921_v58 = vadd.f32 %v1920_v63, %v3864_v14  ;;  %v1922_v9 = vpop.f32.mrb[85].mxu1  ;;  %v2162_v53 = vadd.f32 %v2161_v15, %v3652_v62  ;;  %v2804_v4 = vpop.f32.mrb[114].mxu0  ;;  %v3872_v14 = vld [vmem:[#allocation11_spill] sm:$0xff] }
 0x1cb   : > { %v1923_v50 = vpop.f32.mrb[86].mxu1  ;;  %2310 = vst.msk [vmem:[%s3604_s18 + $0x130] sm:$0xff] %vm1597_vm1, %v2170_v49  ;;  %v2173_v5 = vadd.f32 %v2804_v4, %v3674_v10  ;;  %v2164_v42 = vpop.f32.mrb[115].mxu0 }
 0x1cc   : > { %v3758_v20 = vadd.f32 %v1923_v50, %v3865_v37  ;;  %v1925_v29 = vpop.f32.mrb[87].mxu1  ;;  %2308 = vst.msk [vmem:[%s3604_s18 + $0x120] sm:$0xff] %vm1597_vm1, %v2162_v53  ;;  %v2165_v12 = vadd.f32 %v2164_v42, %v3656_v40  ;;  %v3873_v37 = vld [vmem:[#allocation13_spill] sm:$0xff] }
 0x1cd   : > { %2311 = vst.msk [vmem:[%s3604_s18 + $0x138] sm:$0xff] %vm1597_vm1, %v2173_v5 }
 0x1ce   : > { %2309 = vst.msk [vmem:[%s3604_s18 + $0x128] sm:$0xff] %vm1597_vm1, %v2165_v12 }
 0x1d0   : > { %v2807_v8 = vpop.f32.mrb[116].mxu0 }
 0x1d1   : > { %v1928_v34 = vpop.f32.mrb[88].mxu1  ;;  %v2186_v10 = vadd.f32 %v2807_v8, %v3706_v13  ;;  %v2177_v41 = vpop.f32.mrb[117].mxu0 }
 0x1d2   : > { %v1929_v62 = vadd.f32 %v3866_v46, %v1928_v34  ;;  %v1930_v17 = vpop.f32.mrb[89].mxu1  ;;  %v2178_v40 = vadd.f32 %v2177_v41, %v3688_v7  ;;  %v2808_v1 = vpop.f32.mrb[118].mxu0  ;;  %v3874_v46 = vld [vmem:[#allocation10_spill] sm:$0xff] }
 0x1d3   : > { %v1931_v24 = vpop.f32.mrb[90].mxu1  ;;  %2314 = vst.msk [vmem:[%s3604_s18 + $0x150] sm:$0xff] %vm1597_vm1, %v2186_v10  ;;  %v2189_v36 = vadd.f32 %v2808_v1, %v3710_v23  ;;  %v2180_v38 = vpop.f32.mrb[119].mxu0 }
 0x1d4   : > { %v1932_v16 = vadd.f32 %v3867_v31, %v1931_v24  ;;  %v1933_v6 = vpop.f32.mrb[91].mxu1  ;;  %2312 = vst.msk [vmem:[%s3604_s18 + $0x140] sm:$0xff] %vm1597_vm1, %v2178_v40  ;;  %v2181_v57 = vadd.f32 %v2180_v38, %v3692_v18  ;;  %v3875_v31 = vld [vmem:[#allocation12_spill] sm:$0xff] }
 0x1d5   : > { %2315 = vst.msk [vmem:[%s3604_s18 + $0x158] sm:$0xff] %vm1597_vm1, %v2189_v36 }
 0x1d6   : > { %2313 = vst.msk [vmem:[%s3604_s18 + $0x148] sm:$0xff] %vm1597_vm1, %v2181_v57 }
 0x1d8   : > { %v2811_v55 = vpop.f32.mrb[120].mxu0 }
 0x1d9   : > { %v1936_v13 = vpop.f32.mrb[92].mxu1  ;;  %v2202_v23 = vadd.f32 %v2811_v55, %v1913_v32  ;;  %v2193_v30 = vpop.f32.mrb[121].mxu0  ;;  %v3870_v32 = vld [vmem:[#allocation6_spill] sm:$0xff] }
 0x1da   : > { %v1937_v7 = vadd.f32 %v1936_v13, %v3868_v44  ;;  %v1938_v47 = vpop.f32.mrb[93].mxu1  ;;  %v2194_v18 = vadd.f32 %v2193_v30, %v3724_v19  ;;  %v2812_v60 = vpop.f32.mrb[122].mxu0  ;;  %v3876_v44 = vld [vmem:[#allocation15_spill] sm:$0xff] }
 0x1db   : > { %v1939_v56 = vpop.f32.mrb[94].mxu1  ;;  %2318 = vst.msk [vmem:[%s3604_s18 + $0x170] sm:$0xff] %vm1597_vm1, %v2202_v23  ;;  %v2205_v54 = vadd.f32 %v2812_v60, %v1916_v35  ;;  %v2196_v61 = vpop.f32.mrb[123].mxu0  ;;  %v3871_v35 = vld [vmem:[#allocation8_spill] sm:$0xff]  ;;  %v3877_v23 = vld [vmem:[#allocation17_spill] sm:$0xff] }
 0x1dc   : > { %v1940_v33 = vadd.f32 %v1939_v56, %v3869_v26  ;;  %v1941_v48 = vpop.f32.mrb[95].mxu1  ;;  %2316 = vst.msk [vmem:[%s3604_s18 + $0x160] sm:$0xff] %vm1597_vm1, %v2194_v18  ;;  %v2197_v21 = vadd.f32 %v2196_v61, %v3728_v0 }
 0x1dd   : > { %2319 = vst.msk [vmem:[%s3604_s18 + $0x178] sm:$0xff] %vm1597_vm1, %v2205_v54 }
 0x1de   : > { %2317 = vst.msk [vmem:[%s3604_s18 + $0x168] sm:$0xff] %vm1597_vm1, %v2197_v21  ;;  %v3878_v21 = vld [vmem:[#allocation14_spill] sm:$0xff] }
 0x1e0   : > { %v2815_v39 = vpop.f32.mrb[124].mxu0 }
 0x1e1   : > { %v1944_v2 = vpop.f32.mrb[96].mxu1  ;;  %v2218_v3 = vadd.f32 %v2815_v39, %v1929_v62  ;;  %v2209_v25 = vpop.f32.mrb[125].mxu0  ;;  %v3879_v39 = vld [vmem:[#allocation16_spill] sm:$0xff] }
 0x1e2   : > { %v1945_v43 = vadd.f32 %v3870_v32, %v1944_v2  ;;  %v1946_v19 = vpop.f32.mrb[97].mxu1  ;;  %v2210_v22 = vadd.f32 %v2209_v25, %v1921_v58  ;;  %v2816_v0 = vpop.f32.mrb[126].mxu0 }
 0x1e3   : > { %v1947_v45 = vpop.f32.mrb[98].mxu1  ;;  %2322 = vst.msk [vmem:[%s3604_s18 + $0x190] sm:$0xff] %vm1597_vm1, %v2218_v3  ;;  %v2221_v51 = vadd.f32 %v2816_v0, %v1932_v16  ;;  %v2212_v28 = vpop.f32.mrb[127].mxu0 }
 0x1e4   : > { %v1948_v59 = vadd.f32 %v3871_v35, %v1947_v45  ;;  %v1949_v11 = vpop.f32.mrb[99].mxu1  ;;  %2320 = vst.msk [vmem:[%s3604_s18 + $0x180] sm:$0xff] %vm1597_vm1, %v2210_v22  ;;  %v2213_v52 = vadd.f32 %v2212_v28, %v3758_v20 }
 0x1e5   : > { %2323 = vst.msk [vmem:[%s3604_s18 + $0x198] sm:$0xff] %vm1597_vm1, %v2221_v51 }
 0x1e6   : > { %2321 = vst.msk [vmem:[%s3604_s18 + $0x188] sm:$0xff] %vm1597_vm1, %v2213_v52 }
 0x1e8   : > { %v2819_v27 = vpop.f32.mrb[128].mxu0 }
 0x1e9   : > { %v1952_v63 = vpop.f32.mrb[100].mxu1  ;;  %v2234_v49 = vadd.f32 %v2819_v27, %v1945_v43  ;;  %v2225_v29 = vpop.f32.mrb[129].mxu0 }
 0x1ea   : > { %v1953_v9 = vadd.f32 %v1952_v63, %v3872_v14  ;;  %v1954_v58 = vpop.f32.mrb[101].mxu1  ;;  %v2226_v4 = vadd.f32 %v2225_v29, %v1937_v7  ;;  %v2820_v20 = vpop.f32.mrb[130].mxu0 }
 0x1eb   : > { %v1955_v50 = vpop.f32.mrb[102].mxu1  ;;  %2326 = vst.msk [vmem:[%s3604_s18 + $0x1b0] sm:$0xff] %vm1597_vm1, %v2234_v49  ;;  %v2237_v5 = vadd.f32 %v2820_v20, %v1948_v59  ;;  %v2228_v42 = vpop.f32.mrb[131].mxu0 }
 0x1ec   : > { %v1956_v15 = vadd.f32 %v1955_v50, %v3873_v37  ;;  %v1957_v53 = vpop.f32.mrb[103].mxu1  ;;  %2324 = vst.msk [vmem:[%s3604_s18 + $0x1a0] sm:$0xff] %vm1597_vm1, %v2226_v4  ;;  %v2229_v12 = vadd.f32 %v2228_v42, %v1940_v33 }
 0x1ed   : > { %2327 = vst.msk [vmem:[%s3604_s18 + $0x1b8] sm:$0xff] %vm1597_vm1, %v2237_v5 }
 0x1ee   : > { %2325 = vst.msk [vmem:[%s3604_s18 + $0x1a8] sm:$0xff] %vm1597_vm1, %v2229_v12 }
 0x1f0   : > { %v2823_v8 = vpop.f32.mrb[132].mxu0 }
 0x1f1   : > { %v1960_v34 = vpop.f32.mrb[104].mxu1  ;;  %v2241_v41 = vpop.f32.mrb[133].mxu0 }
 0x1f2   : > { %v1961_v62 = vadd.f32 %v3874_v46, %v1960_v34  ;;  %v1962_v17 = vpop.f32.mrb[105].mxu1  ;;  %v2242_v40 = vadd.f32 %v2241_v41, %v1953_v9  ;;  %v2824_v1 = vpop.f32.mrb[134].mxu0 }
 0x1f3   : > { %v1963_v24 = vpop.f32.mrb[106].mxu1  ;;  %v2244_v38 = vpop.f32.mrb[135].mxu0 }
 0x1f4   : > { %v2250_v10 = vadd.f32 %v2823_v8, %v1961_v62  ;;  %v1964_v16 = vadd.f32 %v3875_v31, %v1963_v24  ;;  %v1965_v6 = vpop.f32.mrb[107].mxu1  ;;  %2328 = vst.msk [vmem:[%s3604_s18 + $0x1c0] sm:$0xff] %vm1597_vm1, %v2242_v40  ;;  %v2245_v57 = vadd.f32 %v2244_v38, %v1956_v15 }
 0x1f6   : > { %2330 = vst.msk [vmem:[%s3604_s18 + $0x1d0] sm:$0xff] %vm1597_vm1, %v2250_v10  ;;  %v2253_v36 = vadd.f32 %v2824_v1, %v1964_v16  ;;  %2329 = vst.msk [vmem:[%s3604_s18 + $0x1c8] sm:$0xff] %vm1597_vm1, %v2245_v57 }
 0x1f8   : > { %2331 = vst.msk [vmem:[%s3604_s18 + $0x1d8] sm:$0xff] %vm1597_vm1, %v2253_v36  ;;  %v2827_v55 = vpop.f32.mrb[136].mxu0 }
 0x1f9   : > { %v1968_v13 = vpop.f32.mrb[108].mxu1  ;;  %v2257_v33 = vpop.f32.mrb[137].mxu0 }
 0x1fa   : > { %v1969_v7 = vadd.f32 %v1968_v13, %v3876_v44  ;;  %v1970_v47 = vpop.f32.mrb[109].mxu1  ;;  %v2828_v18 = vpop.f32.mrb[138].mxu0 }
 0x1fb   : > { %v1971_v56 = vpop.f32.mrb[110].mxu1  ;;  %v2260_v60 = vpop.f32.mrb[139].mxu0 }
 0x1fc   : > { %v1972_v26 = vadd.f32 %v1971_v56, %v3877_v23  ;;  %v1973_v30 = vpop.f32.mrb[111].mxu1  ;;  %v2258_v48 = vadd.f32 %v2257_v33, %v1969_v7 }
 0x1fe   : > { %2332 = vst.msk [vmem:[%s3604_s18 + $0x1e0] sm:$0xff] %vm1597_vm1, %v2258_v48  ;;  %v2261_v54 = vadd.f32 %v2260_v60, %v1972_v26 }
 0x200   : > { %2333 = vst.msk [vmem:[%s3604_s18 + $0x1e8] sm:$0xff] %vm1597_vm1, %v2261_v54 }
 0x201   : > { %v1976_v61 = vpop.f32.mrb[112].mxu1 }
 0x202   : > { %v1977_v2 = vadd.f32 %v3878_v21, %v1976_v61  ;;  %v1978_v32 = vpop.f32.mrb[113].mxu1 }
 0x203   : > { %v1979_v43 = vpop.f32.mrb[114].mxu1 }
 0x204   : > { %v2266_v19 = vadd.f32 %v2827_v55, %v1977_v2  ;;  %v1980_v45 = vadd.f32 %v3879_v39, %v1979_v43  ;;  %v1981_v3 = vpop.f32.mrb[115].mxu1 }
 0x206   : > { %2334 = vst.msk [vmem:[%s3604_s18 + $0x1f0] sm:$0xff] %vm1597_vm1, %v2266_v19  ;;  %v2269_v35 = vadd.f32 %v2828_v18, %v1980_v45 }
 0x208   : > { %2335 = vst.msk [vmem:[%s3604_s18 + $0x1f8] sm:$0xff] %vm1597_vm1, %v2269_v35 }
 0x209 PF: > { %s14_s15 = sadd.s32 1, %s3056_s15  }
 0x20a   : > { %p11_p4 = scmp.ge.s32.totalorder %s14_s15, 6  }
 0x20c   :  { %13 = sbr.rel (!%p11_p4) target bundleno = 1 (0x1), region = 69 }

// kernel: _wrn_forward_impl.15
= control target key start
LH: loop header
LB: loop body
LE: loop exit
PB: predicated region body
PF: predicated region fallthrough
CT: control target
= control target key end

     0   :  { %s453_s12 = smov 0   ;;  %s612_s0 = inlined_call_operand.vmem [shape: f32[512,128], index: 0, kind: input, shape index: {}]   ;;  %s613_s1 = inlined_call_operand.vmem [shape: f32[1,128], index: 1, kind: input, shape index: {}]   ;;  %s614_s2 = inlined_call_operand.vmem [shape: f32[1,128], index: 2, kind: input, shape index: {}]   ;;  %s615_s3 = inlined_call_operand.vmem [shape: f32[512,128], index: 3, kind: output, shape index: {}]  }
   0x1 LB: > { %s404_s13 = sadd.s32 4294967295, %s431_s12   ;;  %p408_p0 = scmp.ge.s32.totalorder %s431_s12, 1  ;;  %s431_s12 = sphi %s453_s12, %s13_s12  }
   0x2   : > { %p138_p1 = scmp.lt.s32.totalorder %s431_s12, 3 }
   0x4   : > { %p139_p2 = pnand %p408_p0, %p138_p1 }
   0x5   : > { %s409_s14 = sshll.u32 (!%p139_p2), %s404_s13, 5  ;;  %v464_v0 = vld [vmem:[%s613_s1] ss:$0 sm:$0xff] (!%p139_p2) }
   0x6   : > { %142 = sbr.rel (%p139_p2) target bundleno = 46 (0x2e), region = 32  ;;  %p163_p3 = scmp.lt.s32.totalorder (!%p139_p2), %s409_s14, 63  ;;  %v474_v1 = vld [vmem:[%s614_s2] ss:$0 sm:$0xff] (!%p139_p2) }
   0xd   : > { %s617_s14 = smov (!%p163_p3, %s409_s14), 63 }
   0xe   : > { %s410_s15 = sshll.u32 %s617_s14, 3 }
   0xf   : > { %s469_s20 = scalar_lea.vmem %s612_s0, %s410_s15  ;;  %s497_s25 = scalar_lea.vmem %s615_s3, %s410_s15 }
  0x10   : > { %v174_v2 = vld [vmem:[%s469_s20] sm:$0xff]  ;;  %v175_v3 = vld [vmem:[%s469_s20 + $0x8] sm:$0xff]  ;;  %v176_v4 = vld [vmem:[%s469_s20 + $0x10] sm:$0xff] }
  0x11   : > { %v213_v5 = vmul.f32 %v464_v0, %v174_v2  ;;  %v214_v6 = vmul.f32 %v464_v0, %v175_v3  ;;  %v215_v7 = vmul.f32 %v464_v0, %v176_v4  ;;  %v177_v8 = vld [vmem:[%s469_s20 + $0x18] sm:$0xff]  ;;  %v178_v9 = vld [vmem:[%s469_s20 + $0x20] sm:$0xff]  ;;  %v179_v10 = vld [vmem:[%s469_s20 + $0x28] sm:$0xff] }
  0x12   : > { %v216_v11 = vmul.f32 %v464_v0, %v177_v8  ;;  %v217_v12 = vmul.f32 %v464_v0, %v178_v9  ;;  %v218_v13 = vmul.f32 %v464_v0, %v179_v10  ;;  %v180_v14 = vld [vmem:[%s469_s20 + $0x30] sm:$0xff]  ;;  %v181_v15 = vld [vmem:[%s469_s20 + $0x38] sm:$0xff]  ;;  %v182_v24 = vld [vmem:[%s469_s20 + $0x40] sm:$0xff] }
  0x13   : > { %v252_v16 = vadd.f32 %v474_v1, %v213_v5  ;;  %v253_v17 = vadd.f32 %v474_v1, %v214_v6  ;;  %v254_v18 = vadd.f32 %v474_v1, %v215_v7  ;;  %v219_v19 = vmul.f32 %v464_v0, %v180_v14  ;;  %v183_v25 = vld [vmem:[%s469_s20 + $0x48] sm:$0xff]  ;;  %v184_v26 = vld [vmem:[%s469_s20 + $0x50] sm:$0xff]  ;;  %v185_v31 = vld [vmem:[%s469_s20 + $0x58] sm:$0xff] }
  0x14   : > { %v255_v20 = vadd.f32 %v474_v1, %v216_v11  ;;  %v256_v21 = vadd.f32 %v474_v1, %v217_v12  ;;  %v257_v22 = vadd.f32 %v474_v1, %v218_v13  ;;  %v220_v23 = vmul.f32 %v464_v0, %v181_v15  ;;  %v186_v32 = vld [vmem:[%s469_s20 + $0x60] sm:$0xff]  ;;  %v187_v33 = vld [vmem:[%s469_s20 + $0x68] sm:$0xff]  ;;  %v188_v38 = vld [vmem:[%s469_s20 + $0x70] sm:$0xff] }
  0x15   : > { %v284_v27 = vmax.f32 %v252_v16, 0.0  ;;  %v285_v28 = vmax.f32 %v253_v17, 0.0  ;;  %v286_v29 = vmax.f32 %v254_v18, 0.0  ;;  %v258_v30 = vadd.f32 %v474_v1, %v219_v19  ;;  %v189_v43 = vld [vmem:[%s469_s20 + $0x78] sm:$0xff]  ;;  %v190_v56 = vld [vmem:[%s469_s20 + $0x80] sm:$0xff]  ;;  %v191_v57 = vld [vmem:[%s469_s20 + $0x88] sm:$0xff] }
  0x16   : > { %v287_v34 = vmax.f32 %v255_v20, 0.0  ;;  %v288_v35 = vmax.f32 %v256_v21, 0.0  ;;  %v289_v36 = vmax.f32 %v257_v22, 0.0  ;;  %v259_v37 = vadd.f32 %v474_v1, %v220_v23  ;;  %v192_v58 = vld [vmem:[%s469_s20 + $0x90] sm:$0xff]  ;;  %v193_v63 = vld [vmem:[%s469_s20 + $0x98] sm:$0xff]  ;;  %v194_v2 = vld [vmem:[%s469_s20 + $0xa0] sm:$0xff] }
  0x17   : > { %316 = vst [vmem:[%s497_s25] sm:$0xff] %v284_v27  ;;  %317 = vst [vmem:[%s497_s25 + $0x8] sm:$0xff] %v285_v28  ;;  %v290_v39 = vmax.f32 %v258_v30, 0.0  ;;  %v221_v40 = vmul.f32 %v464_v0, %v182_v24  ;;  %v222_v41 = vmul.f32 %v464_v0, %v183_v25  ;;  %v223_v42 = vmul.f32 %v464_v0, %v184_v26  ;;  %v195_v3 = vld [vmem:[%s469_s20 + $0xa8] sm:$0xff]  ;;  %v196_v8 = vld [vmem:[%s469_s20 + $0xb0] sm:$0xff] }
  0x18   : > { %318 = vst [vmem:[%s497_s25 + $0x10] sm:$0xff] %v286_v29  ;;  %319 = vst [vmem:[%s497_s25 + $0x18] sm:$0xff] %v287_v34  ;;  %v291_v44 = vmax.f32 %v259_v37, 0.0  ;;  %v224_v45 = vmul.f32 %v464_v0, %v185_v31  ;;  %v225_v46 = vmul.f32 %v464_v0, %v186_v32  ;;  %v226_v47 = vmul.f32 %v464_v0, %v187_v33  ;;  %v197_v13 = vld [vmem:[%s469_s20 + $0xb8] sm:$0xff]  ;;  %v198_v26 = vld [vmem:[%s469_s20 + $0xc0] sm:$0xff] }
  0x19   : > { %320 = vst [vmem:[%s497_s25 + $0x20] sm:$0xff] %v288_v35  ;;  %321 = vst [vmem:[%s497_s25 + $0x28] sm:$0xff] %v289_v36  ;;  %v260_v48 = vadd.f32 %v474_v1, %v221_v40  ;;  %v261_v49 = vadd.f32 %v474_v1, %v222_v41  ;;  %v262_v50 = vadd.f32 %v474_v1, %v223_v42  ;;  %v199_v27 = vld [vmem:[%s469_s20 + $0xc8] sm:$0xff]  ;;  %v200_v28 = vld [vmem:[%s469_s20 + $0xd0] sm:$0xff] }
  0x1a   : > { %322 = vst [vmem:[%s497_s25 + $0x30] sm:$0xff] %v290_v39  ;;  %v227_v51 = vmul.f32 %v464_v0, %v188_v38  ;;  %323 = vst [vmem:[%s497_s25 + $0x38] sm:$0xff] %v291_v44  ;;  %v263_v52 = vadd.f32 %v474_v1, %v224_v45  ;;  %v264_v53 = vadd.f32 %v474_v1, %v225_v46  ;;  %v201_v33 = vld [vmem:[%s469_s20 + $0xd8] sm:$0xff]  ;;  %v202_v34 = vld [vmem:[%s469_s20 + $0xe0] sm:$0xff] }
  0x1b   : > { %v265_v54 = vadd.f32 %v474_v1, %v226_v47  ;;  %v228_v55 = vmul.f32 %v464_v0, %v189_v43  ;;  %v292_v59 = vmax.f32 %v260_v48, 0.0  ;;  %v293_v60 = vmax.f32 %v261_v49, 0.0  ;;  %v203_v35 = vld [vmem:[%s469_s20 + $0xe8] sm:$0xff]  ;;  %v204_v40 = vld [vmem:[%s469_s20 + $0xf0] sm:$0xff]  ;;  %v205_v45 = vld [vmem:[%s469_s20 + $0xf8] sm:$0xff] }
  0x1c   : > { %v294_v61 = vmax.f32 %v262_v50, 0.0  ;;  %v266_v62 = vadd.f32 %v474_v1, %v227_v51  ;;  %v295_v4 = vmax.f32 %v263_v52, 0.0  ;;  %v296_v5 = vmax.f32 %v264_v53, 0.0 }
  0x1d   : > { %v297_v6 = vmax.f32 %v265_v54, 0.0  ;;  %v267_v7 = vadd.f32 %v474_v1, %v228_v55  ;;  %324 = vst [vmem:[%s497_s25 + $0x40] sm:$0xff] %v292_v59  ;;  %325 = vst [vmem:[%s497_s25 + $0x48] sm:$0xff] %v293_v60  ;;  %v229_v10 = vmul.f32 %v464_v0, %v190_v56  ;;  %v230_v11 = vmul.f32 %v464_v0, %v191_v57 }
  0x1e   : > { %326 = vst [vmem:[%s497_s25 + $0x50] sm:$0xff] %v294_v61  ;;  %v298_v9 = vmax.f32 %v266_v62, 0.0  ;;  %v231_v12 = vmul.f32 %v464_v0, %v192_v58  ;;  %327 = vst [vmem:[%s497_s25 + $0x58] sm:$0xff] %v295_v4  ;;  %v232_v15 = vmul.f32 %v464_v0, %v193_v63  ;;  %v233_v16 = vmul.f32 %v464_v0, %v194_v2 }
  0x1f   : > { %328 = vst [vmem:[%s497_s25 + $0x60] sm:$0xff] %v296_v5  ;;  %329 = vst [vmem:[%s497_s25 + $0x68] sm:$0xff] %v297_v6  ;;  %v299_v14 = vmax.f32 %v267_v7, 0.0  ;;  %v234_v17 = vmul.f32 %v464_v0, %v195_v3  ;;  %v268_v18 = vadd.f32 %v474_v1, %v229_v10  ;;  %v269_v19 = vadd.f32 %v474_v1, %v230_v11 }
  0x20   : > { %330 = vst [vmem:[%s497_s25 + $0x70] sm:$0xff] %v298_v9  ;;  %v270_v20 = vadd.f32 %v474_v1, %v231_v12  ;;  %v235_v21 = vmul.f32 %v464_v0, %v196_v8  ;;  %v271_v22 = vadd.f32 %v474_v1, %v232_v15  ;;  %v272_v23 = vadd.f32 %v474_v1, %v233_v16 }
  0x21   : > { %331 = vst [vmem:[%s497_s25 + $0x78] sm:$0xff] %v299_v14  ;;  %v273_v24 = vadd.f32 %v474_v1, %v234_v17  ;;  %v236_v25 = vmul.f32 %v464_v0, %v197_v13  ;;  %v300_v29 = vmax.f32 %v268_v18, 0.0  ;;  %v301_v30 = vmax.f32 %v269_v19, 0.0 }
  0x22   : > { %v302_v31 = vmax.f32 %v270_v20, 0.0  ;;  %v274_v32 = vadd.f32 %v474_v1, %v235_v21  ;;  %v303_v36 = vmax.f32 %v271_v22, 0.0  ;;  %v304_v37 = vmax.f32 %v272_v23, 0.0 }
  0x23   : > { %v305_v38 = vmax.f32 %v273_v24, 0.0  ;;  %v275_v39 = vadd.f32 %v474_v1, %v236_v25  ;;  %332 = vst [vmem:[%s497_s25 + $0x80] sm:$0xff] %v300_v29  ;;  %333 = vst [vmem:[%s497_s25 + $0x88] sm:$0xff] %v301_v30  ;;  %v237_v42 = vmul.f32 %v464_v0, %v198_v26  ;;  %v238_v43 = vmul.f32 %v464_v0, %v199_v27 }
  0x24   : > { %334 = vst [vmem:[%s497_s25 + $0x90] sm:$0xff] %v302_v31  ;;  %v306_v41 = vmax.f32 %v274_v32, 0.0  ;;  %v239_v44 = vmul.f32 %v464_v0, %v200_v28  ;;  %335 = vst [vmem:[%s497_s25 + $0x98] sm:$0xff] %v303_v36  ;;  %v240_v47 = vmul.f32 %v464_v0, %v201_v33  ;;  %v241_v48 = vmul.f32 %v464_v0, %v202_v34 }
  0x25   : > { %336 = vst [vmem:[%s497_s25 + $0xa0] sm:$0xff] %v304_v37  ;;  %337 = vst [vmem:[%s497_s25 + $0xa8] sm:$0xff] %v305_v38  ;;  %v307_v46 = vmax.f32 %v275_v39, 0.0  ;;  %v242_v49 = vmul.f32 %v464_v0, %v203_v35  ;;  %v276_v50 = vadd.f32 %v474_v1, %v237_v42  ;;  %v277_v51 = vadd.f32 %v474_v1, %v238_v43 }
  0x26   : > { %338 = vst [vmem:[%s497_s25 + $0xb0] sm:$0xff] %v306_v41  ;;  %v278_v52 = vadd.f32 %v474_v1, %v239_v44  ;;  %v243_v53 = vmul.f32 %v464_v0, %v204_v40  ;;  %v279_v54 = vadd.f32 %v474_v1, %v240_v47  ;;  %v280_v55 = vadd.f32 %v474_v1, %v241_v48 }
  0x27   : > { %339 = vst [vmem:[%s497_s25 + $0xb8] sm:$0xff] %v307_v46  ;;  %v281_v56 = vadd.f32 %v474_v1, %v242_v49  ;;  %v244_v57 = vmul.f32 %v464_v0, %v205_v45  ;;  %v308_v58 = vmax.f32 %v276_v50, 0.0  ;;  %v309_v59 = vmax.f32 %v277_v51, 0.0 }
  0x28   : > { %v310_v60 = vmax.f32 %v278_v52, 0.0  ;;  %v282_v61 = vadd.f32 %v474_v1, %v243_v53  ;;  %v311_v62 = vmax.f32 %v279_v54, 0.0  ;;  %v312_v63 = vmax.f32 %v280_v55, 0.0 }
  0x29   : > { %v313_v2 = vmax.f32 %v281_v56, 0.0  ;;  %v283_v3 = vadd.f32 %v474_v1, %v244_v57  ;;  %340 = vst [vmem:[%s497_s25 + $0xc0] sm:$0xff] %v308_v58  ;;  %341 = vst [vmem:[%s497_s25 + $0xc8] sm:$0xff] %v309_v59 }
  0x2a   : > { %342 = vst [vmem:[%s497_s25 + $0xd0] sm:$0xff] %v310_v60  ;;  %v314_v4 = vmax.f32 %v282_v61, 0.0  ;;  %343 = vst [vmem:[%s497_s25 + $0xd8] sm:$0xff] %v311_v62 }
  0x2b   : > { %344 = vst [vmem:[%s497_s25 + $0xe0] sm:$0xff] %v312_v63  ;;  %345 = vst [vmem:[%s497_s25 + $0xe8] sm:$0xff] %v313_v2  ;;  %v315_v0 = vmax.f32 %v283_v3, 0.0 }
  0x2c   : > { %346 = vst [vmem:[%s497_s25 + $0xf0] sm:$0xff] %v314_v4 }
  0x2d   : > { %347 = vst [vmem:[%s497_s25 + $0xf8] sm:$0xff] %v315_v0 }
  0x2e PF: > { %s13_s12 = sadd.s32 1, %s431_s12  }
  0x2f   : > { %p10_p4 = scmp.ge.s32.totalorder %s13_s12, 4  }
  0x31   :  { %12 = sbr.rel (!%p10_p4) target bundleno = 1 (0x1), region = 62 }

// kernel: _wrn_forward_impl.16
= control target key start
LH: loop header
LB: loop body
LE: loop exit
PB: predicated region body
PF: predicated region fallthrough
CT: control target
= control target key end

     0   :  { %s1624_s15 = smov 0   ;;  %s1941_s0 = inlined_call_operand.vmem [shape: bf16[512,288], index: 0, kind: input, shape index: {}]   ;;  %s1942_s1 = inlined_call_operand.vmem [shape: bf16[288,64], index: 1, kind: input, shape index: {}]   ;;  %s1943_s2 = inlined_call_operand.vmem [shape: f32[1,64], index: 2, kind: input, shape index: {}]   ;;  %s1944_s3 = inlined_call_operand.vmem [shape: f32[1,64], index: 3, kind: input, shape index: {}]   ;;  %s1945_s4 = inlined_call_operand.vmem [shape: f32[512,64], index: 4, kind: output, shape index: {}]  }
   0x1 LB: > { %s1223_s16 = sadd.s32 4294967295, %s1597_s15   ;;  %p1227_p0 = scmp.ge.s32.totalorder %s1597_s15, 1  ;;  %s1597_s15 = sphi %s1624_s15, %s14_s15  }
   0x2   : > { %p164_p1 = scmp.lt.s32.totalorder %s1597_s15, 3 }
   0x4   : > { %p165_p2 = pnand %p1227_p0, %p164_p1 }
   0x5   : > { %v1509_v0 = vld [vmem:[%s1942_s1 + $0x40] sm:$0xff] (!%p165_p2)   ;;  %s1228_s19 = sshll.u32 (!%p165_p2), %s1223_s16, 5  ;;  %v1511_v2 = vld [vmem:[%s1942_s1 + $0x48] sm:$0xff] (!%p165_p2)   ;;  %v1513_v4 = vld [vmem:[%s1942_s1 + $0x50] sm:$0xff] (!%p165_p2)   ;;  %vm653_vm0 = vcmask (!%p165_p2), 261120   ;;  %vm1134_vm1 = vcmask (!%p165_p2), 523264  }
   0x6   : > { %168 = sbr.rel (%p165_p2) target bundleno = 352 (0x160), region = 36  ;;  %v1510_v1 = vld [vmem:[%s1942_s1] sm:$0xff] (!%p165_p2)   ;;  %1318 = vmatprep.subr.bf16.mxu0 (!%p165_p2), %v1509_v0  ;;  %1484 = vmatprep.subr.bf16.mxu1 (!%p165_p2), %v1509_v0  ;;  %p192_p3 = scmp.lt.s32.totalorder (!%p165_p2), %s1228_s19, 63  ;;  %v1512_v3 = vld [vmem:[%s1942_s1 + $0x8] sm:$0xff] (!%p165_p2)   ;;  %v1514_v5 = vld [vmem:[%s1942_s1 + $0x10] sm:$0xff] (!%p165_p2)  }
   0x7   : > { %1319 = vmatpush3.bf16.msra.mxu0 (!%p165_p2), %v1510_v1  ;;  %1492 = vmatpush3.bf16.msra.mxu1 (!%p165_p2), %v1510_v1  ;;  %v1515_v6 = vld [vmem:[%s1942_s1 + $0x58] sm:$0xff] (!%p165_p2)   ;;  %v1517_v8 = vld [vmem:[%s1942_s1 + $0x60] sm:$0xff] (!%p165_p2)   ;;  %v1519_v10 = vld [vmem:[%s1942_s1 + $0x68] sm:$0xff] (!%p165_p2)  }
   0x8   : > { %1320 = vmatprep.subr.bf16.mxu0 (!%p165_p2), %v1511_v2  ;;  %1485 = vmatprep.subr.bf16.mxu1 (!%p165_p2), %v1511_v2  ;;  %v1516_v7 = vld [vmem:[%s1942_s1 + $0x18] sm:$0xff] (!%p165_p2)   ;;  %v1518_v9 = vld [vmem:[%s1942_s1 + $0x20] sm:$0xff] (!%p165_p2)   ;;  %v1520_v13 = vld [vmem:[%s1942_s1 + $0x28] sm:$0xff] (!%p165_p2)  }
   0x9   : > { %v1521_v14 = vld [vmem:[%s1942_s1 + $0x70] sm:$0xff] (!%p165_p2)   ;;  %v1523_v16 = vld [vmem:[%s1942_s1 + $0x78] sm:$0xff] (!%p165_p2)   ;;  %v1531_v18 = vld [vmem:[%s1942_s1 + $0x80] sm:$0xff] (!%p165_p2)  }
   0xa   : > { %v1522_v15 = vld [vmem:[%s1942_s1 + $0x30] sm:$0xff] (!%p165_p2)   ;;  %v1524_v17 = vld [vmem:[%s1942_s1 + $0x38] sm:$0xff] (!%p165_p2)   ;;  %v1544_v23 = vld [vmem:[%s1942_s1 + $0x88] sm:$0xff] (!%p165_p2)  }
   0xb   : > { %1321 = vmatpush3.bf16.msra.mxu0 (!%p165_p2), %v1512_v3  ;;  %1493 = vmatpush3.bf16.msra.mxu1 (!%p165_p2), %v1512_v3 }
   0xc   : > { %1322 = vmatprep.subr.bf16.mxu0 (!%p165_p2), %v1513_v4  ;;  %1486 = vmatprep.subr.bf16.mxu1 (!%p165_p2), %v1513_v4 }
   0xd   : > { %s1947_s19 = smov (!%p192_p3, %s1228_s19), 63 }
   0xe   : > { %s1500_s6 = smul.u32 12, %s1947_s19  ;;  %s1231_s12 = sshll.u32 %s1947_s19, 3 }
   0xf   : > { %1323 = vmatpush3.bf16.msra.mxu0 %v1514_v5  ;;  %1494 = vmatpush3.bf16.msra.mxu1 %v1514_v5  ;;  %s1796_s16 = scalar_lea.vmem %s1945_s4, %s1231_s12 }
  0x10   : > { %1324 = vmatprep.subr.bf16.mxu0 %v1515_v6  ;;  %1487 = vmatprep.subr.bf16.mxu1 %v1515_v6  ;;  %s1665_s13 = scalar_lea.vmem %s1941_s0, %s1500_s6 }
  0x11   : > { %v1527_v11 = vld [vmem:[%s1665_s13 + $0x4] ss:$12 sps:$4 sm:$0xff]   ;;  %v1525_v19 = vld [vmem:[%s1665_s13] ss:$12 sps:$4 sm:$0xff]   ;;  %v1532_v21 = vld [vmem:[%s1665_s13 + $0x1c] ss:$12 sps:$4 sm:$0xff]  }
  0x12   : > { %v1530_v12 = vld [vmem:[%s1665_s13 + $0x124] ss:$12 sps:$4 sm:$0xff]   ;;  %734 = vmatprep.mubr.bf16.mxu0 %v1527_v11  ;;  %v1528_v20 = vld [vmem:[%s1665_s13 + $0x120] ss:$12 sps:$4 sm:$0xff]   ;;  %v1534_v22 = vld [vmem:[%s1665_s13 + $0x13c] ss:$12 sps:$4 sm:$0xff]  }
  0x13   : > { %1325 = vmatpush3.bf16.msra.mxu0 %v1516_v7  ;;  %1495 = vmatpush3.bf16.msra.mxu1 %v1516_v7  ;;  %v1536_v24 = vld [vmem:[%s1665_s13 + $0x18] ss:$12 sps:$4 sm:$0xff]   ;;  %v1538_v26 = vld [vmem:[%s1665_s13 + $0x34] ss:$12 sps:$4 sm:$0xff]   ;;  %v1542_v28 = vld [vmem:[%s1665_s13 + $0x30] ss:$12 sps:$4 sm:$0xff]  }
  0x14   : > { %1326 = vmatprep.subr.bf16.mxu0 %v1517_v8  ;;  %1488 = vmatprep.subr.bf16.mxu1 %v1517_v8  ;;  %v1537_v25 = vld [vmem:[%s1665_s13 + $0x138] ss:$12 sps:$4 sm:$0xff]   ;;  %v1540_v27 = vld [vmem:[%s1665_s13 + $0x154] ss:$12 sps:$4 sm:$0xff]   ;;  %v1543_v29 = vld [vmem:[%s1665_s13 + $0x150] ss:$12 sps:$4 sm:$0xff]  }
  0x15   : > { %830 = vmatprep.mubr.bf16.mxu1 %v1530_v12  ;;  %v1545_v30 = vld [vmem:[%s1665_s13 + $0x4c] ss:$12 sps:$4 sm:$0xff]   ;;  %v1549_v32 = vld [vmem:[%s1665_s13 + $0x48] ss:$12 sps:$4 sm:$0xff]   ;;  %v1551_v34 = vld [vmem:[%s1665_s13 + $0x64] ss:$12 sps:$4 sm:$0xff]  }
  0x16   : > { %v1547_v31 = vld [vmem:[%s1665_s13 + $0x16c] ss:$12 sps:$4 sm:$0xff]   ;;  %v1550_v33 = vld [vmem:[%s1665_s13 + $0x168] ss:$12 sps:$4 sm:$0xff]   ;;  %v1560_v41 = vld [vmem:[%s1665_s13 + $0x50] ss:$12 sps:$4 sm:$0xff]  }
  0x17   : > { %1327 = vmatpush3.bf16.msra.mxu0 %v1518_v9  ;;  %1496 = vmatpush3.bf16.msra.mxu1 %v1518_v9  ;;  %v1553_v35 = vld [vmem:[%s1665_s13 + $0x8] ss:$12 sps:$4 sm:$0xff]   ;;  %v1554_v36 = vld [vmem:[%s1665_s13 + $0x60] ss:$12 sps:$4 sm:$0xff]   ;;  %v1558_v39 = vld [vmem:[%s1665_s13 + $0x38] ss:$12 sps:$4 sm:$0xff]  }
  0x18   : > { %1328 = vmatprep.subr.bf16.mxu0 %v1519_v10  ;;  %1489 = vmatprep.subr.bf16.mxu1 %v1519_v10  ;;  %v1555_v37 = vld [vmem:[%s1665_s13 + $0x20] ss:$12 sps:$4 sm:$0xff]   ;;  %v1556_v38 = vld [vmem:[%s1665_s13 + $0x7c] ss:$12 sps:$4 sm:$0xff]   ;;  %v1559_v40 = vld [vmem:[%s1665_s13 + $0x78] ss:$12 sps:$4 sm:$0xff]  }
  0x19   : > { %v1561_v42 = vld [vmem:[%s1665_s13 + $0x94] ss:$12 sps:$4 sm:$0xff]   ;;  %v1564_v44 = vld [vmem:[%s1665_s13 + $0x90] ss:$12 sps:$4 sm:$0xff]   ;;  %v1566_v46 = vld [vmem:[%s1665_s13 + $0xac] ss:$12 sps:$4 sm:$0xff]  }
  0x1a   : > { %v1563_v43 = vld [vmem:[%s1665_s13 + $0x68] ss:$12 sps:$4 sm:$0xff]   ;;  %v1565_v45 = vld [vmem:[%s1665_s13 + $0x80] ss:$12 sps:$4 sm:$0xff]   ;;  %v1568_v47 = vld [vmem:[%s1665_s13 + $0x98] ss:$12 sps:$4 sm:$0xff]  }
  0x1b   : > { %1329 = vmatpush3.bf16.msra.mxu0 %v1520_v13  ;;  %1497 = vmatpush3.bf16.msra.mxu1 %v1520_v13  ;;  %v1569_v48 = vld [vmem:[%s1665_s13 + $0xa8] ss:$12 sps:$4 sm:$0xff]   ;;  %v1570_v49 = vld [vmem:[%s1665_s13 + $0xb0] ss:$12 sps:$4 sm:$0xff]   ;;  %v1574_v52 = vld [vmem:[%s1665_s13 + $0xc0] ss:$12 sps:$4 sm:$0xff]  }
  0x1c   : > { %1330 = vmatprep.subr.bf16.mxu0 %v1521_v14  ;;  %1490 = vmatprep.subr.bf16.mxu1 %v1521_v14  ;;  %v1571_v50 = vld [vmem:[%s1665_s13 + $0xc4] ss:$12 sps:$4 sm:$0xff]   ;;  %v1573_v51 = vld [vmem:[%s1665_s13 + $0xc8] ss:$12 sps:$4 sm:$0xff]   ;;  %v1575_v53 = vld [vmem:[%s1665_s13 + $0xe0] ss:$12 sps:$4 sm:$0xff]  }
  0x1d   : > { %v1576_v54 = vld [vmem:[%s1665_s13 + $0xdc] ss:$12 sps:$4 sm:$0xff]   ;;  %v1578_v55 = vld [vmem:[%s1665_s13 + $0xf8] ss:$12 sps:$4 sm:$0xff]   ;;  %v1581_v58 = vld [vmem:[%s1665_s13 + $0xf4] ss:$12 sps:$4 sm:$0xff]  }
  0x1e   : > { %v1579_v56 = vld [vmem:[%s1665_s13 + $0xd8] ss:$12 sps:$4 sm:$0xff]   ;;  %v1580_v57 = vld [vmem:[%s1665_s13 + $0x110] ss:$12 sps:$4 sm:$0xff]   ;;  %v1583_v59 = vld [vmem:[%s1665_s13 + $0x128] ss:$12 sps:$4 sm:$0xff]  }
  0x1f   : > { %1331 = vmatpush3.bf16.msra.mxu0 %v1522_v15  ;;  %1498 = vmatpush3.bf16.msra.mxu1 %v1522_v15  ;;  %v1584_v60 = vld [vmem:[%s1665_s13 + $0xf0] ss:$12 sps:$4 sm:$0xff]   ;;  %v1585_v61 = vld [vmem:[%s1665_s13 + $0x140] ss:$12 sps:$4 sm:$0xff]   ;;  %v1588_v63 = vld [vmem:[%s1665_s13 + $0x158] ss:$12 sps:$4 sm:$0xff]  }
  0x20   : > { %1332 = vmatprep.subr.bf16.mxu0 %v1523_v16  ;;  %1491 = vmatprep.subr.bf16.mxu1 %v1523_v16  ;;  %v1586_v62 = vld [vmem:[%s1665_s13 + $0x10c] ss:$12 sps:$4 sm:$0xff]   ;;  %v1589_v0 = vld [vmem:[%s1665_s13 + $0x108] ss:$12 sps:$4 sm:$0xff]   ;;  %v1590_v1 = vld [vmem:[%s1665_s13 + $0x170] ss:$12 sps:$4 sm:$0xff]  }
  0x23   : > { %1333 = vmatpush3.bf16.msra.mxu0 %v1524_v17  ;;  %1499 = vmatpush3.bf16.msra.mxu1 %v1524_v17 }
  0x24   : > { %1448 = vmatprep.subr.bf16.mxu1 %v1531_v18 }
  0x26   : > { %735 = vmatmul.mubr.bf16.vlgmr.msra.gmra.mrb[0].mxu0 %v1525_v19  ;;  %831 = vmatmul.mubr.bf16.vlgmr.msra.gmra.mrb[0].mxu1 %v1528_v20 }
  0x27   : > { %1449 = vmatpush3.bf16.msra.mxu1 %v1531_v18  ;;  %742 = vmatprep.mubr.bf16.mxu0 %v1532_v21 }
  0x28   : > { %838 = vmatprep.mubr.bf16.mxu1 %v1534_v22  ;;  %1450 = vmatprep.subr.bf16.mxu1 %v1544_v23 }
  0x2b   : > { %1451 = vmatpush3.bf16.msra.mxu1 %v1544_v23 }
  0x2e   : > { %743 = vmatmul.mubr.bf16.gmra.mrb[4].mxu0 %v1536_v24  ;;  %839 = vmatmul.mubr.bf16.gmra.mrb[4].mxu1 %v1537_v25 }
  0x2f   : > { %750 = vmatprep.mubr.bf16.mxu0 %v1538_v26  ;;  %846 = vmatprep.mubr.bf16.mxu1 %v1540_v27 }
  0x36   : > { %751 = vmatmul.mubr.bf16.gmra.mrb[8].mxu0 %v1542_v28  ;;  %847 = vmatmul.mubr.bf16.gmra.mrb[8].mxu1 %v1543_v29 }
  0x37   : > { %758 = vmatprep.mubr.bf16.mxu0 %v1545_v30  ;;  %854 = vmatprep.mubr.bf16.mxu1 %v1547_v31 }
  0x3e   : > { %759 = vmatmul.mubr.bf16.gmra.mrb[12].mxu0 %v1549_v32  ;;  %855 = vmatmul.mubr.bf16.gmra.mrb[12].mxu1 %v1550_v33 }
  0x3f   : > { %766 = vmatprep.mubr.bf16.mxu0 %v1551_v34  ;;  %1452 = vmatprep.mubr.msk.bf16.mxu1 %vm653_vm0, %v1553_v35 }
  0x46   : > { %767 = vmatmul.mubr.bf16.gmra.mrb[16].mxu0 %v1554_v36  ;;  %1453 = vmatmul.mubr.msk.bf16.vlgmr.msra.gmra.mrb[16].mxu1 %vm653_vm0, %v1555_v37 }
  0x47   : > { %774 = vmatprep.mubr.bf16.mxu0 %v1556_v38  ;;  %1456 = vmatprep.mubr.msk.bf16.mxu1 %vm653_vm0, %v1558_v39 }
  0x4e   : > { %775 = vmatmul.mubr.bf16.gmra.mrb[20].mxu0 %v1559_v40  ;;  %1457 = vmatmul.mubr.msk.bf16.gmra.mrb[20].mxu1 %vm653_vm0, %v1560_v41 }
  0x4f   : > { %782 = vmatprep.mubr.bf16.mxu0 %v1561_v42  ;;  %1460 = vmatprep.mubr.msk.bf16.mxu1 %vm653_vm0, %v1563_v43 }
  0x56   : > { %783 = vmatmul.mubr.bf16.gmra.mrb[24].mxu0 %v1564_v44  ;;  %1461 = vmatmul.mubr.msk.bf16.gmra.mrb[24].mxu1 %vm653_vm0, %v1565_v45 }
  0x57   : > { %790 = vmatprep.mubr.bf16.mxu0 %v1566_v46  ;;  %1464 = vmatprep.mubr.msk.bf16.mxu1 %vm653_vm0, %v1568_v47 }
  0x5e   : > { %791 = vmatmul.mubr.bf16.gmra.mrb[28].mxu0 %v1569_v48  ;;  %1465 = vmatmul.mubr.msk.bf16.gmra.mrb[28].mxu1 %vm653_vm0, %v1570_v49 }
  0x5f   : > { %798 = vmatprep.mubr.bf16.mxu0 %v1571_v50  ;;  %1468 = vmatprep.mubr.msk.bf16.mxu1 %vm653_vm0, %v1573_v51 }
  0x66   : > { %799 = vmatmul.mubr.bf16.gmra.mrb[32].mxu0 %v1574_v52  ;;  %1469 = vmatmul.mubr.msk.bf16.gmra.mrb[32].mxu1 %vm653_vm0, %v1575_v53  ;;  %v1779_v52 = vld [vmem:[%s1943_s2] ss:$0 sm:$0xff] }
  0x67   : > { %806 = vmatprep.mubr.bf16.mxu0 %v1576_v54  ;;  %1472 = vmatprep.mubr.msk.bf16.mxu1 %vm653_vm0, %v1578_v55 }
  0x6e   : > { %807 = vmatmul.mubr.bf16.gmra.mrb[36].mxu0 %v1579_v56  ;;  %1473 = vmatmul.mubr.msk.bf16.gmra.mrb[36].mxu1 %vm653_vm0, %v1580_v57  ;;  %v1784_v56 = vld [vmem:[%s1944_s3] ss:$0 sm:$0xff] }
  0x6f   : > { %814 = vmatprep.mubr.bf16.mxu0 %v1581_v58  ;;  %1476 = vmatprep.mubr.msk.bf16.mxu1 %vm653_vm0, %v1583_v59 }
  0x76   : > { %815 = vmatmul.mubr.bf16.gmra.mrb[40].mxu0 %v1584_v60  ;;  %1477 = vmatmul.mubr.msk.bf16.gmra.mrb[40].mxu1 %vm653_vm0, %v1585_v61 }
  0x77   : > { %822 = vmatprep.mubr.bf16.mxu0 %v1586_v62  ;;  %1480 = vmatprep.mubr.msk.bf16.mxu1 %vm653_vm0, %v1588_v63 }
  0x7e   : > { %823 = vmatmul.mubr.bf16.gmra.mrb[44].mxu0 %v1589_v0  ;;  %1481 = vmatmul.mubr.msk.bf16.gmra.mrb[44].mxu1 %vm653_vm0, %v1590_v1 }
  0xf9   : > { %v1334_v2 = vpop.f32.mrb[0].mxu0  ;;  %v1406_v3 = vpop.f32.mrb[0].mxu1 }
  0xfa   : > { %v1335_v4 = vpop.f32.mrb[1].mxu0  ;;  %v1407_v5 = vpop.f32.mrb[1].mxu1 }
  0xfb   : > { %v1336_v6 = vadd.f32 %v1335_v4, %v1334_v2  ;;  %v1758_v7 = vadd.f32 %v1407_v5, %v1406_v3  ;;  %v1337_v8 = vpop.f32.mrb[2].mxu0  ;;  %v1409_v9 = vpop.f32.mrb[2].mxu1 }
  0xfc   : > { %v1338_v10 = vpop.f32.mrb[3].mxu0  ;;  %v1410_v11 = vpop.f32.mrb[3].mxu1 }
  0xfd   : > { %v1339_v12 = vadd.f32 %v1338_v10, %v1337_v8  ;;  %v1760_v13 = vadd.f32 %v1410_v11, %v1409_v9 }
 0x101   : > { %v1340_v14 = vpop.f32.mrb[4].mxu0  ;;  %v1412_v15 = vpop.f32.mrb[4].mxu1 }
 0x102   : > { %v1341_v16 = vpop.f32.mrb[5].mxu0  ;;  %v1413_v17 = vpop.f32.mrb[5].mxu1 }
 0x103   : > { %v1342_v18 = vadd.f32 %v1341_v16, %v1340_v14  ;;  %v1762_v19 = vadd.f32 %v1413_v17, %v1412_v15  ;;  %v1343_v20 = vpop.f32.mrb[6].mxu0  ;;  %v1415_v21 = vpop.f32.mrb[6].mxu1 }
 0x104   : > { %v1344_v22 = vpop.f32.mrb[7].mxu0  ;;  %v1416_v23 = vpop.f32.mrb[7].mxu1 }
 0x105   : > { %v1345_v24 = vadd.f32 %v1344_v22, %v1343_v20  ;;  %v1764_v25 = vadd.f32 %v1416_v23, %v1415_v21 }
 0x109   : > { %v1346_v26 = vpop.f32.mrb[8].mxu0  ;;  %v1418_v27 = vpop.f32.mrb[8].mxu1 }
 0x10a   : > { %v1347_v28 = vpop.f32.mrb[9].mxu0  ;;  %v1419_v29 = vpop.f32.mrb[9].mxu1 }
 0x10b   : > { %v1348_v30 = vadd.f32 %v1347_v28, %v1346_v26  ;;  %v1766_v31 = vadd.f32 %v1419_v29, %v1418_v27  ;;  %v1349_v32 = vpop.f32.mrb[10].mxu0  ;;  %v1421_v33 = vpop.f32.mrb[10].mxu1 }
 0x10c   : > { %v1350_v34 = vpop.f32.mrb[11].mxu0  ;;  %v1422_v35 = vpop.f32.mrb[11].mxu1 }
 0x10d   : > { %v1768_v36 = vadd.f32 %v1350_v34, %v1349_v32  ;;  %v1770_v37 = vadd.f32 %v1422_v35, %v1421_v33 }
 0x111   : > { %v1352_v38 = vpop.f32.mrb[12].mxu0  ;;  %v1424_v39 = vpop.f32.mrb[12].mxu1 }
 0x112   : > { %v1353_v40 = vpop.f32.mrb[13].mxu0  ;;  %v1425_v41 = vpop.f32.mrb[13].mxu1 }
 0x113   : > { %v1354_v42 = vadd.f32 %v1353_v40, %v1352_v38  ;;  %v1772_v43 = vadd.f32 %v1425_v41, %v1424_v39  ;;  %v1355_v44 = vpop.f32.mrb[14].mxu0  ;;  %v1427_v45 = vpop.f32.mrb[14].mxu1 }
 0x114   : > { %v1356_v46 = vpop.f32.mrb[15].mxu0  ;;  %v1428_v47 = vpop.f32.mrb[15].mxu1 }
 0x115   : > { %v1357_v48 = vadd.f32 %v1356_v46, %v1355_v44  ;;  %v1774_v49 = vadd.f32 %v1428_v47, %v1427_v45 }
 0x119   : > { %v1358_v50 = vpop.f32.mrb[16].mxu0  ;;  %v1454_v51 = vpop.f32.mrb[16].mxu1 }
 0x11a   : > { %v906_v53 = vadd.f32 %v1454_v51, %v1342_v18  ;;  %v1359_v54 = vpop.f32.mrb[17].mxu0  ;;  %v897_v55 = vpop.f32.mrb[17].mxu1 }
 0x11b   : > { %v1360_v57 = vadd.f32 %v1359_v54, %v1358_v50  ;;  %v898_v58 = vadd.f32 %v1336_v6, %v897_v55  ;;  %v1361_v59 = vpop.f32.mrb[18].mxu0  ;;  %v1455_v60 = vpop.f32.mrb[18].mxu1 }
 0x11c   : > { %v1033_v61 = vmul.f32 %v1779_v52, %v906_v53  ;;  %v909_v62 = vadd.f32 %v1455_v60, %v1345_v24  ;;  %v1362_v63 = vpop.f32.mrb[19].mxu0  ;;  %v900_v0 = vpop.f32.mrb[19].mxu1 }
 0x11d   : > { %v1031_v1 = vmul.f32 %v1779_v52, %v898_v58  ;;  %v1789_v2 = vadd.f32 %v1362_v63, %v1361_v59  ;;  %v901_v3 = vadd.f32 %v1339_v12, %v900_v0 }
 0x11e   : > { %v1072_v4 = vadd.f32 %v1784_v56, %v1033_v61  ;;  %v1034_v5 = vmul.f32 %v1779_v52, %v909_v62 }
 0x11f   : > { %v1070_v6 = vadd.f32 %v1784_v56, %v1031_v1  ;;  %v1032_v8 = vmul.f32 %v1779_v52, %v901_v3 }
 0x120   : > { %v1104_v9 = vmax.f32 %v1072_v4, 0.0  ;;  %v1073_v10 = vadd.f32 %v1784_v56, %v1034_v5 }
 0x121   : > { %v1102_v11 = vmax.f32 %v1070_v6, 0.0  ;;  %v1071_v12 = vadd.f32 %v1784_v56, %v1032_v8  ;;  %v1364_v14 = vpop.f32.mrb[20].mxu0  ;;  %v1458_v15 = vpop.f32.mrb[20].mxu1 }
 0x122   : > { %1137 = vst.msk [vmem:[%s1796_s16 + $0x10] sm:$0xff] %vm1134_vm1, %v1104_v9  ;;  %v1105_v16 = vmax.f32 %v1073_v10, 0.0  ;;  %v922_v17 = vadd.f32 %v1458_v15, %v1354_v42  ;;  %v1365_v18 = vpop.f32.mrb[21].mxu0  ;;  %v913_v20 = vpop.f32.mrb[21].mxu1 }
 0x123   : > { %1135 = vst.msk [vmem:[%s1796_s16] sm:$0xff] %vm1134_vm1, %v1102_v11  ;;  %v1103_v21 = vmax.f32 %v1071_v12, 0.0  ;;  %v1366_v22 = vadd.f32 %v1365_v18, %v1364_v14  ;;  %v914_v23 = vadd.f32 %v1348_v30, %v913_v20  ;;  %v1367_v24 = vpop.f32.mrb[22].mxu0  ;;  %v1459_v26 = vpop.f32.mrb[22].mxu1 }
 0x124   : > { %1138 = vst.msk [vmem:[%s1796_s16 + $0x18] sm:$0xff] %vm1134_vm1, %v1105_v16  ;;  %v1037_v27 = vmul.f32 %v1779_v52, %v922_v17  ;;  %v925_v28 = vadd.f32 %v1459_v26, %v1357_v48  ;;  %v1368_v29 = vpop.f32.mrb[23].mxu0  ;;  %v916_v32 = vpop.f32.mrb[23].mxu1 }
 0x125   : > { %1136 = vst.msk [vmem:[%s1796_s16 + $0x8] sm:$0xff] %vm1134_vm1, %v1103_v21  ;;  %v1035_v33 = vmul.f32 %v1779_v52, %v914_v23  ;;  %v1369_v34 = vadd.f32 %v1368_v29, %v1367_v24  ;;  %v917_v35 = vadd.f32 %v1768_v36, %v916_v32 }
 0x126   : > { %v1076_v30 = vadd.f32 %v1784_v56, %v1037_v27  ;;  %v1038_v38 = vmul.f32 %v1779_v52, %v925_v28 }
 0x127   : > { %v1074_v39 = vadd.f32 %v1784_v56, %v1035_v33  ;;  %v1036_v40 = vmul.f32 %v1779_v52, %v917_v35 }
 0x128   : > { %v1108_v41 = vmax.f32 %v1076_v30, 0.0  ;;  %v1077_v42 = vadd.f32 %v1784_v56, %v1038_v38 }
 0x129   : > { %v1106_v44 = vmax.f32 %v1074_v39, 0.0  ;;  %v1075_v45 = vadd.f32 %v1784_v56, %v1036_v40  ;;  %v1370_v46 = vpop.f32.mrb[24].mxu0  ;;  %v1462_v47 = vpop.f32.mrb[24].mxu1 }
 0x12a   : > { %1141 = vst.msk [vmem:[%s1796_s16 + $0x30] sm:$0xff] %vm1134_vm1, %v1108_v41  ;;  %v1109_v36 = vmax.f32 %v1077_v42, 0.0  ;;  %v938_v48 = vadd.f32 %v1462_v47, %v1366_v22  ;;  %v1371_v50 = vpop.f32.mrb[25].mxu0  ;;  %v929_v51 = vpop.f32.mrb[25].mxu1 }
 0x12b   : > { %1139 = vst.msk [vmem:[%s1796_s16 + $0x20] sm:$0xff] %vm1134_vm1, %v1106_v44  ;;  %v1107_v53 = vmax.f32 %v1075_v45, 0.0  ;;  %v1372_v54 = vadd.f32 %v1371_v50, %v1370_v46  ;;  %v930_v55 = vadd.f32 %v1360_v57, %v929_v51  ;;  %v1373_v58 = vpop.f32.mrb[26].mxu0  ;;  %v1463_v59 = vpop.f32.mrb[26].mxu1 }
 0x12c   : > { %1142 = vst.msk [vmem:[%s1796_s16 + $0x38] sm:$0xff] %vm1134_vm1, %v1109_v36  ;;  %v1041_v60 = vmul.f32 %v1779_v52, %v938_v48  ;;  %v941_v61 = vadd.f32 %v1463_v59, %v1369_v34  ;;  %v1374_v62 = vpop.f32.mrb[27].mxu0  ;;  %v932_v63 = vpop.f32.mrb[27].mxu1 }
 0x12d   : > { %1140 = vst.msk [vmem:[%s1796_s16 + $0x28] sm:$0xff] %vm1134_vm1, %v1107_v53  ;;  %v1039_v0 = vmul.f32 %v1779_v52, %v930_v55  ;;  %v1375_v1 = vadd.f32 %v1374_v62, %v1373_v58  ;;  %v933_v3 = vadd.f32 %v1789_v2, %v932_v63 }
 0x12e   : > { %v1080_v57 = vadd.f32 %v1784_v56, %v1041_v60  ;;  %v1042_v4 = vmul.f32 %v1779_v52, %v941_v61 }
 0x12f   : > { %v1078_v5 = vadd.f32 %v1784_v56, %v1039_v0  ;;  %v1040_v6 = vmul.f32 %v1779_v52, %v933_v3 }
 0x130   : > { %v1112_v8 = vmax.f32 %v1080_v57, 0.0  ;;  %v1081_v9 = vadd.f32 %v1784_v56, %v1042_v4 }
 0x131   : > { %v1110_v10 = vmax.f32 %v1078_v5, 0.0  ;;  %v1079_v11 = vadd.f32 %v1784_v56, %v1040_v6  ;;  %v1376_v12 = vpop.f32.mrb[28].mxu0  ;;  %v1466_v14 = vpop.f32.mrb[28].mxu1 }
 0x132   : > { %1145 = vst.msk [vmem:[%s1796_s16 + $0x50] sm:$0xff] %vm1134_vm1, %v1112_v8  ;;  %v1113_v2 = vmax.f32 %v1081_v9, 0.0  ;;  %v1377_v15 = vpop.f32.mrb[29].mxu0  ;;  %v945_v16 = vpop.f32.mrb[29].mxu1 }
 0x133   : > { %1143 = vst.msk [vmem:[%s1796_s16 + $0x40] sm:$0xff] %vm1134_vm1, %v1110_v10  ;;  %v1111_v17 = vmax.f32 %v1079_v11, 0.0  ;;  %v1378_v18 = vadd.f32 %v1377_v15, %v1376_v12  ;;  %v946_v20 = vadd.f32 %v1372_v54, %v945_v16  ;;  %v1379_v21 = vpop.f32.mrb[30].mxu0  ;;  %v1467_v22 = vpop.f32.mrb[30].mxu1 }
 0x134   : > { %1146 = vst.msk [vmem:[%s1796_s16 + $0x58] sm:$0xff] %vm1134_vm1, %v1113_v2  ;;  %v1380_v23 = vpop.f32.mrb[31].mxu0  ;;  %v948_v24 = vpop.f32.mrb[31].mxu1 }
 0x135   : > { %1144 = vst.msk [vmem:[%s1796_s16 + $0x48] sm:$0xff] %vm1134_vm1, %v1111_v17  ;;  %v954_v26 = vadd.f32 %v1466_v14, %v1378_v18  ;;  %v1043_v27 = vmul.f32 %v1779_v52, %v946_v20  ;;  %v1381_v28 = vadd.f32 %v1380_v23, %v1379_v21  ;;  %v949_v29 = vadd.f32 %v1375_v1, %v948_v24 }
 0x137   : > { %v1045_v32 = vmul.f32 %v1779_v52, %v954_v26  ;;  %v1082_v33 = vadd.f32 %v1784_v56, %v1043_v27  ;;  %v957_v34 = vadd.f32 %v1467_v22, %v1381_v28  ;;  %v1044_v35 = vmul.f32 %v1779_v52, %v949_v29 }
 0x139   : > { %v1084_v30 = vadd.f32 %v1784_v56, %v1045_v32  ;;  %v1114_v38 = vmax.f32 %v1082_v33, 0.0  ;;  %v1046_v39 = vmul.f32 %v1779_v52, %v957_v34  ;;  %v1083_v40 = vadd.f32 %v1784_v56, %v1044_v35  ;;  %v1382_v41 = vpop.f32.mrb[32].mxu0  ;;  %v1470_v42 = vpop.f32.mrb[32].mxu1 }
 0x13a   : > { %v1383_v44 = vpop.f32.mrb[33].mxu0  ;;  %v961_v45 = vpop.f32.mrb[33].mxu1 }
 0x13b   : > { %v1116_v46 = vmax.f32 %v1084_v30, 0.0  ;;  %1147 = vst.msk [vmem:[%s1796_s16 + $0x60] sm:$0xff] %vm1134_vm1, %v1114_v38  ;;  %v1085_v47 = vadd.f32 %v1784_v56, %v1046_v39  ;;  %v1115_v36 = vmax.f32 %v1083_v40, 0.0  ;;  %v1384_v48 = vadd.f32 %v1383_v44, %v1382_v41  ;;  %v1385_v50 = vpop.f32.mrb[34].mxu0  ;;  %v1471_v51 = vpop.f32.mrb[34].mxu1 }
 0x13c   : > { %v1386_v53 = vpop.f32.mrb[35].mxu0  ;;  %v964_v54 = vpop.f32.mrb[35].mxu1 }
 0x13d   : > { %1149 = vst.msk [vmem:[%s1796_s16 + $0x70] sm:$0xff] %vm1134_vm1, %v1116_v46  ;;  %v1117_v55 = vmax.f32 %v1085_v47, 0.0  ;;  %1148 = vst.msk [vmem:[%s1796_s16 + $0x68] sm:$0xff] %vm1134_vm1, %v1115_v36  ;;  %v962_v58 = vadd.f32 %v1384_v48, %v961_v45  ;;  %v1387_v59 = vadd.f32 %v1386_v53, %v1385_v50 }
 0x13f   : > { %1150 = vst.msk [vmem:[%s1796_s16 + $0x78] sm:$0xff] %vm1134_vm1, %v1117_v55  ;;  %v1047_v60 = vmul.f32 %v1779_v52, %v962_v58  ;;  %v965_v61 = vadd.f32 %v1387_v59, %v964_v54 }
 0x141   : > { %v1086_v62 = vadd.f32 %v1784_v56, %v1047_v60  ;;  %v1048_v63 = vmul.f32 %v1779_v52, %v965_v61  ;;  %v1388_v0 = vpop.f32.mrb[36].mxu0  ;;  %v1863_v1 = vpop.f32.mrb[36].mxu1 }
 0x142   : > { %v1389_v3 = vpop.f32.mrb[37].mxu0  ;;  %v977_v57 = vpop.f32.mrb[37].mxu1 }
 0x143   : > { %v1118_v4 = vmax.f32 %v1086_v62, 0.0  ;;  %v1087_v5 = vadd.f32 %v1784_v56, %v1048_v63  ;;  %v1390_v6 = vadd.f32 %v1389_v3, %v1388_v0  ;;  %v1391_v8 = vpop.f32.mrb[38].mxu0  ;;  %v1866_v9 = vpop.f32.mrb[38].mxu1 }
 0x144   : > { %v1392_v10 = vpop.f32.mrb[39].mxu0  ;;  %v980_v11 = vpop.f32.mrb[39].mxu1 }
 0x145   : > { %1151 = vst.msk [vmem:[%s1796_s16 + $0x80] sm:$0xff] %vm1134_vm1, %v1118_v4  ;;  %v1119_v12 = vmax.f32 %v1087_v5, 0.0  ;;  %v970_v14 = vadd.f32 %v1470_v42, %v1390_v6  ;;  %v1393_v2 = vadd.f32 %v1392_v10, %v1391_v8 }
 0x147   : > { %1152 = vst.msk [vmem:[%s1796_s16 + $0x88] sm:$0xff] %vm1134_vm1, %v1119_v12  ;;  %v1049_v15 = vmul.f32 %v1779_v52, %v970_v14  ;;  %v973_v16 = vadd.f32 %v1471_v51, %v1393_v2 }
 0x149   : > { %v1088_v17 = vadd.f32 %v1784_v56, %v1049_v15  ;;  %v1050_v18 = vmul.f32 %v1779_v52, %v973_v16  ;;  %v1394_v20 = vpop.f32.mrb[40].mxu0  ;;  %v1478_v21 = vpop.f32.mrb[40].mxu1 }
 0x14a   : > { %v1002_v22 = vadd.f32 %v1478_v21, %v1762_v19  ;;  %v1395_v23 = vpop.f32.mrb[41].mxu0  ;;  %v993_v24 = vpop.f32.mrb[41].mxu1 }
 0x14b   : > { %v1120_v26 = vmax.f32 %v1088_v17, 0.0  ;;  %v1089_v27 = vadd.f32 %v1784_v56, %v1050_v18  ;;  %v1396_v28 = vadd.f32 %v1395_v23, %v1394_v20  ;;  %v994_v29 = vadd.f32 %v1758_v7, %v993_v24  ;;  %v1397_v32 = vpop.f32.mrb[42].mxu0  ;;  %v1479_v33 = vpop.f32.mrb[42].mxu1 }
 0x14c   : > { %v1057_v34 = vmul.f32 %v1779_v52, %v1002_v22  ;;  %v1005_v35 = vadd.f32 %v1479_v33, %v1764_v25  ;;  %v1398_v30 = vpop.f32.mrb[43].mxu0  ;;  %v996_v38 = vpop.f32.mrb[43].mxu1 }
 0x14d   : > { %1153 = vst.msk [vmem:[%s1796_s16 + $0x90] sm:$0xff] %vm1134_vm1, %v1120_v26  ;;  %v1121_v19 = vmax.f32 %v1089_v27, 0.0  ;;  %v978_v39 = vadd.f32 %v1396_v28, %v977_v57  ;;  %v1055_v40 = vmul.f32 %v1779_v52, %v994_v29  ;;  %v1399_v41 = vadd.f32 %v1398_v30, %v1397_v32 }
 0x14e   : > { %v1096_v42 = vadd.f32 %v1784_v56, %v1057_v34  ;;  %v1058_v7 = vmul.f32 %v1779_v52, %v1005_v35  ;;  %v997_v44 = vadd.f32 %v1760_v13, %v996_v38 }
 0x14f   : > { %1154 = vst.msk [vmem:[%s1796_s16 + $0x98] sm:$0xff] %vm1134_vm1, %v1121_v19  ;;  %v1051_v25 = vmul.f32 %v1779_v52, %v978_v39  ;;  %v1094_v45 = vadd.f32 %v1784_v56, %v1055_v40  ;;  %v981_v46 = vadd.f32 %v1399_v41, %v980_v11 }
 0x150   : > { %v1128_v47 = vmax.f32 %v1096_v42, 0.0  ;;  %v1097_v36 = vadd.f32 %v1784_v56, %v1058_v7  ;;  %v1056_v48 = vmul.f32 %v1779_v52, %v997_v44 }
 0x151   : > { %v1090_v50 = vadd.f32 %v1784_v56, %v1051_v25  ;;  %v1126_v51 = vmax.f32 %v1094_v45, 0.0  ;;  %v1052_v53 = vmul.f32 %v1779_v52, %v981_v46  ;;  %v1400_v13 = vpop.f32.mrb[44].mxu0  ;;  %v1482_v54 = vpop.f32.mrb[44].mxu1 }
 0x152   : > { %1161 = vst.msk [vmem:[%s1796_s16 + $0xd0] sm:$0xff] %vm1134_vm1, %v1128_v47  ;;  %v1129_v55 = vmax.f32 %v1097_v36, 0.0  ;;  %v1095_v58 = vadd.f32 %v1784_v56, %v1056_v48  ;;  %v1018_v59 = vadd.f32 %v1482_v54, %v1772_v43  ;;  %v1401_v60 = vpop.f32.mrb[45].mxu0  ;;  %v1009_v61 = vpop.f32.mrb[45].mxu1 }
 0x153   : > { %v1122_v62 = vmax.f32 %v1090_v50, 0.0  ;;  %1159 = vst.msk [vmem:[%s1796_s16 + $0xc0] sm:$0xff] %vm1134_vm1, %v1126_v51  ;;  %v1091_v63 = vadd.f32 %v1784_v56, %v1052_v53  ;;  %v1402_v0 = vadd.f32 %v1401_v60, %v1400_v13  ;;  %v1010_v3 = vadd.f32 %v1766_v31, %v1009_v61  ;;  %v1403_v57 = vpop.f32.mrb[46].mxu0  ;;  %v1483_v4 = vpop.f32.mrb[46].mxu1 }
 0x154   : > { %1162 = vst.msk [vmem:[%s1796_s16 + $0xd8] sm:$0xff] %vm1134_vm1, %v1129_v55  ;;  %v1127_v5 = vmax.f32 %v1095_v58, 0.0  ;;  %v1061_v43 = vmul.f32 %v1779_v52, %v1018_v59  ;;  %v1021_v6 = vadd.f32 %v1483_v4, %v1774_v49  ;;  %v1404_v8 = vpop.f32.mrb[47].mxu0  ;;  %v1012_v10 = vpop.f32.mrb[47].mxu1 }
 0x155   : > { %1155 = vst.msk [vmem:[%s1796_s16 + $0xa0] sm:$0xff] %vm1134_vm1, %v1122_v62  ;;  %v1123_v11 = vmax.f32 %v1091_v63, 0.0  ;;  %v986_v12 = vadd.f32 %v1863_v1, %v1402_v0  ;;  %v1059_v14 = vmul.f32 %v1779_v52, %v1010_v3  ;;  %v1405_v31 = vadd.f32 %v1404_v8, %v1403_v57 }
 0x156   : > { %1160 = vst.msk [vmem:[%s1796_s16 + $0xc8] sm:$0xff] %vm1134_vm1, %v1127_v5  ;;  %v1100_v2 = vadd.f32 %v1784_v56, %v1061_v43  ;;  %v1062_v15 = vmul.f32 %v1779_v52, %v1021_v6  ;;  %v1013_v49 = vadd.f32 %v1770_v37, %v1012_v10 }
 0x157   : > { %1156 = vst.msk [vmem:[%s1796_s16 + $0xa8] sm:$0xff] %vm1134_vm1, %v1123_v11  ;;  %v1053_v16 = vmul.f32 %v1779_v52, %v986_v12  ;;  %v1098_v1 = vadd.f32 %v1784_v56, %v1059_v14  ;;  %v989_v17 = vadd.f32 %v1866_v9, %v1405_v31 }
 0x158   : > { %v1132_v18 = vmax.f32 %v1100_v2, 0.0  ;;  %v1101_v20 = vadd.f32 %v1784_v56, %v1062_v15  ;;  %v1060_v21 = vmul.f32 %v1779_v52, %v1013_v49 }
 0x159   : > { %v1092_v22 = vadd.f32 %v1784_v56, %v1053_v16  ;;  %v1130_v37 = vmax.f32 %v1098_v1, 0.0  ;;  %v1054_v23 = vmul.f32 %v1779_v52, %v989_v17 }
 0x15a   : > { %1165 = vst.msk [vmem:[%s1796_s16 + $0xf0] sm:$0xff] %vm1134_vm1, %v1132_v18  ;;  %v1133_v24 = vmax.f32 %v1101_v20, 0.0  ;;  %v1099_v26 = vadd.f32 %v1784_v56, %v1060_v21 }
 0x15b   : > { %v1124_v27 = vmax.f32 %v1092_v22, 0.0  ;;  %1163 = vst.msk [vmem:[%s1796_s16 + $0xe0] sm:$0xff] %vm1134_vm1, %v1130_v37  ;;  %v1093_v9 = vadd.f32 %v1784_v56, %v1054_v23 }
 0x15c   : > { %1166 = vst.msk [vmem:[%s1796_s16 + $0xf8] sm:$0xff] %vm1134_vm1, %v1133_v24  ;;  %v1131_v28 = vmax.f32 %v1099_v26, 0.0 }
 0x15d   : > { %1157 = vst.msk [vmem:[%s1796_s16 + $0xb0] sm:$0xff] %vm1134_vm1, %v1124_v27  ;;  %v1125_v29 = vmax.f32 %v1093_v9, 0.0 }
 0x15e   : > { %1164 = vst.msk [vmem:[%s1796_s16 + $0xe8] sm:$0xff] %vm1134_vm1, %v1131_v28 }
 0x15f   : > { %1158 = vst.msk [vmem:[%s1796_s16 + $0xb8] sm:$0xff] %vm1134_vm1, %v1125_v29 }
 0x160 PF: > { %s14_s15 = sadd.s32 1, %s1597_s15  }
 0x161   : > { %p11_p4 = scmp.ge.s32.totalorder %s14_s15, 4  }
 0x163   :  { %13 = sbr.rel (!%p11_p4) target bundleno = 1 (0x1), region = 66 }

// kernel: _wrn_forward_impl.17
= control target key start
LH: loop header
LB: loop body
LE: loop exit
PB: predicated region body
PF: predicated region fallthrough
CT: control target
= control target key end

     0   :  { %s2818_s15 = smov 0   ;;  %s3296_s0 = inlined_call_operand.vmem [shape: bf16[512,576], index: 0, kind: input, shape index: {}]   ;;  %s3297_s1 = inlined_call_operand.vmem [shape: bf16[576,64], index: 1, kind: input, shape index: {}]   ;;  %s3298_s2 = inlined_call_operand.vmem [shape: bf16[512,32], index: 2, kind: input, shape index: {}]   ;;  %s3299_s3 = inlined_call_operand.vmem [shape: bf16[32,64], index: 3, kind: input, shape index: {}]   ;;  %s3300_s4 = inlined_call_operand.vmem [shape: f32[512,64], index: 4, kind: output, shape index: {}]  }
   0x1 LB: > { %s1981_s16 = sadd.s32 4294967295, %s2791_s15   ;;  %p1985_p0 = scmp.ge.s32.totalorder %s2791_s15, 1  ;;  %s2791_s15 = sphi %s2818_s15, %s14_s15  }
   0x2   : > { %p175_p1 = scmp.lt.s32.totalorder %s2791_s15, 3 }
   0x4   : > { %p176_p2 = pnand %p1985_p0, %p175_p1 }
   0x5   : > { %v2619_v0 = vld [vmem:[%s3299_s3] sm:$0xff] (!%p176_p2)   ;;  %s1986_s19 = sshll.u32 (!%p176_p2), %s1981_s16, 5  ;;  %v2622_v3 = vld [vmem:[%s3299_s3 + $0x8] sm:$0xff] (!%p176_p2)   ;;  %v2627_v6 = vld [vmem:[%s3297_s1 + $0x50] sm:$0xff] (!%p176_p2)   ;;  %vm523_vm0 = vcmask (!%p176_p2), 261120   ;;  %vm1349_vm1 = vcmask (!%p176_p2), 523264  }
   0x6   : > { %179 = sbr.rel (%p176_p2) target bundleno = 436 (0x1b4), region = 36  ;;  %v2620_v1 = vld [vmem:[%s3297_s1 + $0x40] sm:$0xff] (!%p176_p2)   ;;  %p208_p3 = scmp.lt.s32.totalorder (!%p176_p2), %s1986_s19, 63  ;;  %2422 = vmatprep.subr.bf16.mxu0 (!%p176_p2), %v2619_v0  ;;  %v2623_v4 = vld [vmem:[%s3297_s1 + $0x48] sm:$0xff] (!%p176_p2)   ;;  %v2629_v10 = vld [vmem:[%s3297_s1 + $0x10] sm:$0xff] (!%p176_p2)  }
   0x7   : > { %v2621_v2 = vld [vmem:[%s3297_s1] sm:$0xff] (!%p176_p2)   ;;  %2178 = vmatprep.subr.bf16.mxu1 (!%p176_p2), %v2620_v1  ;;  %2423 = vmatpush3.bf16.msra.mxu0 (!%p176_p2), %v2619_v0  ;;  %v2624_v5 = vld [vmem:[%s3297_s1 + $0x8] sm:$0xff] (!%p176_p2)   ;;  %v2631_v12 = vld [vmem:[%s3297_s1 + $0x58] sm:$0xff] (!%p176_p2)  }
   0x8   : > { %2179 = vmatpush3.bf16.msra.mxu1 (!%p176_p2), %v2621_v2  ;;  %2424 = vmatprep.subr.bf16.mxu0 (!%p176_p2), %v2622_v3  ;;  %v2628_v7 = vld [vmem:[%s3297_s1 + $0xc0] sm:$0xff] (!%p176_p2)   ;;  %v2632_v13 = vld [vmem:[%s3297_s1 + $0x18] sm:$0xff] (!%p176_p2)   ;;  %v2636_v17 = vld [vmem:[%s3297_s1 + $0xc8] sm:$0xff] (!%p176_p2)  }
   0x9   : > { %2180 = vmatprep.subr.bf16.mxu1 (!%p176_p2), %v2623_v4  ;;  %v2630_v11 = vld [vmem:[%s3297_s1 + $0x80] sm:$0xff] (!%p176_p2)   ;;  %v2638_v19 = vld [vmem:[%s3297_s1 + $0x88] sm:$0xff] (!%p176_p2)   ;;  %v2643_v24 = vld [vmem:[%s3297_s1 + $0x70] sm:$0xff] (!%p176_p2)  }
   0xa   : > { %v2635_v16 = vld [vmem:[%s3297_s1 + $0x60] sm:$0xff] (!%p176_p2)   ;;  %v2639_v20 = vld [vmem:[%s3297_s1 + $0x68] sm:$0xff] (!%p176_p2)   ;;  %v2644_v25 = vld [vmem:[%s3297_s1 + $0xd0] sm:$0xff] (!%p176_p2)  }
   0xb   : > { %2425 = vmatpush3.bf16.msra.mxu0 (!%p176_p2), %v2622_v3  ;;  %v2637_v18 = vld [vmem:[%s3297_s1 + $0x20] sm:$0xff] (!%p176_p2)   ;;  %v2640_v21 = vld [vmem:[%s3297_s1 + $0x28] sm:$0xff] (!%p176_p2)   ;;  %v2645_v26 = vld [vmem:[%s3297_s1 + $0x30] sm:$0xff] (!%p176_p2)  }
   0xc   : > { %2181 = vmatpush3.bf16.msra.mxu1 (!%p176_p2), %v2624_v5  ;;  %2290 = vmatprep.subr.bf16.mxu0 (!%p176_p2), %v2628_v7  ;;  %v2646_v27 = vld [vmem:[%s3297_s1 + $0x90] sm:$0xff] (!%p176_p2)   ;;  %v2647_v28 = vld [vmem:[%s3297_s1 + $0x78] sm:$0xff] (!%p176_p2)   ;;  %v2661_v40 = vld [vmem:[%s3297_s1 + $0xe0] sm:$0xff] (!%p176_p2)  }
   0xd   : > { %s3302_s19 = smov (!%p208_p3, %s1986_s19), 63  ;;  %2182 = vmatprep.subr.bf16.mxu1 %v2627_v6  ;;  %v2648_v29 = vld [vmem:[%s3297_s1 + $0x38] sm:$0xff]   ;;  %v2662_v41 = vld [vmem:[%s3297_s1 + $0xa0] sm:$0xff]   ;;  %v2668_v44 = vld [vmem:[%s3297_s1 + $0xe8] sm:$0xff]  }
   0xe   : > { %s1989_s30 = sshll.u32 %s3302_s19, 2  ;;  %s2610_s8 = smul.u32 20, %s3302_s19  ;;  %v2654_v34 = vld [vmem:[%s3297_s1 + $0xd8] sm:$0xff]   ;;  %v2669_v46 = vld [vmem:[%s3297_s1 + $0xa8] sm:$0xff]   ;;  %v2675_v50 = vld [vmem:[%s3297_s1 + $0xf0] sm:$0xff]  }
   0xf   : > { %s2853_s9 = scalar_lea.vmem %s3298_s2, %s1989_s30  ;;  %v2655_v35 = vld [vmem:[%s3297_s1 + $0x98] sm:$0xff]   ;;  %v2676_v51 = vld [vmem:[%s3297_s1 + $0xb0] sm:$0xff]   ;;  %v2690_v58 = vld [vmem:[%s3297_s1 + $0x100] sm:$0xff]  }
  0x10   : > { %v2625_v8 = vld [vmem:[%s2853_s9] sm:$0xff]   ;;  %v2626_v9 = vld [vmem:[%s2853_s9 + $0x8] sm:$0xff]   ;;  %2183 = vmatpush3.bf16.msra.mxu1 %v2629_v10  ;;  %v2633_v14 = vld [vmem:[%s2853_s9 + $0x10] sm:$0xff]   ;;  %s2916_s22 = scalar_lea.vmem %s3296_s0, %s2610_s8 }
  0x11   : > { %2426 = vmatprep.mubr.msk.bf16.mxu0 %vm523_vm0, %v2625_v8  ;;  %2184 = vmatprep.subr.bf16.mxu1 %v2631_v12  ;;  %v2634_v15 = vld [vmem:[%s2853_s9 + $0x18] sm:$0xff]   ;;  %v2641_v22 = vld [vmem:[%s2853_s9 + $0x20] sm:$0xff]   ;;  %v2642_v23 = vld [vmem:[%s2853_s9 + $0x28] sm:$0xff]  }
  0x12   : > { %2427 = vmatmul.mubr.msk.bf16.vlgmr.msra.gmra.mrb[0].mxu0 %vm523_vm0, %v2626_v9  ;;  %v2649_v30 = vld [vmem:[%s2853_s9 + $0x30] sm:$0xff]   ;;  %v2652_v32 = vld [vmem:[%s2916_s22 + $0x4] ss:$20 sps:$4 sm:$0xff]   ;;  %v2657_v37 = vld [vmem:[%s2916_s22 + $0x2c] ss:$20 sps:$4 sm:$0xff]  }
  0x13   : > { %2291 = vmatpush3.bf16.msra.mxu0 %v2630_v11  ;;  %2430 = vmatprep.mubr.msk.bf16.mxu0 %vm523_vm0, %v2633_v14  ;;  %v2650_v31 = vld [vmem:[%s2916_s22] ss:$20 sps:$4 sm:$0xff]   ;;  %v2653_v33 = vld [vmem:[%s2853_s9 + $0x38] sm:$0xff]   ;;  %v2659_v38 = vld [vmem:[%s2853_s9 + $0x48] sm:$0xff]  }
  0x14   : > { %2185 = vmatpush3.bf16.msra.mxu1 %v2632_v13  ;;  %2292 = vmatprep.subr.bf16.mxu0 %v2636_v17  ;;  %v2656_v36 = vld [vmem:[%s2853_s9 + $0x40] sm:$0xff]   ;;  %v2660_v39 = vld [vmem:[%s2916_s22 + $0x28] ss:$20 sps:$4 sm:$0xff]   ;;  %v2663_v42 = vld [vmem:[%s2853_s9 + $0x50] sm:$0xff]  }
  0x15   : > { %2186 = vmatprep.subr.bf16.mxu1 %v2635_v16  ;;  %1430 = vmatprep.mubr.bf16.mxu1 %v2652_v32  ;;  %v2664_v43 = vld [vmem:[%s2916_s22 + $0x54] ss:$20 sps:$4 sm:$0xff]   ;;  %v2666_v45 = vld [vmem:[%s2853_s9 + $0x58] sm:$0xff]   ;;  %v2667_v47 = vld [vmem:[%s2916_s22 + $0x50] ss:$20 sps:$4 sm:$0xff]  }
  0x16   : > { %v2670_v48 = vld [vmem:[%s2853_s9 + $0x60] sm:$0xff]   ;;  %v2671_v49 = vld [vmem:[%s2916_s22 + $0x7c] ss:$20 sps:$4 sm:$0xff]   ;;  %v2673_v52 = vld [vmem:[%s2853_s9 + $0x68] sm:$0xff]  }
  0x17   : > { %2293 = vmatpush3.bf16.msra.mxu0 %v2638_v19  ;;  %v2674_v53 = vld [vmem:[%s2916_s22 + $0x78] ss:$20 sps:$4 sm:$0xff]   ;;  %v2677_v54 = vld [vmem:[%s2853_s9 + $0x70] sm:$0xff]   ;;  %v2686_v63 = vld [vmem:[%s2916_s22 + $0x8] ss:$20 sps:$4 sm:$0xff]  }
  0x18   : > { %2187 = vmatpush3.bf16.msra.mxu1 %v2637_v18  ;;  %2294 = vmatprep.subr.bf16.mxu0 %v2644_v25  ;;  %v2678_v55 = vld [vmem:[%s2916_s22 + $0xa4] ss:$20 sps:$4 sm:$0xff]   ;;  %v2681_v60 = vld [vmem:[%s2916_s22 + $0xa0] ss:$20 sps:$4 sm:$0xff]   ;;  %v2689_v0 = vld [vmem:[%s2916_s22 + $0xc8] ss:$20 sps:$4 sm:$0xff]  }
  0x19   : > { %2188 = vmatprep.subr.bf16.mxu1 %v2639_v20  ;;  %v2682_v56 = vld [vmem:[%s3297_s1 + $0xf8] sm:$0xff]   ;;  %v2684_v61 = vld [vmem:[%s2916_s22 + $0xcc] ss:$20 sps:$4 sm:$0xff]   ;;  %v2691_v1 = vld [vmem:[%s2916_s22 + $0xf4] ss:$20 sps:$4 sm:$0xff]  }
  0x1a   : > { %2431 = vmatmul.mubr.msk.bf16.gmra.mrb[4].mxu0 %vm523_vm0, %v2634_v15  ;;  %v2683_v57 = vld [vmem:[%s3297_s1 + $0xb8] sm:$0xff]   ;;  %v2688_v62 = vld [vmem:[%s2916_s22 + $0xc] ss:$20 sps:$4 sm:$0xff]   ;;  %v2693_v2 = vld [vmem:[%s2916_s22 + $0x34] ss:$20 sps:$4 sm:$0xff]  }
  0x1b   : > { %2434 = vmatprep.mubr.msk.bf16.mxu0 %vm523_vm0, %v2641_v22  ;;  %2295 = vmatpush3.bf16.msra.mxu0 %v2646_v27  ;;  %v2680_v59 = vld [vmem:[%s2853_s9 + $0x78] sm:$0xff]   ;;  %v2703_v3 = vld [vmem:[%s3297_s1 + $0x108] sm:$0xff]   ;;  %v2722_v4 = vld [vmem:[%s3297_s1 + $0x110] sm:$0xff]  }
  0x1c   : > { %2189 = vmatpush3.bf16.msra.mxu1 %v2640_v21  ;;  %2296 = vmatprep.subr.bf16.mxu0 %v2654_v34  ;;  %v2695_v5 = vld [vmem:[%s2916_s22 + $0xf0] ss:$20 sps:$4 sm:$0xff]   ;;  %v2735_v9 = vld [vmem:[%s3297_s1 + $0x118] sm:$0xff]   ;;  %v2708_v14 = vld [vmem:[%s2916_s22 + $0x140] ss:$20 sps:$4 sm:$0xff]  }
  0x1d   : > { %2190 = vmatprep.subr.bf16.mxu1 %v2643_v24  ;;  %v2696_v6 = vld [vmem:[%s2916_s22 + $0x30] ss:$20 sps:$4 sm:$0xff]   ;;  %v2701_v10 = vld [vmem:[%s2916_s22 + $0x118] ss:$20 sps:$4 sm:$0xff]   ;;  %v2709_v15 = vld [vmem:[%s2916_s22 + $0x80] ss:$20 sps:$4 sm:$0xff]  }
  0x1e   : > { %v2699_v8 = vld [vmem:[%s2916_s22 + $0x5c] ss:$20 sps:$4 sm:$0xff]   ;;  %v2704_v12 = vld [vmem:[%s2916_s22 + $0x144] ss:$20 sps:$4 sm:$0xff]   ;;  %v2710_v16 = vld [vmem:[%s2916_s22 + $0x16c] ss:$20 sps:$4 sm:$0xff]  }
  0x1f   : > { %2297 = vmatpush3.bf16.msra.mxu0 %v2655_v35  ;;  %v2706_v13 = vld [vmem:[%s2916_s22 + $0x84] ss:$20 sps:$4 sm:$0xff]   ;;  %v2714_v18 = vld [vmem:[%s2916_s22 + $0x168] ss:$20 sps:$4 sm:$0xff]   ;;  %v2736_v32 = vld [vmem:[%s2916_s22 + $0x20c] ss:$20 sps:$4 sm:$0xff]  }
  0x20   : > { %2191 = vmatpush3.bf16.msra.mxu1 %v2645_v26  ;;  %2298 = vmatprep.subr.bf16.mxu0 %v2661_v40  ;;  %v2716_v20 = vld [vmem:[%s2916_s22 + $0x194] ss:$20 sps:$4 sm:$0xff]   ;;  %v2720_v22 = vld [vmem:[%s2916_s22 + $0x190] ss:$20 sps:$4 sm:$0xff]   ;;  %v2727_v26 = vld [vmem:[%s2916_s22 + $0x1b8] ss:$20 sps:$4 sm:$0xff]  }
  0x21   : > { %2192 = vmatprep.subr.bf16.mxu1 %v2647_v28  ;;  %v2718_v21 = vld [vmem:[%s2916_s22 + $0xd4] ss:$20 sps:$4 sm:$0xff]   ;;  %v2723_v24 = vld [vmem:[%s2916_s22 + $0x1bc] ss:$20 sps:$4 sm:$0xff]   ;;  %v2729_v28 = vld [vmem:[%s2916_s22 + $0x1e4] ss:$20 sps:$4 sm:$0xff]  }
  0x22   : > { %2435 = vmatmul.mubr.msk.bf16.gmra.mrb[8].mxu0 %vm523_vm0, %v2642_v23  ;;  %v2721_v23 = vld [vmem:[%s2916_s22 + $0xd0] ss:$20 sps:$4 sm:$0xff]  }
  0x23   : > { %2438 = vmatprep.mubr.msk.bf16.mxu0 %vm523_vm0, %v2649_v30  ;;  %2299 = vmatpush3.bf16.msra.mxu0 %v2662_v41  ;;  %v2733_v30 = vld [vmem:[%s2916_s22 + $0x1e0] ss:$20 sps:$4 sm:$0xff]  }
  0x24   : > { %2193 = vmatpush3.bf16.msra.mxu1 %v2648_v29  ;;  %2300 = vmatprep.subr.bf16.mxu0 %v2668_v44  ;;  %v2731_v29 = vld [vmem:[%s2916_s22 + $0x124] ss:$20 sps:$4 sm:$0xff]  }
  0x25   : > { %2498 = vmatprep.subr.bf16.mxu1 %v2628_v7  ;;  %v2697_v7 = vld [vmem:[%s2916_s22 + $0x11c] ss:$20 sps:$4 sm:$0xff]  }
  0x27   : > { %1431 = vmatmul.mubr.bf16.vlgmr.msra.gmra.mrb[0].mxu1 %v2650_v31  ;;  %2301 = vmatpush3.bf16.msra.mxu0 %v2669_v46  ;;  %v2734_v31 = vld [vmem:[%s2916_s22 + $0x120] ss:$20 sps:$4 sm:$0xff]  }
  0x28   : > { %2506 = vmatpush3.bf16.msra.mxu1 %v2630_v11  ;;  %1438 = vmatprep.mubr.bf16.mxu1 %v2657_v37  ;;  %v2702_v11 = vld [vmem:[%s2916_s22 + $0x58] ss:$20 sps:$4 sm:$0xff]   ;;  %v2744_v37 = vld [vmem:[%s2916_s22 + $0x174] ss:$20 sps:$4 sm:$0xff]  }
  0x29   : > { %2499 = vmatprep.subr.bf16.mxu1 %v2636_v17  ;;  %2302 = vmatprep.subr.bf16.mxu0 %v2675_v50  ;;  %v2712_v17 = vld [vmem:[%s2916_s22 + $0xac] ss:$20 sps:$4 sm:$0xff]  }
  0x2a   : > { %2439 = vmatmul.mubr.msk.bf16.gmra.mrb[12].mxu0 %vm523_vm0, %v2653_v33  ;;  %v2738_v33 = vld [vmem:[%s2916_s22 + $0x14c] ss:$20 sps:$4 sm:$0xff]  }
  0x2b   : > { %2442 = vmatprep.mubr.msk.bf16.mxu0 %vm523_vm0, %v2656_v36  ;;  %2303 = vmatpush3.bf16.msra.mxu0 %v2676_v51  ;;  %v2742_v36 = vld [vmem:[%s2916_s22 + $0x234] ss:$20 sps:$4 sm:$0xff]  }
  0x2c   : > { %2507 = vmatpush3.bf16.msra.mxu1 %v2638_v19  ;;  %2304 = vmatprep.subr.bf16.mxu0 %v2682_v56  ;;  %v2715_v19 = vld [vmem:[%s2916_s22 + $0xa8] ss:$20 sps:$4 sm:$0xff]  }
  0x2d   : > { %2500 = vmatprep.subr.bf16.mxu1 %v2644_v25  ;;  %v2725_v25 = vld [vmem:[%s2916_s22 + $0xfc] ss:$20 sps:$4 sm:$0xff]  }
  0x2f   : > { %1439 = vmatmul.mubr.bf16.gmra.mrb[4].mxu1 %v2660_v39  ;;  %2305 = vmatpush3.bf16.msra.mxu0 %v2683_v57  ;;  %v2747_v39 = vld [vmem:[%s2916_s22 + $0x170] ss:$20 sps:$4 sm:$0xff]  }
  0x30   : > { %1446 = vmatprep.mubr.bf16.mxu1 %v2664_v43  ;;  %2508 = vmatpush3.bf16.msra.mxu1 %v2646_v27  ;;  %v2728_v27 = vld [vmem:[%s2916_s22 + $0xf8] ss:$20 sps:$4 sm:$0xff]  }
  0x31   : > { %2501 = vmatprep.subr.bf16.mxu1 %v2654_v34  ;;  %2458 = vmatprep.subr.bf16.mxu0 %v2690_v58  ;;  %v2740_v34 = vld [vmem:[%s2916_s22 + $0x208] ss:$20 sps:$4 sm:$0xff]   ;;  %v2752_v43 = vld [vmem:[%s2916_s22 + $0x38] ss:$20 sps:$4 sm:$0xff]  }
  0x32   : > { %2443 = vmatmul.mubr.msk.bf16.gmra.mrb[16].mxu0 %vm523_vm0, %v2659_v38  ;;  %v2746_v38 = vld [vmem:[%s2916_s22 + $0x230] ss:$20 sps:$4 sm:$0xff]  }
  0x33   : > { %2446 = vmatprep.mubr.msk.bf16.mxu0 %vm523_vm0, %v2663_v42  ;;  %v2751_v42 = vld [vmem:[%s2916_s22 + $0x258] ss:$20 sps:$4 sm:$0xff]  }
  0x34   : > { %2509 = vmatpush3.bf16.msra.mxu1 %v2655_v35  ;;  %v2741_v35 = vld [vmem:[%s2916_s22 + $0x148] ss:$20 sps:$4 sm:$0xff]  }
  0x35   : > { %2502 = vmatprep.subr.bf16.mxu1 %v2661_v40  ;;  %v2748_v40 = vld [vmem:[%s2916_s22 + $0x25c] ss:$20 sps:$4 sm:$0xff]  }
  0x37   : > { %1447 = vmatmul.mubr.bf16.gmra.mrb[8].mxu1 %v2667_v47  ;;  %v2757_v47 = vld [vmem:[%s2916_s22 + $0x88] ss:$20 sps:$4 sm:$0xff]  }
  0x38   : > { %1454 = vmatprep.mubr.bf16.mxu1 %v2671_v49  ;;  %2510 = vmatpush3.bf16.msra.mxu1 %v2662_v41  ;;  %v2750_v41 = vld [vmem:[%s2916_s22 + $0x10] ss:$20 sps:$4 sm:$0xff]  }
  0x39   : > { %2503 = vmatprep.subr.bf16.mxu1 %v2668_v44  ;;  %v2755_v44 = vld [vmem:[%s2916_s22 + $0x19c] ss:$20 sps:$4 sm:$0xff]  }
  0x3a   : > { %2447 = vmatmul.mubr.msk.bf16.gmra.mrb[20].mxu0 %vm523_vm0, %v2666_v45  ;;  %v2756_v45 = vld [vmem:[%s2916_s22 + $0x60] ss:$20 sps:$4 sm:$0xff]   ;;  %v2760_v49 = vld [vmem:[%s2916_s22 + $0xb0] ss:$20 sps:$4 sm:$0xff]  }
  0x3b   : > { %2450 = vmatprep.mubr.msk.bf16.mxu0 %vm523_vm0, %v2670_v48  ;;  %v2758_v48 = vld [vmem:[%s2916_s22 + $0x1c4] ss:$20 sps:$4 sm:$0xff]  }
  0x3c   : > { %2511 = vmatpush3.bf16.msra.mxu1 %v2669_v46  ;;  %v2753_v46 = vld [vmem:[%s2916_s22 + $0x198] ss:$20 sps:$4 sm:$0xff]  }
  0x3d   : > { %2504 = vmatprep.subr.bf16.mxu1 %v2675_v50  ;;  %v2761_v50 = vld [vmem:[%s2916_s22 + $0x1c0] ss:$20 sps:$4 sm:$0xff]  }
  0x3f   : > { %1455 = vmatmul.mubr.bf16.gmra.mrb[12].mxu1 %v2674_v53  ;;  %v2765_v53 = vld [vmem:[%s2916_s22 + $0x100] ss:$20 sps:$4 sm:$0xff]  }
  0x40   : > { %1462 = vmatprep.mubr.bf16.mxu1 %v2678_v55  ;;  %2512 = vmatpush3.bf16.msra.mxu1 %v2676_v51  ;;  %v2762_v51 = vld [vmem:[%s2916_s22 + $0xd8] ss:$20 sps:$4 sm:$0xff]   ;;  %v2767_v55 = vld [vmem:[%s2916_s22 + $0x128] ss:$20 sps:$4 sm:$0xff]  }
  0x41   : > { %2505 = vmatprep.subr.bf16.mxu1 %v2682_v56  ;;  %v2768_v56 = vld [vmem:[%s2916_s22 + $0x214] ss:$20 sps:$4 sm:$0xff]  }
  0x42   : > { %2451 = vmatmul.mubr.msk.bf16.gmra.mrb[24].mxu0 %vm523_vm0, %v2673_v52  ;;  %v2763_v52 = vld [vmem:[%s2916_s22 + $0x1ec] ss:$20 sps:$4 sm:$0xff]  }
  0x43   : > { %2454 = vmatprep.mubr.msk.bf16.mxu0 %vm523_vm0, %v2677_v54  ;;  %v2766_v54 = vld [vmem:[%s2916_s22 + $0x1e8] ss:$20 sps:$4 sm:$0xff]  }
  0x44   : > { %2513 = vmatpush3.bf16.msra.mxu1 %v2683_v57  ;;  %v2770_v57 = vld [vmem:[%s2916_s22 + $0x150] ss:$20 sps:$4 sm:$0xff]  }
  0x47   : > { %1463 = vmatmul.mubr.bf16.gmra.mrb[16].mxu1 %v2681_v60  ;;  %v2773_v60 = vld [vmem:[%s2916_s22 + $0x23c] ss:$20 sps:$4 sm:$0xff]  }
  0x48   : > { %1470 = vmatprep.mubr.bf16.mxu1 %v2684_v61  ;;  %v2775_v61 = vld [vmem:[%s2916_s22 + $0x1a0] ss:$20 sps:$4 sm:$0xff]  }
  0x4a   : > { %2455 = vmatmul.mubr.msk.bf16.gmra.mrb[28].mxu0 %vm523_vm0, %v2680_v59  ;;  %v2772_v59 = vld [vmem:[%s2916_s22 + $0x178] ss:$20 sps:$4 sm:$0xff]  }
  0x4b   : > { %1591 = vmatprep.mubr.bf16.mxu0 %v2688_v62  ;;  %v2776_v62 = vld [vmem:[%s2916_s22 + $0x238] ss:$20 sps:$4 sm:$0xff]  }
  0x4f   : > { %1471 = vmatmul.mubr.bf16.gmra.mrb[20].mxu1 %v2689_v0  ;;  %v2778_v0 = vld [vmem:[%s2916_s22 + $0x264] ss:$20 sps:$4 sm:$0xff]  }
  0x50   : > { %1478 = vmatprep.mubr.bf16.mxu1 %v2691_v1  ;;  %v2780_v1 = vld [vmem:[%s2916_s22 + $0x1f0] ss:$20 sps:$4 sm:$0xff]  }
  0x52   : > { %1592 = vmatmul.mubr.bf16.vlgmr.msra.gmra.mrb[32].mxu0 %v2686_v63  ;;  %v2777_v63 = vld [vmem:[%s2916_s22 + $0x1c8] ss:$20 sps:$4 sm:$0xff]  }
  0x53   : > { %2459 = vmatpush3.bf16.msra.mxu0 %v2690_v58  ;;  %1599 = vmatprep.mubr.bf16.mxu0 %v2693_v2  ;;  %v2771_v58 = vld [vmem:[%s2916_s22 + $0x210] ss:$20 sps:$4 sm:$0xff]   ;;  %v2781_v2 = vld [vmem:[%s2916_s22 + $0x260] ss:$20 sps:$4 sm:$0xff]  }
  0x54   : > { %2460 = vmatprep.subr.bf16.mxu0 %v2703_v3 }
  0x57   : > { %2461 = vmatpush3.bf16.msra.mxu0 %v2703_v3  ;;  %1479 = vmatmul.mubr.bf16.gmra.mrb[24].mxu1 %v2695_v5  ;;  %v2782_v3 = vld [vmem:[%s2916_s22 + $0x218] ss:$20 sps:$4 sm:$0xff]   ;;  %v2784_v5 = vld [vmem:[%s2916_s22 + $0x268] ss:$20 sps:$4 sm:$0xff]  }
  0x58   : > { %2462 = vmatprep.subr.bf16.mxu0 %v2722_v4  ;;  %1486 = vmatprep.mubr.bf16.mxu1 %v2697_v7 }
  0x5a   : > { %1600 = vmatmul.mubr.bf16.gmra.mrb[36].mxu0 %v2696_v6 }
  0x5b   : > { %1607 = vmatprep.mubr.bf16.mxu0 %v2699_v8  ;;  %2463 = vmatpush3.bf16.msra.mxu0 %v2722_v4  ;;  %v2783_v4 = vld [vmem:[%s2916_s22 + $0x240] ss:$20 sps:$4 sm:$0xff]   ;;  %s1991_s22 = sshll.u32 %s3302_s19, 3 }
  0x5c   : > { %2464 = vmatprep.subr.bf16.mxu0 %v2735_v9  ;;  %s3185_s8 = scalar_lea.vmem %s3300_s4, %s1991_s22 }
  0x5f   : > { %2465 = vmatpush3.bf16.msra.mxu0 %v2735_v9  ;;  %1487 = vmatmul.mubr.bf16.gmra.mrb[28].mxu1 %v2701_v10 }
  0x60   : > { %1494 = vmatprep.mubr.bf16.mxu1 %v2704_v12 }
  0x62   : > { %1608 = vmatmul.mubr.bf16.gmra.mrb[40].mxu0 %v2702_v11 }
  0x63   : > { %1615 = vmatprep.mubr.bf16.mxu0 %v2706_v13 }
  0x67   : > { %1495 = vmatmul.mubr.bf16.gmra.mrb[32].mxu1 %v2708_v14 }
  0x68   : > { %1502 = vmatprep.mubr.bf16.mxu1 %v2710_v16 }
  0x6a   : > { %1616 = vmatmul.mubr.bf16.gmra.mrb[44].mxu0 %v2709_v15 }
  0x6b   : > { %1623 = vmatprep.mubr.bf16.mxu0 %v2712_v17 }
  0x6f   : > { %1503 = vmatmul.mubr.bf16.gmra.mrb[36].mxu1 %v2714_v18 }
  0x70   : > { %1510 = vmatprep.mubr.bf16.mxu1 %v2716_v20 }
  0x72   : > { %1624 = vmatmul.mubr.bf16.gmra.mrb[48].mxu0 %v2715_v19 }
  0x73   : > { %1631 = vmatprep.mubr.bf16.mxu0 %v2718_v21 }
  0x77   : > { %1511 = vmatmul.mubr.bf16.gmra.mrb[40].mxu1 %v2720_v22 }
  0x78   : > { %1518 = vmatprep.mubr.bf16.mxu1 %v2723_v24 }
  0x7a   : > { %1632 = vmatmul.mubr.bf16.gmra.mrb[52].mxu0 %v2721_v23 }
  0x7b   : > { %1639 = vmatprep.mubr.bf16.mxu0 %v2725_v25 }
  0x7f   : > { %1519 = vmatmul.mubr.bf16.gmra.mrb[44].mxu1 %v2727_v26 }
  0x80   : > { %1526 = vmatprep.mubr.bf16.mxu1 %v2729_v28 }
  0x82   : > { %1640 = vmatmul.mubr.bf16.gmra.mrb[56].mxu0 %v2728_v27 }
  0x83   : > { %1647 = vmatprep.mubr.bf16.mxu0 %v2731_v29 }
  0x87   : > { %1527 = vmatmul.mubr.bf16.gmra.mrb[48].mxu1 %v2733_v30 }
  0x88   : > { %1534 = vmatprep.mubr.bf16.mxu1 %v2736_v32 }
  0x8a   : > { %1648 = vmatmul.mubr.bf16.gmra.mrb[60].mxu0 %v2734_v31 }
  0x8b   : > { %1655 = vmatprep.mubr.bf16.mxu0 %v2738_v33 }
  0x8f   : > { %1535 = vmatmul.mubr.bf16.gmra.mrb[52].mxu1 %v2740_v34 }
  0x90   : > { %1542 = vmatprep.mubr.bf16.mxu1 %v2742_v36 }
  0x92   : > { %1656 = vmatmul.mubr.bf16.gmra.mrb[64].mxu0 %v2741_v35 }
  0x93   : > { %1663 = vmatprep.mubr.bf16.mxu0 %v2744_v37 }
  0x97   : > { %1543 = vmatmul.mubr.bf16.gmra.mrb[56].mxu1 %v2746_v38 }
  0x98   : > { %1550 = vmatprep.mubr.bf16.mxu1 %v2748_v40 }
  0x9a   : > { %1664 = vmatmul.mubr.bf16.gmra.mrb[68].mxu0 %v2747_v39 }
  0x9b   : > { %2466 = vmatprep.mubr.msk.bf16.mxu0 %vm1349_vm1, %v2750_v41 }
  0x9f   : > { %1551 = vmatmul.mubr.bf16.gmra.mrb[60].mxu1 %v2751_v42 }
  0xa0   : > { %1671 = vmatprep.mubr.bf16.mxu1 %v2755_v44 }
  0xa2   : > { %2467 = vmatmul.mubr.msk.bf16.vlgmr.msra.gmra.mrb[0].mxu0 %vm1349_vm1, %v2752_v43 }
  0xa3   : > { %2470 = vmatprep.mubr.msk.bf16.mxu0 %vm1349_vm1, %v2756_v45 }
  0xa7   : > { %1672 = vmatmul.mubr.bf16.vlgmr.msra.gmra.mrb[64].mxu1 %v2753_v46 }
  0xa8   : > { %1679 = vmatprep.mubr.bf16.mxu1 %v2758_v48 }
  0xaa   : > { %2471 = vmatmul.mubr.msk.bf16.gmra.mrb[4].mxu0 %vm1349_vm1, %v2757_v47 }
  0xab   : > { %2474 = vmatprep.mubr.msk.bf16.mxu0 %vm1349_vm1, %v2760_v49 }
  0xaf   : > { %1680 = vmatmul.mubr.bf16.gmra.mrb[68].mxu1 %v2761_v50 }
  0xb0   : > { %1687 = vmatprep.mubr.bf16.mxu1 %v2763_v52 }
  0xb2   : > { %2475 = vmatmul.mubr.msk.bf16.gmra.mrb[8].mxu0 %vm1349_vm1, %v2762_v51 }
  0xb3   : > { %2478 = vmatprep.mubr.msk.bf16.mxu0 %vm1349_vm1, %v2765_v53 }
  0xb7   : > { %1688 = vmatmul.mubr.bf16.gmra.mrb[72].mxu1 %v2766_v54 }
  0xb8   : > { %1695 = vmatprep.mubr.bf16.mxu1 %v2768_v56 }
  0xba   : > { %2479 = vmatmul.mubr.msk.bf16.gmra.mrb[12].mxu0 %vm1349_vm1, %v2767_v55 }
  0xbb   : > { %2482 = vmatprep.mubr.msk.bf16.mxu0 %vm1349_vm1, %v2770_v57 }
  0xbf   : > { %1696 = vmatmul.mubr.bf16.gmra.mrb[76].mxu1 %v2771_v58 }
  0xc0   : > { %1703 = vmatprep.mubr.bf16.mxu1 %v2773_v60 }
  0xc2   : > { %2483 = vmatmul.mubr.msk.bf16.gmra.mrb[16].mxu0 %vm1349_vm1, %v2772_v59 }
  0xc3   : > { %2486 = vmatprep.mubr.msk.bf16.mxu0 %vm1349_vm1, %v2775_v61 }
  0xc7   : > { %1704 = vmatmul.mubr.bf16.gmra.mrb[80].mxu1 %v2776_v62 }
  0xc8   : > { %1711 = vmatprep.mubr.bf16.mxu1 %v2778_v0 }
  0xca   : > { %2487 = vmatmul.mubr.msk.bf16.gmra.mrb[20].mxu0 %vm1349_vm1, %v2777_v63 }
  0xcb   : > { %2490 = vmatprep.mubr.msk.bf16.mxu0 %vm1349_vm1, %v2780_v1 }
  0xcf   : > { %1712 = vmatmul.mubr.bf16.gmra.mrb[84].mxu1 %v2781_v2 }
  0xd2   : > { %2491 = vmatmul.mubr.msk.bf16.gmra.mrb[24].mxu0 %vm1349_vm1, %v2782_v3 }
  0xd3   : > { %2494 = vmatprep.mubr.msk.bf16.mxu0 %vm1349_vm1, %v2783_v4 }
  0xda   : > { %2495 = vmatmul.mubr.msk.bf16.gmra.mrb[28].mxu0 %vm1349_vm1, %v2784_v5 }
  0xfa   : > { %v2194_v6 = vpop.f32.mrb[0].mxu1 }
  0xfb   : > { %v2195_v7 = vpop.f32.mrb[1].mxu1 }
  0xfc   : > { %v2196_v8 = vadd.f32 %v2195_v7, %v2194_v6  ;;  %v2197_v9 = vpop.f32.mrb[2].mxu1 }
  0xfd   : > { %v2198_v10 = vpop.f32.mrb[3].mxu1 }
  0xfe   : > { %v2199_v11 = vadd.f32 %v2198_v10, %v2197_v9 }
 0x102   : > { %v2200_v12 = vpop.f32.mrb[4].mxu1 }
 0x103   : > { %v2201_v13 = vpop.f32.mrb[5].mxu1 }
 0x104   : > { %v2202_v14 = vadd.f32 %v2201_v13, %v2200_v12  ;;  %v2203_v15 = vpop.f32.mrb[6].mxu1 }
 0x105   : > { %v2204_v16 = vpop.f32.mrb[7].mxu1 }
 0x106   : > { %v2205_v17 = vadd.f32 %v2204_v16, %v2203_v15 }
 0x10a   : > { %v2206_v18 = vpop.f32.mrb[8].mxu1 }
 0x10b   : > { %v2207_v19 = vpop.f32.mrb[9].mxu1 }
 0x10c   : > { %v2208_v20 = vadd.f32 %v2207_v19, %v2206_v18  ;;  %v2209_v21 = vpop.f32.mrb[10].mxu1 }
 0x10d   : > { %v2210_v22 = vpop.f32.mrb[11].mxu1 }
 0x10e   : > { %v2211_v23 = vadd.f32 %v2210_v22, %v2209_v21 }
 0x112   : > { %v2212_v24 = vpop.f32.mrb[12].mxu1 }
 0x113   : > { %v2213_v25 = vpop.f32.mrb[13].mxu1 }
 0x114   : > { %v3082_v26 = vadd.f32 %v2213_v25, %v2212_v24  ;;  %v2215_v27 = vpop.f32.mrb[14].mxu1 }
 0x115   : > { %v2216_v28 = vpop.f32.mrb[15].mxu1 }
 0x116   : > { %v2217_v29 = vadd.f32 %v2216_v28, %v2215_v27 }
 0x11a   : > { %v2218_v30 = vpop.f32.mrb[16].mxu1 }
 0x11b   : > { %v2219_v31 = vpop.f32.mrb[17].mxu1 }
 0x11c   : > { %v3084_v32 = vadd.f32 %v2219_v31, %v2218_v30  ;;  %v2221_v33 = vpop.f32.mrb[18].mxu1 }
 0x11d   : > { %v2222_v34 = vpop.f32.mrb[19].mxu1 }
 0x11e   : > { %v3086_v35 = vadd.f32 %v2222_v34, %v2221_v33 }
 0x122   : > { %v2224_v37 = vpop.f32.mrb[20].mxu1 }
 0x123   : > { %v2225_v39 = vpop.f32.mrb[21].mxu1 }
 0x124   : > { %v3088_v42 = vadd.f32 %v2225_v39, %v2224_v37  ;;  %v2227_v43 = vpop.f32.mrb[22].mxu1 }
 0x125   : > { %v2306_v36 = vpop.f32.mrb[32].mxu0  ;;  %v2228_v45 = vpop.f32.mrb[23].mxu1 }
 0x126   : > { %v2307_v38 = vpop.f32.mrb[33].mxu0  ;;  %v3090_v47 = vadd.f32 %v2228_v45, %v2227_v43 }
 0x127   : > { %v2308_v40 = vadd.f32 %v2307_v38, %v2306_v36  ;;  %v2309_v41 = vpop.f32.mrb[34].mxu0 }
 0x128   : > { %v2310_v44 = vpop.f32.mrb[35].mxu0 }
 0x129   : > { %v2311_v46 = vadd.f32 %v2310_v44, %v2309_v41  ;;  %v3092_v48 = vadd.f32 %v2308_v40, %v2196_v8 }
 0x12a   : > { %v2230_v51 = vpop.f32.mrb[24].mxu1 }
 0x12b   : > { %v3094_v49 = vadd.f32 %v2311_v46, %v2199_v11  ;;  %v2231_v53 = vpop.f32.mrb[25].mxu1 }
 0x12c   : > { %v3096_v56 = vadd.f32 %v2231_v53, %v2230_v51  ;;  %v2233_v57 = vpop.f32.mrb[26].mxu1 }
 0x12d   : > { %v2312_v50 = vpop.f32.mrb[36].mxu0  ;;  %v2234_v59 = vpop.f32.mrb[27].mxu1 }
 0x12e   : > { %v2313_v52 = vpop.f32.mrb[37].mxu0  ;;  %v3098_v61 = vadd.f32 %v2234_v59, %v2233_v57 }
 0x12f   : > { %v2314_v54 = vadd.f32 %v2313_v52, %v2312_v50  ;;  %v2315_v55 = vpop.f32.mrb[38].mxu0 }
 0x130   : > { %v2316_v58 = vpop.f32.mrb[39].mxu0 }
 0x131   : > { %v2317_v60 = vadd.f32 %v2316_v58, %v2315_v55  ;;  %v3100_v62 = vadd.f32 %v2314_v54, %v2202_v14 }
 0x132   : > { %v2236_v1 = vpop.f32.mrb[28].mxu1 }
 0x133   : > { %v3102_v63 = vadd.f32 %v2317_v60, %v2205_v17  ;;  %v2237_v3 = vpop.f32.mrb[29].mxu1 }
 0x134   : > { %v3104_v6 = vadd.f32 %v2237_v3, %v2236_v1  ;;  %v2239_v7 = vpop.f32.mrb[30].mxu1 }
 0x135   : > { %v2318_v0 = vpop.f32.mrb[40].mxu0  ;;  %v2240_v9 = vpop.f32.mrb[31].mxu1 }
 0x136   : > { %v2319_v2 = vpop.f32.mrb[41].mxu0  ;;  %v3106_v11 = vadd.f32 %v2240_v9, %v2239_v7 }
 0x137   : > { %v2320_v4 = vadd.f32 %v2319_v2, %v2318_v0  ;;  %v2321_v5 = vpop.f32.mrb[42].mxu0 }
 0x138   : > { %v2322_v8 = vpop.f32.mrb[43].mxu0 }
 0x139   : > { %v2323_v10 = vadd.f32 %v2322_v8, %v2321_v5  ;;  %v3108_v12 = vadd.f32 %v2320_v4, %v2208_v20 }
 0x13a   : > { %v2242_v15 = vpop.f32.mrb[32].mxu1 }
 0x13b   : > { %v3110_v13 = vadd.f32 %v2323_v10, %v2211_v23  ;;  %v2243_v17 = vpop.f32.mrb[33].mxu1 }
 0x13c   : > { %v3112_v21 = vadd.f32 %v2243_v17, %v2242_v15  ;;  %v2245_v22 = vpop.f32.mrb[34].mxu1 }
 0x13d   : > { %v2324_v14 = vpop.f32.mrb[44].mxu0  ;;  %v2246_v25 = vpop.f32.mrb[35].mxu1 }
 0x13e   : > { %v2325_v16 = vpop.f32.mrb[45].mxu0  ;;  %v3114_v28 = vadd.f32 %v2246_v25, %v2245_v22 }
 0x13f   : > { %v2326_v18 = vadd.f32 %v2325_v16, %v2324_v14  ;;  %v2327_v19 = vpop.f32.mrb[46].mxu0 }
 0x140   : > { %v2328_v24 = vpop.f32.mrb[47].mxu0 }
 0x141   : > { %v2329_v27 = vadd.f32 %v2328_v24, %v2327_v19  ;;  %v3117_v30 = vadd.f32 %v2326_v18, %v3082_v26 }
 0x142   : > { %v2248_v31 = vpop.f32.mrb[36].mxu1 }
 0x143   : > { %v3119_v20 = vadd.f32 %v2329_v27, %v2217_v29  ;;  %v2249_v34 = vpop.f32.mrb[37].mxu1 }
 0x144   : > { %v3121_v38 = vadd.f32 %v2249_v34, %v2248_v31  ;;  %v2251_v39 = vpop.f32.mrb[38].mxu1 }
 0x145   : > { %v2330_v23 = vpop.f32.mrb[48].mxu0  ;;  %v2252_v41 = vpop.f32.mrb[39].mxu1 }
 0x146   : > { %v2331_v33 = vpop.f32.mrb[49].mxu0  ;;  %v3123_v44 = vadd.f32 %v2252_v41, %v2251_v39 }
 0x147   : > { %v2332_v36 = vadd.f32 %v2331_v33, %v2330_v23  ;;  %v2333_v37 = vpop.f32.mrb[50].mxu0 }
 0x148   : > { %v2334_v40 = vpop.f32.mrb[51].mxu0 }
 0x149   : > { %v2335_v43 = vadd.f32 %v2334_v40, %v2333_v37  ;;  %v3126_v45 = vadd.f32 %v2332_v36, %v3084_v32 }
 0x14a   : > { %v2254_v46 = vpop.f32.mrb[40].mxu1 }
 0x14b   : > { %v3129_v26 = vadd.f32 %v2335_v43, %v3086_v35  ;;  %v2255_v51 = vpop.f32.mrb[41].mxu1 }
 0x14c   : > { %v3131_v54 = vadd.f32 %v2255_v51, %v2254_v46  ;;  %v2257_v55 = vpop.f32.mrb[42].mxu1 }
 0x14d   : > { %v2336_v29 = vpop.f32.mrb[52].mxu0  ;;  %v2258_v58 = vpop.f32.mrb[43].mxu1 }
 0x14e   : > { %v2337_v50 = vpop.f32.mrb[53].mxu0  ;;  %v3133_v60 = vadd.f32 %v2258_v58, %v2257_v55 }
 0x14f   : > { %v2338_v52 = vadd.f32 %v2337_v50, %v2336_v29  ;;  %v2339_v53 = vpop.f32.mrb[54].mxu0 }
 0x150   : > { %v2340_v57 = vpop.f32.mrb[55].mxu0 }
 0x151   : > { %v2341_v59 = vadd.f32 %v2340_v57, %v2339_v53  ;;  %v3136_v32 = vadd.f32 %v2338_v52, %v3088_v42 }
 0x152   : > { %v2260_v1 = vpop.f32.mrb[44].mxu1 }
 0x153   : > { %v3139_v35 = vadd.f32 %v2341_v59, %v3090_v47  ;;  %v2261_v3 = vpop.f32.mrb[45].mxu1 }
 0x154   : > { %v3141_v7 = vadd.f32 %v2261_v3, %v2260_v1  ;;  %v2263_v8 = vpop.f32.mrb[46].mxu1 }
 0x155   : > { %v2342_v0 = vpop.f32.mrb[56].mxu0  ;;  %v2264_v10 = vpop.f32.mrb[47].mxu1 }
 0x156   : > { %v2343_v2 = vpop.f32.mrb[57].mxu0  ;;  %v3143_v15 = vadd.f32 %v2264_v10, %v2263_v8 }
 0x157   : > { %v2344_v4 = vadd.f32 %v2343_v2, %v2342_v0  ;;  %v2345_v5 = vpop.f32.mrb[58].mxu0 }
 0x158   : > { %v2346_v9 = vpop.f32.mrb[59].mxu0 }
 0x159   : > { %v2347_v14 = vadd.f32 %v2346_v9, %v2345_v5  ;;  %v3146_v42 = vadd.f32 %v2344_v4, %v3096_v56 }
 0x15a   : > { %v2266_v17 = vpop.f32.mrb[48].mxu1 }
 0x15b   : > { %v3149_v47 = vadd.f32 %v2347_v14, %v3098_v61  ;;  %v2267_v19 = vpop.f32.mrb[49].mxu1 }
 0x15c   : > { %v3151_v25 = vadd.f32 %v2267_v19, %v2266_v17  ;;  %v2269_v27 = vpop.f32.mrb[50].mxu1 }
 0x15d   : > { %v2348_v16 = vpop.f32.mrb[60].mxu0  ;;  %v2270_v31 = vpop.f32.mrb[51].mxu1 }
 0x15e   : > { %v2349_v18 = vpop.f32.mrb[61].mxu0  ;;  %v3153_v34 = vadd.f32 %v2270_v31, %v2269_v27 }
 0x15f   : > { %v2350_v22 = vadd.f32 %v2349_v18, %v2348_v16  ;;  %v2351_v24 = vpop.f32.mrb[62].mxu0 }
 0x160   : > { %v2352_v23 = vpop.f32.mrb[63].mxu0 }
 0x161   : > { %v2353_v33 = vadd.f32 %v2352_v23, %v2351_v24  ;;  %v3156_v56 = vadd.f32 %v2350_v22, %v3104_v6 }
 0x162   : > { %v2272_v37 = vpop.f32.mrb[52].mxu1 }
 0x163   : > { %v3159_v61 = vadd.f32 %v2353_v33, %v3106_v11  ;;  %v2273_v40 = vpop.f32.mrb[53].mxu1 }
 0x164   : > { %v3161_v29 = vadd.f32 %v2273_v40, %v2272_v37  ;;  %v2275_v46 = vpop.f32.mrb[54].mxu1 }
 0x165   : > { %v2354_v36 = vpop.f32.mrb[64].mxu0  ;;  %v2276_v51 = vpop.f32.mrb[55].mxu1 }
 0x166   : > { %v2355_v39 = vpop.f32.mrb[65].mxu0  ;;  %v3163_v53 = vadd.f32 %v2276_v51, %v2275_v46 }
 0x167   : > { %v2356_v41 = vadd.f32 %v2355_v39, %v2354_v36  ;;  %v2357_v43 = vpop.f32.mrb[66].mxu0 }
 0x168   : > { %v2358_v50 = vpop.f32.mrb[67].mxu0 }
 0x169   : > { %v2359_v52 = vadd.f32 %v2358_v50, %v2357_v43  ;;  %v3166_v6 = vadd.f32 %v2356_v41, %v3112_v21 }
 0x16a   : > { %v2278_v57 = vpop.f32.mrb[56].mxu1 }
 0x16b   : > { %v3169_v11 = vadd.f32 %v2359_v52, %v3114_v28  ;;  %v2279_v59 = vpop.f32.mrb[57].mxu1 }
 0x16c   : > { %v3171_v2 = vadd.f32 %v2279_v59, %v2278_v57  ;;  %v2281_v3 = vpop.f32.mrb[58].mxu1 }
 0x16d   : > { %v2360_v55 = vpop.f32.mrb[68].mxu0  ;;  %v2282_v5 = vpop.f32.mrb[59].mxu1 }
 0x16e   : > { %v2361_v58 = vpop.f32.mrb[69].mxu0  ;;  %v3173_v9 = vadd.f32 %v2282_v5, %v2281_v3 }
 0x16f   : > { %v2362_v0 = vadd.f32 %v2361_v58, %v2360_v55  ;;  %v2363_v1 = vpop.f32.mrb[70].mxu0 }
 0x170   : > { %v2364_v4 = vpop.f32.mrb[71].mxu0 }
 0x171   : > { %v2365_v8 = vadd.f32 %v2364_v4, %v2363_v1  ;;  %v3176_v21 = vadd.f32 %v2362_v0, %v3121_v38 }
 0x172   : > { %v2284_v14 = vpop.f32.mrb[60].mxu1 }
 0x173   : > { %v3180_v28 = vadd.f32 %v2365_v8, %v3123_v44  ;;  %v2285_v38 = vpop.f32.mrb[61].mxu1 }
 0x174   : > { %v3189_v44 = vadd.f32 %v2285_v38, %v2284_v14  ;;  %v2287_v22 = vpop.f32.mrb[62].mxu1 }
 0x175   : > { %v2468_v10 = vpop.f32.mrb[0].mxu0  ;;  %v2288_v23 = vpop.f32.mrb[63].mxu1 }
 0x176   : > { %v2515_v16 = vadd.f32 %v3100_v62, %v2468_v10  ;;  %v1754_v17 = vpop.f32.mrb[1].mxu0  ;;  %v3197_v62 = vadd.f32 %v2288_v23, %v2287_v22 }
 0x177   : > { %v2517_v18 = vadd.f32 %v3092_v48, %v1754_v17  ;;  %v2469_v19 = vpop.f32.mrb[2].mxu0 }
 0x178   : > { %1883 = vst.msk [vmem:[%s3185_s8 + $0x10] sm:$0xff] %vm1349_vm1, %v2515_v16  ;;  %v2519_v24 = vadd.f32 %v3102_v63, %v2469_v19  ;;  %v1757_v27 = vpop.f32.mrb[3].mxu0 }
 0x179   : > { %1881 = vst.msk [vmem:[%s3185_s8] sm:$0xff] %vm1349_vm1, %v2517_v18  ;;  %v2521_v31 = vadd.f32 %v3094_v49, %v1757_v27 }
 0x17a   : > { %1884 = vst.msk [vmem:[%s3185_s8 + $0x18] sm:$0xff] %vm1349_vm1, %v2519_v24  ;;  %v2366_v48 = vpop.f32.mrb[64].mxu1 }
 0x17b   : > { %1882 = vst.msk [vmem:[%s3185_s8 + $0x8] sm:$0xff] %vm1349_vm1, %v2521_v31  ;;  %v2367_v63 = vpop.f32.mrb[65].mxu1 }
 0x17c   : > { %v2368_v39 = vadd.f32 %v2367_v63, %v2366_v48  ;;  %v2369_v41 = vpop.f32.mrb[66].mxu1 }
 0x17d   : > { %v2472_v33 = vpop.f32.mrb[4].mxu0  ;;  %v2370_v46 = vpop.f32.mrb[67].mxu1 }
 0x17e   : > { %v2523_v36 = vadd.f32 %v3117_v30, %v2472_v33  ;;  %v1770_v37 = vpop.f32.mrb[5].mxu0  ;;  %v2371_v51 = vadd.f32 %v2370_v46, %v2369_v41  ;;  %v3212_v52 = vadd.f32 %v2368_v39, %v3131_v54 }
 0x17f   : > { %v2525_v40 = vadd.f32 %v3108_v12, %v1770_v37  ;;  %v2473_v49 = vpop.f32.mrb[6].mxu0 }
 0x180   : > { %1887 = vst.msk [vmem:[%s3185_s8 + $0x30] sm:$0xff] %vm1349_vm1, %v2523_v36  ;;  %v2527_v43 = vadd.f32 %v3119_v20, %v2473_v49  ;;  %v1773_v50 = vpop.f32.mrb[7].mxu0  ;;  %v3219_v12 = vadd.f32 %v2371_v51, %v3133_v60 }
 0x181   : > { %1885 = vst.msk [vmem:[%s3185_s8 + $0x20] sm:$0xff] %vm1349_vm1, %v2525_v40  ;;  %v2529_v30 = vadd.f32 %v3110_v13, %v1773_v50 }
 0x182   : > { %1888 = vst.msk [vmem:[%s3185_s8 + $0x38] sm:$0xff] %vm1349_vm1, %v2527_v43  ;;  %v2372_v20 = vpop.f32.mrb[68].mxu1 }
 0x183   : > { %1886 = vst.msk [vmem:[%s3185_s8 + $0x28] sm:$0xff] %vm1349_vm1, %v2529_v30  ;;  %v2373_v58 = vpop.f32.mrb[69].mxu1 }
 0x184   : > { %v2374_v13 = vadd.f32 %v2373_v58, %v2372_v20  ;;  %v2375_v0 = vpop.f32.mrb[70].mxu1 }
 0x185   : > { %v2476_v55 = vpop.f32.mrb[8].mxu0  ;;  %v2376_v4 = vpop.f32.mrb[71].mxu1 }
 0x186   : > { %v2531_v57 = vadd.f32 %v3136_v32, %v2476_v55  ;;  %v1786_v59 = vpop.f32.mrb[9].mxu0  ;;  %v2377_v5 = vadd.f32 %v2376_v4, %v2375_v0  ;;  %v2554_v8 = vadd.f32 %v2374_v13, %v3141_v7 }
 0x187   : > { %v2533_v54 = vadd.f32 %v3126_v45, %v1786_v59  ;;  %v2477_v1 = vpop.f32.mrb[10].mxu0 }
 0x188   : > { %1891 = vst.msk [vmem:[%s3185_s8 + $0x50] sm:$0xff] %vm1349_vm1, %v2531_v57  ;;  %v2535_v3 = vadd.f32 %v3139_v35, %v2477_v1  ;;  %v1789_v60 = vpop.f32.mrb[11].mxu0  ;;  %v2558_v45 = vadd.f32 %v2377_v5, %v3143_v15 }
 0x189   : > { %1889 = vst.msk [vmem:[%s3185_s8 + $0x40] sm:$0xff] %vm1349_vm1, %v2533_v54  ;;  %v2537_v32 = vadd.f32 %v3129_v26, %v1789_v60 }
 0x18a   : > { %1892 = vst.msk [vmem:[%s3185_s8 + $0x58] sm:$0xff] %vm1349_vm1, %v2535_v3  ;;  %v2378_v10 = vpop.f32.mrb[72].mxu1 }
 0x18b   : > { %1890 = vst.msk [vmem:[%s3185_s8 + $0x48] sm:$0xff] %vm1349_vm1, %v2537_v32  ;;  %v2379_v16 = vpop.f32.mrb[73].mxu1 }
 0x18c   : > { %v2380_v38 = vadd.f32 %v2379_v16, %v2378_v10  ;;  %v2381_v18 = vpop.f32.mrb[74].mxu1 }
 0x18d   : > { %v2480_v14 = vpop.f32.mrb[12].mxu0  ;;  %v2382_v22 = vpop.f32.mrb[75].mxu1 }
 0x18e   : > { %v2539_v35 = vadd.f32 %v3156_v56, %v2480_v14  ;;  %v1802_v17 = vpop.f32.mrb[13].mxu0  ;;  %v2383_v15 = vadd.f32 %v2382_v22, %v2381_v18  ;;  %v2564_v27 = vadd.f32 %v2380_v38, %v3151_v25 }
 0x18f   : > { %v2541_v26 = vadd.f32 %v3146_v42, %v1802_v17  ;;  %v2481_v7 = vpop.f32.mrb[14].mxu0 }
 0x190   : > { %1895 = vst.msk [vmem:[%s3185_s8 + $0x70] sm:$0xff] %vm1349_vm1, %v2539_v35  ;;  %v2543_v19 = vadd.f32 %v3159_v61, %v2481_v7  ;;  %v1805_v24 = vpop.f32.mrb[15].mxu0  ;;  %v2568_v42 = vadd.f32 %v2383_v15, %v3153_v34 }
 0x191   : > { %1893 = vst.msk [vmem:[%s3185_s8 + $0x60] sm:$0xff] %vm1349_vm1, %v2541_v26  ;;  %v2545_v56 = vadd.f32 %v3149_v47, %v1805_v24 }
 0x192   : > { %1896 = vst.msk [vmem:[%s3185_s8 + $0x78] sm:$0xff] %vm1349_vm1, %v2543_v19  ;;  %v2384_v23 = vpop.f32.mrb[76].mxu1 }
 0x193   : > { %1894 = vst.msk [vmem:[%s3185_s8 + $0x68] sm:$0xff] %vm1349_vm1, %v2545_v56  ;;  %v2385_v48 = vpop.f32.mrb[77].mxu1 }
 0x194   : > { %v2386_v36 = vadd.f32 %v2385_v48, %v2384_v23  ;;  %v2387_v63 = vpop.f32.mrb[78].mxu1 }
 0x195   : > { %v2484_v31 = vpop.f32.mrb[16].mxu0  ;;  %v2388_v39 = vpop.f32.mrb[79].mxu1 }
 0x196   : > { %v2547_v61 = vadd.f32 %v3176_v21, %v2484_v31  ;;  %v1818_v33 = vpop.f32.mrb[17].mxu0  ;;  %v2389_v34 = vadd.f32 %v2388_v39, %v2387_v63  ;;  %v2562_v41 = vadd.f32 %v2386_v36, %v3161_v29 }
 0x197   : > { %v2549_v47 = vadd.f32 %v3166_v6, %v1818_v33  ;;  %v2485_v25 = vpop.f32.mrb[18].mxu0 }
 0x198   : > { %1899 = vst.msk [vmem:[%s3185_s8 + $0x90] sm:$0xff] %vm1349_vm1, %v2547_v61  ;;  %v2551_v37 = vadd.f32 %v3180_v28, %v2485_v25  ;;  %v1821_v40 = vpop.f32.mrb[19].mxu0  ;;  %v2566_v6 = vadd.f32 %v2389_v34, %v3163_v53 }
 0x199   : > { %1897 = vst.msk [vmem:[%s3185_s8 + $0x80] sm:$0xff] %vm1349_vm1, %v2549_v47  ;;  %v2553_v21 = vadd.f32 %v3169_v11, %v1821_v40 }
 0x19a   : > { %1900 = vst.msk [vmem:[%s3185_s8 + $0x98] sm:$0xff] %vm1349_vm1, %v2551_v37  ;;  %v2390_v49 = vpop.f32.mrb[80].mxu1 }
 0x19b   : > { %1898 = vst.msk [vmem:[%s3185_s8 + $0x88] sm:$0xff] %vm1349_vm1, %v2553_v21  ;;  %v2391_v46 = vpop.f32.mrb[81].mxu1 }
 0x19c   : > { %v2392_v51 = vadd.f32 %v2391_v46, %v2390_v49  ;;  %v2393_v11 = vpop.f32.mrb[82].mxu1 }
 0x19d   : > { %v2488_v43 = vpop.f32.mrb[20].mxu0  ;;  %v2394_v55 = vpop.f32.mrb[83].mxu1 }
 0x19e   : > { %v2555_v28 = vadd.f32 %v2554_v8, %v2488_v43  ;;  %v1834_v50 = vpop.f32.mrb[21].mxu0  ;;  %v2395_v53 = vadd.f32 %v2394_v55, %v2393_v11  ;;  %v2572_v59 = vadd.f32 %v2392_v51, %v3171_v2 }
 0x19f   : > { %v2557_v30 = vadd.f32 %v3212_v52, %v1834_v50  ;;  %v2489_v20 = vpop.f32.mrb[22].mxu0 }
 0x1a0   : > { %1903 = vst.msk [vmem:[%s3185_s8 + $0xb0] sm:$0xff] %vm1349_vm1, %v2555_v28  ;;  %v2559_v29 = vadd.f32 %v2558_v45, %v2489_v20  ;;  %v1837_v57 = vpop.f32.mrb[23].mxu0  ;;  %v2576_v52 = vadd.f32 %v2395_v53, %v3173_v9 }
 0x1a1   : > { %1901 = vst.msk [vmem:[%s3185_s8 + $0xa0] sm:$0xff] %vm1349_vm1, %v2557_v30  ;;  %v2561_v58 = vadd.f32 %v3219_v12, %v1837_v57 }
 0x1a2   : > { %1904 = vst.msk [vmem:[%s3185_s8 + $0xb8] sm:$0xff] %vm1349_vm1, %v2559_v29  ;;  %v2396_v13 = vpop.f32.mrb[84].mxu1 }
 0x1a3   : > { %1902 = vst.msk [vmem:[%s3185_s8 + $0xa8] sm:$0xff] %vm1349_vm1, %v2561_v58  ;;  %v2397_v1 = vpop.f32.mrb[85].mxu1 }
 0x1a4   : > { %v2398_v4 = vadd.f32 %v2397_v1, %v2396_v13  ;;  %v2399_v5 = vpop.f32.mrb[86].mxu1 }
 0x1a5   : > { %v2492_v54 = vpop.f32.mrb[24].mxu0  ;;  %v2400_v32 = vpop.f32.mrb[87].mxu1 }
 0x1a6   : > { %v2563_v0 = vadd.f32 %v2562_v41, %v2492_v54  ;;  %v1850_v3 = vpop.f32.mrb[25].mxu0  ;;  %v2401_v9 = vadd.f32 %v2400_v32, %v2399_v5  ;;  %v2570_v10 = vadd.f32 %v2398_v4, %v3189_v44 }
 0x1a7   : > { %v2565_v60 = vadd.f32 %v2564_v27, %v1850_v3  ;;  %v2493_v12 = vpop.f32.mrb[26].mxu0 }
 0x1a8   : > { %1907 = vst.msk [vmem:[%s3185_s8 + $0xd0] sm:$0xff] %vm1349_vm1, %v2563_v0  ;;  %v2567_v2 = vadd.f32 %v2566_v6, %v2493_v12  ;;  %v1853_v8 = vpop.f32.mrb[27].mxu0  ;;  %v2574_v14 = vadd.f32 %v2401_v9, %v3197_v62 }
 0x1a9   : > { %1905 = vst.msk [vmem:[%s3185_s8 + $0xc0] sm:$0xff] %vm1349_vm1, %v2565_v60  ;;  %v2569_v45 = vadd.f32 %v2568_v42, %v1853_v8 }
 0x1aa   : > { %1908 = vst.msk [vmem:[%s3185_s8 + $0xd8] sm:$0xff] %vm1349_vm1, %v2567_v2 }
 0x1ab   : > { %1906 = vst.msk [vmem:[%s3185_s8 + $0xc8] sm:$0xff] %vm1349_vm1, %v2569_v45 }
 0x1ad   : > { %v2496_v35 = vpop.f32.mrb[28].mxu0 }
 0x1ae   : > { %v2571_v16 = vadd.f32 %v2570_v10, %v2496_v35  ;;  %v1866_v17 = vpop.f32.mrb[29].mxu0 }
 0x1af   : > { %v2573_v38 = vadd.f32 %v2572_v59, %v1866_v17  ;;  %v2497_v26 = vpop.f32.mrb[30].mxu0 }
 0x1b0   : > { %1911 = vst.msk [vmem:[%s3185_s8 + $0xf0] sm:$0xff] %vm1349_vm1, %v2571_v16  ;;  %v2575_v18 = vadd.f32 %v2574_v14, %v2497_v26  ;;  %v1869_v7 = vpop.f32.mrb[31].mxu0 }
 0x1b1   : > { %1909 = vst.msk [vmem:[%s3185_s8 + $0xe0] sm:$0xff] %vm1349_vm1, %v2573_v38  ;;  %v2577_v19 = vadd.f32 %v2576_v52, %v1869_v7 }
 0x1b2   : > { %1912 = vst.msk [vmem:[%s3185_s8 + $0xf8] sm:$0xff] %vm1349_vm1, %v2575_v18 }
 0x1b3   : > { %1910 = vst.msk [vmem:[%s3185_s8 + $0xe8] sm:$0xff] %vm1349_vm1, %v2577_v19 }
 0x1b4 PF: > { %s14_s15 = sadd.s32 1, %s2791_s15  }
 0x1b5   : > { %p11_p4 = scmp.ge.s32.totalorder %s14_s15, 4  }
 0x1b7   :  { %13 = sbr.rel (!%p11_p4) target bundleno = 1 (0x1), region = 69 }

// kernel: _wrn_forward_impl.19
= control target key start
LH: loop header
LB: loop body
LE: loop exit
PB: predicated region body
PF: predicated region fallthrough
CT: control target
= control target key end

     0   :  { %s1218_s15 = smov 0   ;;  %s1377_s0 = inlined_call_operand.vmem [shape: bf16[128,576], index: 0, kind: input, shape index: {}]   ;;  %s1378_s1 = inlined_call_operand.vmem [shape: bf16[576,128], index: 1, kind: input, shape index: {}]   ;;  %s1379_s2 = inlined_call_operand.vmem [shape: f32[1,128], index: 2, kind: input, shape index: {}]   ;;  %s1380_s3 = inlined_call_operand.vmem [shape: f32[1,128], index: 3, kind: input, shape index: {}]   ;;  %s1381_s4 = inlined_call_operand.vmem [shape: f32[128,128], index: 4, kind: output, shape index: {}]  }
   0x1 LB: > { %s927_s16 = sadd.s32 4294967295, %s1191_s15   ;;  %p931_p0 = scmp.ge.s32.totalorder %s1191_s15, 1  ;;  %s1191_s15 = sphi %s1218_s15, %s14_s15  }
   0x2   : > { %p164_p1 = scmp.lt.s32.totalorder %s1191_s15, 3 }
   0x4   : > { %p165_p2 = pnand %p931_p0, %p164_p1 }
   0x5   : > { %v1121_v0 = vld [vmem:[%s1378_s1 + $0x40] sm:$0xff] (!%p165_p2)   ;;  %v1125_v4 = vld [vmem:[%s1378_s1 + $0x48] sm:$0xff] (!%p165_p2)   ;;  %v1129_v8 = vld [vmem:[%s1378_s1 + $0x50] sm:$0xff] (!%p165_p2)   ;;  %s932_s23 = sshll.u32 (!%p165_p2), %s927_s16, 3  ;;  %vm617_vm0 = vcmask (!%p165_p2), 523264  }
   0x6   : > { %168 = sbr.rel (%p165_p2) target bundleno = 296 (0x128), region = 36  ;;  %v1122_v1 = vld [vmem:[%s1378_s1 + $0xc0] sm:$0xff] (!%p165_p2)   ;;  %1000 = vmatprep.subr.bf16.mxu0 (!%p165_p2), %v1121_v0  ;;  %v1126_v5 = vld [vmem:[%s1378_s1 + $0xc8] sm:$0xff] (!%p165_p2)   ;;  %v1130_v9 = vld [vmem:[%s1378_s1 + $0xd0] sm:$0xff] (!%p165_p2)   ;;  %p192_p3 = scmp.lt.s32.totalorder (!%p165_p2), %s932_s23, 15 }
   0x7   : > { %v1123_v2 = vld [vmem:[%s1378_s1] sm:$0xff] (!%p165_p2)   ;;  %1040 = vmatprep.subr.bf16.mxu1 (!%p165_p2), %v1122_v1  ;;  %v1127_v6 = vld [vmem:[%s1378_s1 + $0x8] sm:$0xff] (!%p165_p2)   ;;  %v1131_v10 = vld [vmem:[%s1378_s1 + $0x10] sm:$0xff] (!%p165_p2)  }
   0x8   : > { %v1124_v3 = vld [vmem:[%s1378_s1 + $0x80] sm:$0xff] (!%p165_p2)   ;;  %1001 = vmatpush3.bf16.msra.mxu0 (!%p165_p2), %v1123_v2  ;;  %v1128_v7 = vld [vmem:[%s1378_s1 + $0x88] sm:$0xff] (!%p165_p2)   ;;  %v1132_v11 = vld [vmem:[%s1378_s1 + $0x90] sm:$0xff] (!%p165_p2)  }
   0x9   : > { %1041 = vmatpush3.bf16.msra.mxu1 (!%p165_p2), %v1124_v3  ;;  %1002 = vmatprep.subr.bf16.mxu0 (!%p165_p2), %v1125_v4  ;;  %v1133_v12 = vld [vmem:[%s1378_s1 + $0x58] sm:$0xff] (!%p165_p2)   ;;  %v1137_v16 = vld [vmem:[%s1378_s1 + $0x60] sm:$0xff] (!%p165_p2)   ;;  %v1141_v20 = vld [vmem:[%s1378_s1 + $0x68] sm:$0xff] (!%p165_p2)  }
   0xa   : > { %1042 = vmatprep.subr.bf16.mxu1 (!%p165_p2), %v1126_v5  ;;  %v1134_v13 = vld [vmem:[%s1378_s1 + $0xd8] sm:$0xff] (!%p165_p2)   ;;  %v1138_v17 = vld [vmem:[%s1378_s1 + $0xe0] sm:$0xff] (!%p165_p2)   ;;  %v1142_v21 = vld [vmem:[%s1378_s1 + $0xe8] sm:$0xff] (!%p165_p2)  }
   0xb   : > { %v1135_v14 = vld [vmem:[%s1378_s1 + $0x18] sm:$0xff] (!%p165_p2)   ;;  %v1139_v18 = vld [vmem:[%s1378_s1 + $0x20] sm:$0xff] (!%p165_p2)   ;;  %v1143_v22 = vld [vmem:[%s1378_s1 + $0x28] sm:$0xff] (!%p165_p2)  }
   0xc   : > { %1003 = vmatpush3.bf16.msra.mxu0 (!%p165_p2), %v1127_v6  ;;  %v1136_v15 = vld [vmem:[%s1378_s1 + $0x98] sm:$0xff] (!%p165_p2)   ;;  %v1140_v19 = vld [vmem:[%s1378_s1 + $0xa0] sm:$0xff] (!%p165_p2)   ;;  %v1144_v23 = vld [vmem:[%s1378_s1 + $0xa8] sm:$0xff] (!%p165_p2)  }
   0xd   : > { %1043 = vmatpush3.bf16.msra.mxu1 %v1128_v7  ;;  %1004 = vmatprep.subr.bf16.mxu0 %v1129_v8  ;;  %s1383_s23 = smov (!%p192_p3, %s932_s23), 15  ;;  %v1145_v24 = vld [vmem:[%s1378_s1 + $0x70] sm:$0xff]   ;;  %v1149_v28 = vld [vmem:[%s1378_s1 + $0x78] sm:$0xff]   ;;  %v1159_v36 = vld [vmem:[%s1378_s1 + $0x100] sm:$0xff]  }
   0xe   : > { %1044 = vmatprep.subr.bf16.mxu1 %v1130_v9  ;;  %v1146_v25 = vld [vmem:[%s1378_s1 + $0xf0] sm:$0xff]   ;;  %s1112_s21 = smul.u32 20, %s1383_s23  ;;  %v1150_v29 = vld [vmem:[%s1378_s1 + $0xf8] sm:$0xff]   ;;  %v1166_v39 = vld [vmem:[%s1378_s1 + $0x108] sm:$0xff]   ;;  %s935_s26 = sshll.u32 %s1383_s23, 3 }
   0xf   : > { %v1147_v26 = vld [vmem:[%s1378_s1 + $0x30] sm:$0xff]   ;;  %v1151_v30 = vld [vmem:[%s1378_s1 + $0x38] sm:$0xff]   ;;  %s202_s29 = scalar_lea.vmem %s1381_s4, %s935_s26 }
  0x10   : > { %1005 = vmatpush3.bf16.msra.mxu0 %v1131_v10  ;;  %v1148_v27 = vld [vmem:[%s1378_s1 + $0xb0] sm:$0xff]   ;;  %s1324_s6 = scalar_lea.vmem %s1377_s0, %s1112_s21  ;;  %v1152_v31 = vld [vmem:[%s1378_s1 + $0xb8] sm:$0xff]  }
  0x11   : > { %1045 = vmatpush3.bf16.msra.mxu1 %v1132_v11  ;;  %1006 = vmatprep.subr.bf16.mxu0 %v1133_v12  ;;  %v1153_v32 = vld [vmem:[%s1324_s6] ss:$20 sps:$4 sm:$0xff]   ;;  %v1155_v33 = vld [vmem:[%s1324_s6 + $0x4] ss:$20 sps:$4 sm:$0xff]   ;;  %v1156_v34 = vld [vmem:[%s1324_s6 + $0x8] ss:$20 sps:$4 sm:$0xff]  }
  0x12   : > { %1046 = vmatprep.subr.bf16.mxu1 %v1134_v13  ;;  %v1158_v35 = vld [vmem:[%s1324_s6 + $0xc] ss:$20 sps:$4 sm:$0xff]   ;;  %662 = vmatprep.mubr.bf16.mxu0 %v1155_v33  ;;  %v1162_v38 = vld [vmem:[%s1324_s6 + $0x34] ss:$20 sps:$4 sm:$0xff]   ;;  %v1165_v41 = vld [vmem:[%s1324_s6 + $0x30] ss:$20 sps:$4 sm:$0xff]  }
  0x13   : > { %727 = vmatprep.mubr.bf16.mxu1 %v1158_v35  ;;  %v1160_v37 = vld [vmem:[%s1324_s6 + $0x2c] ss:$20 sps:$4 sm:$0xff]   ;;  %v1164_v40 = vld [vmem:[%s1324_s6 + $0x28] ss:$20 sps:$4 sm:$0xff]   ;;  %v1173_v44 = vld [vmem:[%s1378_s1 + $0x110] sm:$0xff]  }
  0x14   : > { %1007 = vmatpush3.bf16.msra.mxu0 %v1135_v14  ;;  %v1167_v42 = vld [vmem:[%s1324_s6 + $0x54] ss:$20 sps:$4 sm:$0xff]   ;;  %v1169_v43 = vld [vmem:[%s1324_s6 + $0x5c] ss:$20 sps:$4 sm:$0xff]   ;;  %v1172_v47 = vld [vmem:[%s1324_s6 + $0x58] ss:$20 sps:$4 sm:$0xff]  }
  0x15   : > { %1047 = vmatpush3.bf16.msra.mxu1 %v1136_v15  ;;  %1008 = vmatprep.subr.bf16.mxu0 %v1137_v16  ;;  %v1180_v45 = vld [vmem:[%s1378_s1 + $0x118] sm:$0xff]   ;;  %v1171_v46 = vld [vmem:[%s1324_s6 + $0x50] ss:$20 sps:$4 sm:$0xff]   ;;  %v1179_v51 = vld [vmem:[%s1324_s6 + $0x80] ss:$20 sps:$4 sm:$0xff]  }
  0x16   : > { %1048 = vmatprep.subr.bf16.mxu1 %v1138_v17  ;;  %v1174_v48 = vld [vmem:[%s1324_s6 + $0x7c] ss:$20 sps:$4 sm:$0xff]   ;;  %v1176_v49 = vld [vmem:[%s1324_s6 + $0x84] ss:$20 sps:$4 sm:$0xff]   ;;  %v1182_v53 = vld [vmem:[%s1324_s6 + $0x60] ss:$20 sps:$4 sm:$0xff]  }
  0x17   : > { %v1178_v50 = vld [vmem:[%s1324_s6 + $0x78] ss:$20 sps:$4 sm:$0xff]   ;;  %v1181_v52 = vld [vmem:[%s1324_s6 + $0x10] ss:$20 sps:$4 sm:$0xff]   ;;  %v1184_v55 = vld [vmem:[%s1324_s6 + $0x88] ss:$20 sps:$4 sm:$0xff]  }
  0x18   : > { %1009 = vmatpush3.bf16.msra.mxu0 %v1139_v18  ;;  %v1183_v54 = vld [vmem:[%s1324_s6 + $0x38] ss:$20 sps:$4 sm:$0xff]  }
  0x19   : > { %1049 = vmatpush3.bf16.msra.mxu1 %v1140_v19  ;;  %1010 = vmatprep.subr.bf16.mxu0 %v1141_v20 }
  0x1a   : > { %1050 = vmatprep.subr.bf16.mxu1 %v1142_v21 }
  0x1c   : > { %1011 = vmatpush3.bf16.msra.mxu0 %v1143_v22 }
  0x1d   : > { %1051 = vmatpush3.bf16.msra.mxu1 %v1144_v23  ;;  %1012 = vmatprep.subr.bf16.mxu0 %v1145_v24 }
  0x1e   : > { %1052 = vmatprep.subr.bf16.mxu1 %v1146_v25 }
  0x20   : > { %1013 = vmatpush3.bf16.msra.mxu0 %v1147_v26 }
  0x21   : > { %1053 = vmatpush3.bf16.msra.mxu1 %v1148_v27  ;;  %1014 = vmatprep.subr.bf16.mxu0 %v1149_v28 }
  0x22   : > { %1054 = vmatprep.subr.bf16.mxu1 %v1150_v29 }
  0x24   : > { %1015 = vmatpush3.bf16.msra.mxu0 %v1151_v30 }
  0x25   : > { %1055 = vmatpush3.bf16.msra.mxu1 %v1152_v31  ;;  %1088 = vmatprep.subr.bf16.mxu0 %v1159_v36 }
  0x26   : > { %1104 = vmatprep.subr.bf16.mxu1 %v1159_v36 }
  0x27   : > { %663 = vmatmul.mubr.bf16.vlgmr.msra.gmra.mrb[0].mxu0 %v1153_v32 }
  0x28   : > { %728 = vmatmul.mubr.bf16.vlgmr.msra.gmra.mrb[0].mxu1 %v1156_v34  ;;  %1089 = vmatpush3.bf16.msra.mxu0 %v1159_v36 }
  0x29   : > { %1108 = vmatpush3.bf16.msra.mxu1 %v1159_v36  ;;  %670 = vmatprep.mubr.bf16.mxu0 %v1160_v37 }
  0x2a   : > { %735 = vmatprep.mubr.bf16.mxu1 %v1162_v38  ;;  %1090 = vmatprep.subr.bf16.mxu0 %v1166_v39 }
  0x2b   : > { %1105 = vmatprep.subr.bf16.mxu1 %v1166_v39 }
  0x2c   : > { %1091 = vmatpush3.bf16.msra.mxu0 %v1166_v39 }
  0x2d   : > { %1109 = vmatpush3.bf16.msra.mxu1 %v1166_v39  ;;  %1092 = vmatprep.subr.bf16.mxu0 %v1173_v44 }
  0x2e   : > { %1106 = vmatprep.subr.bf16.mxu1 %v1173_v44 }
  0x2f   : > { %671 = vmatmul.mubr.bf16.gmra.mrb[4].mxu0 %v1164_v40 }
  0x30   : > { %736 = vmatmul.mubr.bf16.gmra.mrb[4].mxu1 %v1165_v41  ;;  %678 = vmatprep.mubr.bf16.mxu0 %v1167_v42 }
  0x31   : > { %743 = vmatprep.mubr.bf16.mxu1 %v1169_v43  ;;  %1093 = vmatpush3.bf16.msra.mxu0 %v1173_v44 }
  0x32   : > { %1110 = vmatpush3.bf16.msra.mxu1 %v1173_v44  ;;  %1094 = vmatprep.subr.bf16.mxu0 %v1180_v45 }
  0x33   : > { %1107 = vmatprep.subr.bf16.mxu1 %v1180_v45 }
  0x35   : > { %1095 = vmatpush3.bf16.msra.mxu0 %v1180_v45 }
  0x36   : > { %1111 = vmatpush3.bf16.msra.mxu1 %v1180_v45 }
  0x37   : > { %679 = vmatmul.mubr.bf16.gmra.mrb[8].mxu0 %v1171_v46 }
  0x38   : > { %744 = vmatmul.mubr.bf16.gmra.mrb[8].mxu1 %v1172_v47  ;;  %686 = vmatprep.mubr.bf16.mxu0 %v1174_v48 }
  0x39   : > { %751 = vmatprep.mubr.bf16.mxu1 %v1176_v49  ;;  %v996_v49 = vld [vmem:[%s1379_s2] ss:$0 sm:$0xff] }
  0x3f   : > { %687 = vmatmul.mubr.bf16.gmra.mrb[12].mxu0 %v1178_v50 }
  0x40   : > { %752 = vmatmul.mubr.bf16.gmra.mrb[12].mxu1 %v1179_v51  ;;  %1096 = vmatprep.mubr.msk.bf16.mxu0 %vm617_vm0, %v1181_v52 }
  0x41   : > { %1100 = vmatprep.mubr.msk.bf16.mxu1 %vm617_vm0, %v1182_v53  ;;  %v997_v53 = vld [vmem:[%s1380_s3] ss:$0 sm:$0xff] }
  0x47   : > { %1097 = vmatmul.mubr.msk.bf16.vlgmr.msra.gmra.mrb[16].mxu0 %vm617_vm0, %v1183_v54 }
  0x48   : > { %1101 = vmatmul.mubr.msk.bf16.vlgmr.msra.gmra.mrb[16].mxu1 %vm617_vm0, %v1184_v55 }
  0xfa   : > { %v1016_v56 = vpop.f32.mrb[0].mxu0 }
  0xfb   : > { %v1056_v57 = vpop.f32.mrb[0].mxu1  ;;  %v1017_v58 = vpop.f32.mrb[1].mxu0 }
  0xfc   : > { %v1018_v59 = vadd.f32 %v1017_v58, %v1016_v56  ;;  %v1057_v60 = vpop.f32.mrb[1].mxu1  ;;  %v1019_v61 = vpop.f32.mrb[2].mxu0 }
  0xfd   : > { %v1058_v62 = vadd.f32 %v1057_v60, %v1056_v57  ;;  %v1059_v63 = vpop.f32.mrb[2].mxu1  ;;  %v1020_v0 = vpop.f32.mrb[3].mxu0 }
  0xfe   : > { %v1021_v1 = vadd.f32 %v1020_v0, %v1019_v61  ;;  %v1060_v2 = vpop.f32.mrb[3].mxu1 }
  0xff   : > { %v1061_v3 = vadd.f32 %v1060_v2, %v1059_v63  ;;  %v730_v4 = vadd.f32 %v1058_v62, %v1018_v59 }
 0x101   : > { %v733_v5 = vadd.f32 %v1061_v3, %v1021_v1 }
 0x102   : > { %v1022_v6 = vpop.f32.mrb[4].mxu0 }
 0x103   : > { %v1062_v7 = vpop.f32.mrb[4].mxu1  ;;  %v1023_v8 = vpop.f32.mrb[5].mxu0 }
 0x104   : > { %v1024_v9 = vadd.f32 %v1023_v8, %v1022_v6  ;;  %v1063_v10 = vpop.f32.mrb[5].mxu1  ;;  %v1025_v11 = vpop.f32.mrb[6].mxu0 }
 0x105   : > { %v1064_v12 = vadd.f32 %v1063_v10, %v1062_v7  ;;  %v1065_v13 = vpop.f32.mrb[6].mxu1  ;;  %v1026_v14 = vpop.f32.mrb[7].mxu0 }
 0x106   : > { %v1027_v15 = vadd.f32 %v1026_v14, %v1025_v11  ;;  %v1066_v16 = vpop.f32.mrb[7].mxu1 }
 0x107   : > { %v1067_v17 = vadd.f32 %v1066_v16, %v1065_v13  ;;  %v738_v18 = vadd.f32 %v1064_v12, %v1024_v9 }
 0x109   : > { %v741_v19 = vadd.f32 %v1067_v17, %v1027_v15 }
 0x10a   : > { %v1028_v20 = vpop.f32.mrb[8].mxu0 }
 0x10b   : > { %v1068_v21 = vpop.f32.mrb[8].mxu1  ;;  %v1029_v22 = vpop.f32.mrb[9].mxu0 }
 0x10c   : > { %v1030_v23 = vadd.f32 %v1029_v22, %v1028_v20  ;;  %v1069_v24 = vpop.f32.mrb[9].mxu1  ;;  %v1031_v25 = vpop.f32.mrb[10].mxu0 }
 0x10d   : > { %v1070_v26 = vadd.f32 %v1069_v24, %v1068_v21  ;;  %v1071_v27 = vpop.f32.mrb[10].mxu1  ;;  %v1032_v28 = vpop.f32.mrb[11].mxu0 }
 0x10e   : > { %v1033_v29 = vadd.f32 %v1032_v28, %v1031_v25  ;;  %v1072_v30 = vpop.f32.mrb[11].mxu1 }
 0x10f   : > { %v1073_v31 = vadd.f32 %v1072_v30, %v1071_v27  ;;  %v746_v32 = vadd.f32 %v1070_v26, %v1030_v23 }
 0x111   : > { %v749_v33 = vadd.f32 %v1073_v31, %v1033_v29 }
 0x112   : > { %v1034_v34 = vpop.f32.mrb[12].mxu0 }
 0x113   : > { %v1074_v35 = vpop.f32.mrb[12].mxu1  ;;  %v1035_v36 = vpop.f32.mrb[13].mxu0 }
 0x114   : > { %v1036_v37 = vadd.f32 %v1035_v36, %v1034_v34  ;;  %v1075_v38 = vpop.f32.mrb[13].mxu1  ;;  %v1037_v39 = vpop.f32.mrb[14].mxu0 }
 0x115   : > { %v1076_v40 = vadd.f32 %v1075_v38, %v1074_v35  ;;  %v1077_v41 = vpop.f32.mrb[14].mxu1  ;;  %v1038_v42 = vpop.f32.mrb[15].mxu0 }
 0x116   : > { %v1039_v43 = vadd.f32 %v1038_v42, %v1037_v39  ;;  %v1078_v44 = vpop.f32.mrb[15].mxu1 }
 0x117   : > { %v1079_v45 = vadd.f32 %v1078_v44, %v1077_v41  ;;  %v754_v46 = vadd.f32 %v1076_v40, %v1036_v37 }
 0x119   : > { %v757_v47 = vadd.f32 %v1079_v45, %v1039_v43 }
 0x11a   : > { %v1098_v48 = vpop.f32.mrb[16].mxu0 }
 0x11b   : > { %v803_v50 = vadd.f32 %v1098_v48, %v738_v18  ;;  %v1102_v51 = vpop.f32.mrb[16].mxu1  ;;  %v794_v52 = vpop.f32.mrb[17].mxu0 }
 0x11c   : > { %v819_v54 = vadd.f32 %v1102_v51, %v754_v46  ;;  %v795_v55 = vadd.f32 %v794_v52, %v730_v4  ;;  %v810_v56 = vpop.f32.mrb[17].mxu1  ;;  %v1099_v57 = vpop.f32.mrb[18].mxu0 }
 0x11d   : > { %v834_v58 = vmul.f32 %v996_v49, %v803_v50  ;;  %v811_v59 = vadd.f32 %v810_v56, %v746_v32  ;;  %v806_v60 = vadd.f32 %v1099_v57, %v741_v19  ;;  %v1103_v61 = vpop.f32.mrb[18].mxu1  ;;  %v797_v62 = vpop.f32.mrb[19].mxu0 }
 0x11e   : > { %v838_v63 = vmul.f32 %v996_v49, %v819_v54  ;;  %v832_v0 = vmul.f32 %v996_v49, %v795_v55  ;;  %v822_v1 = vadd.f32 %v1103_v61, %v757_v47  ;;  %v798_v2 = vadd.f32 %v797_v62, %v733_v5  ;;  %v813_v3 = vpop.f32.mrb[19].mxu1 }
 0x11f   : > { %v849_v6 = vadd.f32 %v997_v53, %v834_v58  ;;  %v836_v7 = vmul.f32 %v996_v49, %v811_v59  ;;  %v835_v8 = vmul.f32 %v996_v49, %v806_v60  ;;  %v814_v9 = vadd.f32 %v813_v3, %v749_v33 }
 0x120   : > { %v853_v4 = vadd.f32 %v997_v53, %v838_v63  ;;  %v847_v10 = vadd.f32 %v997_v53, %v832_v0  ;;  %v839_v11 = vmul.f32 %v996_v49, %v822_v1  ;;  %v833_v12 = vmul.f32 %v996_v49, %v798_v2 }
 0x121   : > { %v857_v13 = vmax.f32 %v849_v6, 0.0  ;;  %v851_v14 = vadd.f32 %v997_v53, %v836_v7  ;;  %v850_v15 = vadd.f32 %v997_v53, %v835_v8  ;;  %v837_v16 = vmul.f32 %v996_v49, %v814_v9 }
 0x122   : > { %v861_v17 = vmax.f32 %v853_v4, 0.0  ;;  %v855_v18 = vmax.f32 %v847_v10, 0.0  ;;  %v854_v5 = vadd.f32 %v997_v53, %v839_v11  ;;  %v848_v19 = vadd.f32 %v997_v53, %v833_v12 }
 0x123   : > { %865 = vst [vmem:[%s202_s29 + $0x10] sm:$0xff] %v857_v13  ;;  %v859_v20 = vmax.f32 %v851_v14, 0.0  ;;  %v858_v21 = vmax.f32 %v850_v15, 0.0  ;;  %v852_v22 = vadd.f32 %v997_v53, %v837_v16 }
 0x124   : > { %869 = vst [vmem:[%s202_s29 + $0x30] sm:$0xff] %v861_v17  ;;  %863 = vst [vmem:[%s202_s29] sm:$0xff] %v855_v18  ;;  %v862_v23 = vmax.f32 %v854_v5, 0.0  ;;  %v856_v24 = vmax.f32 %v848_v19, 0.0 }
 0x125   : > { %867 = vst [vmem:[%s202_s29 + $0x20] sm:$0xff] %v859_v20  ;;  %866 = vst [vmem:[%s202_s29 + $0x18] sm:$0xff] %v858_v21  ;;  %v860_v25 = vmax.f32 %v852_v22, 0.0 }
 0x126   : > { %870 = vst [vmem:[%s202_s29 + $0x38] sm:$0xff] %v862_v23  ;;  %864 = vst [vmem:[%s202_s29 + $0x8] sm:$0xff] %v856_v24 }
 0x127   : > { %868 = vst [vmem:[%s202_s29 + $0x28] sm:$0xff] %v860_v25 }
 0x128 PF: > { %s14_s15 = sadd.s32 1, %s1191_s15  }
 0x129   : > { %p11_p4 = scmp.ge.s32.totalorder %s14_s15, 4  }
 0x12b   :  { %13 = sbr.rel (!%p11_p4) target bundleno = 1 (0x1), region = 66 }

// kernel: _wrn_forward_impl.21
= control target key start
LH: loop header
LB: loop body
LE: loop exit
PB: predicated region body
PF: predicated region fallthrough
CT: control target
= control target key end

     0   :  { %v349_v3 = vmov 0.0|0.0   ;;  %vm350_vm0 = vmmov 0   ;;  %v351_v6 = vmov 0.0   ;;  %s526_s0 = inlined_call_operand.vmem [shape: f32[2,64,128], index: 0, kind: input, shape index: {}]   ;;  %s527_s1 = inlined_call_operand.vmem [shape: f32[1,1,128], index: 1, kind: input, shape index: {}]   ;;  %s528_s2 = inlined_call_operand.vmem [shape: f32[1,1,128], index: 2, kind: input, shape index: {}]   ;;  %s529_s3 = inlined_call_operand.vmem [shape: f32[128,10], index: 3, kind: input, shape index: {}]   ;;  %s530_s4 = inlined_call_operand.vmem [shape: f32[1,10], index: 4, kind: input, shape index: {}]   ;;  %s531_s5 = inlined_call_operand.hbm [shape: f32[2,10], index: 5, kind: output, shape index: {}]  }
   0x1   :  { %v128_v0 = vld [vmem:[%s529_s3] sm:$0xff]  ;;  %v129_v1 = vld [vmem:[%s529_s3 + $0x8] sm:$0xff]  ;;  %v130_v2 = vld [vmem:[%s529_s3 + $0x10] sm:$0xff]  ;;  %297 = vmatprep.subr.bf16.mxu0 %v349_v3  ;;  %294 = vmatprep.mubr.msk.f32.mxu0 %vm350_vm0, %v351_v6 }
   0x2   :  { %v298_v4 = vpack.c.bf16 %v129_v1, %v128_v0  ;;  %v131_v5 = vld [vmem:[%s529_s3 + $0x18] sm:$0xff]  ;;  %v132_v8 = vld [vmem:[%s529_s3 + $0x20] sm:$0xff]  ;;  %v133_v9 = vld [vmem:[%s529_s3 + $0x28] sm:$0xff] }
   0x3   :  { %v301_v7 = vpack.c.bf16 %v131_v5, %v130_v2  ;;  %v304_v10 = vpack.c.bf16 %v133_v9, %v132_v8  ;;  %v134_v11 = vld [vmem:[%s529_s3 + $0x30] sm:$0xff]  ;;  %v135_v12 = vld [vmem:[%s529_s3 + $0x38] sm:$0xff]  ;;  %v21_v13 = vld [vmem:[%s526_s0] sm:$0xff] }
   0x4   :  { %299 = vmatpush3.bf16.msra.mxu0 %v298_v4  ;;  %v22_v14 = vld [vmem:[%s526_s0 + $0x8] sm:$0xff]  ;;  %v23_v15 = vld [vmem:[%s526_s0 + $0x10] sm:$0xff]  ;;  %v29_v16 = vld [vmem:[%s526_s0 + $0x40] sm:$0xff]  ;;  %v307_v20 = vpack.c.bf16 %v135_v12, %v134_v11 }
   0x5   :  { %300 = vmatprep.subr.bf16.mxu0 %v349_v3  ;;  %v30_v17 = vld [vmem:[%s526_s0 + $0x48] sm:$0xff]  ;;  %v31_v18 = vld [vmem:[%s526_s0 + $0x50] sm:$0xff]  ;;  %v242_v19 = vld [vmem:[%s527_s1] ss:$0 sm:$0xff] }
   0x6   :  { %v136_v21 = vld [vmem:[%s529_s3 + $0x40] sm:$0xff]  ;;  %v137_v22 = vld [vmem:[%s529_s3 + $0x48] sm:$0xff]  ;;  %v44_v23 = vmul.f32 %v242_v19, %v21_v13  ;;  %v45_v24 = vmul.f32 %v242_v19, %v22_v14 }
   0x8   :  { %302 = vmatpush3.bf16.msra.mxu0 %v301_v7 }
   0x9   :  { %303 = vmatprep.subr.bf16.mxu0 %v349_v3 }
   0xc   :  { %305 = vmatpush3.bf16.msra.mxu0 %v304_v10 }
   0xd   :  { %10 = vsyncpa [#allocation3], 0  ;;  %306 = vmatprep.subr.bf16.mxu0 %v349_v3  ;;  %v24_v25 = vld [vmem:[%s526_s0 + $0x18] sm:$0xff]  ;;  %v447_v27 = vld [vmem:[%s528_s2] ss:$0 sm:$0xff]  ;;  %v46_v30 = vmul.f32 %v242_v19, %v23_v15  ;;  %v52_v31 = vmul.f32 %v242_v19, %v29_v16  ;;  %v53_v32 = vmul.f32 %v242_v19, %v30_v17  ;;  %v54_v33 = vmul.f32 %v242_v19, %v31_v18  ;;  %s352_s8 = smov [#allocation2]  }
   0xe   :  { %v32_v26 = vld [vmem:[%s526_s0 + $0x58] sm:$0xff]  ;;  %v25_v28 = vld [vmem:[%s526_s0 + $0x20] sm:$0xff]  ;;  %v310_v34 = vpack.c.bf16 %v137_v22, %v136_v21  ;;  %v138_v35 = vld [vmem:[%s529_s3 + $0x50] sm:$0xff]  ;;  %v47_v41 = vmul.f32 %v242_v19, %v24_v25  ;;  %v67_v43 = vadd.f32 %v447_v27, %v44_v23  ;;  %v68_v44 = vadd.f32 %v447_v27, %v45_v24  ;;  %s234_s9 = sshll.u32 %s352_s8, 4  ;;  %s235_s9 = int_to_ptr.vmem [resolvable:$true] %s234_s9 }
   0xf   :  { %v33_v29 = vld [vmem:[%s526_s0 + $0x60] sm:$0xff]  ;;  %v139_v36 = vld [vmem:[%s529_s3 + $0x58] sm:$0xff]  ;;  %v141_v38 = vld [vmem:[%s529_s3 + $0x68] sm:$0xff]  ;;  %v55_v42 = vmul.f32 %v242_v19, %v32_v26  ;;  %v48_v45 = vmul.f32 %v242_v19, %v25_v28  ;;  %v69_v49 = vadd.f32 %v447_v27, %v46_v30  ;;  %v75_v50 = vadd.f32 %v447_v27, %v52_v31  ;;  %s325_s10 = scalar_lea.vmem %s235_s9, 32  ;;  %p330_p1 = scmp.lt.s32.totalorder %s235_s9, %s235_s9 }
  0x10   :  { %v140_v37 = vld [vmem:[%s529_s3 + $0x60] sm:$0xff]  ;;  %308 = vmatpush3.bf16.msra.mxu0 %v307_v20  ;;  %v26_v39 = vld [vmem:[%s526_s0 + $0x28] sm:$0xff]  ;;  %v56_v46 = vmul.f32 %v242_v19, %v33_v29  ;;  %v27_v47 = vld [vmem:[%s526_s0 + $0x30] sm:$0xff]  ;;  %v76_v51 = vadd.f32 %v447_v27, %v53_v32  ;;  %v77_v52 = vadd.f32 %v447_v27, %v54_v33  ;;  %v313_v53 = vpack.c.bf16 %v139_v36, %v138_v35  ;;  %p326_p0 = scmp.ne.s32.totalorder %s235_s9, %s325_s10  ;;  %p331_p2 = scmp.lt.s32.totalorder %s325_s10, %s325_s10 }
  0x11   :  { %v34_v40 = vld [vmem:[%s526_s0 + $0x68] sm:$0xff]  ;;  %309 = vmatprep.subr.bf16.mxu0 %v349_v3  ;;  %v35_v48 = vld [vmem:[%s526_s0 + $0x70] sm:$0xff]  ;;  %v316_v54 = vpack.c.bf16 %v141_v38, %v140_v37  ;;  %v49_v55 = vmul.f32 %v242_v19, %v26_v39  ;;  %v28_v57 = vld [vmem:[%s526_s0 + $0x38] sm:$0xff]  ;;  %v70_v59 = vadd.f32 %v447_v27, %v47_v41  ;;  %v78_v60 = vadd.f32 %v447_v27, %v55_v42 }
  0x12   :  { %v57_v56 = vmul.f32 %v242_v19, %v34_v40  ;;  %v36_v58 = vld [vmem:[%s526_s0 + $0x78] sm:$0xff]  ;;  %v83_v61 = vmax.f32 %v67_v43, 0.0  ;;  %v84_v62 = vmax.f32 %v68_v44, 0.0  ;;  %v50_v63 = vmul.f32 %v242_v19, %v27_v47  ;;  %v142_v12 = vld [vmem:[%s529_s3 + $0x70] sm:$0xff]  ;;  %p332_p3 = por %p331_p2, %p330_p1 }
  0x13   :  { %v58_v0 = vmul.f32 %v242_v19, %v35_v48  ;;  %v71_v1 = vadd.f32 %v447_v27, %v48_v45  ;;  %v79_v2 = vadd.f32 %v447_v27, %v56_v46  ;;  %v85_v4 = vmax.f32 %v69_v49, 0.0  ;;  %v143_v13 = vld [vmem:[%s529_s3 + $0x78] sm:$0xff] }
  0x14   :  { %311 = vmatpush3.bf16.msra.mxu0 %v310_v34  ;;  %v91_v5 = vmax.f32 %v75_v50, 0.0  ;;  %v92_v6 = vmax.f32 %v76_v51, 0.0  ;;  %v93_v7 = vmax.f32 %v77_v52, 0.0  ;;  %v51_v8 = vmul.f32 %v242_v19, %v28_v57  ;;  %v244_v57 = vld [vmem:[%s530_s4] ss:$0 sm:$0xff]  ;;  %p333_p4 = pnand %p332_p3, %p326_p0 }
  0x15   :  { %312 = vmatprep.subr.bf16.mxu0 %v349_v3  ;;  %v59_v9 = vmul.f32 %v242_v19, %v36_v58  ;;  %v72_v10 = vadd.f32 %v447_v27, %v49_v55  ;;  %v80_v11 = vadd.f32 %v447_v27, %v57_v56  ;;  %v86_v14 = vmax.f32 %v70_v59, 0.0 }
  0x16   :  { %v94_v15 = vmax.f32 %v78_v60, 0.0  ;;  %v99_v16 = vadd.f32 %v84_v62, %v83_v61  ;;  %v112_v17 = vadd.f32 %v92_v6, %v91_v5  ;;  %v73_v18 = vadd.f32 %v447_v27, %v50_v63 }
  0x17   :  { %v81_v19 = vadd.f32 %v447_v27, %v58_v0  ;;  %v87_v20 = vmax.f32 %v71_v1, 0.0  ;;  %v95_v21 = vmax.f32 %v79_v2, 0.0  ;;  %v319_v24 = vpack.c.bf16 %v143_v13, %v142_v12 }
  0x18   :  { %314 = vmatpush3.bf16.msra.mxu0 %v313_v53  ;;  %v100_v22 = vadd.f32 %v99_v16, %v85_v4  ;;  %v113_v23 = vadd.f32 %v112_v17, %v93_v7  ;;  %v74_v25 = vadd.f32 %v447_v27, %v51_v8  ;;  %v82_v26 = vadd.f32 %v447_v27, %v59_v9 }
  0x19   :  { %315 = vmatprep.subr.bf16.mxu0 %v349_v3  ;;  %v88_v28 = vmax.f32 %v72_v10, 0.0  ;;  %v96_v29 = vmax.f32 %v80_v11, 0.0  ;;  %v89_v32 = vmax.f32 %v73_v18, 0.0  ;;  %v97_v33 = vmax.f32 %v81_v19, 0.0 }
  0x1a   :  { %v101_v30 = vadd.f32 %v100_v22, %v86_v14  ;;  %v114_v31 = vadd.f32 %v113_v23, %v94_v15  ;;  %v90_v36 = vmax.f32 %v74_v25, 0.0  ;;  %v98_v37 = vmax.f32 %v82_v26, 0.0 }
  0x1b   :  { %vm153_vm1 = vcmask 1041409   ;;  %vm226_vm2 = vcmask 74752  }
  0x1c   :  { %317 = vmatpush3.bf16.msra.mxu0 %v316_v54  ;;  %v102_v34 = vadd.f32 %v101_v30, %v87_v20  ;;  %v115_v35 = vadd.f32 %v114_v31, %v95_v21 }
  0x1d   :  { %318 = vmatprep.subr.bf16.mxu0 %v349_v3 }
  0x1e   :  { %v103_v38 = vadd.f32 %v102_v34, %v88_v28  ;;  %v116_v39 = vadd.f32 %v115_v35, %v96_v29 }
  0x20   :  { %320 = vmatpush3.bf16.msra.mxu0 %v319_v24  ;;  %v104_v40 = vadd.f32 %v103_v38, %v89_v32  ;;  %v117_v41 = vadd.f32 %v116_v39, %v97_v33 }
  0x22   :  { %v105_v42 = vadd.f32 %v104_v40, %v90_v36  ;;  %v118_v27 = vadd.f32 %v117_v41, %v98_v37 }
  0x24   :  { %v106_v43 = vrot.slane %v105_v42, 4  ;;  %v119_v44 = vrot.slane %v118_v27, 4 }
  0x26   :  { %v107_v45 = vadd.f32 %v106_v43, %v105_v42  ;;  %v120_v46 = vadd.f32 %v119_v44, %v118_v27 }
  0x28   :  { %v108_v47 = vrot.slane %v107_v45, 2  ;;  %v121_v48 = vrot.slane %v120_v46, 2 }
  0x2a   :  { %v109_v3 = vadd.f32 %v108_v47, %v107_v45  ;;  %v122_v49 = vadd.f32 %v121_v48, %v120_v46 }
  0x2c   :  { %v110_v50 = vrot.slane %v109_v3, 1  ;;  %v123_v51 = vrot.slane %v122_v49, 1 }
  0x2e   :  { %v111_v52 = vadd.f32 %v110_v50, %v109_v3  ;;  %v124_v53 = vadd.f32 %v123_v51, %v122_v49 }
  0x30   :  { %v126_v54 = vmul.f32 0.015625, %v111_v52  ;;  %v127_v55 = vmul.f32 0.015625, %v124_v53 }
  0x32   :  { %v154_v56 = vsel %vm153_vm1, %v127_v55, %v126_v54 }
  0x33   :  { %295 = vmatmul.mubr.f32.vlgmr.msra.gmra.mrb[0].mxu0 %v154_v56 }
 0x106   :  { %v222_v58 = vpop.f32.mrb[0].mxu0 }
 0x107   :  { %v223_v59 = vadd.f32 %v244_v57, %v222_v58  ;;  %v296_v60 = vpop.f32.mrb[1].mxu0 }
 0x109   :  { %227 = vst.msk [vmem:[#allocation2] sm:$0x3] %vm226_vm2, %v223_v59 }
 0x10a   :  { %336 = shalt.err (!%p333_p4)
}
 0x10b   :  { %s337_s13 = scalar_lea.hbm %s531_s5, 32 }
 0x10c   :  { %p338_p5 = scmp.ne.s32.totalorder %s531_s5, %s337_s13  ;;  %p341_p6 = scmp.lt.u32.totalorder %s337_s13, %s531_s5 }
 0x10e   :  { %p343_p7 = pnand %p341_p6, %p338_p5 }
 0x110   :  { %346 = shalt.err (!%p343_p7)
}
 0x111   :  { %237 = dma.vmem_to_hbm [thread:$0]  %s235_s9, 32, %s531_s5, [#allocation3]  }
 0x112   :  { %347 = dma.done.wait [#allocation3], 32  }
 0x113   :  { %348 = vsyncadd [#allocation3], 4294967264 }
 0x114   :  { %241 = vsyncpa [#allocation3], 1 }

// kernel: _wrn_forward_impl.20
= control target key start
LH: loop header
LB: loop body
LE: loop exit
PB: predicated region body
PF: predicated region fallthrough
CT: control target
= control target key end

     0   :  { %s2133_s15 = smov 0   ;;  %s2465_s0 = inlined_call_operand.vmem [shape: bf16[128,1152], index: 0, kind: input, shape index: {}]   ;;  %s2466_s1 = inlined_call_operand.vmem [shape: bf16[1152,128], index: 1, kind: input, shape index: {}]   ;;  %s2467_s2 = inlined_call_operand.vmem [shape: bf16[128,64], index: 2, kind: input, shape index: {}]   ;;  %s2468_s3 = inlined_call_operand.vmem [shape: bf16[64,128], index: 3, kind: input, shape index: {}]   ;;  %s2469_s4 = inlined_call_operand.vmem [shape: f32[128,128], index: 4, kind: output, shape index: {}]  }
   0x1 LB: > { %s1566_s16 = sadd.s32 4294967295, %s2106_s15   ;;  %p1570_p0 = scmp.ge.s32.totalorder %s2106_s15, 1  ;;  %s2106_s15 = sphi %s2133_s15, %s14_s15  }
   0x2   : > { %p175_p1 = scmp.lt.s32.totalorder %s2106_s15, 3 }
   0x4   : > { %p176_p2 = pnand %p1570_p0, %p175_p1 }
   0x5   : > { %v1968_v0 = vld [vmem:[%s2468_s3] sm:$0xff] (!%p176_p2)   ;;  %s1571_s19 = sshll.u32 (!%p176_p2), %s1566_s16, 3  ;;  %v1971_v3 = vld [vmem:[%s2468_s3 + $0x8] sm:$0xff] (!%p176_p2)   ;;  %v1974_v6 = vld [vmem:[%s2468_s3 + $0x10] sm:$0xff] (!%p176_p2)   ;;  %vm471_vm0 = vcmask (!%p176_p2), 523264  }
   0x6   : > { %179 = sbr.rel (%p176_p2) target bundleno = 334 (0x14e), region = 36  ;;  %v1969_v1 = vld [vmem:[%s2466_s1 + $0xc0] sm:$0xff] (!%p176_p2)   ;;  %p208_p3 = scmp.lt.s32.totalorder (!%p176_p2), %s1571_s19, 15  ;;  %1879 = vmatprep.subr.bf16.mxu1 (!%p176_p2), %v1968_v0  ;;  %v1972_v4 = vld [vmem:[%s2466_s1 + $0xc8] sm:$0xff] (!%p176_p2)   ;;  %v1975_v7 = vld [vmem:[%s2466_s1 + $0xd0] sm:$0xff] (!%p176_p2)  }
   0x7   : > { %v1970_v2 = vld [vmem:[%s2466_s1 + $0x80] sm:$0xff] (!%p176_p2)   ;;  %1747 = vmatprep.subr.bf16.mxu0 (!%p176_p2), %v1969_v1  ;;  %1880 = vmatpush3.bf16.msra.mxu1 (!%p176_p2), %v1968_v0  ;;  %v1973_v5 = vld [vmem:[%s2466_s1 + $0x88] sm:$0xff] (!%p176_p2)   ;;  %v1976_v8 = vld [vmem:[%s2466_s1 + $0x90] sm:$0xff] (!%p176_p2)  }
   0x8   : > { %1748 = vmatpush3.bf16.msra.mxu0 (!%p176_p2), %v1970_v2  ;;  %1881 = vmatprep.subr.bf16.mxu1 (!%p176_p2), %v1971_v3  ;;  %v1977_v9 = vld [vmem:[%s2468_s3 + $0x18] sm:$0xff] (!%p176_p2)   ;;  %v1982_v14 = vld [vmem:[%s2466_s1 + $0x40] sm:$0xff] (!%p176_p2)   ;;  %v1986_v18 = vld [vmem:[%s2466_s1 + $0x48] sm:$0xff] (!%p176_p2)  }
   0x9   : > { %1749 = vmatprep.subr.bf16.mxu0 (!%p176_p2), %v1972_v4  ;;  %v1978_v10 = vld [vmem:[%s2466_s1 + $0xd8] sm:$0xff] (!%p176_p2)   ;;  %v1983_v15 = vld [vmem:[%s2466_s1 + $0xe0] sm:$0xff] (!%p176_p2)   ;;  %v1987_v19 = vld [vmem:[%s2466_s1 + $0xe8] sm:$0xff] (!%p176_p2)  }
   0xa   : > { %v1979_v11 = vld [vmem:[%s2466_s1 + $0x98] sm:$0xff] (!%p176_p2)   ;;  %v1984_v16 = vld [vmem:[%s2466_s1] sm:$0xff] (!%p176_p2)   ;;  %v1988_v20 = vld [vmem:[%s2466_s1 + $0x8] sm:$0xff] (!%p176_p2)  }
   0xb   : > { %1882 = vmatpush3.bf16.msra.mxu1 (!%p176_p2), %v1971_v3  ;;  %v1985_v17 = vld [vmem:[%s2466_s1 + $0xa0] sm:$0xff] (!%p176_p2)   ;;  %v1989_v21 = vld [vmem:[%s2466_s1 + $0xa8] sm:$0xff] (!%p176_p2)   ;;  %v1990_v22 = vld [vmem:[%s2466_s1 + $0x50] sm:$0xff] (!%p176_p2)  }
   0xc   : > { %1750 = vmatpush3.bf16.msra.mxu0 (!%p176_p2), %v1973_v5  ;;  %1883 = vmatprep.subr.bf16.mxu1 (!%p176_p2), %v1974_v6  ;;  %v1991_v23 = vld [vmem:[%s2466_s1 + $0xf0] sm:$0xff] (!%p176_p2)   ;;  %v1994_v26 = vld [vmem:[%s2466_s1 + $0x58] sm:$0xff] (!%p176_p2)   ;;  %v2001_v32 = vld [vmem:[%s2466_s1 + $0x60] sm:$0xff] (!%p176_p2)  }
   0xd   : > { %s2471_s19 = smov (!%p208_p3, %s1571_s19), 15  ;;  %1751 = vmatprep.subr.bf16.mxu0 %v1975_v7  ;;  %v1992_v24 = vld [vmem:[%s2466_s1 + $0x10] sm:$0xff]   ;;  %v1995_v27 = vld [vmem:[%s2466_s1 + $0xf8] sm:$0xff]   ;;  %v2002_v33 = vld [vmem:[%s2466_s1 + $0x1c0] sm:$0xff]  }
   0xe   : > { %s1574_s6 = sshll.u32 %s2471_s19, 2  ;;  %s1959_s14 = smul.u32 36, %s2471_s19  ;;  %v1993_v25 = vld [vmem:[%s2466_s1 + $0xb0] sm:$0xff]   ;;  %v1996_v28 = vld [vmem:[%s2466_s1 + $0x18] sm:$0xff]   ;;  %v2003_v34 = vld [vmem:[%s2466_s1 + $0x20] sm:$0xff]  }
   0xf   : > { %s2177_s16 = scalar_lea.vmem %s2467_s2, %s1574_s6  ;;  %1884 = vmatpush3.bf16.msra.mxu1 %v1974_v6  ;;  %v1997_v29 = vld [vmem:[%s2466_s1 + $0xb8] sm:$0xff]   ;;  %v2004_v35 = vld [vmem:[%s2466_s1 + $0x180] sm:$0xff]   ;;  %v2005_v36 = vld [vmem:[%s2466_s1 + $0x68] sm:$0xff]  }
  0x10   : > { %1752 = vmatpush3.bf16.msra.mxu0 %v1976_v8  ;;  %1885 = vmatprep.subr.bf16.mxu1 %v1977_v9  ;;  %v1980_v12 = vld [vmem:[%s2177_s16] sm:$0xff]   ;;  %v1981_v13 = vld [vmem:[%s2177_s16 + $0x8] sm:$0xff]   ;;  %s2232_s28 = scalar_lea.vmem %s2465_s0, %s1959_s14  ;;  %v2007_v38 = vld [vmem:[%s2177_s16 + $0x10] sm:$0xff]  }
  0x11   : > { %1753 = vmatprep.subr.bf16.mxu0 %v1978_v10  ;;  %1887 = vmatprep.mubr.msk.bf16.mxu1 %vm471_vm0, %v1980_v12  ;;  %v1998_v30 = vld [vmem:[%s2232_s28 + $0x8] ss:$36 sps:$4 sm:$0xff]   ;;  %v2010_v41 = vld [vmem:[%s2177_s16 + $0x18] sm:$0xff]   ;;  %v2013_v43 = vld [vmem:[%s2466_s1 + $0x70] sm:$0xff]  }
  0x12   : > { %v2000_v31 = vld [vmem:[%s2232_s28 + $0xc] ss:$36 sps:$4 sm:$0xff]   ;;  %v2011_v42 = vld [vmem:[%s2232_s28 + $0x54] ss:$36 sps:$4 sm:$0xff]   ;;  %v2022_v52 = vld [vmem:[%s2232_s28] ss:$36 sps:$4 sm:$0xff]  }
  0x13   : > { %1886 = vmatpush3.bf16.msra.mxu1 %v1977_v9  ;;  %1262 = vmatprep.mubr.bf16.mxu0 %v2000_v31  ;;  %v2006_v37 = vld [vmem:[%s2466_s1 + $0x1c8] sm:$0xff]   ;;  %v2014_v44 = vld [vmem:[%s2232_s28 + $0x50] ss:$36 sps:$4 sm:$0xff]   ;;  %v2018_v48 = vld [vmem:[%s2466_s1 + $0x78] sm:$0xff]  }
  0x14   : > { %1754 = vmatpush3.bf16.msra.mxu0 %v1979_v11  ;;  %1707 = vmatprep.subr.bf16.mxu1 %v1982_v14  ;;  %v2008_v39 = vld [vmem:[%s2466_s1 + $0x28] sm:$0xff]   ;;  %v2015_v45 = vld [vmem:[%s2466_s1 + $0x1d0] sm:$0xff]   ;;  %v2019_v49 = vld [vmem:[%s2466_s1 + $0x1d8] sm:$0xff]  }
  0x15   : > { %1755 = vmatprep.subr.bf16.mxu0 %v1983_v15  ;;  %v2009_v40 = vld [vmem:[%s2466_s1 + $0x188] sm:$0xff]   ;;  %v2016_v46 = vld [vmem:[%s2466_s1 + $0x30] sm:$0xff]   ;;  %v2020_v50 = vld [vmem:[%s2466_s1 + $0x38] sm:$0xff]  }
  0x16   : > { %1888 = vmatmul.mubr.msk.bf16.vlgmr.msra.gmra.mrb[0].mxu1 %vm471_vm0, %v1981_v13  ;;  %v2017_v47 = vld [vmem:[%s2466_s1 + $0x190] sm:$0xff]   ;;  %v2021_v51 = vld [vmem:[%s2466_s1 + $0x198] sm:$0xff]   ;;  %v2024_v53 = vld [vmem:[%s2232_s28 + $0x4] ss:$36 sps:$4 sm:$0xff]  }
  0x17   : > { %1708 = vmatpush3.bf16.msra.mxu1 %v1984_v16  ;;  %1891 = vmatprep.mubr.msk.bf16.mxu1 %vm471_vm0, %v2007_v38  ;;  %v2025_v54 = vld [vmem:[%s2232_s28 + $0x9c] ss:$36 sps:$4 sm:$0xff]   ;;  %v2032_v60 = vld [vmem:[%s2466_s1 + $0x148] sm:$0xff]   ;;  %v2042_v4 = vld [vmem:[%s2466_s1 + $0x150] sm:$0xff]  }
  0x18   : > { %1756 = vmatpush3.bf16.msra.mxu0 %v1985_v17  ;;  %1709 = vmatprep.subr.bf16.mxu1 %v1986_v18  ;;  %v2027_v55 = vld [vmem:[%s2232_s28 + $0x98] ss:$36 sps:$4 sm:$0xff]   ;;  %v2028_v56 = vld [vmem:[%s2466_s1 + $0x140] sm:$0xff]   ;;  %v2033_v61 = vld [vmem:[%s2466_s1 + $0x1e8] sm:$0xff]  }
  0x19   : > { %1757 = vmatprep.subr.bf16.mxu0 %v1987_v19  ;;  %v2029_v57 = vld [vmem:[%s2466_s1 + $0x1e0] sm:$0xff]   ;;  %v2034_v62 = vld [vmem:[%s2466_s1 + $0x108] sm:$0xff]   ;;  %v2043_v5 = vld [vmem:[%s2466_s1 + $0x1f0] sm:$0xff]  }
  0x1a   : > { %v2030_v58 = vld [vmem:[%s2466_s1 + $0x100] sm:$0xff]   ;;  %v2035_v63 = vld [vmem:[%s2466_s1 + $0x1a8] sm:$0xff]   ;;  %v2044_v6 = vld [vmem:[%s2466_s1 + $0x110] sm:$0xff]  }
  0x1b   : > { %1710 = vmatpush3.bf16.msra.mxu1 %v1988_v20  ;;  %v2031_v59 = vld [vmem:[%s2466_s1 + $0x1a0] sm:$0xff]   ;;  %v2036_v0 = vld [vmem:[%s2232_s28 + $0x4c] ss:$36 sps:$4 sm:$0xff]   ;;  %v2046_v8 = vld [vmem:[%s2466_s1 + $0x158] sm:$0xff]  }
  0x1c   : > { %1758 = vmatpush3.bf16.msra.mxu0 %v1989_v21  ;;  %1711 = vmatprep.subr.bf16.mxu1 %v1990_v22  ;;  %v2038_v1 = vld [vmem:[%s2232_s28 + $0xe4] ss:$36 sps:$4 sm:$0xff]   ;;  %v2045_v7 = vld [vmem:[%s2466_s1 + $0x1b0] sm:$0xff]   ;;  %v2047_v9 = vld [vmem:[%s2466_s1 + $0x1f8] sm:$0xff]  }
  0x1d   : > { %1759 = vmatprep.subr.bf16.mxu0 %v1991_v23  ;;  %v2040_v2 = vld [vmem:[%s2232_s28 + $0x48] ss:$36 sps:$4 sm:$0xff]   ;;  %v2041_v3 = vld [vmem:[%s2232_s28 + $0xe0] ss:$36 sps:$4 sm:$0xff]   ;;  %v2048_v10 = vld [vmem:[%s2466_s1 + $0x118] sm:$0xff]  }
  0x1e   : > { %1892 = vmatmul.mubr.msk.bf16.gmra.mrb[4].mxu1 %vm471_vm0, %v2010_v41  ;;  %v2049_v11 = vld [vmem:[%s2466_s1 + $0x1b8] sm:$0xff]   ;;  %v2055_v15 = vld [vmem:[%s2232_s28 + $0x90] ss:$36 sps:$4 sm:$0xff]   ;;  %v2056_v16 = vld [vmem:[%s2466_s1 + $0x160] sm:$0xff]  }
  0x1f   : > { %1712 = vmatpush3.bf16.msra.mxu1 %v1992_v24  ;;  %1197 = vmatprep.mubr.bf16.mxu1 %v2024_v53  ;;  %v2050_v12 = vld [vmem:[%s2232_s28 + $0x94] ss:$36 sps:$4 sm:$0xff]   ;;  %v2054_v14 = vld [vmem:[%s2232_s28 + $0x1c] ss:$36 sps:$4 sm:$0xff]   ;;  %v2059_v19 = vld [vmem:[%s2466_s1 + $0x168] sm:$0xff]  }
  0x20   : > { %1760 = vmatpush3.bf16.msra.mxu0 %v1993_v25  ;;  %1713 = vmatprep.subr.bf16.mxu1 %v1994_v26  ;;  %v2052_v13 = vld [vmem:[%s2232_s28 + $0x18] ss:$36 sps:$4 sm:$0xff]   ;;  %v2057_v17 = vld [vmem:[%s2466_s1 + $0x200] sm:$0xff]   ;;  %v2060_v20 = vld [vmem:[%s2466_s1 + $0x208] sm:$0xff]  }
  0x21   : > { %1761 = vmatprep.subr.bf16.mxu0 %v1995_v27  ;;  %v2058_v18 = vld [vmem:[%s2466_s1 + $0x120] sm:$0xff]   ;;  %v2061_v21 = vld [vmem:[%s2466_s1 + $0x128] sm:$0xff]   ;;  %v2066_v24 = vld [vmem:[%s2232_s28 + $0xd8] ss:$36 sps:$4 sm:$0xff]  }
  0x22   : > { %v2062_v22 = vld [vmem:[%s2232_s28 + $0xdc] ss:$36 sps:$4 sm:$0xff]   ;;  %v2064_v23 = vld [vmem:[%s2232_s28 + $0x64] ss:$36 sps:$4 sm:$0xff]   ;;  %v2067_v25 = vld [vmem:[%s2466_s1 + $0x170] sm:$0xff]  }
  0x23   : > { %1714 = vmatpush3.bf16.msra.mxu1 %v1996_v28  ;;  %v2068_v26 = vld [vmem:[%s2232_s28 + $0x60] ss:$36 sps:$4 sm:$0xff]   ;;  %v2069_v27 = vld [vmem:[%s2466_s1 + $0x210] sm:$0xff]   ;;  %v2073_v31 = vld [vmem:[%s2466_s1 + $0x138] sm:$0xff]  }
  0x24   : > { %1762 = vmatpush3.bf16.msra.mxu0 %v1997_v29  ;;  %1715 = vmatprep.subr.bf16.mxu1 %v2001_v32  ;;  %v2070_v28 = vld [vmem:[%s2466_s1 + $0x130] sm:$0xff]   ;;  %v2071_v29 = vld [vmem:[%s2466_s1 + $0x178] sm:$0xff]  }
  0x25   : > { %1827 = vmatprep.subr.bf16.mxu0 %v2002_v33  ;;  %v2074_v32 = vld [vmem:[%s2232_s28 + $0x10] ss:$36 sps:$4 sm:$0xff]   ;;  %v2082_v38 = vld [vmem:[%s2232_s28 + $0x5c] ss:$36 sps:$4 sm:$0xff]  }
  0x26   : > { %v2076_v33 = vld [vmem:[%s2232_s28 + $0x14] ss:$36 sps:$4 sm:$0xff]  }
  0x27   : > { %1263 = vmatmul.mubr.bf16.vlgmr.msra.gmra.mrb[0].mxu0 %v1998_v30  ;;  %1716 = vmatpush3.bf16.msra.mxu1 %v2003_v34  ;;  %v2072_v30 = vld [vmem:[%s2466_s1 + $0x218] sm:$0xff]   ;;  %v2077_v34 = vld [vmem:[%s2232_s28 + $0xac] ss:$36 sps:$4 sm:$0xff]  }
  0x28   : > { %1828 = vmatpush3.bf16.msra.mxu0 %v2004_v35  ;;  %1717 = vmatprep.subr.bf16.mxu1 %v2005_v36  ;;  %v2079_v35 = vld [vmem:[%s2232_s28 + $0xa8] ss:$36 sps:$4 sm:$0xff]   ;;  %v2080_v36 = vld [vmem:[%s2466_s1 + $0x220] sm:$0xff]   ;;  %v2087_v41 = vld [vmem:[%s2232_s28 + $0xf0] ss:$36 sps:$4 sm:$0xff]  }
  0x29   : > { %1829 = vmatprep.subr.bf16.mxu0 %v2006_v37  ;;  %1270 = vmatprep.mubr.bf16.mxu0 %v2011_v42  ;;  %v2081_v37 = vld [vmem:[%s2466_s1 + $0x228] sm:$0xff]   ;;  %v2086_v42 = vld [vmem:[%s2232_s28 + $0x58] ss:$36 sps:$4 sm:$0xff]  }
  0x2b   : > { %1718 = vmatpush3.bf16.msra.mxu1 %v2008_v39  ;;  %v2084_v39 = vld [vmem:[%s2232_s28 + $0xf4] ss:$36 sps:$4 sm:$0xff]  }
  0x2c   : > { %1830 = vmatpush3.bf16.msra.mxu0 %v2009_v40  ;;  %1719 = vmatprep.subr.bf16.mxu1 %v2013_v43  ;;  %v2088_v40 = vld [vmem:[%s2466_s1 + $0x230] sm:$0xff]   ;;  %v2090_v43 = vld [vmem:[%s2232_s28 + $0xa4] ss:$36 sps:$4 sm:$0xff]  }
  0x2d   : > { %1831 = vmatprep.subr.bf16.mxu0 %v2015_v45  ;;  %v2089_v45 = vld [vmem:[%s2466_s1 + $0x238] sm:$0xff]  }
  0x2f   : > { %1271 = vmatmul.mubr.bf16.gmra.mrb[4].mxu0 %v2014_v44  ;;  %1720 = vmatpush3.bf16.msra.mxu1 %v2016_v46  ;;  %v2092_v44 = vld [vmem:[%s2232_s28 + $0x20] ss:$36 sps:$4 sm:$0xff]  }
  0x30   : > { %1832 = vmatpush3.bf16.msra.mxu0 %v2017_v47  ;;  %1721 = vmatprep.subr.bf16.mxu1 %v2018_v48  ;;  %v2093_v46 = vld [vmem:[%s2232_s28 + $0xa0] ss:$36 sps:$4 sm:$0xff]   ;;  %v2094_v47 = vld [vmem:[%s2232_s28 + $0x68] ss:$36 sps:$4 sm:$0xff]  }
  0x31   : > { %1833 = vmatprep.subr.bf16.mxu0 %v2019_v49  ;;  %1278 = vmatprep.mubr.bf16.mxu0 %v2025_v54  ;;  %v2095_v48 = vld [vmem:[%s2232_s28 + $0xec] ss:$36 sps:$4 sm:$0xff]  }
  0x32   : > { %v2097_v49 = vld [vmem:[%s2232_s28 + $0xb0] ss:$36 sps:$4 sm:$0xff]  }
  0x33   : > { %1722 = vmatpush3.bf16.msra.mxu1 %v2020_v50  ;;  %v2098_v50 = vld [vmem:[%s2232_s28 + $0xe8] ss:$36 sps:$4 sm:$0xff]  }
  0x34   : > { %1834 = vmatpush3.bf16.msra.mxu0 %v2021_v51  ;;  %1787 = vmatprep.subr.bf16.mxu1 %v2028_v56  ;;  %v2099_v51 = vld [vmem:[%s2232_s28 + $0xf8] ss:$36 sps:$4 sm:$0xff]   ;;  %s1576_s28 = sshll.u32 %s2471_s19, 3 }
  0x35   : > { %1835 = vmatprep.subr.bf16.mxu0 %v2029_v57  ;;  %s2448_s17 = scalar_lea.vmem %s2469_s4, %s1576_s28 }
  0x36   : > { %1198 = vmatmul.mubr.bf16.vlgmr.msra.gmra.mrb[8].mxu1 %v2022_v52 }
  0x37   : > { %1279 = vmatmul.mubr.bf16.gmra.mrb[8].mxu0 %v2027_v55  ;;  %1788 = vmatpush3.bf16.msra.mxu1 %v2030_v58 }
  0x38   : > { %1836 = vmatpush3.bf16.msra.mxu0 %v2031_v59  ;;  %1789 = vmatprep.subr.bf16.mxu1 %v2032_v60 }
  0x39   : > { %1837 = vmatprep.subr.bf16.mxu0 %v2033_v61  ;;  %1205 = vmatprep.mubr.bf16.mxu1 %v2036_v0 }
  0x3a   : > { %1286 = vmatprep.mubr.bf16.mxu0 %v2038_v1 }
  0x3b   : > { %1790 = vmatpush3.bf16.msra.mxu1 %v2034_v62 }
  0x3c   : > { %1838 = vmatpush3.bf16.msra.mxu0 %v2035_v63  ;;  %1791 = vmatprep.subr.bf16.mxu1 %v2042_v4 }
  0x3d   : > { %1839 = vmatprep.subr.bf16.mxu0 %v2043_v5 }
  0x3e   : > { %1206 = vmatmul.mubr.bf16.gmra.mrb[12].mxu1 %v2040_v2 }
  0x3f   : > { %1287 = vmatmul.mubr.bf16.gmra.mrb[12].mxu0 %v2041_v3  ;;  %1792 = vmatpush3.bf16.msra.mxu1 %v2044_v6 }
  0x40   : > { %1840 = vmatpush3.bf16.msra.mxu0 %v2045_v7  ;;  %1793 = vmatprep.subr.bf16.mxu1 %v2046_v8 }
  0x41   : > { %1841 = vmatprep.subr.bf16.mxu0 %v2047_v9  ;;  %1213 = vmatprep.mubr.bf16.mxu1 %v2050_v12 }
  0x42   : > { %1392 = vmatprep.mubr.bf16.mxu0 %v2054_v14 }
  0x43   : > { %1794 = vmatpush3.bf16.msra.mxu1 %v2048_v10 }
  0x44   : > { %1842 = vmatpush3.bf16.msra.mxu0 %v2049_v11  ;;  %1795 = vmatprep.subr.bf16.mxu1 %v2056_v16 }
  0x45   : > { %1895 = vmatprep.subr.bf16.mxu0 %v2057_v17 }
  0x46   : > { %1214 = vmatmul.mubr.bf16.gmra.mrb[16].mxu1 %v2055_v15 }
  0x47   : > { %1393 = vmatmul.mubr.bf16.vlgmr.msra.gmra.mrb[16].mxu0 %v2052_v13  ;;  %1796 = vmatpush3.bf16.msra.mxu1 %v2058_v18 }
  0x48   : > { %1896 = vmatpush3.bf16.msra.mxu0 %v2057_v17  ;;  %1797 = vmatprep.subr.bf16.mxu1 %v2059_v19 }
  0x49   : > { %1897 = vmatprep.subr.bf16.mxu0 %v2060_v20  ;;  %1221 = vmatprep.mubr.bf16.mxu1 %v2062_v22 }
  0x4a   : > { %1400 = vmatprep.mubr.bf16.mxu0 %v2064_v23 }
  0x4b   : > { %1798 = vmatpush3.bf16.msra.mxu1 %v2061_v21 }
  0x4c   : > { %1898 = vmatpush3.bf16.msra.mxu0 %v2060_v20  ;;  %1799 = vmatprep.subr.bf16.mxu1 %v2067_v25 }
  0x4d   : > { %1899 = vmatprep.subr.bf16.mxu0 %v2069_v27 }
  0x4e   : > { %1222 = vmatmul.mubr.bf16.gmra.mrb[20].mxu1 %v2066_v24 }
  0x4f   : > { %1401 = vmatmul.mubr.bf16.gmra.mrb[20].mxu0 %v2068_v26  ;;  %1800 = vmatpush3.bf16.msra.mxu1 %v2070_v28 }
  0x50   : > { %1900 = vmatpush3.bf16.msra.mxu0 %v2069_v27  ;;  %1801 = vmatprep.subr.bf16.mxu1 %v2071_v29 }
  0x51   : > { %1901 = vmatprep.subr.bf16.mxu0 %v2072_v30  ;;  %1327 = vmatprep.mubr.bf16.mxu1 %v2076_v33 }
  0x52   : > { %1408 = vmatprep.mubr.bf16.mxu0 %v2077_v34 }
  0x53   : > { %1802 = vmatpush3.bf16.msra.mxu1 %v2073_v31 }
  0x54   : > { %1902 = vmatpush3.bf16.msra.mxu0 %v2072_v30 }
  0x55   : > { %1903 = vmatprep.subr.bf16.mxu0 %v2080_v36 }
  0x56   : > { %1328 = vmatmul.mubr.bf16.vlgmr.msra.gmra.mrb[24].mxu1 %v2074_v32 }
  0x57   : > { %1409 = vmatmul.mubr.bf16.gmra.mrb[24].mxu0 %v2079_v35  ;;  %1335 = vmatprep.mubr.bf16.mxu1 %v2082_v38 }
  0x58   : > { %1904 = vmatpush3.bf16.msra.mxu0 %v2080_v36  ;;  %1416 = vmatprep.mubr.bf16.mxu0 %v2084_v39 }
  0x59   : > { %1905 = vmatprep.subr.bf16.mxu0 %v2081_v37 }
  0x5c   : > { %1906 = vmatpush3.bf16.msra.mxu0 %v2081_v37 }
  0x5d   : > { %1907 = vmatprep.subr.bf16.mxu0 %v2088_v40 }
  0x5e   : > { %1336 = vmatmul.mubr.bf16.gmra.mrb[28].mxu1 %v2086_v42 }
  0x5f   : > { %1417 = vmatmul.mubr.bf16.gmra.mrb[28].mxu0 %v2087_v41  ;;  %1343 = vmatprep.mubr.bf16.mxu1 %v2090_v43 }
  0x60   : > { %1911 = vmatprep.mubr.bf16.mxu0 %v2092_v44  ;;  %1908 = vmatpush3.bf16.msra.mxu0 %v2088_v40 }
  0x61   : > { %1909 = vmatprep.subr.bf16.mxu0 %v2089_v45 }
  0x64   : > { %1910 = vmatpush3.bf16.msra.mxu0 %v2089_v45 }
  0x66   : > { %1344 = vmatmul.mubr.bf16.gmra.mrb[32].mxu1 %v2093_v46 }
  0x67   : > { %1912 = vmatmul.mubr.bf16.vlgmr.msra.gmra.mrb[32].mxu0 %v2094_v47  ;;  %1351 = vmatprep.mubr.bf16.mxu1 %v2095_v48 }
  0x68   : > { %1915 = vmatprep.mubr.bf16.mxu0 %v2097_v49 }
  0x6e   : > { %1352 = vmatmul.mubr.bf16.gmra.mrb[36].mxu1 %v2098_v50 }
  0x6f   : > { %1916 = vmatmul.mubr.bf16.gmra.mrb[36].mxu0 %v2099_v51 }
  0xe9   : > { %v1889_v52 = vpop.f32.mrb[0].mxu1 }
  0xea   : > { %v518_v53 = vpop.f32.mrb[1].mxu1 }
  0xeb   : > { %v1890_v54 = vpop.f32.mrb[2].mxu1 }
  0xec   : > { %v521_v55 = vpop.f32.mrb[3].mxu1 }
  0xf1   : > { %v2427_v62 = vpop.f32.mrb[4].mxu1 }
  0xf2   : > { %v534_v63 = vpop.f32.mrb[5].mxu1 }
  0xf3   : > { %v2429_v0 = vpop.f32.mrb[6].mxu1 }
  0xf4   : > { %v537_v2 = vpop.f32.mrb[7].mxu1 }
  0xfa   : > { %v1763_v56 = vpop.f32.mrb[0].mxu0 }
  0xfb   : > { %v1764_v57 = vpop.f32.mrb[1].mxu0 }
  0xfc   : > { %v1765_v58 = vadd.f32 %v1764_v57, %v1763_v56  ;;  %v1766_v59 = vpop.f32.mrb[2].mxu0 }
  0xfd   : > { %v1767_v60 = vpop.f32.mrb[3].mxu0 }
  0xfe   : > { %v1768_v61 = vadd.f32 %v1767_v60, %v1766_v59 }
 0x102   : > { %v1769_v1 = vpop.f32.mrb[4].mxu0 }
 0x103   : > { %v1770_v3 = vpop.f32.mrb[5].mxu0 }
 0x104   : > { %v1771_v4 = vadd.f32 %v1770_v3, %v1769_v1  ;;  %v1772_v5 = vpop.f32.mrb[6].mxu0 }
 0x105   : > { %v1773_v6 = vpop.f32.mrb[7].mxu0 }
 0x106   : > { %v1774_v7 = vadd.f32 %v1773_v6, %v1772_v5 }
 0x109   : > { %v1723_v8 = vpop.f32.mrb[8].mxu1 }
 0x10a   : > { %v1724_v9 = vpop.f32.mrb[9].mxu1  ;;  %v1775_v10 = vpop.f32.mrb[8].mxu0 }
 0x10b   : > { %v1725_v11 = vadd.f32 %v1724_v9, %v1723_v8  ;;  %v1726_v12 = vpop.f32.mrb[10].mxu1  ;;  %v1776_v13 = vpop.f32.mrb[9].mxu0 }
 0x10c   : > { %v1727_v14 = vpop.f32.mrb[11].mxu1  ;;  %v1777_v15 = vadd.f32 %v1776_v13, %v1775_v10  ;;  %v1778_v16 = vpop.f32.mrb[10].mxu0 }
 0x10d   : > { %v1200_v17 = vadd.f32 %v1725_v11, %v518_v53  ;;  %v1728_v18 = vadd.f32 %v1727_v14, %v1726_v12  ;;  %v1779_v19 = vpop.f32.mrb[11].mxu0 }
 0x10e   : > { %v1780_v20 = vadd.f32 %v1779_v19, %v1778_v16 }
 0x10f   : > { %v1203_v21 = vadd.f32 %v1728_v18, %v521_v55  ;;  %v1265_v22 = vadd.f32 %v1765_v58, %v1200_v17 }
 0x111   : > { %v1268_v23 = vadd.f32 %v1768_v61, %v1203_v21  ;;  %v1729_v24 = vpop.f32.mrb[12].mxu1 }
 0x112   : > { %v1730_v25 = vpop.f32.mrb[13].mxu1  ;;  %v1781_v26 = vpop.f32.mrb[12].mxu0 }
 0x113   : > { %v1731_v27 = vadd.f32 %v1730_v25, %v1729_v24  ;;  %v1732_v28 = vpop.f32.mrb[14].mxu1  ;;  %v1782_v29 = vpop.f32.mrb[13].mxu0 }
 0x114   : > { %v1733_v30 = vpop.f32.mrb[15].mxu1  ;;  %v1783_v31 = vadd.f32 %v1782_v29, %v1781_v26  ;;  %v1784_v32 = vpop.f32.mrb[14].mxu0 }
 0x115   : > { %v1208_v33 = vadd.f32 %v1889_v52, %v1731_v27  ;;  %v1734_v34 = vadd.f32 %v1733_v30, %v1732_v28  ;;  %v1785_v35 = vpop.f32.mrb[15].mxu0 }
 0x116   : > { %v1786_v36 = vadd.f32 %v1785_v35, %v1784_v32 }
 0x117   : > { %v1211_v37 = vadd.f32 %v1890_v54, %v1734_v34  ;;  %v1273_v38 = vadd.f32 %v1771_v4, %v1208_v33 }
 0x119   : > { %v2431_v39 = vadd.f32 %v1774_v7, %v1211_v37  ;;  %v1735_v40 = vpop.f32.mrb[16].mxu1 }
 0x11a   : > { %v1736_v41 = vpop.f32.mrb[17].mxu1  ;;  %v1843_v42 = vpop.f32.mrb[16].mxu0 }
 0x11b   : > { %v1737_v43 = vadd.f32 %v1736_v41, %v1735_v40  ;;  %v1738_v44 = vpop.f32.mrb[18].mxu1  ;;  %v1844_v45 = vpop.f32.mrb[17].mxu0 }
 0x11c   : > { %v1739_v46 = vpop.f32.mrb[19].mxu1  ;;  %v1845_v47 = vadd.f32 %v1844_v45, %v1843_v42  ;;  %v1846_v48 = vpop.f32.mrb[18].mxu0 }
 0x11d   : > { %v1216_v49 = vadd.f32 %v1737_v43, %v534_v63  ;;  %v1740_v50 = vadd.f32 %v1739_v46, %v1738_v44  ;;  %v1847_v51 = vpop.f32.mrb[19].mxu0 }
 0x11e   : > { %v1848_v52 = vadd.f32 %v1847_v51, %v1846_v48 }
 0x11f   : > { %v1219_v53 = vadd.f32 %v1740_v50, %v537_v2  ;;  %v2433_v55 = vadd.f32 %v1777_v15, %v1216_v49 }
 0x121   : > { %v2435_v54 = vadd.f32 %v1780_v20, %v1219_v53  ;;  %v1741_v56 = vpop.f32.mrb[20].mxu1 }
 0x122   : > { %v1742_v57 = vpop.f32.mrb[21].mxu1  ;;  %v1849_v58 = vpop.f32.mrb[20].mxu0 }
 0x123   : > { %v1743_v59 = vadd.f32 %v1742_v57, %v1741_v56  ;;  %v1744_v60 = vpop.f32.mrb[22].mxu1  ;;  %v1850_v61 = vpop.f32.mrb[21].mxu0 }
 0x124   : > { %v1745_v1 = vpop.f32.mrb[23].mxu1  ;;  %v1851_v3 = vadd.f32 %v1850_v61, %v1849_v58  ;;  %v1852_v4 = vpop.f32.mrb[22].mxu0 }
 0x125   : > { %v1224_v5 = vadd.f32 %v2427_v62, %v1743_v59  ;;  %v1746_v63 = vadd.f32 %v1745_v1, %v1744_v60  ;;  %v1853_v6 = vpop.f32.mrb[23].mxu0 }
 0x126   : > { %v1854_v7 = vadd.f32 %v1853_v6, %v1852_v4 }
 0x127   : > { %v1227_v2 = vadd.f32 %v2429_v0, %v1746_v63  ;;  %v2439_v8 = vadd.f32 %v1783_v31, %v1224_v5 }
 0x129   : > { %v2441_v9 = vadd.f32 %v1786_v36, %v1227_v2  ;;  %v1803_v11 = vpop.f32.mrb[24].mxu1 }
 0x12a   : > { %v1855_v10 = vpop.f32.mrb[24].mxu0  ;;  %v1804_v13 = vpop.f32.mrb[25].mxu1 }
 0x12b   : > { %v1856_v12 = vpop.f32.mrb[25].mxu0  ;;  %v1805_v16 = vadd.f32 %v1804_v13, %v1803_v11  ;;  %v1806_v17 = vpop.f32.mrb[26].mxu1 }
 0x12c   : > { %v1857_v14 = vadd.f32 %v1856_v12, %v1855_v10  ;;  %v1858_v15 = vpop.f32.mrb[26].mxu0  ;;  %v1807_v19 = vpop.f32.mrb[27].mxu1 }
 0x12d   : > { %v1859_v18 = vpop.f32.mrb[27].mxu0  ;;  %v1330_v20 = vadd.f32 %v1805_v16, %v1265_v22  ;;  %v1808_v21 = vadd.f32 %v1807_v19, %v1806_v17 }
 0x12e   : > { %v1860_v62 = vadd.f32 %v1859_v18, %v1858_v15 }
 0x12f   : > { %v1333_v24 = vadd.f32 %v1808_v21, %v1268_v23  ;;  %v1395_v0 = vadd.f32 %v1845_v47, %v1330_v20 }
 0x131   : > { %v1809_v26 = vpop.f32.mrb[28].mxu1  ;;  %v1398_v28 = vadd.f32 %v1848_v52, %v1333_v24 }
 0x132   : > { %v1861_v25 = vpop.f32.mrb[28].mxu0  ;;  %v1810_v29 = vpop.f32.mrb[29].mxu1 }
 0x133   : > { %v1862_v27 = vpop.f32.mrb[29].mxu0  ;;  %v1811_v32 = vadd.f32 %v1810_v29, %v1809_v26  ;;  %v1812_v33 = vpop.f32.mrb[30].mxu1 }
 0x134   : > { %v1863_v30 = vadd.f32 %v1862_v27, %v1861_v25  ;;  %v1864_v31 = vpop.f32.mrb[30].mxu0  ;;  %v1813_v35 = vpop.f32.mrb[31].mxu1 }
 0x135   : > { %v1865_v34 = vpop.f32.mrb[31].mxu0  ;;  %v1338_v37 = vadd.f32 %v1811_v32, %v1273_v38  ;;  %v1814_v40 = vadd.f32 %v1813_v35, %v1812_v33 }
 0x136   : > { %v1866_v36 = vadd.f32 %v1865_v34, %v1864_v31 }
 0x137   : > { %v1341_v22 = vadd.f32 %v1814_v40, %v2431_v39  ;;  %v1403_v23 = vadd.f32 %v1851_v3, %v1338_v37 }
 0x139   : > { %v1815_v41 = vpop.f32.mrb[32].mxu1  ;;  %v1406_v43 = vadd.f32 %v1854_v7, %v1341_v22 }
 0x13a   : > { %v1913_v42 = vpop.f32.mrb[32].mxu0  ;;  %v1816_v45 = vpop.f32.mrb[33].mxu1 }
 0x13b   : > { %v1468_v44 = vadd.f32 %v1913_v42, %v1403_v23  ;;  %v1459_v38 = vpop.f32.mrb[33].mxu0  ;;  %v1817_v46 = vadd.f32 %v1816_v45, %v1815_v41  ;;  %v1818_v48 = vpop.f32.mrb[34].mxu1 }
 0x13c   : > { %v1460_v47 = vadd.f32 %v1459_v38, %v1395_v0  ;;  %v1914_v39 = vpop.f32.mrb[34].mxu0  ;;  %v1819_v50 = vpop.f32.mrb[35].mxu1 }
 0x13d   : > { %1492 = vst [vmem:[%s2448_s17 + $0x10] sm:$0xff] %v1468_v44  ;;  %v1471_v49 = vadd.f32 %v1914_v39, %v1406_v43  ;;  %v1462_v51 = vpop.f32.mrb[35].mxu0  ;;  %v1346_v52 = vadd.f32 %v1817_v46, %v2433_v55  ;;  %v1820_v53 = vadd.f32 %v1819_v50, %v1818_v48 }
 0x13e   : > { %1490 = vst [vmem:[%s2448_s17] sm:$0xff] %v1460_v47  ;;  %v1463_v56 = vadd.f32 %v1462_v51, %v1398_v28 }
 0x13f   : > { %1493 = vst [vmem:[%s2448_s17 + $0x18] sm:$0xff] %v1471_v49  ;;  %v1349_v57 = vadd.f32 %v1820_v53, %v2435_v54  ;;  %v1411_v58 = vadd.f32 %v1857_v14, %v1346_v52 }
 0x140   : > { %1491 = vst [vmem:[%s2448_s17 + $0x8] sm:$0xff] %v1463_v56 }
 0x141   : > { %v1821_v59 = vpop.f32.mrb[36].mxu1  ;;  %v1414_v61 = vadd.f32 %v1860_v62, %v1349_v57 }
 0x142   : > { %v1917_v60 = vpop.f32.mrb[36].mxu0  ;;  %v1822_v1 = vpop.f32.mrb[37].mxu1 }
 0x143   : > { %v1475_v3 = vpop.f32.mrb[37].mxu0  ;;  %v1823_v4 = vadd.f32 %v1822_v1, %v1821_v59  ;;  %v1824_v55 = vpop.f32.mrb[38].mxu1 }
 0x144   : > { %v1476_v5 = vadd.f32 %v1475_v3, %v1411_v58  ;;  %v1918_v63 = vpop.f32.mrb[38].mxu0  ;;  %v1825_v6 = vpop.f32.mrb[39].mxu1 }
 0x145   : > { %v1478_v7 = vpop.f32.mrb[39].mxu0  ;;  %v1354_v2 = vadd.f32 %v1823_v4, %v2439_v8  ;;  %v1826_v54 = vadd.f32 %v1825_v6, %v1824_v55 }
 0x146   : > { %1494 = vst [vmem:[%s2448_s17 + $0x20] sm:$0xff] %v1476_v5  ;;  %v1479_v10 = vadd.f32 %v1478_v7, %v1414_v61 }
 0x147   : > { %v1419_v11 = vadd.f32 %v1863_v30, %v1354_v2  ;;  %v1357_v12 = vadd.f32 %v1826_v54, %v2441_v9 }
 0x148   : > { %1495 = vst [vmem:[%s2448_s17 + $0x28] sm:$0xff] %v1479_v10 }
 0x149   : > { %v1484_v13 = vadd.f32 %v1917_v60, %v1419_v11  ;;  %v1422_v14 = vadd.f32 %v1866_v36, %v1357_v12 }
 0x14b   : > { %1496 = vst [vmem:[%s2448_s17 + $0x30] sm:$0xff] %v1484_v13  ;;  %v1487_v15 = vadd.f32 %v1918_v63, %v1422_v14 }
 0x14d   : > { %1497 = vst [vmem:[%s2448_s17 + $0x38] sm:$0xff] %v1487_v15 }
 0x14e PF: > { %s14_s15 = sadd.s32 1, %s2106_s15  }
 0x14f   : > { %p11_p4 = scmp.ge.s32.totalorder %s14_s15, 4  }
 0x151   :  { %13 = sbr.rel (!%p11_p4) target bundleno = 1 (0x1), region = 69 }

</bundles_post_ra>
